<compile_context>
chip_gen: v5e
topology: v5e:2x2
jax: 0.10.0
libtpu: 0.0.40
codegen_flags: <defaults>
</compile_context>

<pallas_src>
import functools

import jax
import jax.numpy as jnp
import numpy as np
from jax import lax
from jax.experimental import pallas as pl
from jax.experimental.pallas import tpu as pltpu


# -----------------------------------------------------------------------------
# Fused kernel: [Conv3x3(pad=1)+bias+ReLU+MaxPool2] x 2, one image per step
# -----------------------------------------------------------------------------
def _encoder_kernel(xp_ref, w1_ref, b1_ref, w2_ref, b2_ref, o_ref,
                    s1_ref, p2_ref, s2_ref, *, C, H, W, C1, C2):
    # xp_ref: (1, C, H+2, W+2)   pre-padded NCHW input, one image
    # w1_ref: (C1, 9*C)          conv1 weights, transposed im2col layout
    # b1_ref: (C1, 1)
    # w2_ref: (C2, 9*C1)
    # b2_ref: (C2, 1)
    # o_ref : (1, 1, C2*H4*W4)   lane-dense NCHW-flat output
    # s1_ref: VMEM (9*C,  H*W)      stage-1 transposed im2col slab
    # p2_ref: VMEM (C1, H2+2, W2+2) stage-2 halo buffer (stage-1 pooled + pad)
    # s2_ref: VMEM (9*C1, H2*W2)    stage-2 transposed im2col slab
    H2, W2 = H // 2, W // 2
    H4, W4 = H // 4, W // 4
    M1 = H * W
    M2 = H2 * W2

    # ---------------- stage 1: conv(C -> C1) + bias + ReLU -------------------
    # Each tap writes a C-row sublane block at full M1-lane width.
    for kh in range(3):
        for kw in range(3):
            t = kh * 3 + kw
            s1_ref[t * C:(t + 1) * C, :] = (
                xp_ref[0, :, kh:kh + H, kw:kw + W].reshape(C, M1))

    # (C1, 9C) @ (9C, M1): spatial M1 on lanes, channels on sublanes.
    a = jnp.dot(w1_ref[...], s1_ref[...], preferred_element_type=jnp.float32)
    a = jnp.maximum(a + b1_ref[...], 0.0)                     # (C1, M1)

    # ---------------- maxpool 2x2 (stage 1) ----------------------------------
    # Row pairs: contiguous half-slab max (pure VPU).  Column pairs: one
    # size-2 minor-axis max (adjacent lanes).
    ah = a.reshape(C1, H2, 2 * W)
    ah = jnp.maximum(ah[:, :, :W], ah[:, :, W:])              # (C1, H2, W)
    pooled1 = jnp.max(ah.reshape(C1, H2, W2, 2), axis=3)      # (C1, H2, W2)

    # ---------------- stage 2 halo: zero only the 1-px border ---------------
    p2_ref[:, 0:1, :] = jnp.zeros((C1, 1, W2 + 2), jnp.float32)
    p2_ref[:, H2 + 1:H2 + 2, :] = jnp.zeros((C1, 1, W2 + 2), jnp.float32)
    p2_ref[:, :, 0:1] = jnp.zeros((C1, H2 + 2, 1), jnp.float32)
    p2_ref[:, :, W2 + 1:W2 + 2] = jnp.zeros((C1, H2 + 2, 1), jnp.float32)
    p2_ref[:, 1:H2 + 1, 1:W2 + 1] = pooled1

    # ---------------- stage 2: conv(C1 -> C2) + bias + ReLU ------------------
    for kh in range(3):
        for kw in range(3):
            t = kh * 3 + kw
            s2_ref[t * C1:(t + 1) * C1, :] = (
                p2_ref[:, kh:kh + H2, kw:kw + W2].reshape(C1, M2))

    z = jnp.dot(w2_ref[...], s2_ref[...], preferred_element_type=jnp.float32)
    z = jnp.maximum(z + b2_ref[...], 0.0)                     # (C2, M2)

    # ---------------- maxpool 2x2 (stage 2) ----------------------------------
    zh = z.reshape(C2, H4, 2 * W2)
    zh = jnp.maximum(zh[:, :, :W2], zh[:, :, W2:])            # (C2, H4, W2)
    pooled2 = jnp.max(zh.reshape(C2, H4, W4, 2), axis=3)      # (C2, H4, W4)

    # Lane-dense NCHW-flat output slab; the wrapper only reshapes (no transpose).
    o_ref[...] = pooled2.reshape(1, 1, C2 * H4 * W4).astype(o_ref.dtype)


def encoder_forward(x_nchw, w1, b1, w2, b2):
    """x_nchw: (N, C, H, W); w*: (3, 3, Cin, Cout) HWIO; b*: (Cout,)."""
    N, C, H, W = x_nchw.shape
    C1 = w1.shape[-1]
    C2 = w2.shape[-1]
    assert H % 4 == 0 and W % 4 == 0
    H2, W2, H4, W4 = H // 2, W // 2, H // 4, W // 4

    # Pre-pad once (tiny) so the kernel needs no stage-1 halo buffer/zero-fill.
    xp = jnp.pad(x_nchw, ((0, 0), (0, 0), (1, 1), (1, 1)))

    # Weights in transposed (Cout, 9*Cin) im2col layout (tap order kh, kw, cin);
    # biases as (Cout, 1) columns so bias-add broadcasts along the lane axis.
    w1t = w1.reshape(9 * C, C1).T
    w2t = w2.reshape(9 * C1, C2).T

    kernel = functools.partial(_encoder_kernel, C=C, H=H, W=W, C1=C1, C2=C2)

    y = pl.pallas_call(
        kernel,
        out_shape=jax.ShapeDtypeStruct((N, 1, C2 * H4 * W4), x_nchw.dtype),
        grid=(N,),
        in_specs=[
            pl.BlockSpec((1, C, H + 2, W + 2), lambda n: (n, 0, 0, 0)),
            pl.BlockSpec((C1, 9 * C), lambda n: (0, 0)),
            pl.BlockSpec((C1, 1), lambda n: (0, 0)),
            pl.BlockSpec((C2, 9 * C1), lambda n: (0, 0)),
            pl.BlockSpec((C2, 1), lambda n: (0, 0)),
        ],
        out_specs=pl.BlockSpec((1, 1, C2 * H4 * W4), lambda n: (n, 0, 0)),
        scratch_shapes=[
            pltpu.VMEM((9 * C, H * W), jnp.float32),
            pltpu.VMEM((C1, H2 + 2, W2 + 2), jnp.float32),
            pltpu.VMEM((9 * C1, H2 * W2), jnp.float32),
        ],
        compiler_params=pltpu.CompilerParams(
            dimension_semantics=("parallel",)),
    )(xp, w1t, b1.reshape(C1, 1), w2t, b2.reshape(C2, 1))

    return y.reshape(N, C2, H4, W4)


@jax.jit
def model_forward(x_nchw, params):
    (w1, b1), (w2, b2) = params
    return encoder_forward(x_nchw, w1, b1, w2, b2)


# -----------------------------------------------------------------------------
# Parameter init (deterministic; mirrors PyTorch Conv2d default init ranges)
# -----------------------------------------------------------------------------
def init_conv_params(key, cin, cout, k=3):
    kw_key, kb_key = jax.random.split(key)
    fan_in = cin * k * k
    bound = 1.0 / np.sqrt(fan_in)
    # PyTorch layout (Cout, Cin, kH, kW) -> HWIO (kH, kW, Cin, Cout)
    w_pt = jax.random.uniform(kw_key, (cout, cin, k, k), jnp.float32,
                              minval=-bound, maxval=bound)
    b = jax.random.uniform(kb_key, (cout,), jnp.float32,
                           minval=-bound, maxval=bound)
    w = jnp.transpose(w_pt, (2, 3, 1, 0))
    return w, b


# -----------------------------------------------------------------------------
# Pure-JAX reference for correctness check
# -----------------------------------------------------------------------------
def ref_conv_relu_pool(x_nhwc, w, b):
    y = lax.conv_general_dilated(
        x_nhwc, w, window_strides=(1, 1), padding=((1, 1), (1, 1)),
        dimension_numbers=("NHWC", "HWIO", "NHWC"))
    y = jnp.maximum(y + b, 0.0)
    return lax.reduce_window(y, -jnp.inf, lax.max,
                             (1, 2, 2, 1), (1, 2, 2, 1), "VALID")


def ref_forward(x_nchw, params):
    (w1, b1), (w2, b2) = params
    x = jnp.transpose(x_nchw, (0, 2, 3, 1))
    x = ref_conv_relu_pool(x, w1, b1)
    x = ref_conv_relu_pool(x, w2, b2)
    return jnp.transpose(x, (0, 3, 1, 2))


if __name__ == "__main__":
    key = jax.random.PRNGKey(0)
    kx, k1, k2 = jax.random.split(key, 3)

    # Small shapes: batch=2, c=4 input channels, 16x16 spatial.
    N, C, H, W = 2, 4, 16, 16
    x = jax.random.normal(kx, (N, C, H, W), jnp.float32)

    params = (init_conv_params(k1, C, 8),    # conv1: c -> 8
              init_conv_params(k2, 8, 16))   # conv2: 8 -> 16

    out = model_forward(x, params)
    out = jax.block_until_ready(out)

    expected = jax.block_until_ready(ref_forward(x, params))
    assert out.shape == (N, 16, H // 4, W // 4), out.shape
    np.testing.assert_allclose(np.asarray(out), np.asarray(expected),
                               rtol=1e-4, atol=1e-4)
    print("KERNEL_OK")
</pallas_src>

<mosaic_0001>
module attributes {stable_mosaic.version = 11 : i64} {
  func.func @_encoder_kernel(%arg0: i32, %arg1: memref<1x4x18x18xf32, #tpu.memory_space<vmem>>, %arg2: memref<8x36xf32, #tpu.memory_space<vmem>>, %arg3: memref<8x1xf32, #tpu.memory_space<vmem>>, %arg4: memref<16x72xf32, #tpu.memory_space<vmem>>, %arg5: memref<16x1xf32, #tpu.memory_space<vmem>>, %arg6: memref<1x1x256xf32, #tpu.memory_space<vmem>>, %arg7: memref<36x256xf32, #tpu.memory_space<vmem>>, %arg8: memref<8x10x10xf32, #tpu.memory_space<vmem>>, %arg9: memref<72x64xf32, #tpu.memory_space<vmem>>) attributes {dimension_semantics = [#tpu.dimension_semantics<parallel>], iteration_bounds = array<i64: 2>, scalar_prefetch = 0 : i64, scratch_operands = 3 : i64, tpu.core_type = #tpu.core_type<tc>, window_params = [{transform_indices = @transform_0, window_bounds = array<i64: 1, 4, 18, 18>}, {pipeline_mode = #tpu.pipeline_mode<synchronous>, transform_indices = @transform_1, window_bounds = array<i64: 8, 36>}, {pipeline_mode = #tpu.pipeline_mode<synchronous>, transform_indices = @transform_2, window_bounds = array<i64: 8, 1>}, {pipeline_mode = #tpu.pipeline_mode<synchronous>, transform_indices = @transform_3, window_bounds = array<i64: 16, 72>}, {pipeline_mode = #tpu.pipeline_mode<synchronous>, transform_indices = @transform_4, window_bounds = array<i64: 16, 1>}, {transform_indices = @transform_5, window_bounds = array<i64: 1, 1, 256>}]} {
    %c0 = arith.constant 0 : index
    %c0_0 = arith.constant 0 : index
    %c0_1 = arith.constant 0 : index
    %c0_2 = arith.constant 0 : index
    %0 = vector.load %arg1[%c0, %c0_0, %c0_1, %c0_2] : memref<1x4x18x18xf32, #tpu.memory_space<vmem>>, vector<1x4x16x16xf32>
    %1 = vector.shape_cast %0 : vector<1x4x16x16xf32> to vector<4x16x16xf32>
    %2 = vector.shape_cast %1 : vector<4x16x16xf32> to vector<4x256xf32>
    %c0_3 = arith.constant 0 : index
    %c0_4 = arith.constant 0 : index
    %3 = vector.load %arg7[%c0_3, %c0_4] : memref<36x256xf32, #tpu.memory_space<vmem>>, vector<4x256xf32>
    tpu.vector_store %arg7[%c0_3, %c0_4], %2 {strides = array<i32>} : memref<36x256xf32, #tpu.memory_space<vmem>>, vector<4x256xf32>,
    %c0_5 = arith.constant 0 : index
    %c0_6 = arith.constant 0 : index
    %c0_7 = arith.constant 0 : index
    %c1 = arith.constant 1 : index
    %4 = vector.load %arg1[%c0_5, %c0_6, %c0_7, %c1] : memref<1x4x18x18xf32, #tpu.memory_space<vmem>>, vector<1x4x16x16xf32>
    %5 = vector.shape_cast %4 : vector<1x4x16x16xf32> to vector<4x16x16xf32>
    %6 = vector.shape_cast %5 : vector<4x16x16xf32> to vector<4x256xf32>
    %c4 = arith.constant 4 : index
    %c0_8 = arith.constant 0 : index
    %7 = vector.load %arg7[%c4, %c0_8] : memref<36x256xf32, #tpu.memory_space<vmem>>, vector<4x256xf32>
    tpu.vector_store %arg7[%c4, %c0_8], %6 {strides = array<i32>} : memref<36x256xf32, #tpu.memory_space<vmem>>, vector<4x256xf32>,
    %c0_9 = arith.constant 0 : index
    %c0_10 = arith.constant 0 : index
    %c0_11 = arith.constant 0 : index
    %c2 = arith.constant 2 : index
    %8 = vector.load %arg1[%c0_9, %c0_10, %c0_11, %c2] : memref<1x4x18x18xf32, #tpu.memory_space<vmem>>, vector<1x4x16x16xf32>
    %9 = vector.shape_cast %8 : vector<1x4x16x16xf32> to vector<4x16x16xf32>
    %10 = vector.shape_cast %9 : vector<4x16x16xf32> to vector<4x256xf32>
    %c8 = arith.constant 8 : index
    %c0_12 = arith.constant 0 : index
    %11 = vector.load %arg7[%c8, %c0_12] : memref<36x256xf32, #tpu.memory_space<vmem>>, vector<4x256xf32>
    tpu.vector_store %arg7[%c8, %c0_12], %10 {strides = array<i32>} : memref<36x256xf32, #tpu.memory_space<vmem>>, vector<4x256xf32>,
    %c0_13 = arith.constant 0 : index
    %c0_14 = arith.constant 0 : index
    %c1_15 = arith.constant 1 : index
    %c0_16 = arith.constant 0 : index
    %12 = vector.load %arg1[%c0_13, %c0_14, %c1_15, %c0_16] : memref<1x4x18x18xf32, #tpu.memory_space<vmem>>, vector<1x4x16x16xf32>
    %13 = vector.shape_cast %12 : vector<1x4x16x16xf32> to vector<4x16x16xf32>
    %14 = vector.shape_cast %13 : vector<4x16x16xf32> to vector<4x256xf32>
    %c12 = arith.constant 12 : index
    %c0_17 = arith.constant 0 : index
    %15 = vector.load %arg7[%c12, %c0_17] : memref<36x256xf32, #tpu.memory_space<vmem>>, vector<4x256xf32>
    tpu.vector_store %arg7[%c12, %c0_17], %14 {strides = array<i32>} : memref<36x256xf32, #tpu.memory_space<vmem>>, vector<4x256xf32>,
    %c0_18 = arith.constant 0 : index
    %c0_19 = arith.constant 0 : index
    %c1_20 = arith.constant 1 : index
    %c1_21 = arith.constant 1 : index
    %16 = vector.load %arg1[%c0_18, %c0_19, %c1_20, %c1_21] : memref<1x4x18x18xf32, #tpu.memory_space<vmem>>, vector<1x4x16x16xf32>
    %17 = vector.shape_cast %16 : vector<1x4x16x16xf32> to vector<4x16x16xf32>
    %18 = vector.shape_cast %17 : vector<4x16x16xf32> to vector<4x256xf32>
    %c16 = arith.constant 16 : index
    %c0_22 = arith.constant 0 : index
    %19 = vector.load %arg7[%c16, %c0_22] : memref<36x256xf32, #tpu.memory_space<vmem>>, vector<4x256xf32>
    tpu.vector_store %arg7[%c16, %c0_22], %18 {strides = array<i32>} : memref<36x256xf32, #tpu.memory_space<vmem>>, vector<4x256xf32>,
    %c0_23 = arith.constant 0 : index
    %c0_24 = arith.constant 0 : index
    %c1_25 = arith.constant 1 : index
    %c2_26 = arith.constant 2 : index
    %20 = vector.load %arg1[%c0_23, %c0_24, %c1_25, %c2_26] : memref<1x4x18x18xf32, #tpu.memory_space<vmem>>, vector<1x4x16x16xf32>
    %21 = vector.shape_cast %20 : vector<1x4x16x16xf32> to vector<4x16x16xf32>
    %22 = vector.shape_cast %21 : vector<4x16x16xf32> to vector<4x256xf32>
    %c20 = arith.constant 20 : index
    %c0_27 = arith.constant 0 : index
    %23 = vector.load %arg7[%c20, %c0_27] : memref<36x256xf32, #tpu.memory_space<vmem>>, vector<4x256xf32>
    tpu.vector_store %arg7[%c20, %c0_27], %22 {strides = array<i32>} : memref<36x256xf32, #tpu.memory_space<vmem>>, vector<4x256xf32>,
    %c0_28 = arith.constant 0 : index
    %c0_29 = arith.constant 0 : index
    %c2_30 = arith.constant 2 : index
    %c0_31 = arith.constant 0 : index
    %24 = vector.load %arg1[%c0_28, %c0_29, %c2_30, %c0_31] : memref<1x4x18x18xf32, #tpu.memory_space<vmem>>, vector<1x4x16x16xf32>
    %25 = vector.shape_cast %24 : vector<1x4x16x16xf32> to vector<4x16x16xf32>
    %26 = vector.shape_cast %25 : vector<4x16x16xf32> to vector<4x256xf32>
    %c24 = arith.constant 24 : index
    %c0_32 = arith.constant 0 : index
    %27 = vector.load %arg7[%c24, %c0_32] : memref<36x256xf32, #tpu.memory_space<vmem>>, vector<4x256xf32>
    tpu.vector_store %arg7[%c24, %c0_32], %26 {strides = array<i32>} : memref<36x256xf32, #tpu.memory_space<vmem>>, vector<4x256xf32>,
    %c0_33 = arith.constant 0 : index
    %c0_34 = arith.constant 0 : index
    %c2_35 = arith.constant 2 : index
    %c1_36 = arith.constant 1 : index
    %28 = vector.load %arg1[%c0_33, %c0_34, %c2_35, %c1_36] : memref<1x4x18x18xf32, #tpu.memory_space<vmem>>, vector<1x4x16x16xf32>
    %29 = vector.shape_cast %28 : vector<1x4x16x16xf32> to vector<4x16x16xf32>
    %30 = vector.shape_cast %29 : vector<4x16x16xf32> to vector<4x256xf32>
    %c28 = arith.constant 28 : index
    %c0_37 = arith.constant 0 : index
    %31 = vector.load %arg7[%c28, %c0_37] : memref<36x256xf32, #tpu.memory_space<vmem>>, vector<4x256xf32>
    tpu.vector_store %arg7[%c28, %c0_37], %30 {strides = array<i32>} : memref<36x256xf32, #tpu.memory_space<vmem>>, vector<4x256xf32>,
    %c0_38 = arith.constant 0 : index
    %c0_39 = arith.constant 0 : index
    %c2_40 = arith.constant 2 : index
    %c2_41 = arith.constant 2 : index
    %32 = vector.load %arg1[%c0_38, %c0_39, %c2_40, %c2_41] : memref<1x4x18x18xf32, #tpu.memory_space<vmem>>, vector<1x4x16x16xf32>
    %33 = vector.shape_cast %32 : vector<1x4x16x16xf32> to vector<4x16x16xf32>
    %34 = vector.shape_cast %33 : vector<4x16x16xf32> to vector<4x256xf32>
    %c32 = arith.constant 32 : index
    %c0_42 = arith.constant 0 : index
    %35 = vector.load %arg7[%c32, %c0_42] : memref<36x256xf32, #tpu.memory_space<vmem>>, vector<4x256xf32>
    tpu.vector_store %arg7[%c32, %c0_42], %34 {strides = array<i32>} : memref<36x256xf32, #tpu.memory_space<vmem>>, vector<4x256xf32>,
    %c0_43 = arith.constant 0 : index
    %c0_44 = arith.constant 0 : index
    %36 = vector.load %arg2[%c0_43, %c0_44] : memref<8x36xf32, #tpu.memory_space<vmem>>, vector<8x36xf32>
    %c0_45 = arith.constant 0 : index
    %c0_46 = arith.constant 0 : index
    %37 = vector.load %arg7[%c0_45, %c0_46] : memref<36x256xf32, #tpu.memory_space<vmem>>, vector<36x256xf32>
    %cst = arith.constant dense<0.000000e+00> : vector<8x256xf32>
    %38 = tpu.matmul %36, %37, %cst {dimension_numbers = #tpu.dot_dimension_numbers<[1], [0], [0], [1], [0, 0, 1, 1], [], []>} : vector<8x36xf32>, vector<36x256xf32>, vector<8x256xf32> -> vector<8x256xf32>
    %c0_47 = arith.constant 0 : index
    %c0_48 = arith.constant 0 : index
    %39 = vector.load %arg3[%c0_47, %c0_48] : memref<8x1xf32, #tpu.memory_space<vmem>>, vector<8x1xf32>
    %40 = vector.broadcast %39 : vector<8x1xf32> to vector<8x256xf32>
    %41 = arith.addf %38, %40 : vector<8x256xf32>
    %cst_49 = arith.constant 0.000000e+00 : f32
    %42 = vector.broadcast %cst_49 : f32 to vector<8x256xf32>
    %43 = arith.maximumf %41, %42 : vector<8x256xf32>
    %44 = vector.shape_cast %43 : vector<8x256xf32> to vector<8x8x32xf32>
    %45 = vector.extract_strided_slice %44 {offsets = [0, 0, 0], sizes = [8, 8, 16], strides = [1, 1, 1]} : vector<8x8x32xf32> to vector<8x8x16xf32>
    %46 = vector.extract_strided_slice %44 {offsets = [0, 0, 16], sizes = [8, 8, 16], strides = [1, 1, 1]} : vector<8x8x32xf32> to vector<8x8x16xf32>
    %47 = arith.maximumf %45, %46 : vector<8x8x16xf32>
    %48 = vector.shape_cast %47 : vector<8x8x16xf32> to vector<8x8x8x2xf32>
    %cst_50 = arith.constant dense<0xFF800000> : vector<8x8x8xf32>
    %49 = vector.multi_reduction <maximumf>, %48, %cst_50 [3] : vector<8x8x8x2xf32> to vector<8x8x8xf32>
    %cst_51 = arith.constant 0.000000e+00 : f32
    %50 = vector.broadcast %cst_51 : f32 to vector<8x1x10xf32>
    %c0_52 = arith.constant 0 : index
    %c0_53 = arith.constant 0 : index
    %c0_54 = arith.constant 0 : index
    %51 = vector.load %arg8[%c0_52, %c0_53, %c0_54] : memref<8x10x10xf32, #tpu.memory_space<vmem>>, vector<8x1x10xf32>
    tpu.vector_store %arg8[%c0_52, %c0_53, %c0_54], %50 {strides = array<i32>} : memref<8x10x10xf32, #tpu.memory_space<vmem>>, vector<8x1x10xf32>,
    %cst_55 = arith.constant 0.000000e+00 : f32
    %52 = vector.broadcast %cst_55 : f32 to vector<8x1x10xf32>
    %c0_56 = arith.constant 0 : index
    %c9 = arith.constant 9 : index
    %c0_57 = arith.constant 0 : index
    %53 = vector.load %arg8[%c0_56, %c9, %c0_57] : memref<8x10x10xf32, #tpu.memory_space<vmem>>, vector<8x1x10xf32>
    tpu.vector_store %arg8[%c0_56, %c9, %c0_57], %52 {strides = array<i32>} : memref<8x10x10xf32, #tpu.memory_space<vmem>>, vector<8x1x10xf32>,
    %cst_58 = arith.constant 0.000000e+00 : f32
    %54 = vector.broadcast %cst_58 : f32 to vector<8x10x1xf32>
    %c0_59 = arith.constant 0 : index
    %c0_60 = arith.constant 0 : index
    %c0_61 = arith.constant 0 : index
    %55 = vector.load %arg8[%c0_59, %c0_60, %c0_61] : memref<8x10x10xf32, #tpu.memory_space<vmem>>, vector<8x10x1xf32>
    tpu.vector_store %arg8[%c0_59, %c0_60, %c0_61], %54 {strides = array<i32>} : memref<8x10x10xf32, #tpu.memory_space<vmem>>, vector<8x10x1xf32>,
    %cst_62 = arith.constant 0.000000e+00 : f32
    %56 = vector.broadcast %cst_62 : f32 to vector<8x10x1xf32>
    %c0_63 = arith.constant 0 : index
    %c0_64 = arith.constant 0 : index
    %c9_65 = arith.constant 9 : index
    %57 = vector.load %arg8[%c0_63, %c0_64, %c9_65] : memref<8x10x10xf32, #tpu.memory_space<vmem>>, vector<8x10x1xf32>
    tpu.vector_store %arg8[%c0_63, %c0_64, %c9_65], %56 {strides = array<i32>} : memref<8x10x10xf32, #tpu.memory_space<vmem>>, vector<8x10x1xf32>,
    %c0_66 = arith.constant 0 : index
    %c1_67 = arith.constant 1 : index
    %c1_68 = arith.constant 1 : index
    %58 = vector.load %arg8[%c0_66, %c1_67, %c1_68] : memref<8x10x10xf32, #tpu.memory_space<vmem>>, vector<8x8x8xf32>
    tpu.vector_store %arg8[%c0_66, %c1_67, %c1_68], %49 {strides = array<i32>} : memref<8x10x10xf32, #tpu.memory_space<vmem>>, vector<8x8x8xf32>,
    %c0_69 = arith.constant 0 : index
    %c0_70 = arith.constant 0 : index
    %c0_71 = arith.constant 0 : index
    %59 = vector.load %arg8[%c0_69, %c0_70, %c0_71] : memref<8x10x10xf32, #tpu.memory_space<vmem>>, vector<8x8x8xf32>
    %60 = vector.shape_cast %59 : vector<8x8x8xf32> to vector<8x64xf32>
    %c0_72 = arith.constant 0 : index
    %c0_73 = arith.constant 0 : index
    %61 = vector.load %arg9[%c0_72, %c0_73] : memref<72x64xf32, #tpu.memory_space<vmem>>, vector<8x64xf32>
    tpu.vector_store %arg9[%c0_72, %c0_73], %60 {strides = array<i32>} : memref<72x64xf32, #tpu.memory_space<vmem>>, vector<8x64xf32>,
    %c0_74 = arith.constant 0 : index
    %c0_75 = arith.constant 0 : index
    %c1_76 = arith.constant 1 : index
    %62 = vector.load %arg8[%c0_74, %c0_75, %c1_76] : memref<8x10x10xf32, #tpu.memory_space<vmem>>, vector<8x8x8xf32>
    %63 = vector.shape_cast %62 : vector<8x8x8xf32> to vector<8x64xf32>
    %c8_77 = arith.constant 8 : index
    %c0_78 = arith.constant 0 : index
    %64 = vector.load %arg9[%c8_77, %c0_78] : memref<72x64xf32, #tpu.memory_space<vmem>>, vector<8x64xf32>
    tpu.vector_store %arg9[%c8_77, %c0_78], %63 {strides = array<i32>} : memref<72x64xf32, #tpu.memory_space<vmem>>, vector<8x64xf32>,
    %c0_79 = arith.constant 0 : index
    %c0_80 = arith.constant 0 : index
    %c2_81 = arith.constant 2 : index
    %65 = vector.load %arg8[%c0_79, %c0_80, %c2_81] : memref<8x10x10xf32, #tpu.memory_space<vmem>>, vector<8x8x8xf32>
    %66 = vector.shape_cast %65 : vector<8x8x8xf32> to vector<8x64xf32>
    %c16_82 = arith.constant 16 : index
    %c0_83 = arith.constant 0 : index
    %67 = vector.load %arg9[%c16_82, %c0_83] : memref<72x64xf32, #tpu.memory_space<vmem>>, vector<8x64xf32>
    tpu.vector_store %arg9[%c16_82, %c0_83], %66 {strides = array<i32>} : memref<72x64xf32, #tpu.memory_space<vmem>>, vector<8x64xf32>,
    %c0_84 = arith.constant 0 : index
    %c1_85 = arith.constant 1 : index
    %c0_86 = arith.constant 0 : index
    %68 = vector.load %arg8[%c0_84, %c1_85, %c0_86] : memref<8x10x10xf32, #tpu.memory_space<vmem>>, vector<8x8x8xf32>
    %69 = vector.shape_cast %68 : vector<8x8x8xf32> to vector<8x64xf32>
    %c24_87 = arith.constant 24 : index
    %c0_88 = arith.constant 0 : index
    %70 = vector.load %arg9[%c24_87, %c0_88] : memref<72x64xf32, #tpu.memory_space<vmem>>, vector<8x64xf32>
    tpu.vector_store %arg9[%c24_87, %c0_88], %69 {strides = array<i32>} : memref<72x64xf32, #tpu.memory_space<vmem>>, vector<8x64xf32>,
    %c0_89 = arith.constant 0 : index
    %c1_90 = arith.constant 1 : index
    %c1_91 = arith.constant 1 : index
    %71 = vector.load %arg8[%c0_89, %c1_90, %c1_91] : memref<8x10x10xf32, #tpu.memory_space<vmem>>, vector<8x8x8xf32>
    %72 = vector.shape_cast %71 : vector<8x8x8xf32> to vector<8x64xf32>
    %c32_92 = arith.constant 32 : index
    %c0_93 = arith.constant 0 : index
    %73 = vector.load %arg9[%c32_92, %c0_93] : memref<72x64xf32, #tpu.memory_space<vmem>>, vector<8x64xf32>
    tpu.vector_store %arg9[%c32_92, %c0_93], %72 {strides = array<i32>} : memref<72x64xf32, #tpu.memory_space<vmem>>, vector<8x64xf32>,
    %c0_94 = arith.constant 0 : index
    %c1_95 = arith.constant 1 : index
    %c2_96 = arith.constant 2 : index
    %74 = vector.load %arg8[%c0_94, %c1_95, %c2_96] : memref<8x10x10xf32, #tpu.memory_space<vmem>>, vector<8x8x8xf32>
    %75 = vector.shape_cast %74 : vector<8x8x8xf32> to vector<8x64xf32>
    %c40 = arith.constant 40 : index
    %c0_97 = arith.constant 0 : index
    %76 = vector.load %arg9[%c40, %c0_97] : memref<72x64xf32, #tpu.memory_space<vmem>>, vector<8x64xf32>
    tpu.vector_store %arg9[%c40, %c0_97], %75 {strides = array<i32>} : memref<72x64xf32, #tpu.memory_space<vmem>>, vector<8x64xf32>,
    %c0_98 = arith.constant 0 : index
    %c2_99 = arith.constant 2 : index
    %c0_100 = arith.constant 0 : index
    %77 = vector.load %arg8[%c0_98, %c2_99, %c0_100] : memref<8x10x10xf32, #tpu.memory_space<vmem>>, vector<8x8x8xf32>
    %78 = vector.shape_cast %77 : vector<8x8x8xf32> to vector<8x64xf32>
    %c48 = arith.constant 48 : index
    %c0_101 = arith.constant 0 : index
    %79 = vector.load %arg9[%c48, %c0_101] : memref<72x64xf32, #tpu.memory_space<vmem>>, vector<8x64xf32>
    tpu.vector_store %arg9[%c48, %c0_101], %78 {strides = array<i32>} : memref<72x64xf32, #tpu.memory_space<vmem>>, vector<8x64xf32>,
    %c0_102 = arith.constant 0 : index
    %c2_103 = arith.constant 2 : index
    %c1_104 = arith.constant 1 : index
    %80 = vector.load %arg8[%c0_102, %c2_103, %c1_104] : memref<8x10x10xf32, #tpu.memory_space<vmem>>, vector<8x8x8xf32>
    %81 = vector.shape_cast %80 : vector<8x8x8xf32> to vector<8x64xf32>
    %c56 = arith.constant 56 : index
    %c0_105 = arith.constant 0 : index
    %82 = vector.load %arg9[%c56, %c0_105] : memref<72x64xf32, #tpu.memory_space<vmem>>, vector<8x64xf32>
    tpu.vector_store %arg9[%c56, %c0_105], %81 {strides = array<i32>} : memref<72x64xf32, #tpu.memory_space<vmem>>, vector<8x64xf32>,
    %c0_106 = arith.constant 0 : index
    %c2_107 = arith.constant 2 : index
    %c2_108 = arith.constant 2 : index
    %83 = vector.load %arg8[%c0_106, %c2_107, %c2_108] : memref<8x10x10xf32, #tpu.memory_space<vmem>>, vector<8x8x8xf32>
    %84 = vector.shape_cast %83 : vector<8x8x8xf32> to vector<8x64xf32>
    %c64 = arith.constant 64 : index
    %c0_109 = arith.constant 0 : index
    %85 = vector.load %arg9[%c64, %c0_109] : memref<72x64xf32, #tpu.memory_space<vmem>>, vector<8x64xf32>
    tpu.vector_store %arg9[%c64, %c0_109], %84 {strides = array<i32>} : memref<72x64xf32, #tpu.memory_space<vmem>>, vector<8x64xf32>,
    %c0_110 = arith.constant 0 : index
    %c0_111 = arith.constant 0 : index
    %86 = vector.load %arg4[%c0_110, %c0_111] : memref<16x72xf32, #tpu.memory_space<vmem>>, vector<16x72xf32>
    %c0_112 = arith.constant 0 : index
    %c0_113 = arith.constant 0 : index
    %87 = vector.load %arg9[%c0_112, %c0_113] : memref<72x64xf32, #tpu.memory_space<vmem>>, vector<72x64xf32>
    %cst_114 = arith.constant dense<0.000000e+00> : vector<16x64xf32>
    %88 = tpu.matmul %86, %87, %cst_114 {dimension_numbers = #tpu.dot_dimension_numbers<[1], [0], [0], [1], [0, 0, 1, 1], [], []>} : vector<16x72xf32>, vector<72x64xf32>, vector<16x64xf32> -> vector<16x64xf32>
    %c0_115 = arith.constant 0 : index
    %c0_116 = arith.constant 0 : index
    %89 = vector.load %arg5[%c0_115, %c0_116] : memref<16x1xf32, #tpu.memory_space<vmem>>, vector<16x1xf32>
    %90 = vector.broadcast %89 : vector<16x1xf32> to vector<16x64xf32>
    %91 = arith.addf %88, %90 : vector<16x64xf32>
    %cst_117 = arith.constant 0.000000e+00 : f32
    %92 = vector.broadcast %cst_117 : f32 to vector<16x64xf32>
    %93 = arith.maximumf %91, %92 : vector<16x64xf32>
    %94 = vector.shape_cast %93 : vector<16x64xf32> to vector<16x4x16xf32>
    %95 = vector.extract_strided_slice %94 {offsets = [0, 0, 0], sizes = [16, 4, 8], strides = [1, 1, 1]} : vector<16x4x16xf32> to vector<16x4x8xf32>
    %96 = vector.extract_strided_slice %94 {offsets = [0, 0, 8], sizes = [16, 4, 8], strides = [1, 1, 1]} : vector<16x4x16xf32> to vector<16x4x8xf32>
    %97 = arith.maximumf %95, %96 : vector<16x4x8xf32>
    %98 = vector.shape_cast %97 : vector<16x4x8xf32> to vector<16x4x4x2xf32>
    %cst_118 = arith.constant dense<0xFF800000> : vector<16x4x4xf32>
    %99 = vector.multi_reduction <maximumf>, %98, %cst_118 [3] : vector<16x4x4x2xf32> to vector<16x4x4xf32>
    %100 = vector.shape_cast %99 : vector<16x4x4xf32> to vector<1x1x256xf32>
    %c0_119 = arith.constant 0 : index
    %c0_120 = arith.constant 0 : index
    %c0_121 = arith.constant 0 : index
    %101 = vector.load %arg6[%c0_119, %c0_120, %c0_121] : memref<1x1x256xf32, #tpu.memory_space<vmem>>, vector<1x1x256xf32>
    tpu.vector_store %arg6[%c0_119, %c0_120, %c0_121], %100 {strides = array<i32>} : memref<1x1x256xf32, #tpu.memory_space<vmem>>, vector<1x1x256xf32>,
    return
  }
  func.func @transform_0(%arg0: i32) -> (i32, i32, i32, i32) {
    %c0_i32 = arith.constant 0 : i32
    %c0_i32_0 = arith.constant 0 : i32
    %c0_i32_1 = arith.constant 0 : i32
    %c0_i32_2 = arith.constant 0 : i32
    return %arg0, %c0_i32, %c0_i32_0, %c0_i32_1 : i32, i32, i32, i32
  }
  func.func @transform_1(%arg0: i32) -> (i32, i32) {
    %c0_i32 = arith.constant 0 : i32
    %c0_i32_0 = arith.constant 0 : i32
    %c0_i32_1 = arith.constant 0 : i32
    return %c0_i32, %c0_i32_0 : i32, i32
  }
  func.func @transform_2(%arg0: i32) -> (i32, i32) {
    %c0_i32 = arith.constant 0 : i32
    %c0_i32_0 = arith.constant 0 : i32
    %c0_i32_1 = arith.constant 0 : i32
    return %c0_i32, %c0_i32_0 : i32, i32
  }
  func.func @transform_3(%arg0: i32) -> (i32, i32) {
    %c0_i32 = arith.constant 0 : i32
    %c0_i32_0 = arith.constant 0 : i32
    %c0_i32_1 = arith.constant 0 : i32
    return %c0_i32, %c0_i32_0 : i32, i32
  }
  func.func @transform_4(%arg0: i32) -> (i32, i32) {
    %c0_i32 = arith.constant 0 : i32
    %c0_i32_0 = arith.constant 0 : i32
    %c0_i32_1 = arith.constant 0 : i32
    return %c0_i32, %c0_i32_0 : i32, i32
  }
  func.func @transform_5(%arg0: i32) -> (i32, i32, i32) {
    %c0_i32 = arith.constant 0 : i32
    %c0_i32_0 = arith.constant 0 : i32
    %c0_i32_1 = arith.constant 0 : i32
    return %arg0, %c0_i32, %c0_i32_0 : i32, i32, i32
  }
}

</mosaic_0001>

<bundles_post_ra>
// kernel: model_forward.1
= control target key start
LH: loop header
LB: loop body
LE: loop exit
PB: predicated region body
PF: predicated region fallthrough
CT: control target
= control target key end

     0   :  { %s7599_s18 = smov 0   ;;  %s11577_s0 = inlined_call_operand.vmem [shape: f32[2,4,18,18], index: 0, kind: input, shape index: {}]   ;;  %s11578_s1 = inlined_call_operand.vmem [shape: f32[8,36], index: 1, kind: input, shape index: {}]   ;;  %s11579_s2 = inlined_call_operand.vmem [shape: f32[8,1], index: 2, kind: input, shape index: {}]   ;;  %s11580_s3 = inlined_call_operand.vmem [shape: f32[16,72], index: 3, kind: input, shape index: {}]   ;;  %s11581_s4 = inlined_call_operand.vmem [shape: f32[16,1], index: 4, kind: input, shape index: {}]   ;;  %s11582_s5 = inlined_call_operand.vmem [shape: f32[2,1,256], index: 5, kind: output, shape index: {}]  }
   0x1 LB: > { %s7479_s19 = sadd.s32 4294967295, %s7544_s18   ;;  %p7483_p0 = scmp.ge.s32.totalorder %s7544_s18, 1  ;;  %s7544_s18 = sphi %s7599_s18, %s15_s18  }
   0x2   : > { %p187_p1 = scmp.lt.s32.totalorder %s7544_s18, 3 }
   0x4   : > { %p188_p2 = pnand %p7483_p0, %p187_p1 }
   0x6   : > { %191 = sbr.rel (%p188_p2) target bundleno = 4146 (0x1032), region = 40 }
   0xb   : > { %p214_p3 = scmp.lt.s32.totalorder %s7479_s19, 1  ;;  %v7546_v0 = vmov 1983009808   ;;  %vm232_vm0 = vcmask 1047556   ;;  %v7547_v10 = vmov 1934713408  }
   0xc   : > { %v237_v1 = vunpack.c.l.s4 %v7546_v0  ;;  %v261_v11 = vunpack.c.l.s4 %v7547_v10  ;;  %s7548_s24 = smov 64   ;;  %s7549_s25 = smov 32   ;;  %vm400_vm1 = vcmask 130048   ;;  %vm402_vm2 = vcmask 261120  }
   0xd   : > { %s11675_s19 = smov (!%p214_p3, %s7479_s19), 1  ;;  %s7550_s26 = smov 96   ;;  %vm404_vm3 = vcmask 392192   ;;  %vm406_vm4 = vcmask 523264   ;;  %vm408_vm5 = vcmask 654336   ;;  %vm410_vm6 = vcmask 785408  }
   0xe   : > { %s7503_s20 = smul.u32 96, %s11675_s19  ;;  %v7624_v5 = vunpack.c.0.s8 %v237_v1  ;;  %v7657_v25 = vunpack.c.0.s8 %v261_v11  ;;  %s7551_s27 = smov 48   ;;  %vm412_vm7 = vcmask 916480   ;;  %vm2196_vm8 = vcmask 1043456  }
   0xf   : > { %s7552_s28 = smov 16   ;;  %s7553_s29 = smov 112   ;;  %vm2192_vm9 = vcmask 293888   ;;  %vm3489_vm10 = vcmask 15360   ;;  %vm3682_vm11 = vcmask 73728   ;;  %vm3699_vm12 = vcmask 7168  }
  0x10   : > { %s7613_s23 = scalar_lea.vmem %s11577_s0, %s7503_s20  ;;  %s7554_s30 = smov 80   ;;  %vm3701_vm13 = vcmask 1024   ;;  %vm3717_vm14 = vcmask 80968   ;;  %vm3719_vm15 = vcmask 74824  }
  0x11   : > { %v7616_v2 = vld [vmem:[%s7613_s23] sm:$0xff]  ;;  %v7619_v3 = vld [vmem:[%s7613_s23 + $0x18] sm:$0xff]  ;;  %v7622_v4 = vld [vmem:[%s7613_s23 + $0x30] sm:$0xff]  ;;  %s7555_s6 = smov 127   ;;  %s7556_s7 = smov 126  }
  0x12   : > { %v7627_v6 = vld [vmem:[%s7613_s23 + $0x48] sm:$0xff]  ;;  %v231_v7 = vrot.slane %v7622_v4, 4  ;;  %v234_v8 = vrot.slane %v7616_v2, 4  ;;  %v246_v9 = vrot.slane %v7619_v3, 4  ;;  %v7634_v13 = vld [vmem:[%s7613_s23 + $0x38] sm:$0xff]  ;;  %v7637_v14 = vld [vmem:[%s7613_s23 + $0x50] sm:$0xff] }
  0x13   : > { %v244_v12 = vrot.slane %v7627_v6, 4  ;;  %v7646_v18 = vld [vmem:[%s7613_s23 + $0x8] sm:$0xff]  ;;  %v288_v19 = vrot.slane %v7634_v13, 4  ;;  %v7655_v24 = vld [vmem:[%s7613_s23 + $0x20] sm:$0xff]  ;;  %v300_v27 = vrot.slane %v7637_v14, 4  ;;  %s7558_s12 = smov 124  }
  0x14   : > { %v235_v15 = vsel %vm232_vm0, %v7622_v4, %v234_v8  ;;  %v247_v16 = vsel %vm232_vm0, %v7627_v6, %v246_v9  ;;  %v233_v17 = vsel %vm232_vm0, %v231_v7, %v7616_v2  ;;  %v302_v34 = vrot.slane %v7655_v24, 4  ;;  %s7559_s13 = smov 122   ;;  %s7560_s14 = smov 120  }
  0x15   : > { %v243_v20 = vperm.slane %v235_v15, %v7624_v5  ;;  %v255_v21 = vperm.slane %v247_v16, %v7624_v5  ;;  %v239_v22 = vperm.slane %v233_v17, %v7624_v5  ;;  %v245_v23 = vsel %vm232_vm0, %v244_v12, %v7619_v3  ;;  %s7561_s15 = smov 118   ;;  %s7562_s16 = smov 116  }
  0x16   : > { %v251_v26 = vperm.slane %v245_v23, %v7624_v5  ;;  %v289_v31 = vsel %vm232_vm0, %v288_v19, %v7646_v18  ;;  %v301_v33 = vsel %vm232_vm0, %v300_v27, %v7655_v24  ;;  %v290_v50 = vrot.slane %v7646_v18, 4  ;;  %s7563_s17 = smov 114   ;;  %s7565_s20 = smov 24  }
  0x17   : > { %v268_v28 = vrot.slane %v255_v21, 4  ;;  %v270_v29 = vrot.slane %v243_v20, 4  ;;  %v258_v30 = vrot.slane %v239_v22, 4  ;;  %v307_v37 = vperm.slane %v301_v33, %v7624_v5  ;;  %s7566_s21 = smov 56   ;;  %s7567_s22 = smov 40  }
  0x18   : > { %v256_v32 = vrot.slane %v251_v26, 4  ;;  %v295_v42 = vperm.slane %v289_v31, %v7624_v5  ;;  %v303_v51 = vsel %vm232_vm0, %v7637_v14, %v302_v34  ;;  %v291_v57 = vsel %vm232_vm0, %v7634_v13, %v290_v50 }
  0x19   : > { %v269_v35 = vsel %vm232_vm0, %v268_v28, %v243_v20  ;;  %v259_v36 = vsel %vm232_vm0, %v251_v26, %v258_v30  ;;  %v271_v38 = vsel %vm232_vm0, %v255_v21, %v270_v29  ;;  %v312_v44 = vrot.slane %v307_v37, 4 }
  0x1a   : > { %v275_v39 = vperm.slane %v269_v35, %v7657_v25  ;;  %v267_v40 = vperm.slane %v259_v36, %v7657_v25  ;;  %v257_v41 = vsel %vm232_vm0, %v256_v32, %v239_v22  ;;  %v279_v45 = vperm.slane %v271_v38, %v7657_v25 }
  0x1b   : > { %v7675_v43 = vperm.slane %v257_v41, %v7657_v25  ;;  %v314_v46 = vrot.slane %v295_v42, 4  ;;  %v313_v49 = vsel %vm232_vm0, %v312_v44, %v295_v42  ;;  %v311_v56 = vperm.slane %v303_v51, %v7624_v5 }
  0x1c   : > { %357 = vrot.lane.b32.xlu1 %v275_v39, %s7548_s24  ;;  %349 = vrot.lane.b32.xlu0 %v267_v40, %s7549_s25  ;;  %v282_v47 = vrot.slane %v267_v40, 4  ;;  %v7690_v55 = vperm.slane %v313_v49, %v7657_v25  ;;  %v286_v60 = vrot.slane %v279_v45, 4  ;;  %v299_v61 = vperm.slane %v291_v57, %v7624_v5 }
  0x1d   : > { %v280_v48 = vrot.slane %v7675_v43, 4  ;;  %365 = vrot.lane.b32.xlu2 %v279_v45, %s7550_s26  ;;  %v315_v52 = vsel %vm232_vm0, %v307_v37, %v314_v46  ;;  %v324_v62 = vrot.slane %v311_v56, 4  ;;  %v284_v63 = vrot.slane %v275_v39, 4 }
  0x1e   : > { %v283_v53 = vsel %vm232_vm0, 0.0, %v282_v47  ;;  %v323_v58 = vperm.slane %v315_v52, %v7657_v25  ;;  %v336_v59 = vrot.slane %v7690_v55, 4  ;;  %v287_v1 = vsel %vm232_vm0, 0.0, %v286_v60 }
  0x1f   : > { %v281_v54 = vsel %vm232_vm0, 0.0, %v280_v48  ;;  %v325_v7 = vsel %vm232_vm0, %v324_v62, %v299_v61  ;;  %v326_v8 = vrot.slane %v299_v61, 4  ;;  %v285_v9 = vsel %vm232_vm0, 0.0, %v284_v63 }
  0x20   : > { %v337_v0 = vsel %vm232_vm0, 0.0, %v336_v59  ;;  %v331_v10 = vperm.slane %v325_v7, %v7657_v25  ;;  %v338_v11 = vrot.slane %v323_v58, 4 }
  0x21   : > { %v327_v12 = vsel %vm232_vm0, %v311_v56, %v326_v8 }
  0x22   : > { %v340_v15 = vrot.slane %v331_v10, 4  ;;  %v339_v16 = vsel %vm232_vm0, 0.0, %v338_v11  ;;  %v335_v17 = vperm.slane %v327_v12, %v7657_v25 }
  0x24   : > { %353 = vrot.lane.b32.xlu1 %v283_v53, %s7551_s27  ;;  %345 = vrot.lane.b32.xlu0 %v281_v54, %s7552_s28  ;;  %v341_v19 = vsel %vm232_vm0, 0.0, %v340_v15  ;;  %v342_v20 = vrot.slane %v335_v17, 4 }
  0x25   : > { %377 = vrot.lane.b32.xlu2 %v323_v58, %s7549_s25 }
  0x26   : > { %v343_v21 = vsel %vm232_vm0, 0.0, %v342_v20 }
  0x2c   : > { %373 = vrot.lane.b32.xlu1 %v337_v0, %s7552_s28  ;;  %369 = vrot.lane.b32.xlu0 %v287_v1, %s7553_s29 }
  0x2d   : > { %361 = vrot.lane.b32.xlu2 %v285_v9, %s7554_s30 }
  0x34   : > { %385 = vrot.lane.b32.xlu1 %v331_v10, %s7548_s24  ;;  %381 = vrot.lane.b32.xlu0 %v339_v16, %s7551_s27 }
  0x35   : > { %389 = vrot.lane.b32.xlu2 %v341_v19, %s7554_s30 }
  0x3c   : > { %397 = vrot.lane.b32.xlu1 %v343_v21, %s7553_s29  ;;  %393 = vrot.lane.b32.xlu0 %v335_v17, %s7550_s26 }
  0x3d   : > { %439 = vrot.lane.b32.xlu2 %v7616_v2, %s7555_s6 }
  0x44   : > { %443 = vrot.lane.b32.xlu1 %v7619_v3, %s7555_s6  ;;  %441 = vrot.lane.b32.xlu0 %v7646_v18, %s7555_s6 }
  0x45   : > { %445 = vrot.lane.b32.xlu2 %v7655_v24, %s7555_s6 }
  0x4c   : > { %449 = vrot.lane.b32.xlu1 %v7634_v13, %s7555_s6  ;;  %447 = vrot.lane.b32.xlu0 %v7622_v4, %s7555_s6 }
  0x4d   : > { %451 = vrot.lane.b32.xlu2 %v7627_v6, %s7555_s6 }
  0x54   : > { %671 = vrot.lane.b32.xlu1 %v7646_v18, %s7556_s7  ;;  %453 = vrot.lane.b32.xlu0 %v7637_v14, %s7555_s6 }
  0x55   : > { %673 = vrot.lane.b32.xlu2 %v7619_v3, %s7556_s7 }
  0x5c   : > { %677 = vrot.lane.b32.xlu1 %v7622_v4, %s7556_s7  ;;  %669 = vrot.lane.b32.xlu0 %v7616_v2, %s7556_s7 }
  0x5d   : > { %679 = vrot.lane.b32.xlu2 %v7634_v13, %s7556_s7 }
  0x64   : > { %683 = vrot.lane.b32.xlu1 %v7637_v14, %s7556_s7  ;;  %675 = vrot.lane.b32.xlu0 %v7655_v24, %s7556_s7 }
  0x6c   : > { %681 = vrot.lane.b32.xlu0 %v7627_v6, %s7556_s7 }
  0x77   : > { %v366_v18 = vpop.permute.xlu2 %365 }
  0x7f   : > { %v378_v3 = vpop.permute.xlu2 %377 }
  0x87   : > { %v362_v4 = vpop.permute.xlu2 %361 }
  0x8e   : > { %v358_v22 = vpop.permute.xlu1 %357  ;;  %v350_v23 = vpop.permute.xlu0 %349 }
  0x8f   : > { %v390_v14 = vpop.permute.xlu2 %389 }
  0x96   : > { %v354_v2 = vpop.permute.xlu1 %353  ;;  %v346_v26 = vpop.permute.xlu0 %345 }
  0x97   : > { %v401_v13 = vsel %vm400_vm1, %v7675_v43, %v346_v26  ;;  %v440_v33 = vpop.permute.xlu2 %439 }
  0x98   : > { %v403_v24 = vsel %vm402_vm2, %v401_v13, %v350_v23  ;;  %v465_v51 = vrot.slane %v440_v33, 4 }
  0x99   : > { %v405_v6 = vsel %vm404_vm3, %v403_v24, %v354_v2 }
  0x9a   : > { %v407_v27 = vsel %vm406_vm4, %v405_v6, %v358_v22 }
  0x9b   : > { %v409_v28 = vsel %vm408_vm5, %v407_v27, %v362_v4 }
  0x9c   : > { %v411_v30 = vsel %vm410_vm6, %v409_v28, %v366_v18 }
  0x9e   : > { %v374_v29 = vpop.permute.xlu1 %373  ;;  %v370_v31 = vpop.permute.xlu0 %369 }
  0x9f   : > { %v413_v32 = vsel %vm412_vm7, %v411_v30, %v370_v31  ;;  %v414_v34 = vsel %vm400_vm1, %v7690_v55, %v374_v29  ;;  %v446_v40 = vpop.permute.xlu2 %445 }
  0xa0   : > { %421 = vst [vmem:[#allocation2 + $0x30] sm:$0xf] %v413_v32  ;;  %v415_v35 = vsel %vm402_vm2, %v414_v34, %v378_v3  ;;  %v533_v8 = vrot.slane %v446_v40, 4 }
  0xa6   : > { %v386_v36 = vpop.permute.xlu1 %385  ;;  %v382_v37 = vpop.permute.xlu0 %381 }
  0xa7   : > { %v416_v38 = vsel %vm404_vm3, %v415_v35, %v382_v37  ;;  %v452_v46 = vpop.permute.xlu2 %451 }
  0xa8   : > { %v417_v39 = vsel %vm406_vm4, %v416_v38, %v386_v36  ;;  %v475_v53 = vrot.slane %v452_v46, 4 }
  0xa9   : > { %v418_v42 = vsel %vm408_vm5, %v417_v39, %v390_v14 }
  0xae   : > { %v398_v41 = vpop.permute.xlu1 %397  ;;  %v394_v43 = vpop.permute.xlu0 %393 }
  0xaf   : > { %v419_v44 = vsel %vm410_vm6, %v418_v42, %v394_v43  ;;  %v674_v31 = vpop.permute.xlu2 %673 }
  0xb0   : > { %v420_v45 = vsel %vm412_vm7, %v419_v44, %v398_v41 }
  0xb1   : > { %422 = vst [vmem:[#allocation2] sm:$0xf] %v420_v45  ;;  %v707_v45 = vrot.slane %v674_v31, 4 }
  0xb6   : > { %v444_v47 = vpop.permute.xlu1 %443  ;;  %v442_v48 = vpop.permute.xlu0 %441 }
  0xb7   : > { %v477_v49 = vrot.slane %v444_v47, 4  ;;  %v521_v54 = vrot.slane %v442_v48, 4  ;;  %v476_v61 = vsel %vm232_vm0, %v475_v53, %v444_v47  ;;  %v7829_v39 = vpop.permute.xlu2 %679 }
  0xb8   : > { %v7778_v9 = vperm.slane %v476_v61, %v7624_v5  ;;  %v749_v41 = vrot.slane %v7829_v39, 4 }
  0xb9   : > { %v478_v50 = vsel %vm232_vm0, %v452_v46, %v477_v49 }
  0xba   : > { %v486_v52 = vperm.slane %v478_v50, %v7624_v5 }
  0xbc   : > { %v499_v57 = vrot.slane %v486_v52, 4 }
  0xbe   : > { %v450_v55 = vpop.permute.xlu1 %449  ;;  %v448_v56 = vpop.permute.xlu0 %447 }
  0xbf   : > { %v519_v58 = vrot.slane %v450_v55, 4  ;;  %v463_v59 = vrot.slane %v448_v56, 4  ;;  %v466_v60 = vsel %vm232_vm0, %v448_v56, %v465_v51  ;;  %v522_v63 = vsel %vm232_vm0, %v450_v55, %v521_v54 }
  0xc0   : > { %v474_v62 = vperm.slane %v466_v60, %v7624_v5  ;;  %v530_v12 = vperm.slane %v522_v63, %v7624_v5 }
  0xc1   : > { %v464_v0 = vsel %vm232_vm0, %v463_v59, %v440_v33  ;;  %v520_v10 = vsel %vm232_vm0, %v519_v58, %v442_v48 }
  0xc2   : > { %v7775_v1 = vperm.slane %v464_v0, %v7624_v5  ;;  %v501_v7 = vrot.slane %v474_v62, 4  ;;  %v500_v11 = vsel %vm232_vm0, %v499_v57, %v474_v62  ;;  %v7792_v20 = vperm.slane %v520_v10, %v7624_v5 }
  0xc3   : > { %v7784_v15 = vperm.slane %v500_v11, %v7657_v25  ;;  %v557_v2 = vrot.slane %v530_v12, 4 }
  0xc4   : > { %v502_v16 = vsel %vm232_vm0, %v486_v52, %v501_v7  ;;  %v489_v17 = vrot.slane %v7775_v1, 4  ;;  %v545_v27 = vrot.slane %v7792_v20, 4  ;;  %v487_v7 = vrot.slane %v7778_v9, 4 }
  0xc5   : > { %v7789_v19 = vperm.slane %v502_v16, %v7657_v25  ;;  %588 = vrot.lane.b32.xlu1 %v7784_v15, %s7548_s24 }
  0xc6   : > { %v7796_v21 = vpop.permute.xlu1 %671  ;;  %v454_v18 = vpop.permute.xlu0 %453  ;;  %v490_v3 = vsel %vm232_vm0, %v7778_v9, %v489_v17  ;;  %v488_v9 = vsel %vm232_vm0, %v487_v7, %v7775_v1  ;;  %v515_v17 = vrot.slane %v7784_v15, 4 }
  0xc7   : > { %v531_v22 = vrot.slane %v454_v18, 4  ;;  %v534_v23 = vsel %vm232_vm0, %v454_v18, %v533_v8  ;;  %596 = vrot.lane.b32.xlu0 %v7789_v19, %s7550_s26  ;;  %v7804_v4 = vperm.slane %v490_v3, %v7657_v25  ;;  %v750_v48 = vsel %vm232_vm0, %v749_v41, %v7796_v21 }
  0xc8   : > { %v542_v26 = vperm.slane %v534_v23, %v7624_v5  ;;  %v756_v54 = vperm.slane %v750_v48, %v7624_v5  ;;  %v7876_v23 = vperm.slane %v488_v9, %v7657_v25 }
  0xc9   : > { %v532_v13 = vsel %vm232_vm0, %v531_v22, %v446_v40  ;;  %580 = vrot.lane.b32.xlu2 %v7804_v4, %s7549_s25  ;;  %v513_v18 = vrot.slane %v7804_v4, 4 }
  0xca   : > { %v538_v14 = vperm.slane %v532_v13, %v7624_v5  ;;  %v555_v24 = vrot.slane %v542_v26, 4  ;;  %v558_v6 = vsel %vm232_vm0, %v542_v26, %v557_v2  ;;  %v775_v11 = vrot.slane %v756_v54, 4 }
  0xcb   : > { %v7814_v28 = vperm.slane %v558_v6, %v7657_v25  ;;  %v516_v2 = vsel %vm232_vm0, 0.0, %v515_v17  ;;  %v514_v1 = vsel %vm232_vm0, 0.0, %v513_v18  ;;  %v511_v4 = vrot.slane %v7876_v23, 4 }
  0xcc   : > { %v546_v29 = vsel %vm232_vm0, %v538_v14, %v545_v27  ;;  %v556_v30 = vsel %vm232_vm0, %v555_v24, %v530_v12  ;;  %v543_v12 = vrot.slane %v538_v14, 4 }
  0xcd   : > { %v7819_v32 = vperm.slane %v546_v29, %v7657_v25  ;;  %624 = vrot.lane.b32.xlu1 %v7814_v28, %s7550_s26  ;;  %v562_v34 = vperm.slane %v556_v30, %v7657_v25  ;;  %v512_v13 = vsel %vm232_vm0, 0.0, %v511_v4  ;;  %v517_v29 = vrot.slane %v7789_v19, 4  ;;  %v7905_v19 = vld [vmem:[%s7613_s23 + $0x49] sm:$0xff] }
  0xce   : > { %v670_v33 = vpop.permute.xlu0 %669  ;;  %v678_v35 = vpop.permute.xlu1 %677  ;;  %v544_v22 = vsel %vm232_vm0, %v543_v12, %v7792_v20  ;;  %v573_v30 = vrot.slane %v7814_v28, 4 }
  0xcf   : > { %608 = vrot.lane.b32.xlu0 %v7819_v32, %s7549_s25  ;;  %v695_v36 = vrot.slane %v670_v33, 4  ;;  %v693_v38 = vrot.slane %v678_v35, 4  ;;  %v7883_v15 = vperm.slane %v544_v22, %v7657_v25  ;;  %v571_v26 = vrot.slane %v562_v34, 4 }
  0xd1   : > { %616 = vrot.lane.b32.xlu2 %v562_v34, %s7548_s24  ;;  %v696_v40 = vsel %vm232_vm0, %v678_v35, %v695_v36  ;;  %v694_v43 = vsel %vm232_vm0, %v693_v38, %v670_v33  ;;  %v567_v20 = vrot.slane %v7883_v15, 4  ;;  %v572_v24 = vsel %vm232_vm0, 0.0, %v571_v26 }
  0xd2   : > { %v704_v44 = vperm.slane %v696_v40, %v7624_v5  ;;  %v700_v47 = vperm.slane %v694_v43, %v7624_v5  ;;  %v751_v36 = vrot.slane %v7796_v21, 4  ;;  %v518_v38 = vsel %vm232_vm0, 0.0, %v517_v29  ;;  %v7919_v43 = vld [vmem:[%s7613_s23 + $0x31] sm:$0xff]  ;;  %v7979_v29 = vld [vmem:[%s7613_s23 + $0x39] sm:$0xff] }
  0xd3   : > { %v568_v14 = vsel %vm232_vm0, 0.0, %v567_v20  ;;  %v574_v40 = vsel %vm232_vm0, 0.0, %v573_v30  ;;  %v7984_v30 = vld [vmem:[%s7613_s23 + $0x21] sm:$0xff] }
  0xd4   : > { %v731_v53 = vrot.slane %v704_v44, 4  ;;  %v719_v57 = vrot.slane %v700_v47, 4 }
  0xd6   : > { %v7827_v37 = vpop.permute.xlu0 %675  ;;  %v7833_v42 = vpop.permute.xlu1 %683 }
  0xd7   : > { %v761_v46 = vrot.slane %v7833_v42, 4 }
  0xd9   : > { %v762_v55 = vsel %vm232_vm0, %v761_v46, %v7827_v37 }
  0xda   : > { %v768_v62 = vperm.slane %v762_v55, %v7624_v5 }
  0xdc   : > { %v776_v16 = vsel %vm232_vm0, %v768_v62, %v775_v11  ;;  %v773_v6 = vrot.slane %v768_v62, 4 }
  0xdd   : > { %v7871_v3 = vperm.slane %v776_v16, %v7657_v25 }
  0xde   : > { %v682_v49 = vpop.permute.xlu0 %681  ;;  %v774_v34 = vsel %vm232_vm0, %v773_v6, %v756_v54 }
  0xdf   : > { %v705_v50 = vrot.slane %v682_v49, 4  ;;  %v708_v51 = vsel %vm232_vm0, %v682_v49, %v707_v45  ;;  %v7911_v41 = vperm.slane %v774_v34, %v7657_v25  ;;  %v897_v45 = vrot.slane %v7905_v19, 4  ;;  %v7988_v34 = vld [vmem:[%s7613_s23 + $0x51] sm:$0xff] }
  0xe0   : > { %v716_v52 = vperm.slane %v708_v51, %v7624_v5 }
  0xe1   : > { %v706_v56 = vsel %vm232_vm0, %v705_v50, %v674_v31  ;;  %v763_v31 = vrot.slane %v7827_v37, 4  ;;  %v797_v48 = vrot.slane %v7911_v41, 4  ;;  %v885_v50 = vrot.slane %v7919_v43, 4 }
  0xe2   : > { %v712_v58 = vperm.slane %v706_v56, %v7624_v5  ;;  %v729_v59 = vrot.slane %v716_v52, 4  ;;  %v732_v60 = vsel %vm232_vm0, %v716_v52, %v731_v53  ;;  %v7934_v52 = vld [vmem:[%s7613_s23 + $0x1] sm:$0xff] }
  0xe3   : > { %v7850_v61 = vperm.slane %v732_v60, %v7657_v25  ;;  %v764_v28 = vsel %vm232_vm0, %v7833_v42, %v763_v31  ;;  %v569_v42 = vrot.slane %v7819_v32, 4  ;;  %v798_v54 = vsel %vm232_vm0, 0.0, %v797_v48 }
  0xe4   : > { %v730_v63 = vsel %vm232_vm0, %v729_v59, %v704_v44  ;;  %v720_v0 = vsel %vm232_vm0, %v712_v58, %v719_v57  ;;  %v717_v27 = vrot.slane %v712_v58, 4  ;;  %v752_v44 = vsel %vm232_vm0, %v7829_v39, %v751_v36 }
  0xe5   : > { %826 = vrot.lane.b32.xlu1 %v7850_v61, %s7550_s26  ;;  %v736_v8 = vperm.slane %v730_v63, %v7657_v25  ;;  %v7860_v10 = vperm.slane %v720_v0, %v7657_v25  ;;  %v772_v46 = vperm.slane %v764_v28, %v7624_v5  ;;  %v760_v51 = vperm.slane %v752_v44, %v7624_v5 }
  0xe6   : > { %v718_v35 = vsel %vm232_vm0, %v717_v27, %v700_v47  ;;  %v7927_v47 = vld [vmem:[%s7613_s23 + $0x19] sm:$0xff]  ;;  %v570_v39 = vsel %vm232_vm0, 0.0, %v569_v42  ;;  %v886_v56 = vsel %vm232_vm0, %v885_v50, %v7934_v52  ;;  %v747_v63 = vrot.slane %v7850_v61, 4 }
  0xe7   : > { %818 = vrot.lane.b32.xlu2 %v736_v8, %s7548_s24  ;;  %810 = vrot.lane.b32.xlu0 %v7860_v10, %s7549_s25  ;;  %v745_v33 = vrot.slane %v736_v8, 4  ;;  %v7914_v21 = vperm.slane %v718_v35, %v7657_v25  ;;  %v898_v32 = vsel %vm232_vm0, %v897_v45, %v7927_v47  ;;  %v785_v53 = vrot.slane %v772_v46, 4 }
  0xe8   : > { %v787_v57 = vrot.slane %v760_v51, 4  ;;  %v904_v58 = vperm.slane %v898_v32, %v7624_v5  ;;  %v743_v59 = vrot.slane %v7860_v10, 4  ;;  %v892_v62 = vperm.slane %v886_v56, %v7624_v5 }
  0xe9   : > { %v746_v37 = vsel %vm232_vm0, 0.0, %v745_v33  ;;  %v741_v49 = vrot.slane %v7914_v21, 4  ;;  %v786_v60 = vsel %vm232_vm0, %v785_v53, %v760_v51  ;;  %v748_v16 = vsel %vm232_vm0, 0.0, %v747_v63 }
  0xea   : > { %v788_v0 = vsel %vm232_vm0, %v772_v46, %v787_v57  ;;  %v909_v7 = vrot.slane %v904_v58, 4  ;;  %v744_v8 = vsel %vm232_vm0, 0.0, %v743_v59  ;;  %v792_v11 = vperm.slane %v786_v60, %v7657_v25 }
  0xeb   : > { %v742_v55 = vsel %vm232_vm0, 0.0, %v741_v49  ;;  %v911_v12 = vrot.slane %v892_v62, 4  ;;  %v796_v10 = vperm.slane %v788_v0, %v7657_v25  ;;  %v899_v9 = vrot.slane %v7927_v47, 4 }
  0xec   : > { %v910_v61 = vsel %vm232_vm0, %v909_v7, %v892_v62  ;;  %v801_v17 = vrot.slane %v792_v11, 4  ;;  %v887_v22 = vrot.slane %v7934_v52, 4  ;;  %v941_v35 = vrot.slane %v7979_v29, 4 }
  0xed   : > { %838 = vrot.lane.b32.xlu1 %v7871_v3, %s7549_s25  ;;  %v912_v18 = vsel %vm232_vm0, %v904_v58, %v911_v12  ;;  %v7965_v4 = vperm.slane %v910_v61, %v7657_v25  ;;  %v900_v20 = vsel %vm232_vm0, %v7905_v19, %v899_v9  ;;  %v955_v28 = vrot.slane %v7984_v30, 4 }
  0xee   : > { %v802_v26 = vsel %vm232_vm0, 0.0, %v801_v17  ;;  %v908_v27 = vperm.slane %v900_v20, %v7624_v5  ;;  %v953_v42 = vrot.slane %v7988_v34, 4 }
  0xef   : > { %592 = vrot.lane.b32.xlu2 %v516_v2, %s7554_s30  ;;  %584 = vrot.lane.b32.xlu0 %v514_v1, %s7551_s27  ;;  %v803_v2 = vrot.slane %v796_v10, 4  ;;  %v799_v1 = vrot.slane %v7871_v3, 4  ;;  %v933_v6 = vrot.slane %v7965_v4, 4  ;;  %v956_v49 = vsel %vm232_vm0, %v7988_v34, %v955_v28 }
  0xf0   : > { %v964_v53 = vperm.slane %v956_v49, %v7624_v5 }
  0xf1   : > { %v800_v3 = vsel %vm232_vm0, 0.0, %v799_v1  ;;  %v934_v36 = vsel %vm232_vm0, 0.0, %v933_v6 }
  0xf2   : > { %v977_v59 = vrot.slane %v964_v53, 4 }
  0xf5   : > { %576 = vrot.lane.b32.xlu1 %v512_v13, %s7552_s28  ;;  %v920_v13 = vperm.slane %v912_v18, %v7657_v25 }
  0xf7   : > { %604 = vrot.lane.b32.xlu2 %v568_v14, %s7552_s28  ;;  %620 = vrot.lane.b32.xlu0 %v572_v24, %s7554_s30  ;;  %v888_v14 = vsel %vm232_vm0, %v7919_v43, %v887_v22  ;;  %v804_v24 = vsel %vm232_vm0, 0.0, %v803_v2  ;;  %v935_v31 = vrot.slane %v920_v13, 4 }
  0xf8   : > { %v896_v33 = vperm.slane %v888_v14, %v7624_v5 }
  0xfa   : > { %v923_v44 = vrot.slane %v896_v33, 4 }
  0xfc   : > { %v924_v50 = vsel %vm232_vm0, %v908_v27, %v923_v44 }
  0xfd   : > { %600 = vrot.lane.b32.xlu1 %v518_v38, %s7553_s29  ;;  %v921_v38 = vrot.slane %v908_v27, 4 }
  0xff   : > { %628 = vrot.lane.b32.xlu2 %v574_v40, %s7553_s29  ;;  %822 = vrot.lane.b32.xlu0 %v746_v37, %s7554_s30  ;;  %v7993_v40 = vld [vmem:[%s7613_s23 + $0x9] sm:$0xff]  ;;  %v936_v37 = vsel %vm232_vm0, 0.0, %v935_v31  ;;  %v922_v46 = vsel %vm232_vm0, %v921_v38, %v896_v33 }
 0x100   : > { %v942_v45 = vsel %vm232_vm0, %v941_v35, %v7993_v40  ;;  %v943_v48 = vrot.slane %v7993_v40, 4  ;;  %v928_v32 = vperm.slane %v922_v46, %v7657_v25 }
 0x101   : > { %v948_v51 = vperm.slane %v942_v45, %v7624_v5 }
 0x102   : > { %v937_v0 = vrot.slane %v928_v32, 4 }
 0x103   : > { %v967_v57 = vrot.slane %v948_v51, 4 }
 0x105   : > { %612 = vrot.lane.b32.xlu1 %v570_v39, %s7551_s27  ;;  %v954_v39 = vsel %vm232_vm0, %v953_v42, %v7984_v30 }
 0x106   : > { %v960_v56 = vperm.slane %v954_v39, %v7624_v5 }
 0x107   : > { %834 = vrot.lane.b32.xlu0 %v798_v54, %s7552_s28  ;;  %806 = vrot.lane.b32.xlu2 %v742_v55, %s7552_s28  ;;  %v944_v54 = vsel %vm232_vm0, %v7979_v29, %v943_v48  ;;  %v932_v55 = vperm.slane %v924_v50, %v7657_v25 }
 0x108   : > { %v952_v58 = vperm.slane %v944_v54, %v7624_v5  ;;  %v965_v60 = vrot.slane %v960_v56, 4  ;;  %v968_v63 = vsel %vm232_vm0, %v960_v56, %v967_v57 }
 0x109   : > { %v939_v62 = vrot.slane %v932_v55, 4  ;;  %v976_v12 = vperm.slane %v968_v63, %v7657_v25 }
 0x10a   : > { %v978_v7 = vsel %vm232_vm0, %v977_v59, %v952_v58  ;;  %v979_v1 = vrot.slane %v952_v58, 4 }
 0x10b   : > { %v991_v9 = vrot.slane %v976_v12, 4 }
 0x10d   : > { %814 = vrot.lane.b32.xlu1 %v744_v8, %s7551_s27  ;;  %v966_v8 = vsel %vm232_vm0, %v965_v60, %v948_v51  ;;  %v992_v2 = vsel %vm232_vm0, 0.0, %v991_v9 }
 0x10e   : > { %v8029_v61 = vperm.slane %v966_v8, %v7657_v25 }
 0x10f   : > { %846 = vrot.lane.b32.xlu0 %v792_v11, %s7548_s24  ;;  %830 = vrot.lane.b32.xlu2 %v748_v16, %s7553_s29  ;;  %v940_v11 = vsel %vm232_vm0, 0.0, %v939_v62  ;;  %v938_v16 = vsel %vm232_vm0, 0.0, %v937_v0 }
 0x110   : > { %v989_v22 = vrot.slane %v8029_v61, 4 }
 0x115   : > { %850 = vrot.lane.b32.xlu1 %v802_v26, %s7554_s30  ;;  %v990_v26 = vsel %vm232_vm0, 0.0, %v989_v22 }
 0x117   : > { %858 = vrot.lane.b32.xlu0 %v804_v24, %s7553_s29  ;;  %842 = vrot.lane.b32.xlu2 %v800_v3, %s7551_s27 }
 0x11d   : > { %998 = vrot.lane.b32.xlu1 %v934_v36, %s7552_s28 }
 0x11f   : > { %1006 = vrot.lane.b32.xlu0 %v936_v37, %s7551_s27  ;;  %854 = vrot.lane.b32.xlu2 %v796_v10, %s7550_s26  ;;  %v984_v10 = vperm.slane %v978_v7, %v7657_v25 }
 0x121   : > { %v993_v18 = vrot.slane %v984_v10, 4 }
 0x123   : > { %v581_v17 = vpop.permute.xlu2 %580  ;;  %v994_v20 = vsel %vm232_vm0, 0.0, %v993_v18 }
 0x125   : > { %1010 = vrot.lane.b32.xlu1 %v928_v32, %s7548_s24 }
 0x127   : > { %1018 = vrot.lane.b32.xlu0 %v932_v55, %s7550_s26  ;;  %1002 = vrot.lane.b32.xlu2 %v920_v13, %s7549_s25  ;;  %v980_v13 = vsel %vm232_vm0, %v964_v53, %v979_v1 }
 0x128   : > { %v988_v24 = vperm.slane %v980_v13, %v7657_v25 }
 0x12a   : > { %v995_v3 = vrot.slane %v988_v24, 4 }
 0x12b   : > { %v617_v14 = vpop.permute.xlu2 %616 }
 0x12c   : > { %v996_v27 = vsel %vm232_vm0, 0.0, %v995_v3 }
 0x12d   : > { %1022 = vrot.lane.b32.xlu1 %v940_v11, %s7553_s29 }
 0x12f   : > { %1030 = vrot.lane.b32.xlu0 %v976_v12, %s7549_s25  ;;  %1014 = vrot.lane.b32.xlu2 %v938_v16, %s7554_s30 }
 0x135   : > { %1034 = vrot.lane.b32.xlu1 %v992_v2, %s7551_s27 }
 0x137   : > { %1042 = vrot.lane.b32.xlu0 %v994_v20, %s7554_s30  ;;  %1026 = vrot.lane.b32.xlu2 %v990_v26, %s7552_s28  ;;  %v589_v31 = vpop.permute.xlu1 %588 }
 0x139   : > { %v597_v33 = vpop.permute.xlu0 %596 }
 0x13d   : > { %1046 = vrot.lane.b32.xlu1 %v988_v24, %s7550_s26 }
 0x13f   : > { %1091 = vrot.lane.b32.xlu0 %v7934_v52, %s7555_s6  ;;  %1038 = vrot.lane.b32.xlu2 %v984_v10, %s7548_s24  ;;  %v625_v36 = vpop.permute.xlu1 %624 }
 0x141   : > { %v819_v6 = vpop.permute.xlu2 %818  ;;  %v609_v38 = vpop.permute.xlu0 %608 }
 0x145   : > { %1093 = vrot.lane.b32.xlu1 %v7993_v40, %s7555_s6 }
 0x147   : > { %1097 = vrot.lane.b32.xlu0 %v7984_v30, %s7555_s6  ;;  %1050 = vrot.lane.b32.xlu2 %v996_v27, %s7553_s29 }
 0x149   : > { %v593_v35 = vpop.permute.xlu2 %592 }
 0x14d   : > { %1099 = vrot.lane.b32.xlu1 %v7919_v43, %s7555_s6 }
 0x14f   : > { %1103 = vrot.lane.b32.xlu0 %v7905_v19, %s7555_s6  ;;  %1095 = vrot.lane.b32.xlu2 %v7927_v47, %s7555_s6 }
 0x151   : > { %v605_v28 = vpop.permute.xlu2 %604 }
 0x155   : > { %1105 = vrot.lane.b32.xlu1 %v7988_v34, %s7555_s6 }
 0x157   : > { %v827_v37 = vpop.permute.xlu1 %826  ;;  %1101 = vrot.lane.b32.xlu2 %v7979_v29, %s7555_s6 }
 0x159   : > { %v629_v44 = vpop.permute.xlu2 %628  ;;  %v811_v42 = vpop.permute.xlu0 %810 }
 0x15f   : > { %v839_v45 = vpop.permute.xlu1 %838 }
 0x161   : > { %v807_v46 = vpop.permute.xlu2 %806  ;;  %v585_v48 = vpop.permute.xlu0 %584 }
 0x162   : > { %v861_v10 = vsel %vm400_vm1, %v7914_v21, %v807_v46 }
 0x163   : > { %v862_v22 = vsel %vm402_vm2, %v861_v10, %v811_v42 }
 0x167   : > { %v577_v49 = vpop.permute.xlu1 %576 }
 0x168   : > { %v631_v50 = vsel %vm400_vm1, %v7876_v23, %v577_v49  ;;  %v638_v23 = vsel %vm400_vm1, %v7883_v15, %v605_v28 }
 0x169   : > { %v632_v51 = vsel %vm402_vm2, %v631_v50, %v581_v17  ;;  %v621_v39 = vpop.permute.xlu0 %620  ;;  %v831_v53 = vpop.permute.xlu2 %830  ;;  %v639_v0 = vsel %vm402_vm2, %v638_v23, %v609_v38 }
 0x16a   : > { %v633_v32 = vsel %vm404_vm3, %v632_v51, %v585_v48 }
 0x16b   : > { %v634_v54 = vsel %vm406_vm4, %v633_v32, %v589_v31 }
 0x16c   : > { %v635_v55 = vsel %vm408_vm5, %v634_v54, %v593_v35 }
 0x16d   : > { %v636_v57 = vsel %vm410_vm6, %v635_v55, %v597_v33 }
 0x16f   : > { %v601_v56 = vpop.permute.xlu1 %600 }
 0x170   : > { %v637_v58 = vsel %vm412_vm7, %v636_v57, %v601_v56 }
 0x171   : > { %v647_v59 = vrot.slane %v637_v58, 4  ;;  %v823_v60 = vpop.permute.xlu0 %822  ;;  %v843_v62 = vpop.permute.xlu2 %842 }
 0x173   : > { %651 = vst [vmem:[#allocation2 + $0x30] sm:$0xf0] %v647_v59 }
 0x177   : > { %v613_v63 = vpop.permute.xlu1 %612 }
 0x178   : > { %v640_v7 = vsel %vm404_vm3, %v639_v0, %v613_v63 }
 0x179   : > { %v641_v8 = vsel %vm406_vm4, %v640_v7, %v617_v14  ;;  %v835_v11 = vpop.permute.xlu0 %834  ;;  %v855_v15 = vpop.permute.xlu2 %854 }
 0x17a   : > { %v642_v12 = vsel %vm408_vm5, %v641_v8, %v621_v39  ;;  %v868_v2 = vsel %vm400_vm1, %v7911_v41, %v835_v11 }
 0x17b   : > { %v643_v16 = vsel %vm410_vm6, %v642_v12, %v625_v36  ;;  %v869_v21 = vsel %vm402_vm2, %v868_v2, %v839_v45 }
 0x17c   : > { %v644_v9 = vsel %vm412_vm7, %v643_v16, %v629_v44  ;;  %v870_v3 = vsel %vm404_vm3, %v869_v21, %v843_v62 }
 0x17d   : > { %v648_v17 = vrot.slane %v644_v9, 4 }
 0x17f   : > { %652 = vst [vmem:[#allocation2] sm:$0xf0] %v648_v17  ;;  %v815_v18 = vpop.permute.xlu1 %814 }
 0x180   : > { %v863_v1 = vsel %vm404_vm3, %v862_v22, %v815_v18 }
 0x181   : > { %v864_v20 = vsel %vm406_vm4, %v863_v1, %v819_v6  ;;  %v847_v26 = vpop.permute.xlu0 %846  ;;  %v1003_v31 = vpop.permute.xlu2 %1002 }
 0x182   : > { %v865_v13 = vsel %vm408_vm5, %v864_v20, %v823_v60  ;;  %v871_v27 = vsel %vm406_vm4, %v870_v3, %v847_v26 }
 0x183   : > { %v866_v14 = vsel %vm410_vm6, %v865_v13, %v827_v37 }
 0x184   : > { %v867_v24 = vsel %vm412_vm7, %v866_v14, %v831_v53 }
 0x185   : > { %875 = vst [vmem:[#allocation2 + $0x18] sm:$0xf] %v867_v24 }
 0x187   : > { %v851_v41 = vpop.permute.xlu1 %850 }
 0x188   : > { %v872_v33 = vsel %vm408_vm5, %v871_v27, %v851_v41 }
 0x189   : > { %v873_v6 = vsel %vm410_vm6, %v872_v33, %v855_v15  ;;  %v859_v35 = vpop.permute.xlu0 %858  ;;  %v1015_v28 = vpop.permute.xlu2 %1014 }
 0x18a   : > { %v874_v36 = vsel %vm412_vm7, %v873_v6, %v859_v35 }
 0x18b   : > { %876 = vst [vmem:[#allocation2 + $0x10] sm:$0xf] %v874_v36 }
 0x18f   : > { %v999_v38 = vpop.permute.xlu1 %998 }
 0x190   : > { %v1053_v44 = vsel %vm400_vm1, %v7965_v4, %v999_v38 }
 0x191   : > { %v1007_v37 = vpop.permute.xlu0 %1006  ;;  %v1054_v42 = vsel %vm402_vm2, %v1053_v44, %v1003_v31  ;;  %v1027_v50 = vpop.permute.xlu2 %1026 }
 0x192   : > { %v1055_v46 = vsel %vm404_vm3, %v1054_v42, %v1007_v37  ;;  %v1060_v4 = vsel %vm400_vm1, %v8029_v61, %v1027_v50 }
 0x197   : > { %v1011_v45 = vpop.permute.xlu1 %1010 }
 0x198   : > { %v1056_v48 = vsel %vm406_vm4, %v1055_v46, %v1011_v45 }
 0x199   : > { %v1019_v49 = vpop.permute.xlu0 %1018  ;;  %v1057_v51 = vsel %vm408_vm5, %v1056_v48, %v1015_v28  ;;  %v1039_v56 = vpop.permute.xlu2 %1038 }
 0x19a   : > { %v1058_v39 = vsel %vm410_vm6, %v1057_v51, %v1019_v49 }
 0x19f   : > { %v1023_v32 = vpop.permute.xlu1 %1022 }
 0x1a0   : > { %v1059_v53 = vsel %vm412_vm7, %v1058_v39, %v1023_v32 }
 0x1a1   : > { %v1069_v54 = vrot.slane %v1059_v53, 4  ;;  %v1031_v55 = vpop.permute.xlu0 %1030  ;;  %v1051_v62 = vpop.permute.xlu2 %1050 }
 0x1a2   : > { %v1061_v58 = vsel %vm402_vm2, %v1060_v4, %v1031_v55 }
 0x1a3   : > { %1073 = vst [vmem:[#allocation2 + $0x18] sm:$0xf0] %v1069_v54 }
 0x1a7   : > { %v1035_v57 = vpop.permute.xlu1 %1034 }
 0x1a8   : > { %v1062_v59 = vsel %vm404_vm3, %v1061_v58, %v1035_v57 }
 0x1a9   : > { %v1043_v60 = vpop.permute.xlu0 %1042  ;;  %v1063_v23 = vsel %vm406_vm4, %v1062_v59, %v1039_v56  ;;  %v1096_v16 = vpop.permute.xlu2 %1095 }
 0x1aa   : > { %v1064_v63 = vsel %vm408_vm5, %v1063_v23, %v1043_v60  ;;  %v1129_v9 = vrot.slane %v1096_v16, 4 }
 0x1af   : > { %v1047_v0 = vpop.permute.xlu1 %1046 }
 0x1b0   : > { %v1065_v7 = vsel %vm410_vm6, %v1064_v63, %v1047_v0 }
 0x1b1   : > { %v1066_v8 = vsel %vm412_vm7, %v1065_v7, %v1051_v62  ;;  %v1092_v11 = vpop.permute.xlu0 %1091  ;;  %v1102_v13 = vpop.permute.xlu2 %1101 }
 0x1b2   : > { %v1070_v12 = vrot.slane %v1066_v8, 4  ;;  %v1117_v15 = vrot.slane %v1092_v11, 4  ;;  %v1171_v33 = vrot.slane %v1102_v13, 4 }
 0x1b4   : > { %1074 = vst [vmem:[#allocation2 + $0x10] sm:$0xf0] %v1070_v12 }
 0x1b7   : > { %v1094_v61 = vpop.permute.xlu1 %1093 }
 0x1b8   : > { %v1172_v45 = vsel %vm232_vm0, %v1171_v33, %v1094_v61  ;;  %v1173_v59 = vrot.slane %v1094_v61, 4 }
 0x1b9   : > { %v1098_v10 = vpop.permute.xlu0 %1097  ;;  %v1178_v54 = vperm.slane %v1172_v45, %v7624_v5 }
 0x1ba   : > { %v1185_v51 = vrot.slane %v1098_v10, 4  ;;  %v1174_v7 = vsel %vm232_vm0, %v1102_v13, %v1173_v59 }
 0x1bb   : > { %v1197_v12 = vrot.slane %v1178_v54, 4  ;;  %v1182_v61 = vperm.slane %v1174_v7, %v7624_v5 }
 0x1bf   : > { %v1100_v17 = vpop.permute.xlu1 %1099 }
 0x1c0   : > { %v1115_v18 = vrot.slane %v1100_v17, 4  ;;  %v1118_v1 = vsel %vm232_vm0, %v1100_v17, %v1117_v15 }
 0x1c1   : > { %v1104_v22 = vpop.permute.xlu0 %1103  ;;  %v1126_v3 = vperm.slane %v1118_v1, %v7624_v5 }
 0x1c2   : > { %v1116_v2 = vsel %vm232_vm0, %v1115_v18, %v1092_v11  ;;  %v1127_v20 = vrot.slane %v1104_v22, 4  ;;  %v1130_v26 = vsel %vm232_vm0, %v1104_v22, %v1129_v9  ;;  %v1209_v18 = vrot.slane %v1182_v61, 4 }
 0x1c3   : > { %v1122_v21 = vperm.slane %v1116_v2, %v7624_v5  ;;  %v1138_v14 = vperm.slane %v1130_v26, %v7624_v5  ;;  %v1153_v39 = vrot.slane %v1126_v3, 4 }
 0x1c4   : > { %v1128_v24 = vsel %vm232_vm0, %v1127_v20, %v1096_v16 }
 0x1c5   : > { %v1134_v27 = vperm.slane %v1128_v24, %v7624_v5  ;;  %v1151_v31 = vrot.slane %v1138_v14, 4  ;;  %v1141_v41 = vrot.slane %v1122_v21, 4  ;;  %v1154_v60 = vsel %vm232_vm0, %v1138_v14, %v1153_v39 }
 0x1c6   : > { %v1162_v0 = vperm.slane %v1154_v60, %v7657_v25 }
 0x1c7   : > { %v1139_v6 = vrot.slane %v1134_v27, 4  ;;  %v1106_v35 = vpop.permute.xlu1 %1105  ;;  %v1142_v36 = vsel %vm232_vm0, %v1134_v27, %v1141_v41  ;;  %v1152_v38 = vsel %vm232_vm0, %v1151_v31, %v1126_v3 }
 0x1c8   : > { %v1183_v28 = vrot.slane %v1106_v35, 4  ;;  %v1150_v37 = vperm.slane %v1142_v36, %v7657_v25  ;;  %v1158_v42 = vperm.slane %v1152_v38, %v7657_v25  ;;  %v1186_v56 = vsel %vm232_vm0, %v1106_v35, %v1185_v51 }
 0x1c9   : > { %v1140_v44 = vsel %vm232_vm0, %v1139_v6, %v1122_v21  ;;  %v1194_v23 = vperm.slane %v1186_v56, %v7624_v5  ;;  %v1169_v17 = vrot.slane %v1162_v0, 4 }
 0x1ca   : > { %v1184_v46 = vsel %vm232_vm0, %v1183_v28, %v1098_v10  ;;  %1232 = vrot.lane.b32.xlu0 %v1150_v37, %s7549_s25  ;;  %v1165_v48 = vrot.slane %v1150_v37, 4  ;;  %v8128_v49 = vperm.slane %v1140_v44, %v7657_v25  ;;  %v1167_v4 = vrot.slane %v1158_v42, 4 }
 0x1cb   : > { %v1190_v50 = vperm.slane %v1184_v46, %v7624_v5  ;;  %v1207_v8 = vrot.slane %v1194_v23, 4  ;;  %v1170_v2 = vsel %vm232_vm0, 0.0, %v1169_v17  ;;  %v1210_v1 = vsel %vm232_vm0, %v1194_v23, %v1209_v18 }
 0x1cc   : > { %v1166_v32 = vsel %vm232_vm0, 0.0, %v1165_v48  ;;  %v1163_v53 = vrot.slane %v8128_v49, 4  ;;  %v1168_v62 = vsel %vm232_vm0, 0.0, %v1167_v4  ;;  %v1218_v26 = vperm.slane %v1210_v1, %v7657_v25 }
 0x1cd   : > { %v1195_v55 = vrot.slane %v1190_v50, 4  ;;  %1236 = vrot.lane.b32.xlu1 %v1166_v32, %s7551_s27  ;;  %v1198_v16 = vsel %vm232_vm0, %v1190_v50, %v1197_v12  ;;  %v1208_v9 = vsel %vm232_vm0, %v1207_v8, %v1182_v61 }
 0x1ce   : > { %v1164_v57 = vsel %vm232_vm0, 0.0, %v1163_v53  ;;  %v1206_v15 = vperm.slane %v1198_v16, %v7657_v25  ;;  %v1214_v22 = vperm.slane %v1208_v9, %v7657_v25  ;;  %v1225_v14 = vrot.slane %v1218_v26, 4 }
 0x1cf   : > { %1228 = vrot.lane.b32.xlu2 %v1164_v57, %s7552_s28  ;;  %v1196_v58 = vsel %vm232_vm0, %v1195_v55, %v1178_v54 }
 0x1d0   : > { %v1202_v63 = vperm.slane %v1196_v58, %v7657_v25  ;;  %v1223_v20 = vrot.slane %v1214_v22, 4  ;;  %v1221_v13 = vrot.slane %v1206_v15, 4  ;;  %v1226_v3 = vsel %vm232_vm0, 0.0, %v1225_v14 }
 0x1d2   : > { %1244 = vrot.lane.b32.xlu0 %v1168_v62, %s7554_s30  ;;  %v1219_v11 = vrot.slane %v1202_v63, 4  ;;  %v1224_v21 = vsel %vm232_vm0, 0.0, %v1223_v20  ;;  %v1222_v24 = vsel %vm232_vm0, 0.0, %v1221_v13 }
 0x1d4   : > { %v1220_v10 = vsel %vm232_vm0, 0.0, %v1219_v11 }
 0x1d5   : > { %1248 = vrot.lane.b32.xlu1 %v1162_v0, %s7550_s26 }
 0x1d7   : > { %1240 = vrot.lane.b32.xlu2 %v1158_v42, %s7548_s24 }
 0x1da   : > { %1256 = vrot.lane.b32.xlu0 %v1220_v10, %s7552_s28 }
 0x1dd   : > { %1260 = vrot.lane.b32.xlu1 %v1206_v15, %s7549_s25 }
 0x1df   : > { %1252 = vrot.lane.b32.xlu2 %v1170_v2, %s7553_s29 }
 0x1e2   : > { %1268 = vrot.lane.b32.xlu0 %v1214_v22, %s7548_s24 }
 0x1e5   : > { %1272 = vrot.lane.b32.xlu1 %v1224_v21, %s7554_s30 }
 0x1e7   : > { %1264 = vrot.lane.b32.xlu2 %v1222_v24, %s7551_s27 }
 0x1ea   : > { %1280 = vrot.lane.b32.xlu0 %v1226_v3, %s7553_s29 }
 0x1ed   : > { %1315 = vrot.lane.b32.xlu1 %v7934_v52, %s7556_s7 }
 0x1ef   : > { %1276 = vrot.lane.b32.xlu2 %v1218_v26, %s7550_s26 }
 0x1f2   : > { %1319 = vrot.lane.b32.xlu0 %v7927_v47, %s7556_s7 }
 0x1f5   : > { %1321 = vrot.lane.b32.xlu1 %v7984_v30, %s7556_s7 }
 0x1f7   : > { %1317 = vrot.lane.b32.xlu2 %v7993_v40, %s7556_s7 }
 0x1fa   : > { %1325 = vrot.lane.b32.xlu0 %v7979_v29, %s7556_s7 }
 0x1fd   : > { %1327 = vrot.lane.b32.xlu1 %v7905_v19, %s7556_s7 }
 0x1ff   : > { %1323 = vrot.lane.b32.xlu2 %v7919_v43, %s7556_s7 }
 0x207   : > { %1329 = vrot.lane.b32.xlu2 %v7988_v34, %s7556_s7 }
 0x229   : > { %v1229_v52 = vpop.permute.xlu2 %1228 }
 0x22a   : > { %v1283_v40 = vsel %vm400_vm1, %v8128_v49, %v1229_v52 }
 0x231   : > { %v1241_v47 = vpop.permute.xlu2 %1240 }
 0x239   : > { %v1253_v27 = vpop.permute.xlu2 %1252 }
 0x23c   : > { %v1233_v31 = vpop.permute.xlu0 %1232 }
 0x23d   : > { %v1284_v41 = vsel %vm402_vm2, %v1283_v40, %v1233_v31 }
 0x23f   : > { %v1237_v30 = vpop.permute.xlu1 %1236 }
 0x240   : > { %v1285_v29 = vsel %vm404_vm3, %v1284_v41, %v1237_v30 }
 0x241   : > { %v1265_v19 = vpop.permute.xlu2 %1264  ;;  %v1286_v6 = vsel %vm406_vm4, %v1285_v29, %v1241_v47 }
 0x244   : > { %v1245_v33 = vpop.permute.xlu0 %1244 }
 0x245   : > { %v1287_v43 = vsel %vm408_vm5, %v1286_v6, %v1245_v33 }
 0x247   : > { %v1249_v35 = vpop.permute.xlu1 %1248 }
 0x248   : > { %v1288_v34 = vsel %vm410_vm6, %v1287_v43, %v1249_v35  ;;  %v8228_v43 = vld [vmem:[%s7613_s23 + $0x4a] sm:$0xff] }
 0x249   : > { %v1289_v36 = vsel %vm412_vm7, %v1288_v34, %v1253_v27  ;;  %v1277_v37 = vpop.permute.xlu2 %1276 }
 0x24a   : > { %1297 = vst [vmem:[#allocation2 + $0x48] sm:$0xf] %v1289_v36 }
 0x24c   : > { %v1257_v38 = vpop.permute.xlu0 %1256 }
 0x24d   : > { %v1290_v44 = vsel %vm400_vm1, %v1202_v63, %v1257_v38 }
 0x24f   : > { %v1261_v28 = vpop.permute.xlu1 %1260 }
 0x250   : > { %v1291_v42 = vsel %vm402_vm2, %v1290_v44, %v1261_v28  ;;  %v8239_v44 = vld [vmem:[%s7613_s23 + $0x32] sm:$0xff] }
 0x251   : > { %v1292_v46 = vsel %vm404_vm3, %v1291_v42, %v1265_v19  ;;  %v1318_v50 = vpop.permute.xlu2 %1317  ;;  %v1549_v42 = vrot.slane %v8228_v43, 4 }
 0x252   : > { %v1397_v35 = vrot.slane %v1318_v50, 4 }
 0x254   : > { %v1269_v45 = vpop.permute.xlu0 %1268 }
 0x255   : > { %v1293_v49 = vsel %vm406_vm4, %v1292_v46, %v1269_v45  ;;  %v8244_v46 = vld [vmem:[%s7613_s23 + $0x1a] sm:$0xff] }
 0x257   : > { %v1273_v48 = vpop.permute.xlu1 %1272 }
 0x258   : > { %v1294_v51 = vsel %vm408_vm5, %v1293_v49, %v1273_v48 }
 0x259   : > { %v1295_v32 = vsel %vm410_vm6, %v1294_v51, %v1277_v37  ;;  %v1324_v55 = vpop.permute.xlu2 %1323 }
 0x25a   : > { %v1339_v57 = vrot.slane %v1324_v55, 4 }
 0x25c   : > { %v1281_v39 = vpop.permute.xlu0 %1280 }
 0x25d   : > { %v1296_v53 = vsel %vm412_vm7, %v1295_v32, %v1281_v39  ;;  %v1537_v39 = vrot.slane %v8239_v44, 4  ;;  %v8251_v32 = vld [vmem:[%s7613_s23 + $0x2] sm:$0xff] }
 0x25e   : > { %1298 = vst [vmem:[#allocation2 + $0x28] sm:$0xf] %v1296_v53  ;;  %v1550_v53 = vsel %vm232_vm0, %v1549_v42, %v8244_v46 }
 0x25f   : > { %v1316_v54 = vpop.permute.xlu1 %1315 }
 0x260   : > { %v1341_v58 = vrot.slane %v1316_v54, 4  ;;  %v1340_v59 = vsel %vm232_vm0, %v1339_v57, %v1316_v54  ;;  %v1556_v57 = vperm.slane %v1550_v53, %v7624_v5 }
 0x261   : > { %v1330_v23 = vpop.permute.xlu2 %1329  ;;  %v1346_v0 = vperm.slane %v1340_v59, %v7624_v5 }
 0x262   : > { %v1342_v63 = vsel %vm232_vm0, %v1324_v55, %v1341_v58  ;;  %v1407_v7 = vrot.slane %v1330_v23, 4 }
 0x263   : > { %v1350_v10 = vperm.slane %v1342_v63, %v7624_v5  ;;  %v1365_v17 = vrot.slane %v1346_v0, 4 }
 0x264   : > { %v1320_v4 = vpop.permute.xlu0 %1319 }
 0x265   : > { %v1353_v60 = vrot.slane %v1320_v4, 4  ;;  %v1377_v19 = vrot.slane %v1350_v10, 4 }
 0x267   : > { %v1322_v56 = vpop.permute.xlu1 %1321 }
 0x268   : > { %v1408_v15 = vsel %vm232_vm0, %v1407_v7, %v1322_v56  ;;  %v1409_v3 = vrot.slane %v1322_v56, 4  ;;  %v1538_v56 = vsel %vm232_vm0, %v1537_v39, %v8251_v32 }
 0x269   : > { %v1414_v13 = vperm.slane %v1408_v15, %v7624_v5  ;;  %v1544_v63 = vperm.slane %v1538_v56, %v7624_v5 }
 0x26a   : > { %v1410_v29 = vsel %vm232_vm0, %v1330_v23, %v1409_v3  ;;  %v1561_v23 = vrot.slane %v1556_v57, 4 }
 0x26b   : > { %v1419_v31 = vrot.slane %v1414_v13, 4  ;;  %v1418_v36 = vperm.slane %v1410_v29, %v7624_v5  ;;  %v8306_v29 = vld [vmem:[%s7613_s23 + $0xa] sm:$0xff] }
 0x26c   : > { %v1326_v62 = vpop.permute.xlu0 %1325  ;;  %v1595_v42 = vrot.slane %v8306_v29, 4 }
 0x26d   : > { %v1395_v61 = vrot.slane %v1326_v62, 4  ;;  %v1398_v37 = vsel %vm232_vm0, %v1326_v62, %v1397_v35  ;;  %v1431_v51 = vrot.slane %v1418_v36, 4 }
 0x26e   : > { %v1406_v49 = vperm.slane %v1398_v37, %v7624_v5 }
 0x26f   : > { %v1328_v8 = vpop.permute.xlu1 %1327  ;;  %v1396_v2 = vsel %vm232_vm0, %v1395_v61, %v1318_v50 }
 0x270   : > { %v1351_v11 = vrot.slane %v1328_v8, 4  ;;  %v1354_v12 = vsel %vm232_vm0, %v1328_v8, %v1353_v60  ;;  %v1402_v52 = vperm.slane %v1396_v2, %v7624_v5  ;;  %v1433_v58 = vrot.slane %v1406_v49, 4 }
 0x271   : > { %v1362_v16 = vperm.slane %v1354_v12, %v7624_v5  ;;  %v1562_v8 = vsel %vm232_vm0, %v1561_v23, %v1544_v63  ;;  %v1563_v12 = vrot.slane %v1544_v63, 4 }
 0x272   : > { %v1352_v9 = vsel %vm232_vm0, %v1351_v11, %v1320_v4  ;;  %v1420_v6 = vsel %vm232_vm0, %v1419_v31, %v1402_v52  ;;  %v1421_v48 = vrot.slane %v1402_v52, 4  ;;  %v1432_v4 = vsel %vm232_vm0, %v1431_v51, %v1406_v49  ;;  %v8301_v31 = vld [vmem:[%s7613_s23 + $0x22] sm:$0xff] }
 0x273   : > { %v1358_v18 = vperm.slane %v1352_v9, %v7624_v5  ;;  %v1375_v22 = vrot.slane %v1362_v16, 4  ;;  %v1378_v34 = vsel %vm232_vm0, %v1362_v16, %v1377_v19  ;;  %v8234_v28 = vperm.slane %v1420_v6, %v7657_v25 }
 0x274   : > { %v1386_v45 = vperm.slane %v1378_v34, %v7657_v25  ;;  %v1422_v54 = vsel %vm232_vm0, %v1414_v13, %v1421_v48  ;;  %v1438_v62 = vperm.slane %v1432_v4, %v7657_v25  ;;  %v1434_v7 = vsel %vm232_vm0, %v1418_v36, %v1433_v58 }
 0x275   : > { %v1363_v1 = vrot.slane %v1358_v18, 4  ;;  %v1366_v20 = vsel %vm232_vm0, %v1358_v18, %v1365_v17  ;;  %v1376_v26 = vsel %vm232_vm0, %v1375_v22, %v1350_v10  ;;  %v1443_v50 = vrot.slane %v8234_v28, 4 }
 0x276   : > { %v1374_v21 = vperm.slane %v1366_v20, %v7657_v25  ;;  %v1382_v24 = vperm.slane %v1376_v26, %v7657_v25  ;;  %v1393_v59 = vrot.slane %v1386_v45, 4  ;;  %v1430_v60 = vperm.slane %v1422_v54, %v7657_v25 }
 0x277   : > { %v1364_v14 = vsel %vm232_vm0, %v1363_v1, %v1346_v0  ;;  %v1444_v55 = vsel %vm232_vm0, 0.0, %v1443_v50  ;;  %v1447_v11 = vrot.slane %v1438_v62, 4  ;;  %v1442_v61 = vperm.slane %v1434_v7, %v7657_v25 }
 0x278   : > { %1456 = vrot.lane.b32.xlu1 %v1374_v21, %s7549_s25  ;;  %v1389_v47 = vrot.slane %v1374_v21, 4  ;;  %v8218_v27 = vperm.slane %v1364_v14, %v7657_v25  ;;  %v1391_v41 = vrot.slane %v1382_v24, 4  ;;  %v1394_v0 = vsel %vm232_vm0, 0.0, %v1393_v59  ;;  %v8290_v21 = vld [vmem:[%s7613_s23 + $0x3a] sm:$0xff]  ;;  %v8293_v14 = vld [vmem:[%s7613_s23 + $0x52] sm:$0xff]  ;;  %s7568_s23 = smov 8  }
 0x279   : > { %v1539_v16 = vrot.slane %v8251_v32, 4  ;;  %v1551_v10 = vrot.slane %v8244_v46, 4  ;;  %v1445_v9 = vrot.slane %v1430_v60, 4  ;;  %v8276_v17 = vperm.slane %v1562_v8, %v7657_v25 }
 0x27a   : > { %v1390_v30 = vsel %vm232_vm0, 0.0, %v1389_v47  ;;  %v1387_v40 = vrot.slane %v8218_v27, 4  ;;  %v1392_v38 = vsel %vm232_vm0, 0.0, %v1391_v41  ;;  %v1448_v15 = vsel %vm232_vm0, 0.0, %v1447_v11 }
 0x27b   : > { %1460 = vrot.lane.b32.xlu2 %v1390_v30, %s7551_s27  ;;  %v1564_v18 = vsel %vm232_vm0, %v1556_v57, %v1563_v12  ;;  %v1449_v22 = vrot.slane %v1442_v61, 4  ;;  %v1540_v2 = vsel %vm232_vm0, %v8239_v44, %v1539_v16  ;;  %v1552_v1 = vsel %vm232_vm0, %v8228_v43, %v1551_v10 }
 0x27c   : > { %v1388_v33 = vsel %vm232_vm0, 0.0, %v1387_v40  ;;  %v1446_v20 = vsel %vm232_vm0, 0.0, %v1445_v9  ;;  %v1585_v26 = vrot.slane %v8276_v17, 4  ;;  %v1572_v13 = vperm.slane %v1564_v18, %v7657_v25 }
 0x27d   : > { %1452 = vrot.lane.b32.xlu0 %v1388_v33, %s7552_s28  ;;  %v1560_v3 = vperm.slane %v1552_v1, %v7624_v5  ;;  %v1450_v52 = vsel %vm232_vm0, 0.0, %v1449_v22  ;;  %v1593_v30 = vrot.slane %v8290_v21, 4  ;;  %v1605_v40 = vrot.slane %v8293_v14, 4 }
 0x27e   : > { %v1586_v47 = vsel %vm232_vm0, 0.0, %v1585_v26  ;;  %v1587_v41 = vrot.slane %v1572_v13, 4  ;;  %v1607_v6 = vrot.slane %v8301_v31, 4 }
 0x27f   : > { %v1573_v19 = vrot.slane %v1560_v3, 4  ;;  %v1594_v35 = vsel %vm232_vm0, %v1593_v30, %v8306_v29  ;;  %v1606_v34 = vsel %vm232_vm0, %v1605_v40, %v8301_v31 }
 0x280   : > { %1468 = vrot.lane.b32.xlu1 %v1392_v38, %s7554_s30  ;;  %v1588_v36 = vsel %vm232_vm0, 0.0, %v1587_v41  ;;  %v1612_v48 = vperm.slane %v1606_v34, %v7624_v5  ;;  %v1608_v49 = vsel %vm232_vm0, %v8293_v14, %v1607_v6 }
 0x281   : > { %v1616_v39 = vperm.slane %v1608_v49, %v7624_v5 }
 0x282   : > { %v1617_v54 = vrot.slane %v1612_v48, 4 }
 0x283   : > { %1472 = vrot.lane.b32.xlu2 %v1386_v45, %s7550_s26  ;;  %v1600_v45 = vperm.slane %v1594_v35, %v7624_v5  ;;  %v1629_v58 = vrot.slane %v1616_v39, 4 }
 0x285   : > { %1464 = vrot.lane.b32.xlu0 %v1382_v24, %s7548_s24  ;;  %v1548_v24 = vperm.slane %v1540_v2, %v7624_v5  ;;  %v1619_v53 = vrot.slane %v1600_v45, 4 }
 0x287   : > { %v1575_v33 = vrot.slane %v1548_v24, 4  ;;  %v1574_v37 = vsel %vm232_vm0, %v1573_v19, %v1548_v24  ;;  %v1620_v59 = vsel %vm232_vm0, %v1612_v48, %v1619_v53 }
 0x288   : > { %1480 = vrot.lane.b32.xlu1 %v1444_v55, %s7552_s28  ;;  %v1580_v50 = vperm.slane %v1574_v37, %v7657_v25  ;;  %v1596_v55 = vsel %vm232_vm0, %v8290_v21, %v1595_v42  ;;  %v1628_v63 = vperm.slane %v1620_v59, %v7657_v25 }
 0x289   : > { %v1576_v38 = vsel %vm232_vm0, %v1560_v3, %v1575_v33  ;;  %v1604_v57 = vperm.slane %v1596_v55, %v7624_v5 }
 0x28a   : > { %v1584_v51 = vperm.slane %v1576_v38, %v7657_v25  ;;  %v1589_v56 = vrot.slane %v1580_v50, 4  ;;  %v1643_v8 = vrot.slane %v1628_v63, 4 }
 0x28b   : > { %1484 = vrot.lane.b32.xlu2 %v1430_v60, %s7549_s25  ;;  %v1618_v60 = vsel %vm232_vm0, %v1617_v54, %v1600_v45  ;;  %v1630_v7 = vsel %vm232_vm0, %v1629_v58, %v1604_v57  ;;  %v1631_v9 = vrot.slane %v1604_v57, 4 }
 0x28c   : > { %v1591_v4 = vrot.slane %v1584_v51, 4  ;;  %v1636_v11 = vperm.slane %v1630_v7, %v7657_v25 }
 0x28d   : > { %1476 = vrot.lane.b32.xlu0 %v1394_v0, %s7553_s29  ;;  %v8339_v0 = vperm.slane %v1618_v60, %v7657_v25  ;;  %v1632_v18 = vsel %vm232_vm0, %v1616_v39, %v1631_v9 }
 0x28e   : > { %v1592_v23 = vsel %vm232_vm0, 0.0, %v1591_v4  ;;  %v1645_v16 = vrot.slane %v1636_v11, 4  ;;  %v1640_v22 = vperm.slane %v1632_v18, %v7657_v25 }
 0x28f   : > { %v1641_v12 = vrot.slane %v8339_v0, 4 }
 0x290   : > { %1492 = vrot.lane.b32.xlu1 %v1438_v62, %s7548_s24  ;;  %v1590_v62 = vsel %vm232_vm0, 0.0, %v1589_v56  ;;  %v1647_v2 = vrot.slane %v1640_v22, 4 }
 0x291   : > { %v1642_v10 = vsel %vm232_vm0, 0.0, %v1641_v12 }
 0x292   : > { %v1648_v1 = vsel %vm232_vm0, 0.0, %v1647_v2 }
 0x293   : > { %1496 = vrot.lane.b32.xlu2 %v1448_v15, %s7554_s30  ;;  %v1646_v15 = vsel %vm232_vm0, 0.0, %v1645_v16 }
 0x295   : > { %1488 = vrot.lane.b32.xlu0 %v1446_v20, %s7551_s27 }
 0x298   : > { %1504 = vrot.lane.b32.xlu1 %v1450_v52, %s7553_s29 }
 0x29b   : > { %1650 = vrot.lane.b32.xlu2 %v1586_v47, %s7552_s28 }
 0x29d   : > { %1500 = vrot.lane.b32.xlu0 %v1442_v61, %s7550_s26  ;;  %v1644_v61 = vsel %vm232_vm0, 0.0, %v1643_v8 }
 0x2a0   : > { %1658 = vrot.lane.b32.xlu1 %v1588_v36, %s7551_s27 }
 0x2a3   : > { %1662 = vrot.lane.b32.xlu2 %v1580_v50, %s7548_s24 }
 0x2a5   : > { %1654 = vrot.lane.b32.xlu0 %v1572_v13, %s7549_s25 }
 0x2a8   : > { %1670 = vrot.lane.b32.xlu1 %v1584_v51, %s7550_s26 }
 0x2ab   : > { %1674 = vrot.lane.b32.xlu2 %v1592_v23, %s7553_s29 }
 0x2ad   : > { %1666 = vrot.lane.b32.xlu0 %v1590_v62, %s7554_s30 }
 0x2b0   : > { %1682 = vrot.lane.b32.xlu1 %v1628_v63, %s7549_s25 }
 0x2b3   : > { %1686 = vrot.lane.b32.xlu2 %v1644_v61, %s7551_s27 }
 0x2b5   : > { %1678 = vrot.lane.b32.xlu0 %v1642_v10, %s7552_s28 }
 0x2b8   : > { %1694 = vrot.lane.b32.xlu1 %v1646_v15, %s7554_s30 }
 0x2bb   : > { %1698 = vrot.lane.b32.xlu2 %v1640_v22, %s7550_s26 }
 0x2bd   : > { %1690 = vrot.lane.b32.xlu0 %v1636_v11, %s7548_s24 }
 0x2c0   : > { %1737 = vrot.lane.b32.xlu1 %v8251_v32, %s7555_s6 }
 0x2c3   : > { %1739 = vrot.lane.b32.xlu2 %v8306_v29, %s7555_s6 }
 0x2c5   : > { %1702 = vrot.lane.b32.xlu0 %v1648_v1, %s7553_s29 }
 0x2c8   : > { %1743 = vrot.lane.b32.xlu1 %v8301_v31, %s7555_s6 }
 0x2cb   : > { %1745 = vrot.lane.b32.xlu2 %v8239_v44, %s7555_s6 }
 0x2cd   : > { %1741 = vrot.lane.b32.xlu0 %v8244_v46, %s7555_s6 }
 0x2d0   : > { %1749 = vrot.lane.b32.xlu1 %v8228_v43, %s7555_s6 }
 0x2d3   : > { %1751 = vrot.lane.b32.xlu2 %v8293_v14, %s7555_s6 }
 0x2d5   : > { %1747 = vrot.lane.b32.xlu0 %v8290_v21, %s7555_s6  ;;  %v1461_v20 = vpop.permute.xlu2 %1460 }
 0x2dd   : > { %v1473_v26 = vpop.permute.xlu2 %1472 }
 0x2e5   : > { %v1485_v13 = vpop.permute.xlu2 %1484 }
 0x2ea   : > { %v1457_v24 = vpop.permute.xlu1 %1456 }
 0x2ed   : > { %v1497_v52 = vpop.permute.xlu2 %1496 }
 0x2ef   : > { %v1453_v3 = vpop.permute.xlu0 %1452 }
 0x2f0   : > { %v1507_v47 = vsel %vm400_vm1, %v8218_v27, %v1453_v3 }
 0x2f1   : > { %v1508_v40 = vsel %vm402_vm2, %v1507_v47, %v1457_v24 }
 0x2f2   : > { %v1469_v30 = vpop.permute.xlu1 %1468  ;;  %v1509_v33 = vsel %vm404_vm3, %v1508_v40, %v1461_v20 }
 0x2f5   : > { %v1651_v6 = vpop.permute.xlu2 %1650 }
 0x2f6   : > { %v1705_v23 = vsel %vm400_vm1, %v8276_v17, %v1651_v6 }
 0x2f7   : > { %v1465_v41 = vpop.permute.xlu0 %1464 }
 0x2f8   : > { %v1510_v19 = vsel %vm406_vm4, %v1509_v33, %v1465_v41 }
 0x2f9   : > { %v1511_v34 = vsel %vm408_vm5, %v1510_v19, %v1469_v30 }
 0x2fa   : > { %v1481_v35 = vpop.permute.xlu1 %1480  ;;  %v1512_v38 = vsel %vm410_vm6, %v1511_v34, %v1473_v26 }
 0x2fb   : > { %v1514_v48 = vsel %vm400_vm1, %v8234_v28, %v1481_v35 }
 0x2fc   : > { %v1515_v50 = vsel %vm402_vm2, %v1514_v48, %v1485_v13 }
 0x2fd   : > { %v1663_v27 = vpop.permute.xlu2 %1662 }
 0x2ff   : > { %v1477_v36 = vpop.permute.xlu0 %1476 }
 0x300   : > { %v1513_v37 = vsel %vm412_vm7, %v1512_v38, %v1477_v36 }
 0x301   : > { %v1523_v42 = vrot.slane %v1513_v37, 4 }
 0x302   : > { %v1493_v45 = vpop.permute.xlu1 %1492 }
 0x303   : > { %1527 = vst [vmem:[#allocation2 + $0x48] sm:$0xf0] %v1523_v42 }
 0x305   : > { %v1675_v54 = vpop.permute.xlu2 %1674 }
 0x307   : > { %v1489_v49 = vpop.permute.xlu0 %1488 }
 0x308   : > { %v1516_v51 = vsel %vm404_vm3, %v1515_v50, %v1489_v49 }
 0x309   : > { %v1517_v53 = vsel %vm406_vm4, %v1516_v51, %v1493_v45 }
 0x30a   : > { %v1505_v39 = vpop.permute.xlu1 %1504  ;;  %v1518_v4 = vsel %vm408_vm5, %v1517_v53, %v1497_v52 }
 0x30d   : > { %v1687_v60 = vpop.permute.xlu2 %1686 }
 0x30f   : > { %v1501_v55 = vpop.permute.xlu0 %1500 }
 0x310   : > { %v1519_v56 = vsel %vm410_vm6, %v1518_v4, %v1501_v55 }
 0x311   : > { %v1520_v57 = vsel %vm412_vm7, %v1519_v56, %v1505_v39 }
 0x312   : > { %v1524_v58 = vrot.slane %v1520_v57, 4  ;;  %v1659_v59 = vpop.permute.xlu1 %1658 }
 0x314   : > { %1528 = vst [vmem:[#allocation2 + $0x28] sm:$0xf0] %v1524_v58 }
 0x315   : > { %v1699_v16 = vpop.permute.xlu2 %1698 }
 0x317   : > { %v1655_v28 = vpop.permute.xlu0 %1654 }
 0x318   : > { %v1706_v62 = vsel %vm402_vm2, %v1705_v23, %v1655_v28 }
 0x319   : > { %v1707_v7 = vsel %vm404_vm3, %v1706_v62, %v1659_v59 }
 0x31a   : > { %v1671_v63 = vpop.permute.xlu1 %1670  ;;  %v1708_v11 = vsel %vm406_vm4, %v1707_v7, %v1663_v27 }
 0x31d   : > { %v8401_v22 = vpop.permute.xlu2 %1739 }
 0x31f   : > { %v1667_v8 = vpop.permute.xlu0 %1666 }
 0x320   : > { %v1709_v12 = vsel %vm408_vm5, %v1708_v11, %v1667_v8 }
 0x321   : > { %v1710_v61 = vsel %vm410_vm6, %v1709_v12, %v1671_v63 }
 0x322   : > { %v1711_v10 = vsel %vm412_vm7, %v1710_v61, %v1675_v54  ;;  %v1683_v9 = vpop.permute.xlu1 %1682 }
 0x323   : > { %1719 = vst [vmem:[#allocation2 + $0x8] sm:$0xf] %v1711_v10 }
 0x325   : > { %v1746_v3 = vpop.permute.xlu2 %1745 }
 0x326   : > { %v1761_v40 = vrot.slane %v1746_v3, 4 }
 0x327   : > { %v1679_v15 = vpop.permute.xlu0 %1678 }
 0x328   : > { %v1712_v17 = vsel %vm400_vm1, %v8339_v0, %v1679_v15 }
 0x329   : > { %v1713_v2 = vsel %vm402_vm2, %v1712_v17, %v1683_v9  ;;  %v1819_v17 = vrot.slane %v8401_v22, 4 }
 0x32a   : > { %v1695_v18 = vpop.permute.xlu1 %1694  ;;  %v1714_v20 = vsel %vm404_vm3, %v1713_v2, %v1687_v60 }
 0x32d   : > { %v1752_v33 = vpop.permute.xlu2 %1751 }
 0x32e   : > { %v1829_v36 = vrot.slane %v1752_v33, 4 }
 0x32f   : > { %v1691_v1 = vpop.permute.xlu0 %1690 }
 0x330   : > { %v1715_v26 = vsel %vm406_vm4, %v1714_v20, %v1691_v1 }
 0x331   : > { %v1716_v24 = vsel %vm408_vm5, %v1715_v26, %v1695_v18 }
 0x332   : > { %v1738_v13 = vpop.permute.xlu1 %1737  ;;  %v1717_v47 = vsel %vm410_vm6, %v1716_v24, %v1699_v16 }
 0x333   : > { %v1762_v41 = vsel %vm232_vm0, %v1761_v40, %v1738_v13  ;;  %v1763_v6 = vrot.slane %v1738_v13, 4 }
 0x334   : > { %v1768_v34 = vperm.slane %v1762_v41, %v7624_v5 }
 0x335   : > { %v1764_v45 = vsel %vm232_vm0, %v1746_v3, %v1763_v6 }
 0x336   : > { %v1787_v49 = vrot.slane %v1768_v34, 4  ;;  %v1772_v53 = vperm.slane %v1764_v45, %v7624_v5 }
 0x337   : > { %v1703_v52 = vpop.permute.xlu0 %1702 }
 0x338   : > { %v1718_v30 = vsel %vm412_vm7, %v1717_v47, %v1703_v52  ;;  %v1799_v9 = vrot.slane %v1772_v53, 4 }
 0x339   : > { %1720 = vst [vmem:[#allocation2 + $0x20] sm:$0xf] %v1718_v30 }
 0x33a   : > { %v1744_v0 = vpop.permute.xlu1 %1743 }
 0x33b   : > { %v1830_v50 = vsel %vm232_vm0, %v1829_v36, %v1744_v0  ;;  %v1831_v8 = vrot.slane %v1744_v0, 4 }
 0x33c   : > { %v1836_v57 = vperm.slane %v1830_v50, %v7624_v5 }
 0x33d   : > { %v1832_v18 = vsel %vm232_vm0, %v1752_v33, %v1831_v8 }
 0x33e   : > { %v1841_v11 = vrot.slane %v1836_v57, 4  ;;  %v1840_v13 = vperm.slane %v1832_v18, %v7624_v5 }
 0x33f   : > { %v1742_v19 = vpop.permute.xlu0 %1741 }
 0x340   : > { %v1775_v35 = vrot.slane %v1742_v19, 4  ;;  %v1853_v47 = vrot.slane %v1840_v13, 4 }
 0x342   : > { %v1750_v38 = vpop.permute.xlu1 %1749 }
 0x343   : > { %v1773_v37 = vrot.slane %v1750_v38, 4  ;;  %v1776_v42 = vsel %vm232_vm0, %v1750_v38, %v1775_v35 }
 0x344   : > { %v1784_v27 = vperm.slane %v1776_v42, %v7624_v5 }
 0x345   : > { %v1774_v48 = vsel %vm232_vm0, %v1773_v37, %v1742_v19 }
 0x346   : > { %v1780_v51 = vperm.slane %v1774_v48, %v7624_v5  ;;  %v1797_v39 = vrot.slane %v1784_v27, 4  ;;  %v1800_v2 = vsel %vm232_vm0, %v1784_v27, %v1799_v9 }
 0x347   : > { %v1748_v54 = vpop.permute.xlu0 %1747  ;;  %v1808_v24 = vperm.slane %v1800_v2, %v7657_v25 }
 0x348   : > { %v1785_v55 = vrot.slane %v1780_v51, 4  ;;  %v1817_v4 = vrot.slane %v1748_v54, 4  ;;  %v1788_v56 = vsel %vm232_vm0, %v1780_v51, %v1787_v49  ;;  %v1798_v59 = vsel %vm232_vm0, %v1797_v39, %v1772_v53 }
 0x349   : > { %v1796_v58 = vperm.slane %v1788_v56, %v7657_v25  ;;  %v1804_v23 = vperm.slane %v1798_v59, %v7657_v25  ;;  %v1820_v26 = vsel %vm232_vm0, %v1748_v54, %v1819_v17  ;;  %v1815_v33 = vrot.slane %v1808_v24, 4 }
 0x34a   : > { %v1818_v28 = vsel %vm232_vm0, %v1817_v4, %v8401_v22  ;;  %v1786_v60 = vsel %vm232_vm0, %v1785_v55, %v1768_v34  ;;  %v1828_v22 = vperm.slane %v1820_v26, %v7624_v5 }
 0x34b   : > { %v1824_v62 = vperm.slane %v1818_v28, %v7624_v5  ;;  %1878 = vrot.lane.b32.xlu1 %v1796_v58, %s7549_s25  ;;  %v1811_v63 = vrot.slane %v1796_v58, 4  ;;  %v8429_v7 = vperm.slane %v1786_v60, %v7657_v25  ;;  %v1813_v16 = vrot.slane %v1804_v23, 4 }
 0x34c   : > { %v1854_v40 = vsel %vm232_vm0, %v1853_v47, %v1828_v22  ;;  %v1855_v41 = vrot.slane %v1828_v22, 4  ;;  %v1816_v35 = vsel %vm232_vm0, 0.0, %v1815_v33 }
 0x34d   : > { %v1812_v12 = vsel %vm232_vm0, 0.0, %v1811_v63  ;;  %v1809_v61 = vrot.slane %v8429_v7, 4  ;;  %v1842_v15 = vsel %vm232_vm0, %v1841_v11, %v1824_v62  ;;  %v1814_v1 = vsel %vm232_vm0, 0.0, %v1813_v16 }
 0x34e   : > { %1882 = vrot.lane.b32.xlu2 %v1812_v12, %s7551_s27  ;;  %v8442_v20 = vperm.slane %v1842_v15, %v7657_v25  ;;  %v1843_v3 = vrot.slane %v1824_v62, 4  ;;  %v1860_v6 = vperm.slane %v1854_v40, %v7657_v25  ;;  %v1856_v34 = vsel %vm232_vm0, %v1840_v13, %v1855_v41 }
 0x34f   : > { %v1810_v10 = vsel %vm232_vm0, 0.0, %v1809_v61  ;;  %v1864_v38 = vperm.slane %v1856_v34, %v7657_v25 }
 0x350   : > { %1874 = vrot.lane.b32.xlu0 %v1810_v10, %s7552_s28  ;;  %v1865_v52 = vrot.slane %v8442_v20, 4  ;;  %v1844_v30 = vsel %vm232_vm0, %v1836_v57, %v1843_v3  ;;  %v1869_v36 = vrot.slane %v1860_v6, 4 }
 0x351   : > { %v1852_v19 = vperm.slane %v1844_v30, %v7657_v25  ;;  %v1871_v45 = vrot.slane %v1864_v38, 4 }
 0x352   : > { %v1866_v0 = vsel %vm232_vm0, 0.0, %v1865_v52  ;;  %v1870_v42 = vsel %vm232_vm0, 0.0, %v1869_v36 }
 0x353   : > { %1890 = vrot.lane.b32.xlu1 %v1814_v1, %s7554_s30  ;;  %v1867_v37 = vrot.slane %v1852_v19, 4  ;;  %v1872_v48 = vsel %vm232_vm0, 0.0, %v1871_v45 }
 0x355   : > { %v1868_v27 = vsel %vm232_vm0, 0.0, %v1867_v37 }
 0x356   : > { %1894 = vrot.lane.b32.xlu2 %v1808_v24, %s7550_s26 }
 0x358   : > { %1886 = vrot.lane.b32.xlu0 %v1804_v23, %s7548_s24 }
 0x35b   : > { %1902 = vrot.lane.b32.xlu1 %v1866_v0, %s7552_s28 }
 0x35e   : > { %1906 = vrot.lane.b32.xlu2 %v1852_v19, %s7549_s25 }
 0x360   : > { %1898 = vrot.lane.b32.xlu0 %v1816_v35, %s7553_s29 }
 0x363   : > { %1914 = vrot.lane.b32.xlu1 %v1860_v6, %s7548_s24 }
 0x366   : > { %1918 = vrot.lane.b32.xlu2 %v1870_v42, %s7554_s30 }
 0x368   : > { %1910 = vrot.lane.b32.xlu0 %v1868_v27, %s7551_s27 }
 0x36b   : > { %1926 = vrot.lane.b32.xlu1 %v1872_v48, %s7553_s29 }
 0x36e   : > { %1967 = vrot.lane.b32.xlu2 %v8251_v32, %s7556_s7 }
 0x370   : > { %1922 = vrot.lane.b32.xlu0 %v1864_v38, %s7550_s26 }
 0x373   : > { %1971 = vrot.lane.b32.xlu1 %v8244_v46, %s7556_s7 }
 0x376   : > { %1973 = vrot.lane.b32.xlu2 %v8301_v31, %s7556_s7 }
 0x378   : > { %1969 = vrot.lane.b32.xlu0 %v8306_v29, %s7556_s7 }
 0x37b   : > { %1977 = vrot.lane.b32.xlu1 %v8290_v21, %s7556_s7 }
 0x37e   : > { %1979 = vrot.lane.b32.xlu2 %v8228_v43, %s7556_s7 }
 0x380   : > { %1975 = vrot.lane.b32.xlu0 %v8239_v44, %s7556_s7 }
 0x388   : > { %1981 = vrot.lane.b32.xlu0 %v8293_v14, %s7556_s7 }
 0x3a8   : > { %v1883_v32 = vpop.permute.xlu2 %1882 }
 0x3b0   : > { %v1895_v46 = vpop.permute.xlu2 %1894 }
 0x3b8   : > { %v1907_v50 = vpop.permute.xlu2 %1906 }
 0x3bd   : > { %v1879_v49 = vpop.permute.xlu1 %1878 }
 0x3c0   : > { %v1919_v39 = vpop.permute.xlu2 %1918 }
 0x3c2   : > { %v1875_v31 = vpop.permute.xlu0 %1874 }
 0x3c3   : > { %v1929_v29 = vsel %vm400_vm1, %v8429_v7, %v1875_v31 }
 0x3c4   : > { %v1930_v21 = vsel %vm402_vm2, %v1929_v29, %v1879_v49 }
 0x3c5   : > { %v1891_v51 = vpop.permute.xlu1 %1890  ;;  %v1931_v43 = vsel %vm404_vm3, %v1930_v21, %v1883_v32 }
 0x3c8   : > { %v1968_v56 = vpop.permute.xlu2 %1967 }
 0x3c9   : > { %v1993_v13 = vrot.slane %v1968_v56, 4 }
 0x3ca   : > { %v1887_v53 = vpop.permute.xlu0 %1886 }
 0x3cb   : > { %v1932_v44 = vsel %vm406_vm4, %v1931_v43, %v1887_v53 }
 0x3cc   : > { %v1933_v14 = vsel %vm408_vm5, %v1932_v44, %v1891_v51 }
 0x3cd   : > { %v1903_v54 = vpop.permute.xlu1 %1902  ;;  %v1934_v4 = vsel %vm410_vm6, %v1933_v14, %v1895_v46 }
 0x3ce   : > { %v1936_v28 = vsel %vm400_vm1, %v8442_v20, %v1903_v54 }
 0x3cf   : > { %v1937_v23 = vsel %vm402_vm2, %v1936_v28, %v1907_v50 }
 0x3d0   : > { %v1974_v63 = vpop.permute.xlu2 %1973 }
 0x3d1   : > { %v2061_v51 = vrot.slane %v1974_v63, 4 }
 0x3d2   : > { %v1899_v55 = vpop.permute.xlu0 %1898 }
 0x3d3   : > { %v1935_v57 = vsel %vm412_vm7, %v1934_v4, %v1899_v55 }
 0x3d4   : > { %v1945_v58 = vrot.slane %v1935_v57, 4 }
 0x3d5   : > { %v1915_v59 = vpop.permute.xlu1 %1914 }
 0x3d6   : > { %1949 = vst [vmem:[#allocation2 + $0x8] sm:$0xf0] %v1945_v58 }
 0x3d8   : > { %v1980_v9 = vpop.permute.xlu2 %1979 }
 0x3d9   : > { %v2003_v17 = vrot.slane %v1980_v9, 4 }
 0x3da   : > { %v1911_v60 = vpop.permute.xlu0 %1910 }
 0x3db   : > { %v1938_v62 = vsel %vm404_vm3, %v1937_v23, %v1911_v60 }
 0x3dc   : > { %v1939_v7 = vsel %vm406_vm4, %v1938_v62, %v1915_v59 }
 0x3dd   : > { %v1927_v8 = vpop.permute.xlu1 %1926  ;;  %v1940_v12 = vsel %vm408_vm5, %v1939_v7, %v1919_v39 }
 0x3e2   : > { %v1923_v11 = vpop.permute.xlu0 %1922 }
 0x3e3   : > { %v1941_v61 = vsel %vm410_vm6, %v1940_v12, %v1923_v11 }
 0x3e4   : > { %v1942_v16 = vsel %vm412_vm7, %v1941_v61, %v1927_v8 }
 0x3e5   : > { %v1946_v10 = vrot.slane %v1942_v16, 4  ;;  %v1972_v15 = vpop.permute.xlu1 %1971 }
 0x3e6   : > { %v2005_v18 = vrot.slane %v1972_v15, 4  ;;  %v2004_v1 = vsel %vm232_vm0, %v2003_v17, %v1972_v15 }
 0x3e7   : > { %1950 = vst [vmem:[#allocation2 + $0x20] sm:$0xf0] %v1946_v10  ;;  %v2010_v26 = vperm.slane %v2004_v1, %v7624_v5 }
 0x3e8   : > { %v2006_v20 = vsel %vm232_vm0, %v1980_v9, %v2005_v18 }
 0x3e9   : > { %v2014_v24 = vperm.slane %v2006_v20, %v7624_v5  ;;  %v2015_v47 = vrot.slane %v2010_v26, 4 }
 0x3ea   : > { %v1970_v2 = vpop.permute.xlu0 %1969 }
 0x3eb   : > { %v2027_v30 = vrot.slane %v2014_v24, 4  ;;  %v2049_v55 = vrot.slane %v1970_v2, 4 }
 0x3ed   : > { %v1978_v41 = vpop.permute.xlu1 %1977 }
 0x3ee   : > { %v2047_v35 = vrot.slane %v1978_v41, 4  ;;  %v2050_v59 = vsel %vm232_vm0, %v1978_v41, %v2049_v55 }
 0x3f0   : > { %v2048_v32 = vsel %vm232_vm0, %v2047_v35, %v1970_v2  ;;  %v2186_v35 = vld [vmem:[%s11579_s2] sm:$0xff] }
 0x3f1   : > { %v2054_v39 = vperm.slane %v2048_v32, %v7624_v5 }
 0x3f2   : > { %v1976_v3 = vpop.permute.xlu0 %1975 }
 0x3f3   : > { %v1991_v22 = vrot.slane %v1976_v3, 4  ;;  %v1994_v52 = vsel %vm232_vm0, %v1976_v3, %v1993_v13  ;;  %v2073_v28 = vrot.slane %v2054_v39, 4 }
 0x3f4   : > { %v2002_v40 = vperm.slane %v1994_v52, %v7624_v5 }
 0x3f5   : > { %v1992_v0 = vsel %vm232_vm0, %v1991_v22, %v1968_v56 }
 0x3f6   : > { %v1998_v33 = vperm.slane %v1992_v0, %v7624_v5  ;;  %v2028_v36 = vsel %vm232_vm0, %v2027_v30, %v2002_v40  ;;  %v2029_v31 = vrot.slane %v2002_v40, 4 }
 0x3f7   : > { %v2034_v48 = vperm.slane %v2028_v36, %v7657_v25 }
 0x3f8   : > { %v2017_v19 = vrot.slane %v1998_v33, 4  ;;  %v2016_v6 = vsel %vm232_vm0, %v2015_v47, %v1998_v33  ;;  %v2030_v54 = vsel %vm232_vm0, %v2014_v24, %v2029_v31  ;;  %v7557_v33 = vmov 0  }
 0x3f9   : > { %v8513_v34 = vperm.slane %v2016_v6, %v7657_v25  ;;  %v2043_v43 = vrot.slane %v2034_v48, 4  ;;  %v2038_v58 = vperm.slane %v2030_v54, %v7657_v25  ;;  %7535 = vset.pattern.permute.xlu0 %v7557_v33  ;;  %7537 = vset.pattern.permute.xlu1 %v7557_v33  ;;  %v2176_v54 = vld [vmem:[#allocation2 + $0x30] sm:$0xff] }
 0x3fa   : > { %v1982_v38 = vpop.permute.xlu0 %1981  ;;  %v2018_v37 = vsel %vm232_vm0, %v2010_v26, %v2017_v19  ;;  %7536 = vset.pattern.permute.xlu2 %v7557_v33 }
 0x3fb   : > { %v2059_v42 = vrot.slane %v1982_v38, 4  ;;  %v2026_v45 = vperm.slane %v2018_v37, %v7657_v25  ;;  %v2039_v27 = vrot.slane %v8513_v34, 4  ;;  %v2062_v44 = vsel %vm232_vm0, %v1982_v38, %v2061_v51  ;;  %v2178_v51 = vld [vmem:[#allocation2 + $0x18] sm:$0xff] }
 0x3fc   : > { %v2070_v4 = vperm.slane %v2062_v44, %v7624_v5  ;;  %v2044_v56 = vsel %vm232_vm0, 0.0, %v2043_v43  ;;  %v2045_v62 = vrot.slane %v2038_v58, 4 }
 0x3fd   : > { %v2060_v46 = vsel %vm232_vm0, %v2059_v42, %v1974_v63  ;;  %2108 = vrot.lane.b32.xlu2 %v2026_v45, %s7549_s25  ;;  %v2040_v49 = vsel %vm232_vm0, 0.0, %v2039_v27  ;;  %v2041_v50 = vrot.slane %v2026_v45, 4  ;;  %v2058_v63 = vperm.slane %v2050_v59, %v7624_v5 }
 0x3fe   : > { %v2066_v29 = vperm.slane %v2060_v46, %v7624_v5  ;;  %2104 = vrot.lane.b32.xlu1 %v2040_v49, %s7552_s28  ;;  %v2083_v60 = vrot.slane %v2070_v4, 4  ;;  %v2046_v12 = vsel %vm232_vm0, 0.0, %v2045_v62  ;;  %v2182_v49 = vld [vmem:[#allocation2 + $0x8] sm:$0xff] }
 0x3ff   : > { %v2042_v21 = vsel %vm232_vm0, 0.0, %v2041_v50  ;;  %v2085_v16 = vrot.slane %v2058_v63, 4 }
 0x400   : > { %v2071_v53 = vrot.slane %v2066_v29, 4  ;;  %2112 = vrot.lane.b32.xlu0 %v2042_v21, %s7551_s27  ;;  %v2074_v7 = vsel %vm232_vm0, %v2066_v29, %v2073_v28  ;;  %v2084_v11 = vsel %vm232_vm0, %v2083_v60, %v2058_v63  ;;  %v2180_v29 = vld [vmem:[#allocation2 + $0x48] sm:$0xff] }
 0x401   : > { %v2082_v61 = vperm.slane %v2074_v7, %v7657_v25  ;;  %v2090_v10 = vperm.slane %v2084_v11, %v7657_v25  ;;  %v2086_v15 = vsel %vm232_vm0, %v2070_v4, %v2085_v16  ;;  %v2183_v4 = vld [vmem:[#allocation2 + $0x20] sm:$0xff] }
 0x402   : > { %v2072_v14 = vsel %vm232_vm0, %v2071_v53, %v2054_v39  ;;  %v2094_v18 = vperm.slane %v2086_v15, %v7657_v25  ;;  %v2175_v53 = vld [vmem:[%s11578_s1] sm:$0xff] }
 0x403   : > { %v2078_v57 = vperm.slane %v2072_v14, %v7657_v25  ;;  %v2097_v9 = vrot.slane %v2082_v61, 4  ;;  %v2099_v17 = vrot.slane %v2090_v10, 4 }
 0x404   : > { %v2101_v20 = vrot.slane %v2094_v18, 4 }
 0x405   : > { %2120 = vrot.lane.b32.xlu2 %v2044_v56, %s7554_s30  ;;  %v2095_v23 = vrot.slane %v2078_v57, 4  ;;  %v2098_v2 = vsel %vm232_vm0, 0.0, %v2097_v9  ;;  %v2100_v1 = vsel %vm232_vm0, 0.0, %v2099_v17  ;;  %v2181_v56 = vld [vmem:[#allocation2 + $0x28] sm:$0xff] }
 0x406   : > { %2116 = vrot.lane.b32.xlu1 %v2034_v48, %s7548_s24  ;;  %v2102_v26 = vsel %vm232_vm0, 0.0, %v2101_v20 }
 0x407   : > { %v2096_v8 = vsel %vm232_vm0, 0.0, %v2095_v23 }
 0x408   : > { %2124 = vrot.lane.b32.xlu0 %v2038_v58, %s7550_s26  ;;  %v2177_v58 = vld [vmem:[#allocation2] sm:$0xff] }
 0x40d   : > { %2132 = vrot.lane.b32.xlu2 %v2096_v8, %s7552_s28 }
 0x40e   : > { %2128 = vrot.lane.b32.xlu1 %v2046_v12, %s7553_s29 }
 0x410   : > { %2136 = vrot.lane.b32.xlu0 %v2082_v61, %s7549_s25 }
 0x415   : > { %2144 = vrot.lane.b32.xlu2 %v2090_v10, %s7548_s24 }
 0x416   : > { %2140 = vrot.lane.b32.xlu1 %v2098_v2, %s7551_s27 }
 0x418   : > { %2148 = vrot.lane.b32.xlu0 %v2100_v1, %s7554_s30 }
 0x41d   : > { %2156 = vrot.lane.b32.xlu2 %v2102_v26, %s7553_s29 }
 0x41e   : > { %2152 = vrot.lane.b32.xlu1 %v2094_v18, %s7550_s26 }
 0x420   : > { %2189 = vperm.xlu0 %7535, %v2186_v35  }
 0x457   : > { %v2109_v13 = vpop.permute.xlu2 %2108 }
 0x45f   : > { %v2121_v22 = vpop.permute.xlu2 %2120 }
 0x467   : > { %v2133_v19 = vpop.permute.xlu2 %2132 }
 0x468   : > { %v2166_v45 = vsel %vm400_vm1, %v2078_v57, %v2133_v19  ;;  %v2179_v57 = vld [vmem:[#allocation2 + $0x10] sm:$0xff] }
 0x46f   : > { %v2145_v42 = vpop.permute.xlu2 %2144 }
 0x470   : > { %v2105_v24 = vpop.permute.xlu1 %2104 }
 0x471   : > { %v2159_v52 = vsel %vm400_vm1, %v8513_v34, %v2105_v24 }
 0x472   : > { %v2113_v3 = vpop.permute.xlu0 %2112  ;;  %v2160_v47 = vsel %vm402_vm2, %v2159_v52, %v2109_v13 }
 0x473   : > { %v2161_v0 = vsel %vm404_vm3, %v2160_v47, %v2113_v3 }
 0x477   : > { %v2157_v43 = vpop.permute.xlu2 %2156 }
 0x478   : > { %v2117_v30 = vpop.permute.xlu1 %2116 }
 0x479   : > { %v2162_v40 = vsel %vm406_vm4, %v2161_v0, %v2117_v30 }
 0x47a   : > { %v2125_v41 = vpop.permute.xlu0 %2124  ;;  %v2163_v6 = vsel %vm408_vm5, %v2162_v40, %v2121_v22 }
 0x47b   : > { %v2164_v34 = vsel %vm410_vm6, %v2163_v6, %v2125_v41 }
 0x480   : > { %v2129_v36 = vpop.permute.xlu1 %2128 }
 0x481   : > { %v2165_v38 = vsel %vm412_vm7, %v2164_v34, %v2129_v36 }
 0x482   : > { %2173 = vst [vmem:[#allocation2 + $0x40] sm:$0xf] %v2165_v38  ;;  %v2137_v37 = vpop.permute.xlu0 %2136 }
 0x483   : > { %v2167_v48 = vsel %vm402_vm2, %v2166_v45, %v2137_v37 }
 0x488   : > { %v2141_v27 = vpop.permute.xlu1 %2140 }
 0x489   : > { %v2184_v32 = vld [vmem:[#allocation2 + $0x40] sm:$0xf]  ;;  %v2168_v46 = vsel %vm404_vm3, %v2167_v48, %v2141_v27 }
 0x48a   : > { %7486 = vmatpush.msk.msra.mxu0 %vm2196_vm8, %v2184_v32  ;;  %v2149_v50 = vpop.permute.xlu0 %2148  ;;  %v2169_v31 = vsel %vm406_vm4, %v2168_v46, %v2145_v42 }
 0x48b   : > { %v2170_v21 = vsel %vm408_vm5, %v2169_v31, %v2149_v50  ;;  %vm3866_vm5 = vcmask 1041409  }
 0x48c   : > { %2215 = vmatpush.msra.mxu0 %v2182_v49 }
 0x48e   : > { %2216 = vmatpush.msra.mxu0 %v2180_v29 }
 0x490   : > { %2217 = vmatpush.msra.mxu0 %v2178_v51  ;;  %v2153_v39 = vpop.permute.xlu1 %2152 }
 0x491   : > { %v2171_v44 = vsel %vm410_vm6, %v2170_v21, %v2153_v39  ;;  %vm3868_vm6 = vcmask 1042434  }
 0x492   : > { %v2172_v14 = vsel %vm412_vm7, %v2171_v44, %v2157_v43  ;;  %2218 = vmatpush.msra.mxu0 %v2176_v54  ;;  %v2190_v59 = vpop.permute.xlu0 %2189  ;;  %vm3870_vm7 = vcmask 1043459  }
 0x493   : > { %2174 = vst [vmem:[#allocation2 + $0x38] sm:$0xf] %v2172_v14  ;;  %7487 = vmatmul.msk.f32.vlgmr.msra.gmra.mxu0 %vm2192_vm9, %v2175_v53 }
 0x49a   : > { %v2185_v55 = vld [vmem:[#allocation2 + $0x38] sm:$0xf] }
 0x49b   : > { %7488 = vmatpush.msk.msra.mxu1 %vm2196_vm8, %v2185_v55  ;;  %vm3872_vm8 = vcmask 1044484  }
 0x49d   : > { %2235 = vmatpush.msra.mxu1 %v2183_v4 }
 0x49f   : > { %2236 = vmatpush.msra.mxu1 %v2181_v56 }
 0x4a1   : > { %2237 = vmatpush.msra.mxu1 %v2179_v57 }
 0x4a3   : > { %2238 = vmatpush.msra.mxu1 %v2177_v58 }
 0x4a4   : > { %7489 = vmatmul.msk.f32.vlgmr.msra.gmra.mxu1 %vm2192_vm9, %v2175_v53  ;;  %vm3874_vm9 = vcmask 1045509  }
 0x510   : > { %v2220_v28 = vpop.f32.mrf.mxu0 }
 0x511   : > { %v2221_v60 = vadd.f32 %v2220_v28, %v2190_v59 }
 0x513   : > { %v2243_v23 = vmax.f32 %v2221_v60, 0.0 }
 0x515   : > { %2249 = vrot.lane.b32.xlu2 %v2243_v23, %s7548_s24  ;;  %2246 = vrot.lane.b32.xlu1 %v2243_v23, %s7550_s26  ;;  %v2267_v12 = vrot.slane %v2243_v23, 4 }
 0x51d   : > { %2252 = vrot.lane.b32.xlu1 %v2243_v23, %s7549_s25 }
 0x521   : > { %v2240_v62 = vpop.f32.mrf.mxu1 }
 0x522   : > { %v2241_v63 = vadd.f32 %v2240_v62, %v2190_v59 }
 0x524   : > { %v2244_v7 = vmax.f32 %v2241_v63, 0.0 }
 0x526   : > { %2262 = vrot.lane.b32.xlu1 %v2244_v7, %s7549_s25  ;;  %2259 = vrot.lane.b32.xlu0 %v2244_v7, %s7548_s24  ;;  %v2291_v22 = vrot.slane %v2244_v7, 4 }
 0x527   : > { %2256 = vrot.lane.b32.xlu2 %v2244_v7, %s7550_s26 }
 0x56f   : > { %v2250_v11 = vpop.permute.xlu2 %2249 }
 0x570   : > { %v2268_v61 = vsel %vm232_vm0, %v2250_v11, %v2267_v12  ;;  %v2265_v15 = vrot.slane %v2250_v11, 4 }
 0x571   : > { %v2276_v18 = vperm.slane %v2268_v61, %v7624_v5 }
 0x572   : > { %v2266_v26 = vsel %vm232_vm0, %v2265_v15, %v2243_v23 }
 0x573   : > { %v2327_v13 = vrot.slane %v2276_v18, 4  ;;  %v2272_v52 = vperm.slane %v2266_v26, %v7624_v5 }
 0x575   : > { %v2315_v48 = vrot.slane %v2272_v52, 4 }
 0x581   : > { %v2257_v2 = vpop.permute.xlu2 %2256 }
 0x582   : > { %v2303_v24 = vrot.slane %v2257_v2, 4 }
 0x587   : > { %v2247_v8 = vpop.permute.xlu1 %2246 }
 0x588   : > { %v2279_v16 = vrot.slane %v2247_v8, 4 }
 0x58f   : > { %v2253_v10 = vpop.permute.xlu1 %2252 }
 0x590   : > { %v2277_v9 = vrot.slane %v2253_v10, 4  ;;  %v2280_v17 = vsel %vm232_vm0, %v2253_v10, %v2279_v16 }
 0x591   : > { %v2288_v20 = vperm.slane %v2280_v17, %v7624_v5 }
 0x592   : > { %v2278_v1 = vsel %vm232_vm0, %v2277_v9, %v2247_v8 }
 0x593   : > { %v2284_v3 = vperm.slane %v2278_v1, %v7624_v5  ;;  %v2328_v47 = vsel %vm232_vm0, %v2288_v20, %v2327_v13  ;;  %v2325_v51 = vrot.slane %v2288_v20, 4 }
 0x594   : > { %v2336_v38 = vperm.slane %v2328_v47, %v7657_v25 }
 0x595   : > { %v2313_v35 = vrot.slane %v2284_v3, 4  ;;  %v2316_v29 = vsel %vm232_vm0, %v2284_v3, %v2315_v48  ;;  %v2326_v59 = vsel %vm232_vm0, %v2325_v51, %v2276_v18 }
 0x596   : > { %v2375_v31 = vrot.slane %v2336_v38, 4  ;;  %v2324_v55 = vperm.slane %v2316_v29, %v7657_v25  ;;  %v2332_v63 = vperm.slane %v2326_v59, %v7657_v25 }
 0x597   : > { %v2314_v39 = vsel %vm232_vm0, %v2313_v35, %v2272_v52 }
 0x598   : > { %v2260_v30 = vpop.permute.xlu0 %2259  ;;  %v2263_v0 = vpop.permute.xlu1 %2262  ;;  %v2320_v57 = vperm.slane %v2314_v39, %v7657_v25  ;;  %v2371_v12 = vrot.slane %v2332_v63, 4  ;;  %v2367_v9 = vrot.slane %v2324_v55, 4 }
 0x599   : > { %v2289_v40 = vrot.slane %v2260_v30, 4  ;;  %v2292_v41 = vsel %vm232_vm0, %v2260_v30, %v2291_v22  ;;  %v2301_v33 = vrot.slane %v2263_v0, 4  ;;  %v2304_v19 = vsel %vm232_vm0, %v2263_v0, %v2303_v24 }
 0x59a   : > { %v2300_v6 = vperm.slane %v2292_v41, %v7624_v5  ;;  %v2312_v27 = vperm.slane %v2304_v19, %v7624_v5  ;;  %v2363_v23 = vrot.slane %v2320_v57, 4 }
 0x59b   : > { %v2290_v34 = vsel %vm232_vm0, %v2289_v40, %v2244_v7  ;;  %v2302_v36 = vsel %vm232_vm0, %v2301_v33, %v2257_v2 }
 0x59c   : > { %v2296_v37 = vperm.slane %v2290_v34, %v7624_v5  ;;  %v2351_v42 = vrot.slane %v2300_v6, 4  ;;  %v2308_v45 = vperm.slane %v2302_v36, %v7624_v5  ;;  %v2349_v14 = vrot.slane %v2312_v27, 4 }
 0x59e   : > { %v2339_v32 = vrot.slane %v2296_v37, 4  ;;  %v2337_v46 = vrot.slane %v2308_v45, 4  ;;  %v2352_v49 = vsel %vm232_vm0, %v2312_v27, %v2351_v42  ;;  %v2350_v60 = vsel %vm232_vm0, %v2349_v14, %v2300_v6 }
 0x59f   : > { %v2360_v50 = vperm.slane %v2352_v49, %v7657_v25  ;;  %v2356_v8 = vperm.slane %v2350_v60, %v7657_v25 }
 0x5a0   : > { %v2340_v21 = vsel %vm232_vm0, %v2308_v45, %v2339_v32  ;;  %v2338_v53 = vsel %vm232_vm0, %v2337_v46, %v2296_v37 }
 0x5a1   : > { %v2376_v43 = vsel %vm232_vm0, %v2360_v50, %v2375_v31  ;;  %v2373_v44 = vrot.slane %v2360_v50, 4  ;;  %v2348_v54 = vperm.slane %v2340_v21, %v7657_v25  ;;  %v2344_v58 = vperm.slane %v2338_v53, %v7657_v25 }
 0x5a2   : > { %2399 = vrot.lane.b32.xlu0 %v2376_v43, %s7553_s29  ;;  %v2372_v61 = vsel %vm232_vm0, %v2356_v8, %v2371_v12  ;;  %v2369_v16 = vrot.slane %v2356_v8, 4 }
 0x5a3   : > { %v2374_v4 = vsel %vm232_vm0, %v2373_v44, %v2336_v38  ;;  %v2365_v56 = vrot.slane %v2348_v54, 4  ;;  %v2361_v62 = vrot.slane %v2344_v58, 4  ;;  %v2364_v7 = vsel %vm232_vm0, %v2344_v58, %v2363_v23 }
 0x5a4   : > { %2397 = vrot.lane.b32.xlu2 %v2374_v4, %s7553_s29  ;;  %v2370_v10 = vsel %vm232_vm0, %v2369_v16, %v2332_v63  ;;  %v2368_v15 = vsel %vm232_vm0, %v2348_v54, %v2367_v9 }
 0x5a5   : > { %v2366_v28 = vsel %vm232_vm0, %v2365_v56, %v2324_v55  ;;  %v2362_v11 = vsel %vm232_vm0, %v2361_v62, %v2320_v57 }
 0x5a6   : > { %2389 = vrot.lane.b32.xlu1 %v2366_v28, %s7553_s29 }
 0x5aa   : > { %2387 = vrot.lane.b32.xlu0 %v2364_v7, %s7553_s29 }
 0x5ac   : > { %2385 = vrot.lane.b32.xlu2 %v2362_v11, %s7553_s29 }
 0x5ae   : > { %2395 = vrot.lane.b32.xlu1 %v2372_v61, %s7553_s29 }
 0x5b2   : > { %2393 = vrot.lane.b32.xlu0 %v2370_v10, %s7553_s29 }
 0x5b4   : > { %2391 = vrot.lane.b32.xlu2 %v2368_v15, %s7553_s29 }
 0x5fe   : > { %v2398_v17 = vpop.permute.xlu2 %2397 }
 0x5ff   : > { %v8639_v18 = vmax.f32 %v2374_v4, %v2398_v17 }
 0x601   : > { %11616 = vst [vmem:[#allocation5_spill] sm:$0xff] %v8639_v18  ;;  %2437 = vrot.lane.b32.xlu1 %v8639_v18, %s7556_s7  ;;  %2461 = vrot.lane.b32.xlu0 %v8639_v18, %s7558_s12 }
 0x606   : > { %v2386_v13 = vpop.permute.xlu2 %2385 }
 0x607   : > { %v8673_v3 = vmax.f32 %v2362_v11, %v2386_v13 }
 0x60e   : > { %v2392_v47 = vpop.permute.xlu2 %2391 }
 0x60f   : > { %v8683_v30 = vmax.f32 %v2368_v15, %v2392_v47 }
 0x614   : > { %v2400_v2 = vpop.permute.xlu0 %2399 }
 0x615   : > { %v8645_v1 = vmax.f32 %v2376_v43, %v2400_v2 }
 0x617   : > { %11617 = vst [vmem:[#allocation6_spill] sm:$0xff] %v8645_v1  ;;  %2463 = vrot.lane.b32.xlu1 %v8645_v1, %s7558_s12  ;;  %2487 = vrot.lane.b32.xlu0 %v8645_v1, %s7559_s13 }
 0x618   : > { %2439 = vrot.lane.b32.xlu2 %v8645_v1, %s7556_s7  ;;  %v2390_v20 = vpop.permute.xlu1 %2389 }
 0x619   : > { %v8665_v26 = vmax.f32 %v2366_v28, %v2390_v20 }
 0x61c   : > { %v2388_v52 = vpop.permute.xlu0 %2387 }
 0x61d   : > { %v8685_v0 = vmax.f32 %v2364_v7, %v2388_v52 }
 0x61f   : > { %2509 = vrot.lane.b32.xlu1 %v8639_v18, %s7560_s14  ;;  %2533 = vrot.lane.b32.xlu0 %v8639_v18, %s7561_s15  ;;  %v2707_v9 = vrot.slane %v8685_v0, 4 }
 0x620   : > { %2485 = vrot.lane.b32.xlu2 %v8639_v18, %s7559_s13  ;;  %v2396_v24 = vpop.permute.xlu1 %2395 }
 0x621   : > { %v8675_v22 = vmax.f32 %v2372_v61, %v2396_v24 }
 0x623   : > { %11618 = vst [vmem:[#allocation7_spill] sm:$0xff] %v8675_v22 }
 0x624   : > { %v2394_v40 = vpop.permute.xlu0 %2393 }
 0x625   : > { %v8693_v41 = vmax.f32 %v2370_v10, %v2394_v40 }
 0x627   : > { %2535 = vrot.lane.b32.xlu1 %v8645_v1, %s7561_s15  ;;  %2559 = vrot.lane.b32.xlu0 %v8645_v1, %s7562_s16  ;;  %11619 = vst [vmem:[#allocation8_spill] sm:$0xff] %v8693_v41 }
 0x628   : > { %2511 = vrot.lane.b32.xlu2 %v8645_v1, %s7560_s14 }
 0x62f   : > { %2581 = vrot.lane.b32.xlu1 %v8639_v18, %s7563_s17  ;;  %2429 = vrot.lane.b32.xlu0 %v8665_v26, %s7556_s7 }
 0x630   : > { %2557 = vrot.lane.b32.xlu2 %v8639_v18, %s7562_s16 }
 0x637   : > { %2435 = vrot.lane.b32.xlu0 %v8675_v22, %s7556_s7  ;;  %2425 = vrot.lane.b32.xlu1 %v8673_v3, %s7556_s7 }
 0x638   : > { %2583 = vrot.lane.b32.xlu2 %v8645_v1, %s7563_s17 }
 0x63f   : > { %2449 = vrot.lane.b32.xlu0 %v8673_v3, %s7558_s12  ;;  %2431 = vrot.lane.b32.xlu1 %v8683_v30, %s7556_s7 }
 0x640   : > { %2427 = vrot.lane.b32.xlu2 %v8685_v0, %s7556_s7 }
 0x647   : > { %2455 = vrot.lane.b32.xlu0 %v8683_v30, %s7558_s12  ;;  %2451 = vrot.lane.b32.xlu1 %v8685_v0, %s7558_s12 }
 0x648   : > { %2433 = vrot.lane.b32.xlu2 %v8693_v41, %s7556_s7 }
 0x64f   : > { %2475 = vrot.lane.b32.xlu0 %v8685_v0, %s7559_s13  ;;  %2457 = vrot.lane.b32.xlu1 %v8693_v41, %s7558_s12 }
 0x650   : > { %2453 = vrot.lane.b32.xlu2 %v8665_v26, %s7558_s12 }
 0x657   : > { %2481 = vrot.lane.b32.xlu0 %v8693_v41, %s7559_s13  ;;  %2477 = vrot.lane.b32.xlu1 %v8665_v26, %s7559_s13 }
 0x658   : > { %2459 = vrot.lane.b32.xlu2 %v8675_v22, %s7558_s12 }
 0x65f   : > { %2501 = vrot.lane.b32.xlu0 %v8665_v26, %s7560_s14  ;;  %2483 = vrot.lane.b32.xlu1 %v8675_v22, %s7559_s13 }
 0x660   : > { %2473 = vrot.lane.b32.xlu2 %v8673_v3, %s7559_s13 }
 0x667   : > { %2507 = vrot.lane.b32.xlu0 %v8675_v22, %s7560_s14  ;;  %2497 = vrot.lane.b32.xlu1 %v8673_v3, %s7560_s14 }
 0x668   : > { %2479 = vrot.lane.b32.xlu2 %v8683_v30, %s7559_s13 }
 0x66f   : > { %2521 = vrot.lane.b32.xlu0 %v8673_v3, %s7561_s15  ;;  %2503 = vrot.lane.b32.xlu1 %v8683_v30, %s7560_s14 }
 0x670   : > { %2499 = vrot.lane.b32.xlu2 %v8685_v0, %s7560_s14 }
 0x672   : > { %v8731_v33 = vpop.permute.xlu2 %2439 }
 0x673   : > { %11620 = vst [vmem:[#allocation9_spill] sm:$0xff] %v8731_v33  ;;  %v8747_v6 = vpop.permute.xlu1 %2437  ;;  %v8749_v35 = vpop.permute.xlu0 %2461  ;;  %v2819_v33 = vrot.slane %v8665_v26, 4 }
 0x674   : > { %11622 = vst [vmem:[#allocation11_spill] sm:$0xff] %v8747_v6 }
 0x675   : > { %11623 = vst [vmem:[#allocation12_spill] sm:$0xff] %v8749_v35 }
 0x677   : > { %2527 = vrot.lane.b32.xlu0 %v8683_v30, %s7561_s15  ;;  %2523 = vrot.lane.b32.xlu1 %v8685_v0, %s7561_s15 }
 0x678   : > { %2505 = vrot.lane.b32.xlu2 %v8693_v41, %s7560_s14 }
 0x67a   : > { %v8739_v19 = vpop.permute.xlu2 %2485 }
 0x67b   : > { %11621 = vst [vmem:[#allocation10_spill] sm:$0xff] %v8739_v19 }
 0x67f   : > { %2547 = vrot.lane.b32.xlu0 %v8685_v0, %s7562_s16  ;;  %2529 = vrot.lane.b32.xlu1 %v8693_v41, %s7561_s15 }
 0x680   : > { %2525 = vrot.lane.b32.xlu2 %v8665_v26, %s7561_s15 }
 0x682   : > { %v8751_v34 = vpop.permute.xlu2 %2511 }
 0x683   : > { %11624 = vst [vmem:[#allocation13_spill] sm:$0xff] %v8751_v34  ;;  %v2595_v34 = vrot.slane %v8673_v3, 4 }
 0x687   : > { %2553 = vrot.lane.b32.xlu0 %v8693_v41, %s7562_s16  ;;  %2549 = vrot.lane.b32.xlu1 %v8665_v26, %s7562_s16 }
 0x688   : > { %2531 = vrot.lane.b32.xlu2 %v8675_v22, %s7561_s15 }
 0x689   : > { %v8759_v36 = vpop.permute.xlu1 %2463  ;;  %v8761_v38 = vpop.permute.xlu0 %2487 }
 0x68a   : > { %11625 = vst [vmem:[#allocation14_spill] sm:$0xff] %v8759_v36  ;;  %v8763_v37 = vpop.permute.xlu2 %2557 }
 0x68b   : > { %11626 = vst [vmem:[#allocation15_spill] sm:$0xff] %v8761_v38 }
 0x68c   : > { %11627 = vst [vmem:[#allocation16_spill] sm:$0xff] %v8763_v37 }
 0x68f   : > { %2573 = vrot.lane.b32.xlu0 %v8665_v26, %s7563_s17  ;;  %2555 = vrot.lane.b32.xlu1 %v8675_v22, %s7562_s16 }
 0x690   : > { %2545 = vrot.lane.b32.xlu2 %v8673_v3, %s7562_s16 }
 0x691   : > { %v8771_v42 = vpop.permute.xlu1 %2509  ;;  %v8773_v45 = vpop.permute.xlu0 %2533 }
 0x692   : > { %11628 = vst [vmem:[#allocation17_spill] sm:$0xff] %v8771_v42  ;;  %v8775_v27 = vpop.permute.xlu2 %2583 }
 0x693   : > { %11629 = vst [vmem:[#allocation18_spill] sm:$0xff] %v8773_v45 }
 0x694   : > { %11630 = vst [vmem:[#allocation19_spill] sm:$0xff] %v8775_v27 }
 0x697   : > { %2579 = vrot.lane.b32.xlu0 %v8675_v22, %s7563_s17  ;;  %2569 = vrot.lane.b32.xlu1 %v8673_v3, %s7563_s17 }
 0x698   : > { %2551 = vrot.lane.b32.xlu2 %v8683_v30, %s7562_s16 }
 0x699   : > { %v8783_v48 = vpop.permute.xlu1 %2535  ;;  %v8785_v32 = vpop.permute.xlu0 %2559 }
 0x69a   : > { %11631 = vst [vmem:[#allocation20_spill] sm:$0xff] %v8783_v48  ;;  %v8787_v46 = vpop.permute.xlu2 %2427 }
 0x69b   : > { %11632 = vst [vmem:[#allocation21_spill] sm:$0xff] %v8785_v32  ;;  %v2719_v15 = vrot.slane %v8787_v46, 4 }
 0x69f   : > { %2575 = vrot.lane.b32.xlu1 %v8683_v30, %s7563_s17 }
 0x6a0   : > { %2571 = vrot.lane.b32.xlu2 %v8685_v0, %s7563_s17 }
 0x6a1   : > { %v8793_v49 = vpop.permute.xlu1 %2581  ;;  %v8795_v50 = vpop.permute.xlu0 %2429 }
 0x6a2   : > { %11633 = vst [vmem:[#allocation22_spill] sm:$0xff] %v8793_v49  ;;  %v8797_v31 = vpop.permute.xlu2 %2433  ;;  %v2831_v1 = vrot.slane %v8795_v50, 4 }
 0x6a3   : > { %11634 = vst [vmem:[#allocation23_spill] sm:$0xff] %v8797_v31 }
 0x6a8   : > { %2577 = vrot.lane.b32.xlu2 %v8693_v41, %s7563_s17 }
 0x6a9   : > { %v8801_v29 = vpop.permute.xlu0 %2435  ;;  %v8803_v51 = vpop.permute.xlu1 %2425 }
 0x6aa   : > { %11635 = vst [vmem:[#allocation24_spill] sm:$0xff] %v8801_v29  ;;  %v8805_v21 = vpop.permute.xlu2 %2453  ;;  %v2607_v36 = vrot.slane %v8803_v51, 4 }
 0x6b1   : > { %v8807_v39 = vpop.permute.xlu0 %2449  ;;  %v8809_v53 = vpop.permute.xlu1 %2431 }
 0x6b2   : > { %v8811_v43 = vpop.permute.xlu2 %2459  ;;  %v2943_v29 = vrot.slane %v8809_v53, 4 }
 0x6b3   : > { %11636 = vst [vmem:[#allocation25_spill] sm:$0xff] %v8811_v43 }
 0x6b9   : > { %v8813_v44 = vpop.permute.xlu0 %2455  ;;  %v8815_v54 = vpop.permute.xlu1 %2451 }
 0x6ba   : > { %v8817_v14 = vpop.permute.xlu2 %2473  ;;  %v2708_v17 = vsel %vm232_vm0, %v8815_v54, %v2707_v9 }
 0x6bb   : > { %v8866_v24 = vperm.slane %v2708_v17, %v7624_v5  ;;  %v2820_v17 = vsel %vm232_vm0, %v8805_v21, %v2819_v33 }
 0x6bc   : > { %v8898_v6 = vperm.slane %v2820_v17, %v7624_v5 }
 0x6c1   : > { %v8819_v55 = vpop.permute.xlu0 %2475  ;;  %v8821_v4 = vpop.permute.xlu1 %2457 }
 0x6c2   : > { %11637 = vst [vmem:[#allocation26_spill] sm:$0xff] %v8821_v4  ;;  %v8823_v56 = vpop.permute.xlu2 %2479  ;;  %v2720_v2 = vsel %vm232_vm0, %v8819_v55, %v2719_v15  ;;  %v2767_v15 = vrot.slane %v8866_v24, 4 }
 0x6c3   : > { %v8872_v40 = vperm.slane %v2720_v2, %v7624_v5 }
 0x6c5   : > { %v2768_v38 = vsel %vm232_vm0, %v8872_v40, %v2767_v15  ;;  %v2605_v15 = vrot.slane %v8817_v14, 4 }
 0x6c6   : > { %v8910_v19 = vperm.slane %v2768_v38, %v7657_v25 }
 0x6c7   : > { %v2606_v49 = vsel %vm232_vm0, %v2605_v15, %v8803_v51 }
 0x6c9   : > { %v8825_v57 = vpop.permute.xlu0 %2481  ;;  %v8827_v58 = vpop.permute.xlu1 %2477 }
 0x6ca   : > { %v8829_v59 = vpop.permute.xlu2 %2499  ;;  %v2832_v32 = vsel %vm232_vm0, %v8827_v58, %v2831_v1 }
 0x6cb   : > { %v2731_v47 = vrot.slane %v8829_v59, 4  ;;  %v8914_v37 = vperm.slane %v2832_v32, %v7624_v5  ;;  %v2931_v32 = vrot.slane %v8683_v30, 4 }
 0x6d1   : > { %v8831_v28 = vpop.permute.xlu0 %2501  ;;  %v8833_v60 = vpop.permute.xlu1 %2483 }
 0x6d2   : > { %11638 = vst [vmem:[#allocation27_spill] sm:$0xff] %v8833_v60  ;;  %v8835_v23 = vpop.permute.xlu2 %2505  ;;  %v2843_v1 = vrot.slane %v8831_v28, 4 }
 0x6d3   : > { %11639 = vst [vmem:[#allocation28_spill] sm:$0xff] %v8835_v23 }
 0x6d9   : > { %v8837_v62 = vpop.permute.xlu0 %2507  ;;  %v8839_v63 = vpop.permute.xlu1 %2497 }
 0x6da   : > { %11640 = vst [vmem:[#allocation29_spill] sm:$0xff] %v8837_v62  ;;  %v8841_v7 = vpop.permute.xlu2 %2525 }
 0x6e1   : > { %v8843_v8 = vpop.permute.xlu0 %2521  ;;  %v8845_v11 = vpop.permute.xlu1 %2503 }
 0x6e2   : > { %v8847_v12 = vpop.permute.xlu2 %2531 }
 0x6e3   : > { %11641 = vst [vmem:[#allocation30_spill] sm:$0xff] %v8847_v12  ;;  %v2612_v12 = vperm.slane %v2606_v49, %v7624_v5 }
 0x6e9   : > { %v8849_v61 = vpop.permute.xlu0 %2527  ;;  %v8851_v16 = vpop.permute.xlu1 %2523 }
 0x6ea   : > { %v8853_v10 = vpop.permute.xlu2 %2545  ;;  %v2743_v48 = vrot.slane %v8851_v16, 4 }
 0x6eb   : > { %v2617_v22 = vrot.slane %v8853_v10, 4 }
 0x6f1   : > { %v8861_v20 = vpop.permute.xlu0 %2547  ;;  %v8863_v13 = vpop.permute.xlu1 %2529 }
 0x6f2   : > { %v8868_v52 = vpop.permute.xlu2 %2551  ;;  %v2732_v9 = vsel %vm232_vm0, %v8861_v20, %v2731_v47  ;;  %v2596_v47 = vsel %vm232_vm0, %v8807_v39, %v2595_v34  ;;  %v2608_v34 = vsel %vm232_vm0, %v8817_v14, %v2607_v36  ;;  %v2879_v14 = vrot.slane %v8898_v6, 4 }
 0x6f3   : > { %v8885_v2 = vperm.slane %v2732_v9, %v7624_v5  ;;  %v2593_v9 = vrot.slane %v8807_v39, 4  ;;  %v2604_v17 = vperm.slane %v2596_v47, %v7624_v5  ;;  %v2616_v38 = vperm.slane %v2608_v34, %v7624_v5 }
 0x6f4   : > { %v2880_v62 = vsel %vm232_vm0, %v8914_v37, %v2879_v14 }
 0x6f5   : > { %v2791_v39 = vrot.slane %v8885_v2, 4  ;;  %v2655_v35 = vrot.slane %v2604_v17, 4  ;;  %v2653_v43 = vrot.slane %v2616_v38, 4 }
 0x6f7   : > { %v2656_v14 = vsel %vm232_vm0, %v2616_v38, %v2655_v35 }
 0x6f9   : > { %v8893_v27 = vpop.permute.xlu0 %2553  ;;  %v8895_v33 = vpop.permute.xlu1 %2549 }
 0x6fa   : > { %v8902_v42 = vpop.permute.xlu2 %2571  ;;  %v2844_v36 = vsel %vm232_vm0, %v8895_v33, %v2843_v1  ;;  %v2815_v1 = vrot.slane %v8910_v19, 4 }
 0x6fb   : > { %v2744_v45 = vsel %vm232_vm0, %v8902_v42, %v2743_v48  ;;  %v2594_v48 = vsel %vm232_vm0, %v2593_v9, %v8673_v3  ;;  %v2855_v3 = vrot.slane %v8841_v7, 4  ;;  %v8939_v9 = vperm.slane %v2844_v36, %v7624_v5 }
 0x6fc   : > { %v8918_v18 = vperm.slane %v2744_v45, %v7624_v5  ;;  %v2600_v34 = vperm.slane %v2594_v48, %v7624_v5  ;;  %v2619_v48 = vrot.slane %v8839_v63, 4  ;;  %v2741_v38 = vrot.slane %v8902_v42, 4 }
 0x6fd   : > { %v2903_v49 = vrot.slane %v8939_v9, 4 }
 0x6fe   : > { %v2792_v47 = vsel %vm232_vm0, %v8918_v18, %v2791_v39  ;;  %v2932_v39 = vsel %vm232_vm0, %v8813_v44, %v2931_v32  ;;  %v2643_v60 = vrot.slane %v2600_v34, 4 }
 0x6ff   : > { %v8932_v45 = vperm.slane %v2792_v47, %v7657_v25 }
 0x701   : > { %v8944_v51 = vpop.permute.xlu0 %2573  ;;  %v8946_v15 = vpop.permute.xlu1 %2555  ;;  %v2816_v47 = vsel %vm232_vm0, %v8932_v45, %v2815_v1  ;;  %v8963_v1 = vperm.slane %v2932_v39, %v7624_v5  ;;  %v2618_v39 = vsel %vm232_vm0, %v2617_v22, %v8839_v63 }
 0x702   : > { %11642 = vst [vmem:[#allocation31_spill] sm:$0xff] %v8946_v15  ;;  %v2856_v36 = vsel %vm232_vm0, %v8944_v51, %v2855_v3  ;;  %v8960_v15 = vperm.slane %v2880_v62, %v7657_v25  ;;  %v3535_v35 = vsel %vm3489_vm10, %v2816_v47, -inf  ;;  %v2620_v3 = vsel %vm232_vm0, %v8853_v10, %v2619_v48 }
 0x703   : > { %v8957_v32 = vperm.slane %v2856_v36, %v7624_v5  ;;  %11644 = vst [vmem:[#allocation33_spill] sm:$0xff] %v8963_v1  ;;  %3536 = vmax.xlane.f32.xlu2 %v3535_v35  ;;  %v8971_v36 = vperm.slane %v2656_v14, %v7657_v25  ;;  %v2641_v62 = vrot.slane %v2612_v12, 4  ;;  %v2944_v47 = vsel %vm232_vm0, %v8823_v56, %v2943_v29 }
 0x704   : > { %11643 = vst [vmem:[#allocation32_spill] sm:$0xff] %v8960_v15  ;;  %v2927_v10 = vrot.slane %v8960_v15, 4  ;;  %v2991_v14 = vrot.slane %v8963_v1, 4  ;;  %v2717_v48 = vrot.slane %v8819_v55, 4  ;;  %v2631_v35 = vrot.slane %v8843_v8, 4 }
 0x705   : > { %v2904_v41 = vsel %vm232_vm0, %v8957_v32, %v2903_v49  ;;  %v2628_v22 = vperm.slane %v2620_v3, %v7624_v5  ;;  %v2624_v63 = vperm.slane %v2618_v39, %v7624_v5  ;;  %v2703_v42 = vrot.slane %v8971_v36, 4 }
 0x706   : > { %v8981_v4 = vperm.slane %v2904_v41, %v7657_v25  ;;  %v2654_v41 = vsel %vm232_vm0, %v2653_v43, %v2604_v17  ;;  %v8994_v15 = vperm.slane %v2944_v47, %v7624_v5  ;;  %v2642_v31 = vsel %vm232_vm0, %v2641_v62, %v2600_v34 }
 0x707   : > { %v2955_v3 = vrot.slane %v8845_v11, 4  ;;  %v2742_v39 = vsel %vm232_vm0, %v2741_v38, %v8851_v16  ;;  %v2718_v43 = vsel %vm232_vm0, %v2717_v48, %v8787_v46  ;;  %v2679_v17 = vrot.slane %v2628_v22, 4 }
 0x708   : > { %v2928_v29 = vsel %vm232_vm0, %v8981_v4, %v2927_v10  ;;  %v2667_v34 = vrot.slane %v2624_v63, 4  ;;  %v9012_v38 = vperm.slane %v2642_v31, %v7657_v25  ;;  %v2729_v46 = vrot.slane %v8861_v20, 4 }
 0x709   : > { %v2570_v49 = vpop.permute.xlu1 %2569  ;;  %v3559_v10 = vsel %vm3489_vm10, %v2928_v29, -inf  ;;  %v2956_v62 = vsel %vm232_vm0, %v8868_v52, %v2955_v3  ;;  %v9018_v48 = vperm.slane %v2742_v39, %v7624_v5  ;;  %v2967_v31 = vrot.slane %v8849_v61, 4 }
 0x70a   : > { %v2629_v23 = vrot.slane %v2570_v49, 4  ;;  %v2632_v55 = vsel %vm232_vm0, %v2570_v49, %v2631_v35  ;;  %3560 = vmax.xlane.f32.xlu1 %v3559_v10  ;;  %v2644_v35 = vsel %vm232_vm0, %v2612_v12, %v2643_v60  ;;  %v2992_v49 = vsel %vm232_vm0, %v8994_v15, %v2991_v14 }
 0x70b   : > { %v2640_v1 = vperm.slane %v2632_v55, %v7624_v5  ;;  %v9027_v55 = vperm.slane %v2956_v62, %v7624_v5  ;;  %v2652_v14 = vperm.slane %v2644_v35, %v7657_v25  ;;  %v2691_v10 = vrot.slane %v9012_v38, 4 }
 0x70c   : > { %v2630_v47 = vsel %vm232_vm0, %v2629_v23, %v8843_v8 }
 0x70d   : > { %v2636_v16 = vperm.slane %v2630_v47, %v7624_v5  ;;  %v2680_v23 = vsel %vm232_vm0, %v2640_v1, %v2679_v17  ;;  %v2677_v8 = vrot.slane %v2640_v1, 4  ;;  %v9038_v17 = vperm.slane %v2992_v49, %v7657_v25 }
 0x70e   : > { %v9022_v12 = vperm.slane %v2680_v23, %v7657_v25  ;;  %v2730_v47 = vsel %vm232_vm0, %v2729_v46, %v8829_v59  ;;  %v2705_v23 = vrot.slane %v8815_v54, 4  ;;  %v3015_v59 = vrot.slane %v9027_v55, 4 }
 0x70f   : > { %v2665_v60 = vrot.slane %v2636_v16, 4  ;;  %v2668_v29 = vsel %vm232_vm0, %v2636_v16, %v2667_v34  ;;  %v2777_v16 = vrot.slane %v9018_v48, 4  ;;  %v2678_v49 = vsel %vm232_vm0, %v2677_v8, %v2628_v22 }
 0x710   : > { %v2676_v20 = vperm.slane %v2668_v29, %v7657_v25  ;;  %v2704_v39 = vsel %vm232_vm0, %v9022_v12, %v2703_v42  ;;  %v2724_v29 = vperm.slane %v2718_v43, %v7624_v5  ;;  %v2684_v22 = vperm.slane %v2678_v49, %v7657_v25 }
 0x711   : > { %v9031_v3 = vpop.permute.xlu1 %2575  ;;  %v2666_v1 = vsel %vm232_vm0, %v2665_v60, %v2624_v63  ;;  %v3511_v34 = vsel %vm3489_vm10, %v2704_v39, -inf  ;;  %v2660_v60 = vperm.slane %v2654_v41, %v7657_v25  ;;  %v3039_v41 = vrot.slane %v9038_v17, 4 }
 0x712   : > { %v2968_v35 = vsel %vm232_vm0, %v9031_v3, %v2967_v31  ;;  %v2672_v62 = vperm.slane %v2666_v1, %v7657_v25  ;;  %3512 = vmax.xlane.f32.xlu0 %v3511_v34  ;;  %v2693_v63 = vrot.slane %v2676_v20, 4  ;;  %v2736_v31 = vperm.slane %v2730_v47, %v7624_v5 }
 0x713   : > { %v9048_v42 = vperm.slane %v2968_v35, %v7624_v5  ;;  %v2699_v47 = vrot.slane %v2660_v60, 4  ;;  %v2753_v34 = vrot.slane %v2724_v29, 4 }
 0x714   : > { %v2692_v46 = vsel %vm232_vm0, %v2672_v62, %v2691_v10  ;;  %v2694_v1 = vsel %vm232_vm0, %v2693_v63, %v2652_v14  ;;  %v2778_v43 = vsel %vm232_vm0, %v2777_v16, %v2736_v31  ;;  %v2706_v10 = vsel %vm232_vm0, %v2705_v23, %v8685_v0 }
 0x715   : > { %v3493_v39 = vsel %vm3489_vm10, %v2692_v46, -inf  ;;  %v3496_v35 = vsel %vm3489_vm10, %v2694_v1, -inf  ;;  %v3016_v54 = vsel %vm232_vm0, %v9048_v42, %v3015_v59  ;;  %v2695_v46 = vrot.slane %v2652_v14, 4 }
 0x716   : > { %3494 = vmax.xlane.f32.xlu1 %v3493_v39  ;;  %3497 = vmax.xlane.f32.xlu2 %v3496_v35  ;;  %v9064_v8 = vperm.slane %v3016_v54, %v7657_v25  ;;  %v2700_v49 = vsel %vm232_vm0, %v2684_v22, %v2699_v47  ;;  %v2784_v39 = vperm.slane %v2778_v43, %v7657_v25  ;;  %v2689_v35 = vrot.slane %v2672_v62, 4 }
 0x717   : > { %v2712_v1 = vperm.slane %v2706_v10, %v7624_v5  ;;  %v2696_v16 = vsel %vm232_vm0, %v2676_v20, %v2695_v46  ;;  %v3505_v0 = vsel %vm3489_vm10, %v2700_v49, -inf  ;;  %v2701_v43 = vrot.slane %v9022_v12, 4 }
 0x718   : > { %v3040_v63 = vsel %vm232_vm0, %v9064_v8, %v3039_v41  ;;  %v3499_v54 = vsel %vm3489_vm10, %v2696_v16, -inf  ;;  %v2801_v14 = vrot.slane %v2784_v39, 4  ;;  %v2690_v47 = vsel %vm232_vm0, %v2689_v35, %v9012_v38 }
 0x719   : > { %v3583_v59 = vsel %vm3489_vm10, %v3040_v63, -inf  ;;  %v2754_v23 = vsel %vm232_vm0, %v2753_v34, %v2712_v1  ;;  %v2755_v41 = vrot.slane %v2712_v1, 4  ;;  %v2779_v63 = vrot.slane %v2736_v31, 4 }
 0x71a   : > { %3584 = vmax.xlane.f32.xlu0 %v3583_v59  ;;  %v2760_v10 = vperm.slane %v2754_v23, %v7657_v25  ;;  %v2829_v62 = vrot.slane %v8827_v58, 4  ;;  %v3490_v34 = vsel %vm3489_vm10, %v2690_v47, -inf  ;;  %v2841_v59 = vrot.slane %v8895_v33, 4 }
 0x71b   : > { %v2756_v20 = vsel %vm232_vm0, %v2724_v29, %v2755_v41  ;;  %v2702_v49 = vsel %vm232_vm0, %v2701_v43, %v8971_v36  ;;  %v2697_v38 = vrot.slane %v2684_v22, 4  ;;  %v2780_v12 = vsel %vm232_vm0, %v9018_v48, %v2779_v63 }
 0x71c   : > { %v2802_v46 = vsel %vm232_vm0, %v2801_v14, %v2760_v10  ;;  %v2789_v31 = vrot.slane %v8918_v18, 4  ;;  %v2853_v29 = vrot.slane %v8944_v51, 4  ;;  %v2764_v58 = vperm.slane %v2756_v20, %v7657_v25 }
 0x71d   : > { %v3514_v1 = vsel %vm3489_vm10, %v2802_v46, -inf  ;;  %v2830_v16 = vsel %vm232_vm0, %v2829_v62, %v8795_v50  ;;  %v3508_v33 = vsel %vm3489_vm10, %v2702_v49, -inf  ;;  %v2788_v36 = vperm.slane %v2780_v12, %v7657_v25 }
 0x71e   : > { %3506 = vmax.xlane.f32.xlu1 %v3505_v0  ;;  %3500 = vmax.xlane.f32.xlu2 %v3499_v54  ;;  %v2842_v22 = vsel %vm232_vm0, %v2841_v59, %v8831_v28  ;;  %v2698_v18 = vsel %vm232_vm0, %v2697_v38, %v2660_v60  ;;  %v2817_v51 = vrot.slane %v8805_v21, 4  ;;  %v2854_v48 = vsel %vm232_vm0, %v2853_v29, %v8841_v7 }
 0x71f   : > { %v2807_v35 = vrot.slane %v2764_v58, 4  ;;  %v2790_v50 = vsel %vm232_vm0, %v2789_v31, %v8885_v2  ;;  %v2836_v0 = vperm.slane %v2830_v16, %v7624_v5  ;;  %v2803_v23 = vrot.slane %v2760_v10, 4 }
 0x720   : > { %v2765_v54 = vrot.slane %v8872_v40, 4  ;;  %v2848_v14 = vperm.slane %v2842_v22, %v7624_v5  ;;  %v3502_v28 = vsel %vm3489_vm10, %v2698_v18, -inf  ;;  %v2860_v21 = vperm.slane %v2854_v48, %v7624_v5 }
 0x721   : > { %v2808_v60 = vsel %vm232_vm0, %v2788_v36, %v2807_v35  ;;  %v2804_v7 = vsel %vm232_vm0, %v2784_v39, %v2803_v23  ;;  %v2805_v41 = vrot.slane %v2788_v36, 4  ;;  %v2796_v47 = vperm.slane %v2790_v50, %v7657_v25 }
 0x722   : > { %3491 = vmax.xlane.f32.xlu0 %v3490_v34  ;;  %v2818_v2 = vsel %vm232_vm0, %v2817_v51, %v8665_v26  ;;  %v2865_v43 = vrot.slane %v2836_v0, 4  ;;  %v3523_v40 = vsel %vm3489_vm10, %v2808_v60, -inf  ;;  %v2891_v10 = vrot.slane %v2848_v14, 4 }
 0x723   : > { %v3517_v63 = vsel %vm3489_vm10, %v2804_v7, -inf  ;;  %v2766_v20 = vsel %vm232_vm0, %v2765_v54, %v8866_v24  ;;  %v2813_v62 = vrot.slane %v8932_v45, 4  ;;  %v2824_v39 = vperm.slane %v2818_v2, %v7624_v5 }
 0x724   : > { %v2889_v34 = vrot.slane %v2860_v21, 4  ;;  %v2806_v46 = vsel %vm232_vm0, %v2805_v41, %v2764_v58  ;;  %v2809_v59 = vrot.slane %v2796_v47, 4  ;;  %v2892_v26 = vsel %vm232_vm0, %v2860_v21, %v2891_v10 }
 0x725   : > { %v2965_v49 = vrot.slane %v9031_v3, 4  ;;  %v2772_v38 = vperm.slane %v2766_v20, %v7657_v25  ;;  %v2866_v12 = vsel %vm232_vm0, %v2865_v43, %v2824_v39  ;;  %v2953_v31 = vrot.slane %v8868_v52, 4  ;;  %v9169_v43 = vpop.permute.xlu2 %2577 }
 0x726   : > { %3515 = vmax.xlane.f32.xlu1 %v3514_v1  ;;  %3509 = vmax.xlane.f32.xlu2 %v3508_v33  ;;  %v3520_v24 = vsel %vm3489_vm10, %v2806_v46, -inf  ;;  %v2814_v45 = vsel %vm232_vm0, %v2813_v62, %v8910_v19  ;;  %v2901_v29 = vrot.slane %v8957_v32, 4  ;;  %v9137_v1 = vperm.slane %v2892_v26, %v7657_v25 }
 0x727   : > { %v2810_v58 = vsel %vm232_vm0, %v2809_v59, %v2772_v38  ;;  %v2890_v3 = vsel %vm232_vm0, %v2889_v34, %v2848_v14  ;;  %v2867_v16 = vrot.slane %v2824_v39, 4  ;;  %v2872_v33 = vperm.slane %v2866_v12, %v7657_v25 }
 0x728   : > { %v2877_v52 = vrot.slane %v8914_v37, 4  ;;  %v2966_v36 = vsel %vm232_vm0, %v2965_v49, %v8849_v61  ;;  %v3532_v19 = vsel %vm3489_vm10, %v2814_v45, -inf  ;;  %v2811_v22 = vrot.slane %v2772_v38, 4 }
 0x729   : > { %v2954_v32 = vsel %vm232_vm0, %v2953_v31, %v8845_v11  ;;  %v3526_v18 = vsel %vm3489_vm10, %v2810_v58, -inf  ;;  %v2868_v51 = vsel %vm232_vm0, %v2836_v0, %v2867_v16  ;;  %v2896_v48 = vperm.slane %v2890_v3, %v7657_v25 }
 0x72a   : > { %3503 = vmax.xlane.f32.xlu0 %v3502_v28  ;;  %v2941_v35 = vrot.slane %v8823_v56, 4  ;;  %v2812_v37 = vsel %vm232_vm0, %v2796_v47, %v2811_v22  ;;  %v2917_v61 = vrot.slane %v9137_v1, 4  ;;  %v2902_v50 = vsel %vm232_vm0, %v2901_v29, %v8939_v9 }
 0x72b   : > { %v2929_v23 = vrot.slane %v8813_v44, 4  ;;  %v2972_v11 = vperm.slane %v2966_v36, %v7624_v5  ;;  %v2915_v54 = vrot.slane %v2872_v33, 4  ;;  %v2960_v14 = vperm.slane %v2954_v32, %v7624_v5 }
 0x72c   : > { %v2876_v0 = vperm.slane %v2868_v51, %v7657_v25  ;;  %v3529_v28 = vsel %vm3489_vm10, %v2812_v37, -inf  ;;  %v2878_v60 = vsel %vm232_vm0, %v2877_v52, %v8898_v6  ;;  %v2908_v21 = vperm.slane %v2902_v50, %v7657_v25  ;;  %v11645_v37 = vld [vmem:[#allocation33_spill] sm:$0xff]  ;;  %v11646_v50 = vld [vmem:[#allocation23_spill] sm:$0xff] }
 0x72d   : > { %v2916_v56 = vsel %vm232_vm0, %v2896_v48, %v2915_v54  ;;  %v2942_v9 = vsel %vm232_vm0, %v2941_v35, %v8809_v53  ;;  %v2913_v7 = vrot.slane %v2896_v48, 4  ;;  %v2930_v41 = vsel %vm232_vm0, %v2929_v23, %v8683_v30 }
 0x72e   : > { %3524 = vmax.xlane.f32.xlu1 %v3523_v40  ;;  %3518 = vmax.xlane.f32.xlu2 %v3517_v63  ;;  %v2918_v44 = vsel %vm232_vm0, %v2917_v61, %v2876_v0  ;;  %v3001_v47 = vrot.slane %v2972_v11, 4  ;;  %v3003_v2 = vrot.slane %v2960_v14, 4  ;;  %v3541_v40 = vsel %vm3489_vm10, %v2916_v56, -inf }
 0x72f   : > { %v2884_v6 = vperm.slane %v2878_v60, %v7657_v25  ;;  %v2948_v10 = vperm.slane %v2942_v9, %v7624_v5  ;;  %v3544_v63 = vsel %vm3489_vm10, %v2918_v44, -inf  ;;  %v2921_v53 = vrot.slane %v2908_v21, 4  ;;  %v11648_v60 = vld [vmem:[#allocation26_spill] sm:$0xff] }
 0x730   : > { %v2936_v20 = vperm.slane %v2930_v41, %v7624_v5  ;;  %v2914_v62 = vsel %vm232_vm0, %v2913_v7, %v2872_v33  ;;  %v3004_v30 = vsel %vm232_vm0, %v2972_v11, %v3003_v2  ;;  %v3077_v39 = vrot.slane %v9169_v43, 4  ;;  %v11647_v11 = vld [vmem:[#allocation28_spill] sm:$0xff] }
 0x731   : > { %v3002_v34 = vsel %vm232_vm0, %v3001_v47, %v2960_v14  ;;  %v2923_v46 = vrot.slane %v2884_v6, 4  ;;  %v2977_v59 = vrot.slane %v2948_v10, 4  ;;  %v3538_v26 = vsel %vm3489_vm10, %v2914_v62, -inf }
 0x732   : > { %3521 = vmax.xlane.f32.xlu0 %v3520_v24  ;;  %v2922_v49 = vsel %vm232_vm0, %v2921_v53, %v2884_v6  ;;  %v3012_v38 = vperm.slane %v3004_v30, %v7657_v25  ;;  %v2979_v12 = vrot.slane %v2936_v20, 4  ;;  %v9185_v24 = vperm.slane %v3002_v34, %v7657_v25  ;;  %v11650_v6 = vld [vmem:[#allocation8_spill] sm:$0xff] }
 0x733   : > { %v2924_v31 = vsel %vm232_vm0, %v2908_v21, %v2923_v46  ;;  %v2989_v45 = vrot.slane %v8994_v15, 4  ;;  %v3078_v29 = vsel %vm232_vm0, %v3077_v39, %v8863_v13  ;;  %v3053_v58 = vrot.slane %v8825_v57, 4 }
 0x734   : > { %v3550_v3 = vsel %vm3489_vm10, %v2922_v49, -inf  ;;  %v2919_v16 = vrot.slane %v2876_v0, 4  ;;  %v2980_v33 = vsel %vm232_vm0, %v2948_v10, %v2979_v12  ;;  %v3065_v52 = vrot.slane %v8893_v27, 4 }
 0x735   : > { %v3553_v36 = vsel %vm3489_vm10, %v2924_v31, -inf  ;;  %v3029_v22 = vrot.slane %v3012_v38, 4  ;;  %v9197_v15 = vperm.slane %v3078_v29, %v7624_v5  ;;  %v3013_v32 = vrot.slane %v9048_v42, 4 }
 0x736   : > { %3533 = vmax.xlane.f32.xlu1 %v3532_v19  ;;  %3527 = vmax.xlane.f32.xlu2 %v3526_v18  ;;  %v2978_v19 = vsel %vm232_vm0, %v2977_v59, %v2936_v20  ;;  %v2920_v18 = vsel %vm232_vm0, %v9137_v1, %v2919_v16  ;;  %v3025_v51 = vrot.slane %v9185_v24, 4  ;;  %v2988_v48 = vperm.slane %v2980_v33, %v7657_v25 }
 0x737   : > { %v2984_v35 = vperm.slane %v2978_v19, %v7657_v25  ;;  %v2990_v61 = vsel %vm232_vm0, %v2989_v45, %v11645_v37  ;;  %v3054_v23 = vsel %vm232_vm0, %v3053_v58, %v11646_v50  ;;  %v3066_v54 = vsel %vm232_vm0, %v3065_v52, %v11647_v11  ;;  %v11652_v37 = vld [vmem:[#allocation25_spill] sm:$0xff] }
 0x738   : > { %v3547_v42 = vsel %vm3489_vm10, %v2920_v18, -inf  ;;  %v3030_v14 = vsel %vm232_vm0, %v3029_v22, %v2988_v48  ;;  %v3113_v1 = vrot.slane %v9197_v15, 4  ;;  %v3014_v56 = vsel %vm232_vm0, %v3013_v32, %v9027_v55  ;;  %v2580_v32 = vpop.permute.xlu0 %2579 }
 0x739   : > { %v3026_v0 = vsel %vm232_vm0, %v3025_v51, %v2984_v35  ;;  %v3041_v21 = vrot.slane %v11648_v60, 4  ;;  %v9220_v9 = vperm.slane %v2990_v61, %v7657_v25  ;;  %v3060_v44 = vperm.slane %v3054_v23, %v7624_v5  ;;  %v11651_v51 = vld [vmem:[#allocation27_spill] sm:$0xff] }
 0x73a   : > { %3530 = vmax.xlane.f32.xlu0 %v3529_v28  ;;  %v2925_v28 = vrot.slane %v8981_v4, 4  ;;  %v3072_v7 = vperm.slane %v3066_v54, %v7624_v5  ;;  %v3568_v41 = vsel %vm3489_vm10, %v3030_v14, -inf  ;;  %v3562_v47 = vsel %vm3489_vm10, %v3026_v0, -inf  ;;  %v11649_v4 = vld [vmem:[#allocation32_spill] sm:$0xff] }
 0x73b   : > { %v3020_v2 = vperm.slane %v3014_v56, %v7657_v25  ;;  %v3042_v10 = vsel %vm232_vm0, %v3041_v21, %v11650_v6  ;;  %v3089_v53 = vrot.slane %v3060_v44, 4  ;;  %v3031_v20 = vrot.slane %v2988_v48, 4  ;;  %v11653_v56 = vld [vmem:[#allocation24_spill] sm:$0xff] }
 0x73c   : > { %v2926_v55 = vsel %vm232_vm0, %v2925_v28, %v11649_v4  ;;  %v3048_v34 = vperm.slane %v3042_v10, %v7624_v5  ;;  %v3079_v46 = vrot.slane %v8863_v13, 4  ;;  %v3027_v31 = vrot.slane %v2984_v35, 4 }
 0x73d   : > { %v3556_v62 = vsel %vm3489_vm10, %v2926_v55, -inf  ;;  %v3032_v59 = vsel %vm232_vm0, %v3012_v38, %v3031_v20  ;;  %v3043_v38 = vrot.slane %v11650_v6, 4  ;;  %v3037_v16 = vrot.slane %v9064_v8, 4  ;;  %v11656_v20 = vld [vmem:[#allocation31_spill] sm:$0xff] }
 0x73e   : > { %3542 = vmax.xlane.f32.xlu1 %v3541_v40  ;;  %3545 = vmax.xlane.f32.xlu2 %v3544_v63  ;;  %v3114_v40 = vsel %vm232_vm0, %v3113_v1, %v3072_v7  ;;  %v3035_v63 = vrot.slane %v9220_v9, 4  ;;  %v3080_v49 = vsel %vm232_vm0, %v9169_v43, %v3079_v46  ;;  %v3090_v45 = vsel %vm232_vm0, %v3089_v53, %v3048_v34 }
 0x73f   : > { %v9236_v39 = vperm.slane %v3114_v40, %v7657_v25  ;;  %v3571_v58 = vsel %vm3489_vm10, %v3032_v59, -inf  ;;  %v3028_v43 = vsel %vm232_vm0, %v9185_v24, %v3027_v31  ;;  %v3055_v33 = vrot.slane %v11646_v50, 4 }
 0x740   : > { %v3036_v30 = vsel %vm232_vm0, %v3020_v2, %v3035_v63  ;;  %v3088_v52 = vperm.slane %v3080_v49, %v7624_v5  ;;  %v3115_v22 = vrot.slane %v3072_v7, 4  ;;  %v3165_v8 = vrot.slane %v11651_v51, 4 }
 0x741   : > { %v3577_v12 = vsel %vm3489_vm10, %v3036_v30, -inf  ;;  %v3137_v13 = vrot.slane %v9236_v39, 4  ;;  %v3056_v24 = vsel %vm232_vm0, %v8825_v57, %v3055_v33  ;;  %v3565_v48 = vsel %vm3489_vm10, %v3028_v43, -inf }
 0x742   : > { %3539 = vmax.xlane.f32.xlu0 %v3538_v26  ;;  %v3067_v26 = vrot.slane %v11647_v11, 4  ;;  %v3153_v61 = vrot.slane %v11652_v37, 4  ;;  %v3038_v50 = vsel %vm232_vm0, %v3037_v16, %v9038_v17  ;;  %v3033_v23 = vrot.slane %v3020_v2, 4  ;;  %v11655_v2 = vld [vmem:[#allocation30_spill] sm:$0xff] }
 0x743   : > { %v3116_v11 = vsel %vm232_vm0, %v9197_v15, %v3115_v22  ;;  %v3189_v57 = vrot.slane %v2580_v32, 4  ;;  %v3064_v1 = vperm.slane %v3056_v24, %v7624_v5  ;;  %v3580_v17 = vsel %vm3489_vm10, %v3038_v50, -inf  ;;  %v11654_v15 = vld [vmem:[#allocation7_spill] sm:$0xff] }
 0x744   : > { %v3068_v29 = vsel %vm232_vm0, %v8893_v27, %v3067_v26  ;;  %v3096_v27 = vperm.slane %v3090_v45, %v7657_v25  ;;  %v3124_v21 = vperm.slane %v3116_v11, %v7657_v25  ;;  %v3191_v63 = vrot.slane %v11655_v2, 4 }
 0x745   : > { %v3076_v19 = vperm.slane %v3068_v29, %v7624_v5  ;;  %v3190_v4 = vsel %vm232_vm0, %v3189_v57, %v11655_v2  ;;  %v3101_v6 = vrot.slane %v3064_v1, 4 }
 0x746   : > { %3551 = vmax.xlane.f32.xlu1 %v3550_v3  ;;  %3554 = vmax.xlane.f32.xlu2 %v3553_v36  ;;  %v3091_v3 = vrot.slane %v3048_v34, 4  ;;  %v3044_v36 = vsel %vm232_vm0, %v11648_v60, %v3043_v38  ;;  %v3138_v35 = vsel %vm232_vm0, %v3137_v13, %v3096_v27  ;;  %v3166_v60 = vsel %vm232_vm0, %v3165_v8, %v11653_v56  ;;  %v11657_v13 = vld [vmem:[#allocation29_spill] sm:$0xff] }
 0x747   : > { %v3052_v54 = vperm.slane %v3044_v36, %v7624_v5  ;;  %v3127_v0 = vrot.slane %v3076_v19, 4  ;;  %v3586_v28 = vsel %vm3489_vm10, %v3138_v35, -inf  ;;  %v9288_v10 = vperm.slane %v3166_v60, %v7624_v5 }
 0x748   : > { %v3092_v18 = vsel %vm232_vm0, %v3060_v44, %v3091_v3  ;;  %v3154_v44 = vsel %vm232_vm0, %v3153_v61, %v11654_v15  ;;  %v3139_v53 = vrot.slane %v3096_v27, 4  ;;  %v3196_v46 = vperm.slane %v3190_v4, %v7624_v5 }
 0x749   : > { %v3100_v14 = vperm.slane %v3092_v18, %v7657_v25  ;;  %v3128_v7 = vsel %vm232_vm0, %v3088_v52, %v3127_v0  ;;  %v3141_v26 = vrot.slane %v3124_v21, 4  ;;  %v9301_v31 = vperm.slane %v3154_v44, %v7624_v5 }
 0x74a   : > { %3548 = vmax.xlane.f32.xlu0 %v3547_v42  ;;  %v3125_v42 = vrot.slane %v3088_v52, 4  ;;  %v3136_v34 = vperm.slane %v3128_v7, %v7657_v25  ;;  %v3140_v59 = vsel %vm232_vm0, %v9236_v39, %v3139_v53  ;;  %v3201_v45 = vrot.slane %v9288_v10, 4 }
 0x74b   : > { %v3143_v55 = vrot.slane %v3100_v14, 4  ;;  %v3589_v3 = vsel %vm3489_vm10, %v3140_v59, -inf  ;;  %v3102_v39 = vsel %vm232_vm0, %v3101_v6, %v3052_v54  ;;  %v3225_v33 = vrot.slane %v3196_v46, 4  ;;  %v11661_v59 = vld [vmem:[#allocation16_spill] sm:$0xff] }
 0x74c   : > { %v3126_v40 = vsel %vm232_vm0, %v3125_v42, %v3076_v19  ;;  %v3149_v43 = vrot.slane %v3136_v34, 4  ;;  %v3142_v52 = vsel %vm232_vm0, %v3141_v26, %v3100_v14  ;;  %v3167_v36 = vrot.slane %v11653_v56, 4 }
 0x74d   : > { %v3132_v49 = vperm.slane %v3126_v40, %v7657_v25  ;;  %v3179_v19 = vrot.slane %v11657_v13, 4  ;;  %v3108_v18 = vperm.slane %v3102_v39, %v7657_v25  ;;  %v3202_v24 = vsel %vm232_vm0, %v3201_v45, %v9301_v31 }
 0x74e   : > { %3569 = vmax.xlane.f32.xlu1 %v3568_v41  ;;  %3563 = vmax.xlane.f32.xlu2 %v3562_v47  ;;  %v3034_v41 = vsel %vm232_vm0, %v3033_v23, %v9220_v9  ;;  %v3103_v47 = vrot.slane %v3052_v54, 4  ;;  %v3144_v9 = vsel %vm232_vm0, %v3124_v21, %v3143_v55  ;;  %v3168_v8 = vsel %vm232_vm0, %v11651_v51, %v3167_v36  ;;  %v11658_v21 = vld [vmem:[#allocation12_spill] sm:$0xff] }
 0x74f   : > { %v3574_v30 = vsel %vm3489_vm10, %v3034_v41, -inf  ;;  %v3595_v29 = vsel %vm3489_vm10, %v3144_v9, -inf  ;;  %v3145_v27 = vrot.slane %v3132_v49, 4  ;;  %v3592_v35 = vsel %vm3489_vm10, %v3142_v52, -inf }
 0x750   : > { %v3208_v54 = vperm.slane %v3202_v24, %v7657_v25  ;;  %v3176_v42 = vperm.slane %v3168_v8, %v7624_v5  ;;  %v3147_v14 = vrot.slane %v3108_v18, 4  ;;  %v3265_v44 = vrot.slane %v11658_v21, 4 }
 0x751   : > { %v3146_v23 = vsel %vm232_vm0, %v3145_v27, %v3108_v18  ;;  %v3289_v26 = vrot.slane %v11661_v59, 4 }
 0x752   : > { %3557 = vmax.xlane.f32.xlu0 %v3556_v62  ;;  %v3177_v62 = vrot.slane %v11656_v20, 4  ;;  %v3148_v60 = vsel %vm232_vm0, %v3132_v49, %v3147_v14  ;;  %v3251_v41 = vrot.slane %v3208_v54, 4  ;;  %v3213_v4 = vrot.slane %v3176_v42, 4 }
 0x753   : > { %v3601_v40 = vsel %vm3489_vm10, %v3148_v60, -inf  ;;  %v3203_v49 = vrot.slane %v9301_v31, 4  ;;  %v7564_v14 = vmov 0.0  }
 0x754   : > { %v3178_v38 = vsel %vm232_vm0, %v3177_v62, %v11657_v13  ;;  %3683 = vst.msk [vmem:[#allocation3] sm:$0x1] %vm3682_vm11, %v7564_v14 }
 0x755   : > { %3691 = vst.msk [vmem:[#allocation3 + $0x9] sm:$0x1] %vm3682_vm11, %v7564_v14 }
 0x756   : > { %3578 = vmax.xlane.f32.xlu1 %v3577_v12  ;;  %3572 = vmax.xlane.f32.xlu2 %v3571_v58  ;;  %v3192_v12 = vsel %vm232_vm0, %v2580_v32, %v3191_v63  ;;  %v3104_v58 = vsel %vm232_vm0, %v3064_v1, %v3103_v47  ;;  %v3184_v32 = vperm.slane %v3178_v38, %v7624_v5  ;;  %v3155_v1 = vrot.slane %v11654_v15, 4  ;;  %v11659_v15 = vld [vmem:[#allocation22_spill] sm:$0xff]  ;;  %v11664_v38 = vld [vmem:[#allocation17_spill] sm:$0xff] }
 0x757   : > { %v9311_v16 = vperm.slane %v3192_v12, %v7624_v5  ;;  %v3112_v22 = vperm.slane %v3104_v58, %v7657_v25  ;;  %v3301_v2 = vrot.slane %v11659_v15, 4  ;;  %v11662_v12 = vld [vmem:[#allocation10_spill] sm:$0xff]  ;;  %3700 = vst.msk [vmem:[#allocation3] sm:$0xff] %vm3699_vm12, %v7564_v14 }
 0x758   : > { %v3226_v11 = vsel %vm232_vm0, %v3225_v33, %v3184_v32  ;;  %v3227_v0 = vrot.slane %v3184_v32, 4  ;;  %v3156_v7 = vsel %vm232_vm0, %v11652_v37, %v3155_v1  ;;  %v3277_v45 = vrot.slane %v11662_v12, 4  ;;  %v11665_v33 = vld [vmem:[#allocation11_spill] sm:$0xff]  ;;  %3702 = vst.msk [vmem:[#allocation3 + $0x8] sm:$0x3] %vm3701_vm13, %v7564_v14 }
 0x759   : > { %v3150_v61 = vsel %vm232_vm0, %v3149_v43, %v3112_v22  ;;  %v3237_v50 = vrot.slane %v9311_v16, 4  ;;  %v3232_v56 = vperm.slane %v3226_v11, %v7657_v25  ;;  %v3151_v55 = vrot.slane %v3112_v22, 4  ;;  %3718 = vst.msk [vmem:[#allocation3] sm:$0xff] %vm3717_vm14, %v7564_v14 }
 0x75a   : > { %3566 = vmax.xlane.f32.xlu0 %v3565_v48  ;;  %v3180_v48 = vsel %vm232_vm0, %v11656_v20, %v3179_v19  ;;  %v3604_v57 = vsel %vm3489_vm10, %v3150_v61, -inf  ;;  %v3228_v47 = vsel %vm232_vm0, %v3196_v46, %v3227_v0  ;;  %v3164_v53 = vperm.slane %v3156_v7, %v7624_v5  ;;  %3720 = vst.msk [vmem:[#allocation3 + $0x8] sm:$0x3] %vm3719_vm15, %v7564_v14 }
 0x75b   : > { %v3188_v51 = vperm.slane %v3180_v48, %v7624_v5  ;;  %v3252_v6 = vsel %vm232_vm0, %v3232_v56, %v3251_v41  ;;  %v3152_v20 = vsel %vm232_vm0, %v3136_v34, %v3151_v55  ;;  %v3249_v37 = vrot.slane %v3232_v56, 4  ;;  %3684 = vst.msk [vmem:[#allocation3 + $0x10] sm:$0x1] %vm3682_vm11, %v7564_v14 }
 0x75c   : > { %v3236_v62 = vperm.slane %v3228_v47, %v7657_v25  ;;  %v3613_v13 = vsel %vm3489_vm10, %v3252_v6, -inf  ;;  %v3214_v34 = vsel %vm232_vm0, %v3213_v4, %v3164_v53  ;;  %v3607_v39 = vsel %vm3489_vm10, %v3152_v20, -inf  ;;  %v11666_v20 = vld [vmem:[#allocation19_spill] sm:$0xff]  ;;  %3685 = vst.msk [vmem:[#allocation3 + $0x20] sm:$0x1] %vm3682_vm11, %v7564_v14 }
 0x75d   : > { %v3204_v43 = vsel %vm232_vm0, %v9288_v10, %v3203_v49  ;;  %v3279_v52 = vrot.slane %v11665_v33, 4  ;;  %v3215_v27 = vrot.slane %v3164_v53, 4  ;;  %v3250_v36 = vsel %vm232_vm0, %v3249_v37, %v3208_v54  ;;  %3686 = vst.msk [vmem:[#allocation3 + $0x30] sm:$0x1] %vm3682_vm11, %v7564_v14 }
 0x75e   : > { %3587 = vmax.xlane.f32.xlu1 %v3586_v28  ;;  %3581 = vmax.xlane.f32.xlu2 %v3580_v17  ;;  %v3598_v28 = vsel %vm3489_vm10, %v3146_v23, -inf  ;;  %v3238_v17 = vsel %vm232_vm0, %v3237_v50, %v3188_v51  ;;  %v3253_v19 = vrot.slane %v3236_v62, 4  ;;  %v3239_v18 = vrot.slane %v3188_v51, 4  ;;  %3687 = vst.msk [vmem:[#allocation3 + $0x40] sm:$0x1] %vm3682_vm11, %v7564_v14 }
 0x75f   : > { %v9347_v63 = vperm.slane %v3238_v17, %v7657_v25  ;;  %v3220_v24 = vperm.slane %v3214_v34, %v7657_v25  ;;  %v3278_v10 = vsel %vm232_vm0, %v3277_v45, %v11665_v33  ;;  %v3216_v48 = vsel %vm232_vm0, %v3176_v42, %v3215_v27  ;;  %v11668_v34 = vld [vmem:[#allocation21_spill] sm:$0xff]  ;;  %v11670_v33 = vld [vmem:[#allocation15_spill] sm:$0xff]  ;;  %3688 = vst.msk [vmem:[#allocation3 + $0x50] sm:$0x1] %vm3682_vm11, %v7564_v14 }
 0x760   : > { %v3280_v61 = vsel %vm232_vm0, %v11662_v12, %v3279_v52  ;;  %v3610_v50 = vsel %vm3489_vm10, %v3250_v36, -inf  ;;  %v3240_v11 = vsel %vm232_vm0, %v9311_v16, %v3239_v18  ;;  %v3284_v51 = vperm.slane %v3278_v10, %v7624_v5  ;;  %3689 = vst.msk [vmem:[#allocation3 + $0x60] sm:$0x1] %vm3682_vm11, %v7564_v14  ;;  %v11671_v10 = vld [vmem:[#allocation13_spill] sm:$0xff] }
 0x761   : > { %v3257_v31 = vrot.slane %v9347_v63, 4  ;;  %v3248_v60 = vperm.slane %v3240_v11, %v7657_v25  ;;  %v9408_v41 = vperm.slane %v3280_v61, %v7624_v5  ;;  %v3259_v53 = vrot.slane %v3220_v24, 4  ;;  %3690 = vst.msk [vmem:[#allocation3 + $0x70] sm:$0x1] %vm3682_vm11, %v7564_v14  ;;  %v11672_v11 = vld [vmem:[#allocation6_spill] sm:$0xff] }
 0x762   : > { %3575 = vmax.xlane.f32.xlu0 %v3574_v30  ;;  %v11660_v30 = vld [vmem:[#allocation5_spill] sm:$0xff]  ;;  %v3313_v55 = vrot.slane %v3284_v51, 4  ;;  %v3389_v52 = vrot.slane %v11670_v33, 4  ;;  %3692 = vst.msk [vmem:[#allocation3 + $0x19] sm:$0x1] %vm3682_vm11, %v7564_v14 }
 0x763   : > { %v3267_v9 = vrot.slane %v11660_v30, 4  ;;  %v3266_v46 = vsel %vm232_vm0, %v3265_v44, %v11660_v30  ;;  %v3258_v23 = vsel %vm232_vm0, %v3257_v31, %v3220_v24  ;;  %v3261_v49 = vrot.slane %v3248_v60, 4  ;;  %3693 = vst.msk [vmem:[#allocation3 + $0x29] sm:$0x1] %vm3682_vm11, %v7564_v14 }
 0x764   : > { %v9371_v22 = vperm.slane %v3266_v46, %v7624_v5  ;;  %v3622_v0 = vsel %vm3489_vm10, %v3258_v23, -inf  ;;  %3694 = vst.msk [vmem:[#allocation3 + $0x39] sm:$0x1] %vm3682_vm11, %v7564_v14 }
 0x765   : > { %v3268_v17 = vsel %vm232_vm0, %v11658_v21, %v3267_v9  ;;  %3695 = vst.msk [vmem:[#allocation3 + $0x49] sm:$0x1] %vm3682_vm11, %v7564_v14 }
 0x766   : > { %3596 = vmax.xlane.f32.xlu1 %v3595_v29  ;;  %3590 = vmax.xlane.f32.xlu2 %v3589_v3  ;;  %v11663_v29 = vld [vmem:[#allocation18_spill] sm:$0xff]  ;;  %v3290_v3 = vsel %vm232_vm0, %v3289_v26, %v11664_v38  ;;  %v3315_v21 = vrot.slane %v9371_v22, 4  ;;  %v3260_v26 = vsel %vm232_vm0, %v9347_v63, %v3259_v53  ;;  %v9443_v45 = vperm.slane %v3268_v17, %v7624_v5 }
 0x767   : > { %v3302_v58 = vsel %vm232_vm0, %v3301_v2, %v11663_v29  ;;  %v3296_v8 = vperm.slane %v3290_v3, %v7624_v5  ;;  %v11669_v63 = vld [vmem:[#allocation14_spill] sm:$0xff]  ;;  %3696 = vst.msk [vmem:[#allocation3 + $0x59] sm:$0x1] %vm3682_vm11, %v7564_v14 }
 0x768   : > { %v3308_v32 = vperm.slane %v3302_v58, %v7624_v5  ;;  %v11667_v58 = vld [vmem:[#allocation20_spill] sm:$0xff]  ;;  %v3377_v3 = vrot.slane %v11669_v63, 4  ;;  %v3316_v31 = vsel %vm232_vm0, %v3284_v51, %v3315_v21  ;;  %v11673_v51 = vld [vmem:[#allocation9_spill] sm:$0xff]  ;;  %3697 = vst.msk [vmem:[#allocation3 + $0x69] sm:$0x1] %vm3682_vm11, %v7564_v14 }
 0x769   : > { %v3339_v1 = vrot.slane %v3296_v8, 4  ;;  %v3391_v17 = vrot.slane %v11673_v51, 4  ;;  %3698 = vst.msk [vmem:[#allocation3 + $0x79] sm:$0x1] %vm3682_vm11, %v7564_v14  ;;  %vm3876_vm11 = vcmask 1046534  }
 0x76a   : > { %3593 = vmax.xlane.f32.xlu0 %v3592_v35  ;;  %v3212_v35 = vperm.slane %v3204_v43, %v7657_v25  ;;  %v3337_v42 = vrot.slane %v3308_v32, 4  ;;  %v3314_v43 = vsel %vm232_vm0, %v3313_v55, %v9371_v22  ;;  %3703 = vst.msk [vmem:[#allocation3 + $0x10] sm:$0xff] %vm3699_vm12, %v7564_v14 }
 0x76b   : > { %v3340_v7 = vsel %vm232_vm0, %v3308_v32, %v3339_v1  ;;  %3704 = vst.msk [vmem:[#allocation3 + $0x18] sm:$0x3] %vm3701_vm13, %v7564_v14 }
 0x76c   : > { %v3254_v54 = vsel %vm232_vm0, %v3253_v19, %v3212_v35  ;;  %v3255_v16 = vrot.slane %v3212_v35, 4  ;;  %v3338_v4 = vsel %vm232_vm0, %v3337_v42, %v3296_v8  ;;  %v9428_v9 = vperm.slane %v3340_v7, %v7657_v25  ;;  %3705 = vst.msk [vmem:[#allocation3 + $0x20] sm:$0xff] %vm3699_vm12, %v7564_v14 }
 0x76d   : > { %v3616_v56 = vsel %vm3489_vm10, %v3254_v54, -inf  ;;  %v9438_v12 = vperm.slane %v3338_v4, %v7657_v25  ;;  %v3625_v19 = vsel %vm3489_vm10, %v3260_v26, -inf  ;;  %v3378_v54 = vsel %vm232_vm0, %v3377_v3, %v11672_v11  ;;  %3706 = vst.msk [vmem:[#allocation3 + $0x28] sm:$0x3] %vm3701_vm13, %v7564_v14 }
 0x76e   : > { %3605 = vmax.xlane.f32.xlu1 %v3604_v57  ;;  %3599 = vmax.xlane.f32.xlu2 %v3598_v28  ;;  %v9389_v57 = vperm.slane %v3216_v48, %v7657_v25  ;;  %v3303_v28 = vrot.slane %v11663_v29, 4  ;;  %v3256_v44 = vsel %vm232_vm0, %v3236_v62, %v3255_v16  ;;  %v3325_v29 = vrot.slane %v9408_v41, 4  ;;  %3707 = vst.msk [vmem:[#allocation3 + $0x30] sm:$0xff] %vm3699_vm12, %v7564_v14 }
 0x76f   : > { %v3619_v62 = vsel %vm3489_vm10, %v3256_v44, -inf  ;;  %v3365_v32 = vrot.slane %v9428_v9, 4  ;;  %v9479_v48 = vperm.slane %v3316_v31, %v7657_v25  ;;  %v3390_v42 = vsel %vm232_vm0, %v3389_v52, %v11673_v51  ;;  %3708 = vst.msk [vmem:[#allocation3 + $0x38] sm:$0x3] %vm3701_vm13, %v7564_v14 }
 0x770   : > { %v3304_v47 = vsel %vm232_vm0, %v11659_v15, %v3303_v28  ;;  %v3263_v2 = vrot.slane %v9389_v57, 4  ;;  %v3413_v15 = vrot.slane %v11666_v20, 4  ;;  %v3262_v24 = vsel %vm232_vm0, %v3261_v49, %v9389_v57  ;;  %3709 = vst.msk [vmem:[#allocation3 + $0x40] sm:$0xff] %vm3699_vm12, %v7564_v14 }
 0x771   : > { %v9433_v46 = vperm.slane %v3304_v47, %v7624_v5  ;;  %v3326_v23 = vsel %vm232_vm0, %v3325_v29, %v9443_v45  ;;  %v3628_v1 = vsel %vm3489_vm10, %v3262_v24, -inf  ;;  %v3327_v44 = vrot.slane %v9443_v45, 4  ;;  %3710 = vst.msk [vmem:[#allocation3 + $0x48] sm:$0x3] %vm3701_vm13, %v7564_v14 }
 0x772   : > { %3602 = vmax.xlane.f32.xlu0 %v3601_v40  ;;  %v3291_v40 = vrot.slane %v11664_v38, 4  ;;  %v3264_v30 = vsel %vm232_vm0, %v3248_v60, %v3263_v2  ;;  %v3401_v38 = vrot.slane %v11668_v34, 4  ;;  %v3379_v7 = vrot.slane %v11672_v11, 4  ;;  %3711 = vst.msk [vmem:[#allocation3 + $0x50] sm:$0xff] %vm3699_vm12, %v7564_v14 }
 0x773   : > { %v3349_v18 = vrot.slane %v9433_v46, 4  ;;  %v9514_v47 = vperm.slane %v3326_v23, %v7657_v25  ;;  %v3396_v2 = vperm.slane %v3390_v42, %v7624_v5  ;;  %v3799_v4 = vlaneseq  ;;  %3712 = vst.msk [vmem:[#allocation3 + $0x58] sm:$0x3] %vm3701_vm13, %v7564_v14 }
 0x774   : > { %v3292_v27 = vsel %vm232_vm0, %v11661_v59, %v3291_v40  ;;  %v3361_v59 = vrot.slane %v9438_v12, 4  ;;  %v3402_v8 = vsel %vm232_vm0, %v3401_v38, %v11671_v10  ;;  %v3384_v40 = vperm.slane %v3378_v54, %v7624_v5  ;;  %3713 = vst.msk [vmem:[#allocation3 + $0x60] sm:$0xff] %vm3699_vm12, %v7564_v14 }
 0x775   : > { %v3300_v35 = vperm.slane %v3292_v27, %v7624_v5  ;;  %v9504_v28 = vperm.slane %v3402_v8, %v7624_v5  ;;  %v3403_v26 = vrot.slane %v11671_v10, 4  ;;  %v3415_v49 = vrot.slane %v11667_v58, 4  ;;  %3714 = vst.msk [vmem:[#allocation3 + $0x68] sm:$0x3] %vm3701_vm13, %v7564_v14 }
 0x776   : > { %3614 = vmax.xlane.f32.xlu1 %v3613_v13  ;;  %3608 = vmax.xlane.f32.xlu2 %v3607_v39  ;;  %v9423_v37 = vpop.xlane.xlu2 %3536  ;;  %v3414_v13 = vsel %vm232_vm0, %v3413_v15, %v11667_v58  ;;  %v3631_v39 = vsel %vm3489_vm10, %v3264_v30, -inf  ;;  %v3367_v38 = vrot.slane %v9479_v48, 4  ;;  %v3371_v3 = vrot.slane %v9514_v47, 4  ;;  %3715 = vst.msk [vmem:[#allocation3 + $0x70] sm:$0xff] %vm3699_vm12, %v7564_v14 }
 0x777   : > { %v9468_v22 = vperm.slane %v3414_v13, %v7624_v5  ;;  %v3350_v60 = vsel %vm232_vm0, %v3349_v18, %v3300_v35  ;;  %v3351_v53 = vrot.slane %v3300_v35, 4  ;;  %v3328_v58 = vsel %vm232_vm0, %v9408_v41, %v3327_v44  ;;  %3716 = vst.msk [vmem:[#allocation3 + $0x78] sm:$0x3] %vm3701_vm13, %v7564_v14 }
 0x778   : > { %v3356_v30 = vperm.slane %v3350_v60, %v7657_v25  ;;  %v9550_v31 = vand.u32 127, %v3799_v4  ;;  %v3427_v52 = vrot.slane %v3384_v40, 4  ;;  %v3392_v10 = vsel %vm232_vm0, %v11670_v33, %v3391_v17  ;;  %3721 = vst.msk [vmem:[#allocation3 + $0x10] sm:$0xff] %vm3717_vm14, %v7564_v14 }
 0x779   : > { %v3449_v16 = vrot.slane %v9468_v22, 4  ;;  %v3352_v13 = vsel %vm232_vm0, %v9433_v46, %v3351_v53  ;;  %3722 = vst.msk [vmem:[#allocation3 + $0x18] sm:$0x3] %vm3719_vm15, %v7564_v14  ;;  %vm3878_vm12 = vcmask 1047559   ;;  %vm3937_vm13 = vcmask 72712  }
 0x77a   : > { %3611 = vmax.xlane.f32.xlu0 %v3610_v50  ;;  %v3320_v50 = vperm.slane %v3314_v43, %v7657_v25  ;;  %v3404_v43 = vsel %vm232_vm0, %v11668_v34, %v3403_v26  ;;  %v3369_v18 = vrot.slane %v3356_v30, 4  ;;  %v9570_v24 = vperm.slane %v3352_v13, %v7657_v25  ;;  %3723 = vst.msk [vmem:[#allocation3 + $0x20] sm:$0xff] %vm3717_vm14, %v7564_v14 }
 0x77b   : > { %v3450_v29 = vsel %vm232_vm0, %v3449_v16, %v9504_v28  ;;  %v3412_v8 = vperm.slane %v3404_v43, %v7624_v5  ;;  %v3428_v51 = vsel %vm232_vm0, %v3396_v2, %v3427_v52  ;;  %v9606_v16 = vperm.slane %v3392_v10, %v7624_v5  ;;  %3724 = vst.msk [vmem:[#allocation3 + $0x28] sm:$0x3] %vm3719_vm15, %v7564_v14 }
 0x77c   : > { %v3363_v55 = vrot.slane %v3320_v50, 4  ;;  %v9563_v34 = vperm.slane %v3450_v29, %v7657_v25  ;;  %v9618_v44 = vperm.slane %v3428_v51, %v7657_v25  ;;  %3725 = vst.msk [vmem:[#allocation3 + $0x30] sm:$0xff] %vm3717_vm14, %v7564_v14 }
 0x77d   : > { %v9418_v6 = vpop.xlane.xlu1 %3560  ;;  %3726 = vst.msk [vmem:[#allocation3 + $0x38] sm:$0x3] %vm3719_vm15, %v7564_v14 }
 0x77e   : > { %3623 = vmax.xlane.f32.xlu1 %v3622_v0  ;;  %3617 = vmax.xlane.f32.xlu2 %v3616_v56  ;;  %v3366_v0 = vsel %vm232_vm0, %v3365_v32, %v9479_v48  ;;  %v3362_v56 = vsel %vm232_vm0, %v3361_v59, %v3320_v50  ;;  %v3364_v45 = vsel %vm232_vm0, %v9438_v12, %v3363_v55  ;;  %v9587_v48 = vadd.s32 4294967295, %v9550_v31 }
 0x77f   : > { %v3640_v21 = vsel %vm3489_vm10, %v3366_v0, -inf  ;;  %v3380_v12 = vsel %vm232_vm0, %v11669_v63, %v3379_v7  ;;  %v3637_v27 = vsel %vm3489_vm10, %v3364_v45, -inf  ;;  %v3416_v63 = vsel %vm232_vm0, %v11666_v20, %v3415_v49  ;;  %3727 = vst.msk [vmem:[#allocation3 + $0x40] sm:$0xff] %vm3717_vm14, %v7564_v14 }
 0x780   : > { %v3368_v32 = vsel %vm232_vm0, %v9428_v9, %v3367_v38  ;;  %v9575_v59 = vperm.slane %v3380_v12, %v7624_v5  ;;  %v9581_v20 = vperm.slane %v3328_v58, %v7657_v25  ;;  %v3451_v9 = vrot.slane %v9504_v28, 4  ;;  %3728 = vst.msk [vmem:[#allocation3 + $0x48] sm:$0x3] %vm3719_vm15, %v7564_v14 }
 0x781   : > { %v3424_v50 = vperm.slane %v3416_v63, %v7624_v5  ;;  %v3643_v11 = vsel %vm3489_vm10, %v3368_v32, -inf  ;;  %v3473_v54 = vrot.slane %v9563_v34, 4  ;;  %v3373_v0 = vrot.slane %v9570_v24, 4  ;;  %3729 = vst.msk [vmem:[#allocation3 + $0x50] sm:$0xff] %vm3717_vm14, %v7564_v14 }
 0x782   : > { %3620 = vmax.xlane.f32.xlu0 %v3619_v62  ;;  %v3634_v62 = vsel %vm3489_vm10, %v3362_v56, -inf  ;;  %v3463_v28 = vrot.slane %v3412_v8, 4  ;;  %v3452_v7 = vsel %vm232_vm0, %v9468_v22, %v3451_v9  ;;  %v3375_v22 = vrot.slane %v9581_v20, 4  ;;  %3730 = vst.msk [vmem:[#allocation3 + $0x58] sm:$0x3] %vm3719_vm15, %v7564_v14 }
 0x783   : > { %v3461_v55 = vrot.slane %v3424_v50, 4  ;;  %v3374_v53 = vsel %vm232_vm0, %v3373_v0, %v9581_v20  ;;  %v3460_v29 = vperm.slane %v3452_v7, %v7657_v25  ;;  %v3479_v58 = vrot.slane %v9618_v44, 4  ;;  %3731 = vst.msk [vmem:[#allocation3 + $0x60] sm:$0xff] %vm3717_vm14, %v7564_v14 }
 0x784   : > { %v3464_v49 = vsel %vm232_vm0, %v3424_v50, %v3463_v28  ;;  %v3376_v43 = vsel %vm232_vm0, %v9570_v24, %v3375_v22  ;;  %3732 = vst.msk [vmem:[#allocation3 + $0x68] sm:$0x3] %vm3719_vm15, %v7564_v14 }
 0x785   : > { %v9461_v36 = vpop.xlane.xlu0 %3512  ;;  %v3462_v12 = vsel %vm232_vm0, %v3461_v55, %v3412_v8  ;;  %v3655_v8 = vsel %vm3489_vm10, %v3376_v43, -inf  ;;  %3733 = vst.msk [vmem:[#allocation3 + $0x70] sm:$0xff] %vm3717_vm14, %v7564_v14  ;;  %vm4097_vm14 = vcmask 195584  }
 0x786   : > { %3632 = vmax.xlane.f32.xlu1 %v3631_v39  ;;  %3626 = vmax.xlane.f32.xlu2 %v3625_v19  ;;  %v3425_v39 = vrot.slane %v3396_v2, 4  ;;  %v3372_v19 = vsel %vm232_vm0, %v3356_v30, %v3371_v3  ;;  %v3437_v30 = vrot.slane %v9606_v16, 4  ;;  %v3652_v3 = vsel %vm3489_vm10, %v3374_v53, -inf  ;;  %3734 = vst.msk [vmem:[#allocation3 + $0x78] sm:$0x3] %vm3719_vm15, %v7564_v14 }
 0x787   : > { %v3649_v35 = vsel %vm3489_vm10, %v3372_v19, -inf  ;;  %vm4100_vm15 = vcmask 326656  }
 0x788   : > { %v3426_v33 = vsel %vm232_vm0, %v3425_v39, %v3384_v40 }
 0x789   : > { %v9484_v61 = vpop.xlane.xlu1 %3494  ;;  %v9495_v57 = vpop.xlane.xlu2 %3497  ;;  %v3432_v60 = vperm.slane %v3426_v33, %v7657_v25 }
 0x78a   : > { %3629 = vmax.xlane.f32.xlu0 %v3628_v1  ;;  %v3370_v1 = vsel %vm232_vm0, %v3369_v18, %v9514_v47  ;;  %v3803_v56 = vperm.slane %v9484_v61, %v9587_v48  ;;  %v3804_v40 = vperm.slane %v9495_v57, %v9587_v48  ;;  %v3809_v18 = vperm.slane %v9461_v36, %v9587_v48 }
 0x78b   : > { %v3646_v2 = vsel %vm3489_vm10, %v3370_v1, -inf  ;;  %v3475_v26 = vrot.slane %v3432_v60, 4  ;;  %v3468_v36 = vperm.slane %v3462_v12, %v7657_v25 }
 0x78d   : > { %v9523_v15 = vpop.xlane.xlu0 %3584  ;;  %v3476_v9 = vsel %vm232_vm0, %v9563_v34, %v3475_v26  ;;  %v3481_v0 = vrot.slane %v3468_v36, 4 }
 0x78e   : > { %3641 = vmax.xlane.f32.xlu1 %v3640_v21  ;;  %3635 = vmax.xlane.f32.xlu2 %v3634_v62  ;;  %v3474_v21 = vsel %vm232_vm0, %v3473_v54, %v3432_v60  ;;  %v3439_v62 = vrot.slane %v9575_v59, 4  ;;  %v3661_v34 = vsel %vm3489_vm10, %v3476_v9, -inf  ;;  %v3438_v54 = vsel %vm232_vm0, %v3437_v30, %v9575_v59 }
 0x78f   : > { %v3658_v45 = vsel %vm3489_vm10, %v3474_v21, -inf  ;;  %v3444_v60 = vperm.slane %v3438_v54, %v7657_v25 }
 0x791   : > { %v9552_v46 = vpop.xlane.xlu1 %3506  ;;  %v9556_v41 = vpop.xlane.xlu2 %3500  ;;  %v3483_v53 = vrot.slane %v3444_v60, 4 }
 0x792   : > { %3638 = vmax.xlane.f32.xlu0 %v3637_v27  ;;  %v3805_v13 = vperm.slane %v9556_v41, %v9587_v48  ;;  %v3807_v52 = vperm.slane %v9552_v46, %v9587_v48  ;;  %v9662_v27 = vperm.slane %v3464_v49, %v7657_v25  ;;  %v3480_v46 = vsel %vm232_vm0, %v3460_v29, %v3479_v58 }
 0x793   : > { %v3667_v50 = vsel %vm3489_vm10, %v3480_v46, -inf  ;;  %v3484_v14 = vsel %vm232_vm0, %v3468_v36, %v3483_v53 }
 0x794   : > { %v3485_v51 = vrot.slane %v9662_v27, 4  ;;  %v3673_v12 = vsel %vm3489_vm10, %v3484_v14, -inf }
 0x795   : > { %v3492_v23 = vpop.xlane.xlu0 %3491 }
 0x796   : > { %3650 = vmax.xlane.f32.xlu1 %v3649_v35  ;;  %v3802_v42 = vperm.slane %v3492_v23, %v9587_v48  ;;  %3644 = vmax.xlane.f32.xlu2 %v3643_v11  ;;  %v3477_v35 = vrot.slane %v3460_v29, 4  ;;  %v3440_v23 = vsel %vm232_vm0, %v9606_v16, %v3439_v62 }
 0x797   : > { %v3448_v28 = vperm.slane %v3440_v23, %v7657_v25 }
 0x798   : > { %v3867_v47 = vsel %vm3866_vm5, %v3803_v56, %v3802_v42  ;;  %v3478_v1 = vsel %vm232_vm0, %v3477_v35, %v9618_v44 }
 0x799   : > { %v9613_v17 = vpop.xlane.xlu1 %3515  ;;  %v3510_v61 = vpop.xlane.xlu2 %3509  ;;  %v3869_v57 = vsel %vm3868_vm6, %v3804_v40, %v3867_v47  ;;  %v3664_v7 = vsel %vm3489_vm10, %v3478_v1, -inf  ;;  %v3486_v47 = vsel %vm232_vm0, %v3485_v51, %v3448_v28 }
 0x79a   : > { %3647 = vmax.xlane.f32.xlu0 %v3646_v2  ;;  %v3871_v41 = vsel %vm3870_vm7, %v3805_v13, %v3869_v57  ;;  %v3808_v19 = vperm.slane %v3510_v61, %v9587_v48  ;;  %v3810_v59 = vperm.slane %v9613_v17, %v9587_v48  ;;  %v3482_v17 = vsel %vm232_vm0, %v3481_v0, %v3444_v60 }
 0x79b   : > { %v3676_v40 = vsel %vm3489_vm10, %v3486_v47, -inf  ;;  %v3670_v62 = vsel %vm3489_vm10, %v3482_v17, -inf }
 0x79d   : > { %v3504_v38 = vpop.xlane.xlu0 %3503 }
 0x79e   : > { %3659 = vmax.xlane.f32.xlu1 %v3658_v45  ;;  %v3806_v39 = vperm.slane %v3504_v38, %v9587_v48  ;;  %3653 = vmax.xlane.f32.xlu2 %v3652_v3  ;;  %v3817_v45 = vperm.slane %v9423_v37, %v9587_v48  ;;  %v3487_v38 = vrot.slane %v3448_v28, 4 }
 0x7a0   : > { %v3873_v63 = vsel %vm3872_vm8, %v3806_v39, %v3871_v41  ;;  %v3488_v43 = vsel %vm232_vm0, %v9662_v27, %v3487_v38 }
 0x7a1   : > { %v3525_v32 = vpop.xlane.xlu1 %3524  ;;  %v3875_v24 = vsel %vm3874_vm9, %v3807_v52, %v3873_v63  ;;  %v3519_v10 = vpop.xlane.xlu2 %3518  ;;  %v3679_v37 = vsel %vm3489_vm10, %v3488_v43, -inf  ;;  %vm4094_vm10 = vcmask 64512  }
 0x7a2   : > { %v3877_v20 = vsel %vm3876_vm11, %v3808_v19, %v3875_v24  ;;  %3656 = vmax.xlane.f32.xlu0 %v3655_v8  ;;  %v3811_v42 = vperm.slane %v3519_v10, %v9587_v48  ;;  %v3813_v55 = vperm.slane %v3525_v32, %v9587_v48 }
 0x7a3   : > { %v3879_v33 = vsel %vm3878_vm12, %v3809_v18, %v3877_v20 }
 0x7a4   : > { %3938 = vst.msk [vmem:[#allocation3 + $0x1] sm:$0xff] %vm3937_vm13, %v3879_v33  ;;  %v3880_v61 = vsel %vm3866_vm5, %v3811_v42, %v3810_v59 }
 0x7a5   : > { %v3522_v11 = vpop.xlane.xlu0 %3521 }
 0x7a6   : > { %3668 = vmax.xlane.f32.xlu1 %v3667_v50  ;;  %3662 = vmax.xlane.f32.xlu2 %v3661_v34  ;;  %v3812_v16 = vperm.slane %v3522_v11, %v9587_v48  ;;  %v3825_v11 = vperm.slane %v9418_v6, %v9587_v48 }
 0x7a8   : > { %v3881_v2 = vsel %vm3868_vm6, %v3812_v16, %v3880_v61 }
 0x7a9   : > { %v3534_v56 = vpop.xlane.xlu1 %3533  ;;  %v3528_v44 = vpop.xlane.xlu2 %3527  ;;  %v3882_v30 = vsel %vm3870_vm7, %v3813_v55, %v3881_v2 }
 0x7aa   : > { %3665 = vmax.xlane.f32.xlu0 %v3664_v7  ;;  %v3814_v21 = vperm.slane %v3528_v44, %v9587_v48  ;;  %v3816_v49 = vperm.slane %v3534_v56, %v9587_v48 }
 0x7ac   : > { %v3883_v57 = vsel %vm3872_vm8, %v3814_v21, %v3882_v30 }
 0x7ad   : > { %v3531_v22 = vpop.xlane.xlu0 %3530 }
 0x7ae   : > { %3677 = vmax.xlane.f32.xlu1 %v3676_v40  ;;  %v3815_v26 = vperm.slane %v3531_v22, %v9587_v48  ;;  %3671 = vmax.xlane.f32.xlu2 %v3670_v62  ;;  %v3833_v22 = vperm.slane %v9523_v15, %v9587_v48 }
 0x7b0   : > { %v3884_v29 = vsel %vm3874_vm9, %v3815_v26, %v3883_v57 }
 0x7b1   : > { %v3543_v13 = vpop.xlane.xlu1 %3542  ;;  %v3885_v3 = vsel %vm3876_vm11, %v3816_v49, %v3884_v29  ;;  %v3546_v58 = vpop.xlane.xlu2 %3545 }
 0x7b2   : > { %v3886_v39 = vsel %vm3878_vm12, %v3817_v45, %v3885_v3  ;;  %3674 = vmax.xlane.f32.xlu0 %v3673_v12  ;;  %v3819_v32 = vperm.slane %v3543_v13, %v9587_v48  ;;  %v3820_v24 = vperm.slane %v3546_v58, %v9587_v48 }
 0x7b3   : > { %3939 = vst.msk [vmem:[#allocation3 + $0x11] sm:$0xff] %vm3937_vm13, %v3886_v39 }
 0x7b5   : > { %v3540_v52 = vpop.xlane.xlu0 %3539 }
 0x7b6   : > { %3680 = vmax.xlane.f32.xlu2 %v3679_v37  ;;  %v3818_v19 = vperm.slane %v3540_v52, %v9587_v48 }
 0x7b8   : > { %v3887_v46 = vsel %vm3866_vm5, %v3819_v32, %v3818_v19 }
 0x7b9   : > { %v3552_v41 = vpop.xlane.xlu1 %3551  ;;  %v3555_v63 = vpop.xlane.xlu2 %3554  ;;  %v3888_v27 = vsel %vm3868_vm6, %v3820_v24, %v3887_v46 }
 0x7ba   : > { %v3822_v35 = vperm.slane %v3552_v41, %v9587_v48  ;;  %v3823_v33 = vperm.slane %v3555_v63, %v9587_v48 }
 0x7bd   : > { %v3549_v18 = vpop.xlane.xlu0 %3548 }
 0x7be   : > { %v3821_v10 = vperm.slane %v3549_v18, %v9587_v48 }
 0x7c0   : > { %v3889_v20 = vsel %vm3870_vm7, %v3821_v10, %v3888_v27 }
 0x7c1   : > { %v3570_v8 = vpop.xlane.xlu1 %3569  ;;  %v3564_v9 = vpop.xlane.xlu2 %3563  ;;  %v3890_v36 = vsel %vm3872_vm8, %v3822_v35, %v3889_v20 }
 0x7c2   : > { %v3891_v34 = vsel %vm3874_vm9, %v3823_v33, %v3890_v36  ;;  %v3826_v28 = vperm.slane %v3564_v9, %v9587_v48  ;;  %v3828_v44 = vperm.slane %v3570_v8, %v9587_v48 }
 0x7c5   : > { %v3558_v50 = vpop.xlane.xlu0 %3557 }
 0x7c6   : > { %v3824_v23 = vperm.slane %v3558_v50, %v9587_v48 }
 0x7c8   : > { %v3892_v54 = vsel %vm3876_vm11, %v3824_v23, %v3891_v34 }
 0x7c9   : > { %v3579_v51 = vpop.xlane.xlu1 %3578  ;;  %v3893_v42 = vsel %vm3878_vm12, %v3825_v11, %v3892_v54  ;;  %v3573_v1 = vpop.xlane.xlu2 %3572 }
 0x7ca   : > { %3940 = vst.msk [vmem:[#allocation3 + $0x21] sm:$0xff] %vm3937_vm13, %v3893_v42  ;;  %v3829_v47 = vperm.slane %v3573_v1, %v9587_v48  ;;  %v3831_v2 = vperm.slane %v3579_v51, %v9587_v48 }
 0x7cd   : > { %v3567_v0 = vpop.xlane.xlu0 %3566 }
 0x7ce   : > { %v3827_v16 = vperm.slane %v3567_v0, %v9587_v48 }
 0x7d0   : > { %v3894_v56 = vsel %vm3866_vm5, %v3827_v16, %v3826_v28 }
 0x7d1   : > { %v3588_v59 = vpop.xlane.xlu1 %3587  ;;  %v3582_v60 = vpop.xlane.xlu2 %3581  ;;  %v9758_v6 = vld [vmem:[#allocation3 + $0x20] sm:$0xff]  ;;  %v3895_v7 = vsel %vm3868_vm6, %v3828_v44, %v3894_v56 }
 0x7d2   : > { %4126 = vrot.lane.b32.xlu2 %v9758_v6, %s7555_s6  ;;  %v3896_v21 = vsel %vm3870_vm7, %v3829_v47, %v3895_v7  ;;  %v3832_v55 = vperm.slane %v3582_v60, %v9587_v48  ;;  %v3834_v29 = vperm.slane %v3588_v59, %v9587_v48 }
 0x7d5   : > { %v3576_v61 = vpop.xlane.xlu0 %3575 }
 0x7d6   : > { %v3830_v17 = vperm.slane %v3576_v61, %v9587_v48 }
 0x7d8   : > { %v3897_v40 = vsel %vm3872_vm8, %v3830_v17, %v3896_v21 }
 0x7d9   : > { %v3597_v53 = vpop.xlane.xlu1 %3596  ;;  %v3898_v62 = vsel %vm3874_vm9, %v3831_v2, %v3897_v40  ;;  %v3591_v30 = vpop.xlane.xlu2 %3590 }
 0x7da   : > { %v3899_v26 = vsel %vm3876_vm11, %v3832_v55, %v3898_v62  ;;  %v3835_v57 = vperm.slane %v3591_v30, %v9587_v48  ;;  %v3837_v12 = vperm.slane %v3597_v53, %v9587_v48 }
 0x7db   : > { %v3900_v14 = vsel %vm3878_vm12, %v3833_v22, %v3899_v26 }
 0x7dc   : > { %3941 = vst.msk [vmem:[#allocation3 + $0x31] sm:$0xff] %vm3937_vm13, %v3900_v14  ;;  %v3901_v15 = vsel %vm3866_vm5, %v3835_v57, %v3834_v29 }
 0x7dd   : > { %v3594_v49 = vpop.xlane.xlu0 %3593 }
 0x7de   : > { %v3836_v45 = vperm.slane %v3594_v49, %v9587_v48 }
 0x7e0   : > { %v3902_v3 = vsel %vm3868_vm6, %v3836_v45, %v3901_v15 }
 0x7e1   : > { %v3606_v13 = vpop.xlane.xlu1 %3605  ;;  %v3600_v38 = vpop.xlane.xlu2 %3599  ;;  %v3903_v43 = vsel %vm3870_vm7, %v3837_v12, %v3902_v3 }
 0x7e2   : > { %v3838_v58 = vperm.slane %v3600_v38, %v9587_v48  ;;  %v3840_v63 = vperm.slane %v3606_v13, %v9587_v48 }
 0x7e4   : > { %v3904_v37 = vsel %vm3872_vm8, %v3838_v58, %v3903_v43 }
 0x7e5   : > { %v3603_v39 = vpop.xlane.xlu0 %3602 }
 0x7e6   : > { %v3839_v52 = vperm.slane %v3603_v39, %v9587_v48 }
 0x7e8   : > { %v3905_v41 = vsel %vm3874_vm9, %v3839_v52, %v3904_v37 }
 0x7e9   : > { %v3615_v19 = vpop.xlane.xlu1 %3614  ;;  %v3609_v32 = vpop.xlane.xlu2 %3608  ;;  %v3906_v18 = vsel %vm3876_vm11, %v3840_v63, %v3905_v41 }
 0x7ea   : > { %v3841_v46 = vperm.slane %v3609_v32, %v9587_v48  ;;  %v3843_v36 = vperm.slane %v3615_v19, %v9587_v48 }
 0x7ec   : > { %v3907_v24 = vsel %vm3878_vm12, %v3841_v46, %v3906_v18 }
 0x7ed   : > { %3942 = vst.msk [vmem:[#allocation3 + $0x41] sm:$0xff] %vm3937_vm13, %v3907_v24  ;;  %v3612_v10 = vpop.xlane.xlu0 %3611 }
 0x7ee   : > { %v3842_v20 = vperm.slane %v3612_v10, %v9587_v48 }
 0x7f0   : > { %v3908_v23 = vsel %vm3866_vm5, %v3843_v36, %v3842_v20 }
 0x7f1   : > { %v3624_v27 = vpop.xlane.xlu1 %3623  ;;  %v3618_v8 = vpop.xlane.xlu2 %3617 }
 0x7f2   : > { %v3844_v35 = vperm.slane %v3618_v8, %v9587_v48  ;;  %v3846_v42 = vperm.slane %v3624_v27, %v9587_v48 }
 0x7f4   : > { %v3909_v34 = vsel %vm3868_vm6, %v3844_v35, %v3908_v23  ;;  %v4109_v35 = vld [vmem:[#allocation3 + $0x30] sm:$0xff]  ;;  %v4106_v23 = vld [vmem:[#allocation3] sm:$0xff] }
 0x7f5   : > { %v3621_v9 = vpop.xlane.xlu0 %3620 }
 0x7f6   : > { %v3845_v33 = vperm.slane %v3621_v9, %v9587_v48 }
 0x7f8   : > { %v3910_v54 = vsel %vm3870_vm7, %v3845_v33, %v3909_v34  ;;  %v3954_v33 = vrot.slane %v9758_v6, 4 }
 0x7f9   : > { %v3633_v50 = vpop.xlane.xlu1 %3632  ;;  %v3627_v11 = vpop.xlane.xlu2 %3626  ;;  %v3911_v0 = vsel %vm3872_vm8, %v3846_v42, %v3910_v54  ;;  %v3966_v54 = vrot.slane %v4109_v35, 4 }
 0x7fa   : > { %v3847_v51 = vperm.slane %v3627_v11, %v9587_v48  ;;  %v3849_v28 = vperm.slane %v3633_v50, %v9587_v48 }
 0x7fc   : > { %v3912_v59 = vsel %vm3874_vm9, %v3847_v51, %v3911_v0 }
 0x7fd   : > { %v3630_v1 = vpop.xlane.xlu0 %3629 }
 0x7fe   : > { %v3848_v16 = vperm.slane %v3630_v1, %v9587_v48  ;;  %v3955_v1 = vsel %vm232_vm0, %v3954_v33, %v4106_v23  ;;  %v9929_v33 = vld [vmem:[#allocation3 + $0x41] sm:$0xff] }
 0x800   : > { %v3913_v56 = vsel %vm3876_vm11, %v3848_v16, %v3912_v59  ;;  %v9852_v16 = vld [vmem:[#allocation3 + $0x10] sm:$0xff] }
 0x801   : > { %v3642_v60 = vpop.xlane.xlu1 %3641  ;;  %v3914_v44 = vsel %vm3878_vm12, %v3849_v28, %v3913_v56  ;;  %v3636_v7 = vpop.xlane.xlu2 %3635  ;;  %v3967_v28 = vsel %vm232_vm0, %v3966_v54, %v9852_v16  ;;  %v9859_v56 = vperm.slane %v3955_v1, %v7624_v5 }
 0x802   : > { %3943 = vst.msk [vmem:[#allocation3 + $0x51] sm:$0xff] %vm3937_vm13, %v3914_v44  ;;  %v3850_v55 = vperm.slane %v3636_v7, %v9587_v48  ;;  %v3852_v62 = vperm.slane %v3642_v60, %v9587_v48  ;;  %v9861_v60 = vld [vmem:[#allocation3 + $0x40] sm:$0xff] }
 0x803   : > { %v4004_v7 = vrot.slane %v9859_v56, 4 }
 0x805   : > { %v3639_v47 = vpop.xlane.xlu0 %3638 }
 0x806   : > { %v3851_v21 = vperm.slane %v3639_v47, %v9587_v48 }
 0x808   : > { %v3915_v53 = vsel %vm3866_vm5, %v3851_v21, %v3850_v55 }
 0x809   : > { %v3651_v61 = vpop.xlane.xlu1 %3650  ;;  %v3645_v17 = vpop.xlane.xlu2 %3644  ;;  %v9808_v2 = vld [vmem:[#allocation3 + $0x50] sm:$0xff]  ;;  %v3916_v26 = vsel %vm3868_vm6, %v3852_v62, %v3915_v53  ;;  %v3956_v53 = vrot.slane %v4106_v23, 4 }
 0x80a   : > { %4132 = vrot.lane.b32.xlu2 %v9808_v2, %s7555_s6  ;;  %v3853_v22 = vperm.slane %v3645_v17, %v9587_v48  ;;  %v3855_v13 = vperm.slane %v3651_v61, %v9587_v48 }
 0x80c   : > { %v3917_v49 = vsel %vm3870_vm7, %v3853_v22, %v3916_v26 }
 0x80d   : > { %v3648_v40 = vpop.xlane.xlu0 %3647 }
 0x80e   : > { %v3854_v30 = vperm.slane %v3648_v40, %v9587_v48 }
 0x810   : > { %v3918_v45 = vsel %vm3872_vm8, %v3854_v30, %v3917_v49  ;;  %v3968_v30 = vrot.slane %v9852_v16, 4  ;;  %v3980_v49 = vrot.slane %v9861_v60, 4 }
 0x811   : > { %v3654_v14 = vpop.xlane.xlu2 %3653  ;;  %v3660_v57 = vpop.xlane.xlu1 %3659  ;;  %v3919_v15 = vsel %vm3874_vm9, %v3855_v13, %v3918_v45 }
 0x812   : > { %4314 = vrot.lane.b32.xlu2 %v9758_v6, %s7556_s7  ;;  %v3856_v29 = vperm.slane %v3654_v14, %v9587_v48  ;;  %v3858_v19 = vperm.slane %v3660_v57, %v9587_v48  ;;  %v3957_v14 = vsel %vm232_vm0, %v9758_v6, %v3956_v53  ;;  %v3969_v13 = vsel %vm232_vm0, %v4109_v35, %v3968_v30 }
 0x814   : > { %v3920_v58 = vsel %vm3876_vm11, %v3856_v29, %v3919_v15  ;;  %v3992_v29 = vrot.slane %v9808_v2, 4 }
 0x815   : > { %v3657_v38 = vpop.xlane.xlu0 %3656 }
 0x816   : > { %v3857_v3 = vperm.slane %v3657_v38, %v9587_v48  ;;  %v9897_v38 = vld [vmem:[#allocation3 + $0x21] sm:$0xff] }
 0x818   : > { %v3921_v12 = vsel %vm3878_vm12, %v3857_v3, %v3920_v58  ;;  %v3965_v3 = vperm.slane %v3957_v14, %v7624_v5 }
 0x819   : > { %3944 = vst.msk [vmem:[#allocation3 + $0x61] sm:$0xff] %vm3937_vm13, %v3921_v12  ;;  %v3663_v39 = vpop.xlane.xlu2 %3662  ;;  %v3669_v43 = vpop.xlane.xlu1 %3668  ;;  %v9908_v12 = vld [vmem:[#allocation3 + $0x31] sm:$0xff] }
 0x81a   : > { %v3859_v37 = vperm.slane %v3663_v39, %v9587_v48  ;;  %v3861_v10 = vperm.slane %v3669_v43, %v9587_v48  ;;  %v3977_v43 = vperm.slane %v3969_v13, %v7624_v5 }
 0x81c   : > { %v3922_v46 = vsel %vm3866_vm5, %v3859_v37, %v3858_v19  ;;  %vm4103_vm5 = vcmask 457728  }
 0x81d   : > { %v3666_v52 = vpop.xlane.xlu0 %3665 }
 0x81e   : > { %v3860_v41 = vperm.slane %v3666_v52, %v9587_v48  ;;  %v4490_v52 = vrot.slane %v9897_v38, 4 }
 0x820   : > { %v9833_v63 = vld [vmem:[#allocation3 + $0x60] sm:$0xff]  ;;  %v3923_v18 = vsel %vm3868_vm6, %v3860_v41, %v3922_v46  ;;  %v4502_v46 = vrot.slane %v9908_v12, 4  ;;  %vm7340_vm6 = vcmask 326912  }
 0x821   : > { %4134 = vrot.lane.b32.xlu1 %v9833_v63, %s7555_s6  ;;  %v3672_v32 = vpop.xlane.xlu2 %3671  ;;  %v3678_v8 = vpop.xlane.xlu1 %3677  ;;  %v3924_v20 = vsel %vm3870_vm7, %v3861_v10, %v3923_v18  ;;  %v3978_v59 = vrot.slane %v9833_v63, 4  ;;  %v3981_v6 = vsel %vm232_vm0, %v9833_v63, %v3980_v49  ;;  %v9910_v39 = vld [vmem:[#allocation3 + $0x61] sm:$0xff]  ;;  %vm7344_vm7 = vcmask 392512  }
 0x822   : > { %v3862_v24 = vperm.slane %v3672_v32, %v9587_v48  ;;  %v3864_v11 = vperm.slane %v3678_v8, %v9587_v48  ;;  %v3989_v37 = vperm.slane %v3981_v6, %v7624_v5  ;;  %v4016_v32 = vrot.slane %v3965_v3, 4 }
 0x823   : > { %v3979_v44 = vsel %vm232_vm0, %v3978_v59, %v9861_v60  ;;  %v4514_v18 = vrot.slane %v9910_v39, 4 }
 0x824   : > { %v3925_v36 = vsel %vm3872_vm8, %v3862_v24, %v3924_v20  ;;  %v9873_v61 = vperm.slane %v3979_v44, %v7624_v5  ;;  %v9921_v24 = vld [vmem:[#allocation3 + $0x1] sm:$0xff]  ;;  %v4017_v10 = vsel %vm232_vm0, %v3977_v43, %v4016_v32  ;;  %vm7348_vm8 = vcmask 458112  }
 0x825   : > { %v3675_v27 = vpop.xlane.xlu0 %3674  ;;  %v4491_v8 = vsel %vm232_vm0, %v4490_v52, %v9921_v24  ;;  %v9942_v54 = vperm.slane %v4017_v10, %v7657_v25 }
 0x826   : > { %v3863_v9 = vperm.slane %v3675_v27, %v9587_v48  ;;  %v4028_v62 = vrot.slane %v9873_v61, 4  ;;  %v4014_v27 = vrot.slane %v3977_v43, 4 }
 0x828   : > { %v3926_v50 = vsel %vm3874_vm9, %v3863_v9, %v3925_v36  ;;  %v4040_v36 = vrot.slane %v3989_v37, 4  ;;  %v4015_v1 = vsel %vm232_vm0, %v4014_v27, %v3965_v3  ;;  %vm7352_vm9 = vcmask 523712  }
 0x829   : > { %4122 = vrot.lane.b32.xlu1 %v4106_v23, %s7555_s6  ;;  %v3681_v34 = vpop.xlane.xlu2 %3680  ;;  %v3927_v42 = vsel %vm3876_vm11, %v3864_v11, %v3926_v50  ;;  %vm7356_vm11 = vcmask 589312  }
 0x82a   : > { %v3865_v51 = vperm.slane %v3681_v34, %v9587_v48  ;;  %v9864_v48 = vperm.slane %v3967_v28, %v7624_v5  ;;  %v4515_v34 = vsel %vm232_vm0, %v4514_v18, %v9929_v33  ;;  %v4516_v28 = vrot.slane %v9929_v33, 4 }
 0x82c   : > { %v3928_v0 = vsel %vm3878_vm12, %v3865_v51, %v3927_v42  ;;  %v4005_v17 = vsel %vm232_vm0, %v9864_v48, %v4004_v7  ;;  %v4497_v42 = vperm.slane %v4491_v8, %v7624_v5  ;;  %v4521_v7 = vperm.slane %v4515_v34, %v7624_v5 }
 0x82d   : > { %3945 = vst.msk [vmem:[#allocation3 + $0x71] sm:$0xff] %vm3937_vm13, %v3928_v0  ;;  %v4013_v40 = vperm.slane %v4005_v17, %v7657_v25  ;;  %v4002_v0 = vrot.slane %v9864_v48, 4  ;;  %v4517_v53 = vsel %vm232_vm0, %v9910_v39, %v4516_v28  ;;  %vm7360_vm12 = vcmask 654912  }
 0x82e   : > { %v4540_v30 = vrot.slane %v4497_v42, 4  ;;  %vm7364_vm13 = vcmask 720512  }
 0x82f   : > { %v4056_v45 = vrot.slane %v4013_v40, 4  ;;  %v4003_v14 = vsel %vm232_vm0, %v4002_v0, %v9859_v56  ;;  %v4492_v56 = vrot.slane %v9921_v24, 4 }
 0x830   : > { %v9982_v6 = vperm.slane %v4003_v14, %v7657_v25 }
 0x831   : > { %4128 = vrot.lane.b32.xlu1 %v4109_v35, %s7555_s6  ;;  %v4493_v52 = vsel %vm232_vm0, %v9897_v38, %v4492_v56 }
 0x832   : > { %v4052_v10 = vrot.slane %v9982_v6, 4  ;;  %v4501_v27 = vperm.slane %v4493_v52, %v7624_v5 }
 0x834   : > { %v9870_v47 = vld [vmem:[#allocation3 + $0x70] sm:$0xff] }
 0x835   : > { %4136 = vrot.lane.b32.xlu0 %v9870_v47, %s7555_s6  ;;  %v3990_v21 = vrot.slane %v9870_v47, 4  ;;  %v3993_v58 = vsel %vm232_vm0, %v9870_v47, %v3992_v29  ;;  %v9915_v41 = vld [vmem:[#allocation3 + $0x71] sm:$0xff]  ;;  %v4525_v29 = vperm.slane %v4517_v53, %v7624_v5 }
 0x836   : > { %v4001_v19 = vperm.slane %v3993_v58, %v7624_v5  ;;  %v4526_v20 = vrot.slane %v9915_v41, 4 }
 0x837   : > { %v3991_v55 = vsel %vm232_vm0, %v3990_v21, %v9808_v2  ;;  %v4576_v32 = vrot.slane %v4525_v29, 4 }
 0x838   : > { %v9884_v22 = vperm.slane %v3991_v55, %v7624_v5  ;;  %v4038_v50 = vrot.slane %v4001_v19, 4  ;;  %v4041_v51 = vsel %vm232_vm0, %v4001_v19, %v4040_v36 }
 0x839   : > { %4310 = vrot.lane.b32.xlu1 %v4106_v23, %s7556_s7  ;;  %v9933_v23 = vld [vmem:[#allocation3 + $0x51] sm:$0xff]  ;;  %v9957_v21 = vperm.slane %v4041_v51, %v7657_v25 }
 0x83a   : > { %v4029_v26 = vsel %vm232_vm0, %v9884_v22, %v4028_v62  ;;  %v4527_v59 = vsel %vm232_vm0, %v4526_v20, %v9933_v23  ;;  %v4528_v17 = vrot.slane %v9933_v23, 4  ;;  %v4039_v48 = vsel %vm232_vm0, %v4038_v50, %v3989_v37 }
 0x83b   : > { %v4037_v57 = vperm.slane %v4029_v26, %v7657_v25  ;;  %v4026_v55 = vrot.slane %v9884_v22, 4  ;;  %v4533_v62 = vperm.slane %v4527_v59, %v7624_v5  ;;  %v4064_v26 = vrot.slane %v9942_v54, 4 }
 0x83c   : > { %v4529_v49 = vsel %vm232_vm0, %v9915_v41, %v4528_v17  ;;  %v4062_v14 = vrot.slane %v9957_v21, 4 }
 0x83d   : > { %4124 = vrot.lane.b32.xlu0 %v9852_v16, %s7555_s6  ;;  %v4057_v15 = vsel %vm232_vm0, %v4037_v57, %v4056_v45  ;;  %v4054_v9 = vrot.slane %v4037_v57, 4  ;;  %v4045_v57 = vperm.slane %v4039_v48, %v7657_v25  ;;  %v4564_v45 = vrot.slane %v4521_v7, 4 }
 0x83e   : > { %4075 = vrot.lane.b32.xlu2 %v4057_v15, %s7565_s20  ;;  %v4065_v13 = vsel %vm232_vm0, %v9957_v21, %v4064_v26  ;;  %v4027_v15 = vsel %vm232_vm0, %v4026_v55, %v9873_v61  ;;  %v4537_v43 = vperm.slane %v4529_v49, %v7624_v5  ;;  %v4562_v51 = vrot.slane %v4533_v62, 4 }
 0x83f   : > { %v4055_v44 = vsel %vm232_vm0, %v4054_v9, %v4013_v40  ;;  %v4021_v40 = vperm.slane %v4015_v1, %v7657_v25  ;;  %v4565_v58 = vsel %vm232_vm0, %v4533_v62, %v4564_v45  ;;  %v9994_v19 = vperm.slane %v4027_v15, %v7657_v25 }
 0x840   : > { %v4577_v8 = vsel %vm232_vm0, %v4537_v43, %v4576_v32  ;;  %v4552_v1 = vrot.slane %v4501_v27, 4  ;;  %v4058_v28 = vrot.slane %v4045_v57, 4  ;;  %v4574_v17 = vrot.slane %v4537_v43, 4 }
 0x841   : > { %4316 = vrot.lane.b32.xlu1 %v4109_v35, %s7556_s7  ;;  %v9927_v35 = vld [vmem:[#allocation3 + $0x11] sm:$0xff]  ;;  %v4060_v3 = vrot.slane %v4021_v40, 4  ;;  %v4053_v36 = vsel %vm232_vm0, %v9994_v19, %v4052_v10  ;;  %v4585_v34 = vperm.slane %v4577_v8, %v7657_v25 }
 0x842   : > { %v4503_v11 = vsel %vm232_vm0, %v4502_v46, %v9927_v35  ;;  %v4504_v61 = vrot.slane %v9927_v35, 4  ;;  %v4573_v46 = vperm.slane %v4565_v58, %v7657_v25  ;;  %v4059_v53 = vsel %vm232_vm0, %v4058_v28, %v4021_v40  ;;  %v4127_v58 = vpop.permute.xlu2 %4126 }
 0x843   : > { %v4061_v37 = vsel %vm232_vm0, %v4045_v57, %v4060_v3  ;;  %v4063_v57 = vsel %vm232_vm0, %v4062_v14, %v9942_v54 }
 0x844   : > { %v4505_v18 = vsel %vm232_vm0, %v9908_v12, %v4504_v61 }
 0x845   : > { %4130 = vrot.lane.b32.xlu0 %v9861_v60, %s7555_s6  ;;  %v4513_v50 = vperm.slane %v4505_v18, %v7624_v5 }
 0x846   : > { %4320 = vrot.lane.b32.xlu2 %v9808_v2, %s7556_s7  ;;  %v4509_v2 = vperm.slane %v4503_v11, %v7624_v5 }
 0x847   : > { %v4553_v59 = vsel %vm232_vm0, %v4513_v50, %v4552_v1 }
 0x848   : > { %v4541_v22 = vsel %vm232_vm0, %v4509_v2, %v4540_v30  ;;  %v4538_v9 = vrot.slane %v4509_v2, 4  ;;  %v4563_v2 = vsel %vm232_vm0, %v4562_v51, %v4521_v7  ;;  %v4561_v55 = vperm.slane %v4553_v59, %v7657_v25 }
 0x849   : > { %4071 = vrot.lane.b32.xlu1 %v4055_v44, %s7552_s28  ;;  %v4598_v44 = vrot.slane %v4585_v34, 4  ;;  %v10022_v62 = vperm.slane %v4563_v2, %v7657_v25  ;;  %v4550_v30 = vrot.slane %v4513_v50, 4 }
 0x84a   : > { %v4539_v0 = vsel %vm232_vm0, %v4538_v9, %v4497_v42  ;;  %v4600_v21 = vrot.slane %v4561_v55, 4 }
 0x84b   : > { %v10017_v48 = vperm.slane %v4539_v0, %v7657_v25  ;;  %v4599_v42 = vsel %vm232_vm0, %v4598_v44, %v4561_v55  ;;  %v4551_v49 = vsel %vm232_vm0, %v4550_v30, %v4501_v27 }
 0x84c   : > { %v4557_v45 = vperm.slane %v4551_v49, %v7657_v25  ;;  %v4601_v54 = vsel %vm232_vm0, %v4585_v34, %v4600_v21 }
 0x84d   : > { %4312 = vrot.lane.b32.xlu0 %v9852_v16, %s7556_s7  ;;  %v9987_v16 = vperm.slane %v4541_v22, %v7657_v25  ;;  %v4588_v7 = vrot.slane %v10017_v48, 4 }
 0x84e   : > { %4091 = vrot.lane.b32.xlu2 %v4065_v13, %s7566_s21  ;;  %v4590_v13 = vrot.slane %v4573_v46, 4  ;;  %v4596_v15 = vrot.slane %v4557_v45, 4 }
 0x84f   : > { %v4592_v20 = vrot.slane %v9987_v16, 4  ;;  %v4589_v26 = vsel %vm232_vm0, %v10022_v62, %v4588_v7 }
 0x851   : > { %4083 = vrot.lane.b32.xlu1 %v4061_v37, %s7567_s22  ;;  %v4593_v11 = vsel %vm232_vm0, %v4573_v46, %v4592_v20 }
 0x855   : > { %4067 = vrot.lane.b32.xlu0 %v4053_v36, %s7568_s23 }
 0x856   : > { %4611 = vrot.lane.b32.xlu2 %v4593_v11, %s7565_s20 }
 0x859   : > { %4322 = vrot.lane.b32.xlu1 %v9833_v63, %s7556_s7  ;;  %v4575_v63 = vsel %vm232_vm0, %v4574_v17, %v4525_v29 }
 0x85a   : > { %v4581_v40 = vperm.slane %v4575_v63, %v7657_v25 }
 0x85c   : > { %v4594_v22 = vrot.slane %v4581_v40, 4 }
 0x85d   : > { %4079 = vrot.lane.b32.xlu0 %v4059_v53, %s7549_s25 }
 0x85e   : > { %4623 = vrot.lane.b32.xlu2 %v4599_v42, %s7551_s27  ;;  %v4595_v29 = vsel %vm232_vm0, %v4594_v22, %v4557_v45 }
 0x861   : > { %4603 = vrot.lane.b32.xlu1 %v4589_v26, %s7568_s23 }
 0x864   : > { %v4133_v52 = vpop.permute.xlu2 %4132 }
 0x865   : > { %4087 = vrot.lane.b32.xlu0 %v4063_v57, %s7551_s27  ;;  %v4184_v10 = vrot.slane %v4133_v52, 4 }
 0x866   : > { %4656 = vrot.lane.b32.xlu2 %v9927_v35, %s7555_s6 }
 0x869   : > { %4615 = vrot.lane.b32.xlu1 %v4595_v29, %s7549_s25 }
 0x86c   : > { %v10090_v59 = vpop.permute.xlu2 %4314 }
 0x86d   : > { %4318 = vrot.lane.b32.xlu0 %v9861_v60, %s7556_s7  ;;  %v4591_v60 = vsel %vm232_vm0, %v4590_v13, %v9987_v16 }
 0x86e   : > { %4662 = vrot.lane.b32.xlu2 %v9929_v33, %s7555_s6 }
 0x871   : > { %4627 = vrot.lane.b32.xlu1 %v4601_v54, %s7566_s21 }
 0x875   : > { %4324 = vrot.lane.b32.xlu0 %v9870_v47, %s7556_s7  ;;  %v4597_v47 = vsel %vm232_vm0, %v4581_v40, %v4596_v15 }
 0x876   : > { %4668 = vrot.lane.b32.xlu2 %v9915_v41, %s7555_s6 }
 0x879   : > { %4658 = vrot.lane.b32.xlu1 %v9897_v38, %s7555_s6 }
 0x87d   : > { %4607 = vrot.lane.b32.xlu0 %v4591_v60, %s7552_s28 }
 0x87e   : > { %4844 = vrot.lane.b32.xlu2 %v9927_v35, %s7556_s7 }
 0x881   : > { %4664 = vrot.lane.b32.xlu1 %v9933_v23, %s7555_s6 }
 0x885   : > { %4619 = vrot.lane.b32.xlu0 %v4597_v47, %s7567_s22 }
 0x889   : > { %4846 = vrot.lane.b32.xlu1 %v9897_v38, %s7556_s7  ;;  %v4146_v38 = vrot.slane %v4127_v58, 4 }
 0x88d   : > { %4654 = vrot.lane.b32.xlu0 %v9921_v24, %s7555_s6 }
 0x893   : > { %v4135_v56 = vpop.permute.xlu1 %4134 }
 0x894   : > { %v4170_v51 = vrot.slane %v4135_v56, 4 }
 0x895   : > { %4660 = vrot.lane.b32.xlu0 %v9908_v12, %s7555_s6 }
 0x89b   : > { %v4123_v3 = vpop.permute.xlu1 %4122 }
 0x89c   : > { %v4147_v46 = vsel %vm232_vm0, %v4146_v38, %v4123_v3  ;;  %v4148_v36 = vrot.slane %v4123_v3, 4  ;;  %v4076_v38 = vpop.permute.xlu2 %4075 }
 0x89d   : > { %4666 = vrot.lane.b32.xlu0 %v9910_v39, %s7555_s6  ;;  %v4153_v20 = vperm.slane %v4147_v46, %v7624_v5 }
 0x89e   : > { %v4149_v44 = vsel %vm232_vm0, %v4127_v58, %v4148_v36 }
 0x89f   : > { %v4196_v53 = vrot.slane %v4153_v20, 4  ;;  %v4157_v22 = vperm.slane %v4149_v44, %v7624_v5 }
 0x8a3   : > { %v4129_v35 = vpop.permute.xlu1 %4128 }
 0x8a4   : > { %v4158_v61 = vrot.slane %v4129_v35, 4 }
 0x8a5   : > { %4842 = vrot.lane.b32.xlu0 %v9921_v24, %s7556_s7 }
 0x8a7   : > { %v4137_v43 = vpop.permute.xlu0 %4136 }
 0x8a8   : > { %v4182_v37 = vrot.slane %v4137_v43, 4  ;;  %v4185_v9 = vsel %vm232_vm0, %v4137_v43, %v4184_v10 }
 0x8a9   : > { %v4193_v1 = vperm.slane %v4185_v9, %v7624_v5 }
 0x8aa   : > { %v4183_v24 = vsel %vm232_vm0, %v4182_v37, %v4133_v52  ;;  %v4208_v52 = vrot.slane %v4157_v22, 4 }
 0x8ab   : > { %v10074_v16 = vpop.permute.xlu1 %4310  ;;  %v4189_v50 = vperm.slane %v4183_v24, %v7624_v5  ;;  %v4230_v30 = vrot.slane %v4193_v1, 4 }
 0x8ad   : > { %4848 = vrot.lane.b32.xlu0 %v9908_v12, %s7556_s7  ;;  %v4218_v42 = vrot.slane %v4189_v50, 4 }
 0x8af   : > { %v4125_v32 = vpop.permute.xlu0 %4124 }
 0x8b0   : > { %v4159_v18 = vsel %vm232_vm0, %v4158_v61, %v4125_v32  ;;  %v4160_v8 = vrot.slane %v4125_v32, 4 }
 0x8b1   : > { %v4165_v27 = vperm.slane %v4159_v18, %v7624_v5 }
 0x8b2   : > { %v4161_v0 = vsel %vm232_vm0, %v4129_v35, %v4160_v8 }
 0x8b3   : > { %v4194_v12 = vrot.slane %v4165_v27, 4  ;;  %v10085_v11 = vpop.permute.xlu1 %4316  ;;  %v4169_v63 = vperm.slane %v4161_v0, %v7624_v5  ;;  %v4197_v57 = vsel %vm232_vm0, %v4165_v27, %v4196_v53 }
 0x8b4   : > { %v4205_v47 = vperm.slane %v4197_v57, %v7657_v25 }
 0x8b5   : > { %v4195_v34 = vsel %vm232_vm0, %v4194_v12, %v4153_v20  ;;  %v4206_v21 = vrot.slane %v4169_v63, 4  ;;  %v4209_v27 = vsel %vm232_vm0, %v4169_v63, %v4208_v52 }
 0x8b6   : > { %v4201_v55 = vperm.slane %v4195_v34, %v7657_v25  ;;  %v4248_v24 = vrot.slane %v4205_v47, 4  ;;  %v4217_v12 = vperm.slane %v4209_v27, %v7657_v25 }
 0x8b7   : > { %v4131_v28 = vpop.permute.xlu0 %4130  ;;  %v4207_v37 = vsel %vm232_vm0, %v4206_v21, %v4157_v22 }
 0x8b8   : > { %v4171_v2 = vsel %vm232_vm0, %v4170_v51, %v4131_v28  ;;  %v4172_v17 = vrot.slane %v4131_v28, 4  ;;  %v4244_v29 = vrot.slane %v4201_v55, 4  ;;  %v10122_v8 = vperm.slane %v4207_v37, %v7657_v25  ;;  %v4321_v28 = vpop.permute.xlu2 %4320 }
 0x8b9   : > { %v4177_v7 = vperm.slane %v4171_v2, %v7624_v5  ;;  %v4256_v2 = vrot.slane %v4217_v12, 4 }
 0x8ba   : > { %v4173_v26 = vsel %vm232_vm0, %v4135_v56, %v4172_v17 }
 0x8bb   : > { %v4181_v14 = vperm.slane %v4173_v26, %v7624_v5  ;;  %v4220_v40 = vrot.slane %v4177_v7, 4  ;;  %v4219_v49 = vsel %vm232_vm0, %v4218_v42, %v4177_v7  ;;  %v4072_v35 = vpop.permute.xlu1 %4071 }
 0x8bc   : > { %v4225_v45 = vperm.slane %v4219_v49, %v7657_v25  ;;  %v4346_v49 = vrot.slane %v10085_v11, 4 }
 0x8bd   : > { %v4232_v54 = vrot.slane %v4181_v14, 4  ;;  %v4221_v13 = vsel %vm232_vm0, %v4189_v50, %v4220_v40  ;;  %v4231_v60 = vsel %vm232_vm0, %v4230_v30, %v4181_v14 }
 0x8be   : > { %v4245_v15 = vsel %vm232_vm0, %v4225_v45, %v4244_v29  ;;  %v4229_v56 = vperm.slane %v4221_v13, %v7657_v25  ;;  %v10109_v3 = vperm.slane %v4231_v60, %v7657_v25  ;;  %v4242_v46 = vrot.slane %v4225_v45, 4 }
 0x8bf   : > { %v10111_v58 = vpop.permute.xlu0 %4312  ;;  %4259 = vrot.lane.b32.xlu2 %v4245_v15, %s7568_s23  ;;  %v4233_v43 = vsel %vm232_vm0, %v4193_v1, %v4232_v54  ;;  %v4050_v1 = vrot.slane %v9994_v19, 4  ;;  %v4334_v29 = vrot.slane %v10090_v59, 4 }
 0x8c0   : > { %v4246_v61 = vrot.slane %v4229_v56, 4  ;;  %v4241_v32 = vperm.slane %v4233_v43, %v7657_v25  ;;  %v4250_v10 = vrot.slane %v10109_v3, 4  ;;  %v10125_v20 = vsel %vm232_vm0, %v4242_v46, %v4201_v55  ;;  %v4092_v7 = vpop.permute.xlu2 %4091 }
 0x8c1   : > { %v10128_v9 = vsel %vm232_vm0, %v4229_v56, %v4248_v24  ;;  %v4051_v44 = vsel %vm232_vm0, %v4050_v1, %v9982_v6  ;;  %v4347_v45 = vsel %vm232_vm0, %v4346_v49, %v10111_v58  ;;  %v4335_v54 = vsel %vm232_vm0, %v4334_v29, %v10074_v16 }
 0x8c2   : > { %v4247_v18 = vsel %vm232_vm0, %v4246_v61, %v4205_v47  ;;  %v4254_v36 = vrot.slane %v4241_v32, 4  ;;  %v4251_v50 = vsel %vm232_vm0, %v4250_v10, %v10122_v8  ;;  %v4257_v55 = vsel %vm232_vm0, %v4241_v32, %v4256_v2 }
 0x8c3   : > { %4263 = vrot.lane.b32.xlu1 %v4247_v18, %s7552_s28  ;;  %v4084_v0 = vpop.permute.xlu1 %4083  ;;  %v4353_v13 = vperm.slane %v4347_v45, %v7624_v5  ;;  %v4341_v15 = vperm.slane %v4335_v54, %v7624_v5  ;;  %v4348_v56 = vrot.slane %v10111_v58, 4  ;;  %v4372_v43 = vrot.slane %v4321_v28, 4 }
 0x8c4   : > { %v10135_v51 = vsel %vm232_vm0, %v4254_v36, %v4217_v12  ;;  %v4586_v58 = vrot.slane %v10022_v62, 4  ;;  %v4336_v1 = vrot.slane %v10074_v16, 4 }
 0x8c5   : > { %v4384_v32 = vrot.slane %v4341_v15, 4  ;;  %v4349_v27 = vsel %vm232_vm0, %v10085_v11, %v4348_v56 }
 0x8c6   : > { %v4357_v11 = vperm.slane %v4349_v27, %v7624_v5  ;;  %v4337_v16 = vsel %vm232_vm0, %v10090_v59, %v4336_v1 }
 0x8c7   : > { %v4068_v34 = vpop.permute.xlu0 %4067  ;;  %4271 = vrot.lane.b32.xlu2 %v4251_v50, %s7549_s25 }
 0x8c8   : > { %v4095_v17 = vsel %vm4094_vm10, %v4051_v44, %v4068_v34  ;;  %v4612_v22 = vpop.permute.xlu2 %4611  ;;  %v4385_v34 = vsel %vm232_vm0, %v4353_v13, %v4384_v32  ;;  %v4394_v49 = vrot.slane %v4357_v11, 4 }
 0x8c9   : > { %v4096_v42 = vsel %vm400_vm1, %v4095_v17, %v4072_v35  ;;  %v4382_v35 = vrot.slane %v4353_v13, 4  ;;  %v4393_v62 = vperm.slane %v4385_v34, %v7657_v25 }
 0x8ca   : > { %v4098_v19 = vsel %vm4097_vm14, %v4096_v42, %v4076_v38 }
 0x8cb   : > { %v4323_v63 = vpop.permute.xlu1 %4322  ;;  %v4383_v12 = vsel %vm232_vm0, %v4382_v35, %v4341_v15 }
 0x8cc   : > { %v4358_v60 = vrot.slane %v4323_v63, 4  ;;  %v4389_v17 = vperm.slane %v4383_v12, %v7657_v25 }
 0x8cf   : > { %v4080_v53 = vpop.permute.xlu0 %4079  ;;  %4283 = vrot.lane.b32.xlu2 %v4257_v55, %s7566_s21 }
 0x8d0   : > { %v4099_v30 = vsel %vm402_vm2, %v4098_v19, %v4080_v53  ;;  %v4624_v46 = vpop.permute.xlu2 %4623 }
 0x8d1   : > { %v4101_v26 = vsel %vm4100_vm15, %v4099_v30, %v4084_v0 }
 0x8d3   : > { %v4604_v57 = vpop.permute.xlu1 %4603 }
 0x8d7   : > { %v4088_v6 = vpop.permute.xlu0 %4087 }
 0x8d8   : > { %v4102_v14 = vsel %vm404_vm3, %v4101_v26, %v4088_v6  ;;  %v10187_v59 = vpop.permute.xlu2 %4656 }
 0x8d9   : > { %v4104_v40 = vsel %vm4103_vm5, %v4102_v14, %v4092_v7 }
 0x8da   : > { %4105 = vst.msk [vmem:[#allocation4] sm:$0xff] %vm406_vm4, %v4104_v40  ;;  %v4432_v40 = vrot.slane %v4389_v17, 4 }
 0x8db   : > { %v4616_v52 = vpop.permute.xlu1 %4615 }
 0x8df   : > { %v4319_v21 = vpop.permute.xlu0 %4318 }
 0x8e0   : > { %v4359_v47 = vsel %vm232_vm0, %v4358_v60, %v4319_v21  ;;  %v4360_v38 = vrot.slane %v4319_v21, 4  ;;  %v4436_v21 = vrot.slane %v4393_v62, 4  ;;  %v4345_v60 = vperm.slane %v4337_v16, %v7624_v5  ;;  %v4663_v34 = vpop.permute.xlu2 %4662 }
 0x8e1   : > { %v4365_v61 = vperm.slane %v4359_v47, %v7624_v5 }
 0x8e2   : > { %v4361_v36 = vsel %vm232_vm0, %v4323_v63, %v4360_v38  ;;  %v4587_v63 = vsel %vm232_vm0, %v4586_v58, %v10017_v48  ;;  %v4395_v47 = vsel %vm232_vm0, %v4394_v49, %v4345_v60 }
 0x8e3   : > { %v4408_v0 = vrot.slane %v4365_v61, 4  ;;  %v4369_v55 = vperm.slane %v4361_v36, %v7624_v5  ;;  %v4630_v6 = vsel %vm4094_vm10, %v4587_v63, %v4604_v57  ;;  %v4628_v45 = vpop.permute.xlu1 %4627 }
 0x8e5   : > { %v4420_v27 = vrot.slane %v4369_v55, 4 }
 0x8e7   : > { %v4325_v37 = vpop.permute.xlu0 %4324 }
 0x8e8   : > { %v4370_v18 = vrot.slane %v4325_v37, 4  ;;  %v4373_v10 = vsel %vm232_vm0, %v4325_v37, %v4372_v43  ;;  %v4396_v43 = vrot.slane %v4345_v60, 4 }
 0x8e9   : > { %v4381_v24 = vperm.slane %v4373_v10, %v7624_v5  ;;  %v4401_v10 = vperm.slane %v4395_v47, %v7657_v25 }
 0x8ea   : > { %v4371_v50 = vsel %vm232_vm0, %v4370_v18, %v4321_v28  ;;  %v4252_v18 = vrot.slane %v10122_v8, 4  ;;  %v4397_v12 = vsel %vm232_vm0, %v4357_v11, %v4396_v43 }
 0x8eb   : > { %v4377_v44 = vperm.slane %v4371_v50, %v7624_v5  ;;  %v4418_v2 = vrot.slane %v4381_v24, 4  ;;  %v4659_v50 = vpop.permute.xlu1 %4658  ;;  %v4421_v8 = vsel %vm232_vm0, %v4381_v24, %v4420_v27 }
 0x8ec   : > { %v4253_v36 = vsel %vm232_vm0, %v10109_v3, %v4252_v18  ;;  %v10221_v1 = vperm.slane %v4421_v8, %v7657_v25  ;;  %v4440_v3 = vrot.slane %v4401_v10, 4 }
 0x8ed   : > { %v4406_v53 = vrot.slane %v4377_v44, 4  ;;  %v4409_v42 = vsel %vm232_vm0, %v4377_v44, %v4408_v0  ;;  %v4419_v30 = vsel %vm232_vm0, %v4418_v2, %v4369_v55  ;;  %v4678_v55 = vrot.slane %v4659_v50, 4 }
 0x8ee   : > { %v4417_v28 = vperm.slane %v4409_v42, %v7657_v25  ;;  %v4425_v13 = vperm.slane %v4419_v30, %v7657_v25 }
 0x8ef   : > { %v4608_v19 = vpop.permute.xlu0 %4607  ;;  %v4407_v7 = vsel %vm232_vm0, %v4406_v53, %v4365_v61 }
 0x8f0   : > { %v4434_v26 = vrot.slane %v4417_v28, 4  ;;  %v4413_v14 = vperm.slane %v4407_v7, %v7657_v25  ;;  %v4631_v29 = vsel %vm400_vm1, %v4630_v6, %v4608_v19  ;;  %v10196_v57 = vsel %vm232_vm0, %v4417_v28, %v4436_v21 }
 0x8f1   : > { %v4632_v15 = vsel %vm4097_vm14, %v4631_v29, %v4612_v22  ;;  %v4438_v35 = vrot.slane %v4425_v13, 4  ;;  %v4441_v2 = vsel %vm232_vm0, %v4425_v13, %v4440_v3 }
 0x8f2   : > { %v4435_v48 = vsel %vm232_vm0, %v4434_v26, %v4393_v62  ;;  %v4433_v54 = vsel %vm232_vm0, %v4413_v14, %v4432_v40  ;;  %v4430_v56 = vrot.slane %v4413_v14, 4  ;;  %v4633_v61 = vsel %vm402_vm2, %v4632_v15, %v4616_v52 }
 0x8f3   : > { %4451 = vrot.lane.b32.xlu1 %v4435_v48, %s7552_s28  ;;  %4447 = vrot.lane.b32.xlu2 %v4433_v54, %s7568_s23  ;;  %v4439_v52 = vsel %vm232_vm0, %v4438_v35, %v4401_v10  ;;  %v4665_v24 = vpop.permute.xlu1 %4664  ;;  %v4692_v14 = vrot.slane %v10187_v59, 4  ;;  %v4704_v40 = vrot.slane %v4663_v34, 4 }
 0x8f4   : > { %v10202_v37 = vsel %vm232_vm0, %v4430_v56, %v4389_v17  ;;  %v4669_v17 = vpop.permute.xlu2 %4668  ;;  %v4716_v62 = vrot.slane %v4665_v24, 4 }
 0x8f5   : > { %v4714_v16 = vrot.slane %v4669_v17, 4 }
 0x8f6   : > { %v4717_v6 = vsel %vm232_vm0, %v4669_v17, %v4716_v62 }
 0x8f7   : > { %v4620_v38 = vpop.permute.xlu0 %4619  ;;  %v4715_v19 = vsel %vm232_vm0, %v4714_v16, %v4665_v24 }
 0x8f8   : > { %v4634_v32 = vsel %vm4100_vm15, %v4633_v61, %v4620_v38  ;;  %v4721_v49 = vperm.slane %v4715_v19, %v7624_v5 }
 0x8f9   : > { %v4635_v22 = vsel %vm404_vm3, %v4634_v32, %v4624_v46  ;;  %v10218_v46 = vperm.slane %v4397_v12, %v7657_v25 }
 0x8fa   : > { %v4636_v58 = vsel %vm4103_vm5, %v4635_v22, %v4628_v45  ;;  %v4725_v45 = vperm.slane %v4717_v6, %v7624_v5 }
 0x8fb   : > { %4637 = vst.msk [vmem:[#allocation4 + $0x18] sm:$0xff] %vm406_vm4, %v4636_v58  ;;  %4275 = vrot.lane.b32.xlu1 %v4253_v36, %s7567_s22  ;;  %4459 = vrot.lane.b32.xlu2 %v4439_v52, %s7549_s25  ;;  %v4444_v44 = vrot.slane %v10218_v46, 4 }
 0x8fc   : > { %v4762_v38 = vrot.slane %v4725_v45, 4 }
 0x8fd   : > { %v4445_v11 = vsel %vm232_vm0, %v10221_v1, %v4444_v44 }
 0x8ff   : > { %v4655_v0 = vpop.permute.xlu0 %4654 }
 0x900   : > { %v4679_v42 = vsel %vm232_vm0, %v4678_v55, %v4655_v0  ;;  %v4680_v54 = vrot.slane %v4655_v0, 4 }
 0x901   : > { %v4685_v7 = vperm.slane %v4679_v42, %v7624_v5 }
 0x902   : > { %v4681_v10 = vsel %vm232_vm0, %v4659_v50, %v4680_v54 }
 0x903   : > { %4463 = vrot.lane.b32.xlu1 %v4441_v2, %s7567_s22  ;;  %4471 = vrot.lane.b32.xlu2 %v4445_v11, %s7566_s21  ;;  %v4728_v29 = vrot.slane %v4685_v7, 4  ;;  %v4689_v8 = vperm.slane %v4681_v10, %v7624_v5 }
 0x907   : > { %v4661_v53 = vpop.permute.xlu0 %4660 }
 0x908   : > { %v4690_v28 = vrot.slane %v4661_v53, 4  ;;  %v4693_v13 = vsel %vm232_vm0, %v4661_v53, %v4692_v14  ;;  %v4740_v53 = vrot.slane %v4689_v8, 4 }
 0x909   : > { %v4701_v61 = vperm.slane %v4693_v13, %v7624_v5 }
 0x90a   : > { %v4691_v63 = vsel %vm232_vm0, %v4690_v28, %v10187_v59  ;;  %v4750_v59 = vrot.slane %v4721_v49, 4 }
 0x90b   : > { %v4697_v30 = vperm.slane %v4691_v63, %v7624_v5  ;;  %v4741_v63 = vsel %vm232_vm0, %v4701_v61, %v4740_v53 }
 0x90d   : > { %v4726_v26 = vrot.slane %v4697_v30, 4  ;;  %v4729_v56 = vsel %vm232_vm0, %v4697_v30, %v4728_v29 }
 0x90e   : > { %v4737_v27 = vperm.slane %v4729_v56, %v7657_v25 }
 0x90f   : > { %v4667_v21 = vpop.permute.xlu0 %4666  ;;  %v4727_v48 = vsel %vm232_vm0, %v4726_v26, %v4685_v7  ;;  %v4749_v26 = vperm.slane %v4741_v63, %v7657_v25 }
 0x910   : > { %v4702_v60 = vrot.slane %v4667_v21, 4  ;;  %v4705_v15 = vsel %vm232_vm0, %v4667_v21, %v4704_v40  ;;  %v4733_v43 = vperm.slane %v4727_v48, %v7657_v25  ;;  %v4780_v2 = vrot.slane %v4737_v27, 4 }
 0x911   : > { %v4713_v47 = vperm.slane %v4705_v15, %v7624_v5  ;;  %v4788_v40 = vrot.slane %v4749_v26, 4 }
 0x912   : > { %v4703_v35 = vsel %vm232_vm0, %v4702_v60, %v4663_v34  ;;  %v4776_v52 = vrot.slane %v4733_v43, 4  ;;  %v4738_v34 = vrot.slane %v4701_v61, 4 }
 0x913   : > { %v4709_v32 = vperm.slane %v4703_v35, %v7624_v5  ;;  %v4764_v18 = vrot.slane %v4713_v47, 4  ;;  %v4763_v12 = vsel %vm232_vm0, %v4762_v38, %v4713_v47 }
 0x914   : > { %v4769_v11 = vperm.slane %v4763_v12, %v7657_v25  ;;  %v4739_v62 = vsel %vm232_vm0, %v4738_v34, %v4689_v8 }
 0x915   : > { %v4752_v22 = vrot.slane %v4709_v32, 4  ;;  %v4751_v58 = vsel %vm232_vm0, %v4750_v59, %v4709_v32  ;;  %v4765_v3 = vsel %vm232_vm0, %v4725_v45, %v4764_v18  ;;  %v4745_v19 = vperm.slane %v4739_v62, %v7657_v25 }
 0x916   : > { %v4757_v36 = vperm.slane %v4751_v58, %v7657_v25  ;;  %v4773_v55 = vperm.slane %v4765_v3, %v7657_v25  ;;  %v4782_v28 = vrot.slane %v4769_v11, 4 }
 0x917   : > { %v4753_v0 = vsel %vm232_vm0, %v4721_v49, %v4752_v22 }
 0x918   : > { %v4777_v44 = vsel %vm232_vm0, %v4757_v36, %v4776_v52  ;;  %v4761_v50 = vperm.slane %v4753_v0, %v7657_v25  ;;  %v4774_v16 = vrot.slane %v4757_v36, 4  ;;  %v4786_v7 = vrot.slane %v4773_v55, 4 }
 0x919   : > { %4791 = vrot.lane.b32.xlu1 %v4777_v44, %s7568_s23  ;;  %v4783_v6 = vsel %vm232_vm0, %v4782_v28, %v4745_v19  ;;  %v4789_v49 = vsel %vm232_vm0, %v4773_v55, %v4788_v40 }
 0x91a   : > { %v4781_v24 = vsel %vm232_vm0, %v4761_v50, %v4780_v2  ;;  %v4778_v17 = vrot.slane %v4761_v50, 4  ;;  %v10269_v30 = vsel %vm232_vm0, %v4774_v16, %v4733_v43  ;;  %v4787_v14 = vsel %vm232_vm0, %v4786_v7, %v4749_v26 }
 0x91b   : > { %4799 = vrot.lane.b32.xlu2 %v4781_v24, %s7565_s20 }
 0x91c   : > { %v4779_v42 = vsel %vm232_vm0, %v4778_v17, %v4737_v27 }
 0x91d   : > { %4795 = vrot.lane.b32.xlu0 %v4779_v42, %s7552_s28 }
 0x921   : > { %4803 = vrot.lane.b32.xlu1 %v4783_v6, %s7549_s25 }
 0x923   : > { %4811 = vrot.lane.b32.xlu2 %v4787_v14, %s7551_s27 }
 0x925   : > { %4267 = vrot.lane.b32.xlu0 %v10128_v9, %s7565_s20  ;;  %v4442_v9 = vrot.slane %v10221_v1, 4 }
 0x927   : > { %v4443_v45 = vsel %vm232_vm0, %v4442_v9, %v10218_v46  ;;  %v10302_v46 = vpop.permute.xlu0 %4842 }
 0x929   : > { %4815 = vrot.lane.b32.xlu1 %v4789_v49, %s7566_s21 }
 0x92b   : > { %4850 = vrot.lane.b32.xlu2 %v9929_v33, %s7556_s7  ;;  %v4784_v33 = vrot.slane %v4745_v19, 4 }
 0x92d   : > { %4279 = vrot.lane.b32.xlu0 %v10135_v51, %s7551_s27  ;;  %v4785_v29 = vsel %vm232_vm0, %v4769_v11, %v4784_v33  ;;  %v10300_v51 = vpop.permute.xlu1 %4846 }
 0x92e   : > { %v4866_v42 = vrot.slane %v10300_v51, 4 }
 0x92f   : > { %v4849_v60 = vpop.permute.xlu0 %4848 }
 0x930   : > { %v4878_v11 = vrot.slane %v4849_v60, 4 }
 0x931   : > { %4852 = vrot.lane.b32.xlu1 %v9933_v23, %s7556_s7  ;;  %v10298_v23 = vpop.permute.xlu2 %4844 }
 0x932   : > { %v4879_v53 = vsel %vm232_vm0, %v4878_v11, %v10298_v23 }
 0x933   : > { %4856 = vrot.lane.b32.xlu2 %v9915_v41, %s7556_s7  ;;  %v4885_v16 = vperm.slane %v4879_v53, %v7624_v5  ;;  %v10392_v53 = vld [vmem:[#allocation3 + $0x22] sm:$0xff] }
 0x935   : > { %4455 = vrot.lane.b32.xlu0 %v10196_v57, %s7565_s20  ;;  %v4264_v1 = vpop.permute.xlu1 %4263 }
 0x939   : > { %v4260_v41 = vpop.permute.xlu2 %4259 }
 0x93d   : > { %4467 = vrot.lane.b32.xlu0 %v4443_v45, %s7551_s27  ;;  %v4914_v45 = vrot.slane %v4885_v16, 4 }
 0x941   : > { %v4272_v57 = vpop.permute.xlu2 %4271 }
 0x945   : > { %4807 = vrot.lane.b32.xlu0 %v4785_v29, %s7567_s22 }
 0x949   : > { %v4284_v21 = vpop.permute.xlu2 %4283 }
 0x94d   : > { %4854 = vrot.lane.b32.xlu0 %v9910_v39, %s7556_s7  ;;  %v4286_v39 = vsel %vm4094_vm10, %v10125_v20, %v4260_v41  ;;  %v4880_v41 = vrot.slane %v10298_v23, 4  ;;  %v4868_v23 = vrot.slane %v10302_v46, 4 }
 0x94e   : > { %v4287_v38 = vsel %vm400_vm1, %v4286_v39, %v4264_v1 }
 0x951   : > { %v4448_v54 = vpop.permute.xlu2 %4447 }
 0x952   : > { %v4474_v36 = vsel %vm4094_vm10, %v10202_v37, %v4448_v54 }
 0x959   : > { %v4460_v15 = vpop.permute.xlu2 %4459 }
 0x961   : > { %v4472_v59 = vpop.permute.xlu2 %4471 }
 0x965   : > { %v4452_v48 = vpop.permute.xlu1 %4451 }
 0x966   : > { %v4475_v8 = vsel %vm400_vm1, %v4474_v36, %v4452_v48 }
 0x96d   : > { %v4276_v13 = vpop.permute.xlu1 %4275 }
 0x975   : > { %v4464_v47 = vpop.permute.xlu1 %4463  ;;  %v4800_v61 = vpop.permute.xlu2 %4799 }
 0x97d   : > { %v4812_v20 = vpop.permute.xlu2 %4811 }
 0x985   : > { %v4851_v44 = vpop.permute.xlu2 %4850 }
 0x98b   : > { %v4792_v35 = vpop.permute.xlu1 %4791 }
 0x98c   : > { %v4818_v37 = vsel %vm4094_vm10, %v10269_v30, %v4792_v35  ;;  %v4867_v30 = vsel %vm232_vm0, %v4866_v42, %v10302_v46  ;;  %v4869_v46 = vsel %vm232_vm0, %v10300_v51, %v4868_v23  ;;  %v10400_v42 = vld [vmem:[#allocation3 + $0x72] sm:$0xff] }
 0x98d   : > { %v4857_v63 = vpop.permute.xlu2 %4856  ;;  %v4873_v9 = vperm.slane %v4867_v30, %v7624_v5 }
 0x98e   : > { %v4902_v40 = vrot.slane %v4857_v63, 4 }
 0x98f   : > { %v4796_v56 = vpop.permute.xlu0 %4795  ;;  %v4916_v1 = vrot.slane %v4873_v9, 4 }
 0x990   : > { %v4819_v55 = vsel %vm400_vm1, %v4818_v37, %v4796_v56  ;;  %v10382_v37 = vld [vmem:[#allocation3 + $0x62] sm:$0xff] }
 0x991   : > { %v4820_v28 = vsel %vm4097_vm14, %v4819_v55, %v4800_v61  ;;  %v4917_v39 = vsel %vm232_vm0, %v4885_v16, %v4916_v1  ;;  %v10386_v55 = vld [vmem:[#allocation3 + $0x32] sm:$0xff] }
 0x992   : > { %v10410_v16 = vld [vmem:[#allocation3 + $0x52] sm:$0xff] }
 0x993   : > { %v4804_v12 = vpop.permute.xlu1 %4803 }
 0x994   : > { %v4821_v19 = vsel %vm402_vm2, %v4820_v28, %v4804_v12  ;;  %v10404_v28 = vld [vmem:[#allocation3 + $0x42] sm:$0xff] }
 0x997   : > { %v4268_v43 = vpop.permute.xlu0 %4267 }
 0x998   : > { %v4288_v32 = vsel %vm4097_vm14, %v4287_v38, %v4268_v43 }
 0x999   : > { %v4289_v18 = vsel %vm402_vm2, %v4288_v32, %v4272_v57  ;;  %v4892_v57 = vrot.slane %v4851_v44, 4 }
 0x99a   : > { %v4290_v27 = vsel %vm4100_vm15, %v4289_v18, %v4276_v13  ;;  %v4915_v13 = vsel %vm232_vm0, %v4914_v45, %v4873_v9  ;;  %v4925_v18 = vperm.slane %v4917_v39, %v7657_v25 }
 0x99b   : > { %v4816_v0 = vpop.permute.xlu1 %4815  ;;  %v10353_v43 = vperm.slane %v4915_v13, %v7657_v25 }
 0x99f   : > { %v4280_v10 = vpop.permute.xlu0 %4279 }
 0x9a0   : > { %v4291_v22 = vsel %vm404_vm3, %v4290_v27, %v4280_v10 }
 0x9a1   : > { %v4292_v58 = vsel %vm4103_vm5, %v4291_v22, %v4284_v21 }
 0x9a2   : > { %4293 = vst.msk [vmem:[#allocation4 + $0x8] sm:$0xff] %vm406_vm4, %v4292_v58  ;;  %v4964_v58 = vrot.slane %v10353_v43, 4 }
 0x9a3   : > { %v4853_v62 = vpop.permute.xlu1 %4852 }
 0x9a4   : > { %v4904_v6 = vrot.slane %v4853_v62, 4  ;;  %v4903_v33 = vsel %vm232_vm0, %v4902_v40, %v4853_v62  ;;  %v10396_v62 = vld [vmem:[#allocation3 + $0x12] sm:$0xff] }
 0x9a5   : > { %v4909_v21 = vperm.slane %v4903_v33, %v7624_v5 }
 0x9a6   : > { %v4905_v29 = vsel %vm232_vm0, %v4857_v63, %v4904_v6 }
 0x9a7   : > { %v4456_v52 = vpop.permute.xlu0 %4455  ;;  %v10343_v48 = vperm.slane %v4905_v29, %v7624_v5  ;;  %v4938_v61 = vrot.slane %v4909_v21, 4 }
 0x9a8   : > { %v4476_v34 = vsel %vm4097_vm14, %v4475_v8, %v4456_v52 }
 0x9a9   : > { %v4477_v3 = vsel %vm402_vm2, %v4476_v34, %v4460_v15  ;;  %v4881_v15 = vsel %vm232_vm0, %v4849_v60, %v4880_v41  ;;  %v4950_v32 = vrot.slane %v10343_v48, 4  ;;  %v4968_v34 = vrot.slane %v4925_v18, 4 }
 0x9aa   : > { %v4478_v2 = vsel %vm4100_vm15, %v4477_v3, %v4464_v47  ;;  %v4889_v38 = vperm.slane %v4881_v15, %v7624_v5  ;;  %v4877_v3 = vperm.slane %v4869_v46, %v7624_v5 }
 0x9af   : > { %v4468_v50 = vpop.permute.xlu0 %4467 }
 0x9b0   : > { %v4479_v24 = vsel %vm404_vm3, %v4478_v2, %v4468_v50 }
 0x9b1   : > { %v4480_v17 = vsel %vm4103_vm5, %v4479_v24, %v4472_v59 }
 0x9b2   : > { %4481 = vst.msk [vmem:[#allocation4 + $0x10] sm:$0xff] %vm406_vm4, %v4480_v17 }
 0x9b7   : > { %v4808_v7 = vpop.permute.xlu0 %4807 }
 0x9b8   : > { %v4822_v26 = vsel %vm4100_vm15, %v4821_v19, %v4808_v7  ;;  %v10422_v19 = vld [vmem:[#allocation3 + $0x2] sm:$0xff] }
 0x9b9   : > { %v4823_v14 = vsel %vm404_vm3, %v4822_v26, %v4812_v20  ;;  %v4926_v20 = vrot.slane %v4889_v38, 4  ;;  %v4928_v26 = vrot.slane %v4877_v3, 4 }
 0x9ba   : > { %v4824_v49 = vsel %vm4103_vm5, %v4823_v14, %v4816_v0 }
 0x9bb   : > { %4825 = vst.msk [vmem:[#allocation4 + $0x20] sm:$0xff] %vm406_vm4, %v4824_v49  ;;  %v4927_v50 = vsel %vm232_vm0, %v4926_v20, %v4877_v3  ;;  %v4929_v40 = vsel %vm232_vm0, %v4889_v38, %v4928_v26  ;;  %v5046_v20 = vrot.slane %v10382_v37, 4 }
 0x9bc   : > { %v4933_v24 = vperm.slane %v4927_v50, %v7657_v25  ;;  %v10440_v9 = vperm.slane %v4929_v40, %v7657_v25 }
 0x9be   : > { %v4972_v30 = vrot.slane %v4933_v24, 4 }
 0x9bf   : > { %v4855_v54 = vpop.permute.xlu0 %4854 }
 0x9c0   : > { %v4890_v47 = vrot.slane %v4855_v54, 4  ;;  %v4893_v56 = vsel %vm232_vm0, %v4855_v54, %v4892_v57 }
 0x9c1   : > { %v4901_v59 = vperm.slane %v4893_v56, %v7624_v5 }
 0x9c2   : > { %v4891_v35 = vsel %vm232_vm0, %v4890_v47, %v4851_v44 }
 0x9c3   : > { %v4897_v60 = vperm.slane %v4891_v35, %v7624_v5  ;;  %v4951_v27 = vsel %vm232_vm0, %v4950_v32, %v4901_v59  ;;  %v4952_v63 = vrot.slane %v4901_v59, 4  ;;  %v5034_v59 = vrot.slane %v10386_v55, 4 }
 0x9c4   : > { %v4957_v0 = vperm.slane %v4951_v27, %v7657_v25 }
 0x9c5   : > { %v4940_v10 = vrot.slane %v4897_v60, 4  ;;  %v4939_v22 = vsel %vm232_vm0, %v4938_v61, %v4897_v60  ;;  %v4953_v7 = vsel %vm232_vm0, %v10343_v48, %v4952_v63  ;;  %v5035_v38 = vsel %vm232_vm0, %v5034_v59, %v10396_v62 }
 0x9c6   : > { %v10364_v12 = vperm.slane %v4939_v22, %v7657_v25  ;;  %v4970_v11 = vrot.slane %v4957_v0, 4  ;;  %v10429_v6 = vperm.slane %v4953_v7, %v7657_v25  ;;  %v4973_v14 = vsel %vm232_vm0, %v4957_v0, %v4972_v30 }
 0x9c7   : > { %v4941_v36 = vsel %vm232_vm0, %v4909_v21, %v4940_v10  ;;  %v5022_v60 = vrot.slane %v10392_v53, 4  ;;  %v10474_v27 = vperm.slane %v5035_v38, %v7624_v5 }
 0x9c8   : > { %v4965_v52 = vsel %vm232_vm0, %v10364_v12, %v4964_v58  ;;  %v4949_v8 = vperm.slane %v4941_v36, %v7657_v25  ;;  %v4971_v17 = vsel %vm232_vm0, %v4970_v11, %v4933_v24  ;;  %v4974_v49 = vrot.slane %v10429_v6, 4 }
 0x9c9   : > { %4979 = vrot.lane.b32.xlu1 %v4965_v52, %s7568_s23  ;;  %v5058_v36 = vrot.slane %v10400_v42, 4  ;;  %v5047_v24 = vsel %vm232_vm0, %v5046_v20, %v10404_v28 }
 0x9ca   : > { %v4969_v51 = vsel %vm232_vm0, %v4949_v8, %v4968_v34  ;;  %v4966_v44 = vrot.slane %v4949_v8, 4  ;;  %v4975_v45 = vsel %vm232_vm0, %v4974_v49, %v10440_v9  ;;  %v5023_v34 = vsel %vm232_vm0, %v5022_v60, %v10422_v19 }
 0x9cb   : > { %4987 = vrot.lane.b32.xlu2 %v4969_v51, %s7565_s20  ;;  %v5070_v51 = vrot.slane %v10474_v27, 4  ;;  %v10495_v11 = vperm.slane %v5023_v34, %v7624_v5  ;;  %v10511_v38 = vperm.slane %v5047_v24, %v7624_v5 }
 0x9cc   : > { %v4967_v2 = vsel %vm232_vm0, %v4966_v44, %v4925_v18 }
 0x9cd   : > { %4983 = vrot.lane.b32.xlu0 %v4967_v2, %s7552_s28 }
 0x9d1   : > { %4991 = vrot.lane.b32.xlu1 %v4971_v17, %s7549_s25  ;;  %v5059_v17 = vsel %vm232_vm0, %v5058_v36, %v10410_v16 }
 0x9d3   : > { %5386 = vrot.lane.b32.xlu2 %v10382_v37, %s7556_s7 }
 0x9d5   : > { %5380 = vrot.lane.b32.xlu0 %v10386_v55, %s7556_s7 }
 0x9d9   : > { %5192 = vrot.lane.b32.xlu1 %v10386_v55, %s7555_s6 }
 0x9db   : > { %5378 = vrot.lane.b32.xlu2 %v10392_v53, %s7556_s7 }
 0x9dd   : > { %5376 = vrot.lane.b32.xlu0 %v10396_v62, %s7556_s7 }
 0x9e1   : > { %5388 = vrot.lane.b32.xlu1 %v10400_v42, %s7556_s7 }
 0x9e3   : > { %5382 = vrot.lane.b32.xlu2 %v10404_v28, %s7556_s7 }
 0x9e5   : > { %5198 = vrot.lane.b32.xlu0 %v10382_v37, %s7555_s6 }
 0x9e9   : > { %5384 = vrot.lane.b32.xlu1 %v10410_v16, %s7556_s7 }
 0x9eb   : > { %5190 = vrot.lane.b32.xlu2 %v10392_v53, %s7555_s6 }
 0x9ed   : > { %5188 = vrot.lane.b32.xlu0 %v10396_v62, %s7555_s6 }
 0x9f1   : > { %5200 = vrot.lane.b32.xlu1 %v10400_v42, %s7555_s6 }
 0x9f3   : > { %5194 = vrot.lane.b32.xlu2 %v10404_v28, %s7555_s6 }
 0x9f5   : > { %5374 = vrot.lane.b32.xlu0 %v10422_v19, %s7556_s7 }
 0x9f9   : > { %5196 = vrot.lane.b32.xlu1 %v10410_v16, %s7555_s6 }
 0x9fb   : > { %4995 = vrot.lane.b32.xlu2 %v4973_v14, %s7567_s22 }
 0x9fd   : > { %5186 = vrot.lane.b32.xlu0 %v10422_v19, %s7555_s6 }
 0xa01   : > { %4999 = vrot.lane.b32.xlu1 %v4975_v45, %s7551_s27  ;;  %v10507_v45 = vsel %vm232_vm0, %v5070_v51, %v10495_v11 }
 0xa25   : > { %v10445_v33 = vpop.permute.xlu2 %4987 }
 0xa2d   : > { %v5387_v29 = vpop.permute.xlu2 %5386 }
 0xa2e   : > { %v5422_v23 = vrot.slane %v5387_v29, 4 }
 0xa35   : > { %v10453_v21 = vpop.permute.xlu2 %5378 }
 0xa36   : > { %v5398_v63 = vrot.slane %v10453_v21, 4 }
 0xa3b   : > { %v10447_v41 = vpop.permute.xlu1 %4979 }
 0xa3d   : > { %v5383_v13 = vpop.permute.xlu2 %5382 }
 0xa3e   : > { %v5423_v61 = vsel %vm232_vm0, %v5422_v23, %v5383_v13  ;;  %v5424_v7 = vrot.slane %v5383_v13, 4  ;;  %v10514_v13 = vperm.slane %v5059_v17, %v7624_v5 }
 0xa3f   : > { %v10449_v57 = vpop.permute.xlu0 %4983  ;;  %v5429_v22 = vperm.slane %v5423_v61, %v7624_v5 }
 0xa41   : > { %v5472_v44 = vrot.slane %v5429_v22, 4 }
 0xa43   : > { %v10451_v1 = vpop.permute.xlu1 %4991 }
 0xa45   : > { %v10464_v39 = vpop.permute.xlu2 %5190 }
 0xa47   : > { %v10455_v48 = vpop.permute.xlu0 %5380 }
 0xa48   : > { %v5410_v46 = vrot.slane %v10455_v48, 4 }
 0xa4b   : > { %v10457_v54 = vpop.permute.xlu1 %5192 }
 0xa4c   : > { %v5222_v14 = vrot.slane %v10457_v54, 4 }
 0xa4d   : > { %v10486_v0 = vpop.permute.xlu2 %5194 }
 0xa4f   : > { %v10459_v15 = vpop.permute.xlu0 %5376 }
 0xa50   : > { %v5411_v52 = vsel %vm232_vm0, %v5410_v46, %v10459_v15  ;;  %v5425_v46 = vsel %vm232_vm0, %v5387_v29, %v5424_v7  ;;  %v5412_v36 = vrot.slane %v10459_v15, 4 }
 0xa51   : > { %v5417_v2 = vperm.slane %v5411_v52, %v7624_v5 }
 0xa53   : > { %v5389_v47 = vpop.permute.xlu1 %5388  ;;  %v5446_v61 = vrot.slane %v5417_v2, 4 }
 0xa54   : > { %v5434_v32 = vrot.slane %v5389_v47, 4 }
 0xa57   : > { %v10461_v56 = vpop.permute.xlu0 %5198 }
 0xa58   : > { %v5234_v58 = vrot.slane %v10461_v56, 4 }
 0xa5a   : > { %v5235_v50 = vsel %vm232_vm0, %v5234_v58, %v10486_v0 }
 0xa5b   : > { %v5385_v35 = vpop.permute.xlu1 %5384  ;;  %v5241_v40 = vperm.slane %v5235_v50, %v7624_v5 }
 0xa5c   : > { %v5435_v18 = vsel %vm232_vm0, %v5434_v32, %v5385_v35  ;;  %v5436_v59 = vrot.slane %v5385_v35, 4  ;;  %v5210_v35 = vrot.slane %v10464_v39, 4 }
 0xa5d   : > { %v5441_v8 = vperm.slane %v5435_v18, %v7624_v5  ;;  %v5284_v52 = vrot.slane %v5241_v40, 4 }
 0xa5f   : > { %v10471_v10 = vpop.permute.xlu0 %5188  ;;  %v5470_v30 = vrot.slane %v5441_v8, 4  ;;  %v5473_v26 = vsel %vm232_vm0, %v5441_v8, %v5472_v44  ;;  %v5437_v44 = vsel %vm232_vm0, %v5389_v47, %v5436_v59  ;;  %v5413_v47 = vsel %vm232_vm0, %v10455_v48, %v5412_v36 }
 0xa60   : > { %v5223_v32 = vsel %vm232_vm0, %v5222_v14, %v10471_v10  ;;  %v5481_v18 = vperm.slane %v5473_v26, %v7657_v25  ;;  %v5236_v48 = vrot.slane %v10486_v0, 4  ;;  %v5224_v0 = vrot.slane %v10471_v10, 4 }
 0xa61   : > { %v5471_v20 = vsel %vm232_vm0, %v5470_v30, %v5429_v22  ;;  %v5229_v50 = vperm.slane %v5223_v32, %v7624_v5  ;;  %v5094_v32 = vrot.slane %v10514_v13, 4 }
 0xa62   : > { %v5498_v22 = vrot.slane %v5481_v18, 4  ;;  %v5477_v15 = vperm.slane %v5471_v20, %v7657_v25  ;;  %v10545_v20 = vperm.slane %v5425_v46, %v7624_v5 }
 0xa63   : > { %v10488_v3 = vpop.permute.xlu1 %5200  ;;  %v5258_v36 = vrot.slane %v5229_v50, 4 }
 0xa64   : > { %v5246_v58 = vrot.slane %v10488_v3, 4 }
 0xa67   : > { %v5375_v49 = vpop.permute.xlu0 %5374 }
 0xa68   : > { %v5399_v23 = vsel %vm232_vm0, %v5398_v63, %v5375_v49  ;;  %v5400_v7 = vrot.slane %v5375_v49, 4 }
 0xa69   : > { %v5405_v60 = vperm.slane %v5399_v23, %v7624_v5 }
 0xa6b   : > { %v5447_v8 = vsel %vm232_vm0, %v5446_v61, %v5405_v60  ;;  %v5448_v34 = vrot.slane %v5405_v60, 4  ;;  %v5197_v51 = vpop.permute.xlu1 %5196  ;;  %v10539_v60 = vperm.slane %v5437_v44, %v7624_v5 }
 0xa6c   : > { %v5247_v24 = vsel %vm232_vm0, %v5246_v58, %v5197_v51  ;;  %v5453_v29 = vperm.slane %v5447_v8, %v7657_v25  ;;  %v5248_v30 = vrot.slane %v5197_v51, 4  ;;  %v10552_v8 = vperm.slane %v5413_v47, %v7624_v5 }
 0xa6d   : > { %v5253_v17 = vperm.slane %v5247_v24, %v7624_v5  ;;  %v5449_v63 = vsel %vm232_vm0, %v5417_v2, %v5448_v34 }
 0xa6e   : > { %v5457_v26 = vperm.slane %v5449_v63, %v7657_v25  ;;  %v5496_v14 = vrot.slane %v5453_v29, 4  ;;  %v5249_v34 = vsel %vm232_vm0, %v10488_v3, %v5248_v30 }
 0xa6f   : > { %v5282_v59 = vrot.slane %v5253_v17, 4  ;;  %v5285_v23 = vsel %vm232_vm0, %v5253_v17, %v5284_v52  ;;  %v5187_v61 = vpop.permute.xlu0 %5186  ;;  %v5482_v17 = vrot.slane %v10539_v60, 4  ;;  %v10568_v3 = vperm.slane %v5249_v34, %v7624_v5 }
 0xa70   : > { %v5211_v2 = vsel %vm232_vm0, %v5210_v35, %v5187_v61  ;;  %v5499_v49 = vsel %vm232_vm0, %v5498_v22, %v5457_v26  ;;  %v5497_v58 = vsel %vm232_vm0, %v5477_v15, %v5496_v14  ;;  %v5401_v35 = vsel %vm232_vm0, %v10453_v21, %v5400_v7 }
 0xa71   : > { %v5217_v52 = vperm.slane %v5211_v2, %v7624_v5  ;;  %5515 = vrot.lane.b32.xlu2 %v5499_v49, %s7552_s28  ;;  %5511 = vrot.lane.b32.xlu0 %v5497_v58, %s7568_s23  ;;  %v5293_v46 = vperm.slane %v5285_v23, %v7657_v25  ;;  %v5283_v24 = vsel %vm232_vm0, %v5282_v59, %v5241_v40  ;;  %v5500_v63 = vrot.slane %v5457_v26, 4 }
 0xa72   : > { %v5494_v14 = vrot.slane %v5477_v15, 4  ;;  %v10565_v21 = vperm.slane %v5401_v35, %v7624_v5  ;;  %v5212_v7 = vrot.slane %v5187_v61, 4  ;;  %v5289_v40 = vperm.slane %v5283_v24, %v7657_v25 }
 0xa73   : > { %v5259_v51 = vsel %vm232_vm0, %v5258_v36, %v5217_v52  ;;  %v5260_v44 = vrot.slane %v5217_v52, 4  ;;  %v5310_v47 = vrot.slane %v5293_v46, 4  ;;  %v5458_v26 = vrot.slane %v10552_v8, 4 }
 0xa74   : > { %v5265_v22 = vperm.slane %v5259_v51, %v7657_v25  ;;  %v5237_v15 = vsel %vm232_vm0, %v10461_v56, %v5236_v48  ;;  %v5225_v23 = vsel %vm232_vm0, %v10457_v54, %v5224_v0  ;;  %v10579_v2 = vsel %vm232_vm0, %v5494_v14, %v5453_v29 }
 0xa75   : > { %v5261_v10 = vsel %vm232_vm0, %v5229_v50, %v5260_v44  ;;  %v5501_v61 = vsel %vm232_vm0, %v5481_v18, %v5500_v63  ;;  %v5483_v58 = vsel %vm232_vm0, %v5482_v17, %v10545_v20  ;;  %v5294_v36 = vrot.slane %v10568_v3, 4 }
 0xa76   : > { %v5269_v30 = vperm.slane %v5261_v10, %v7657_v25  ;;  %v5308_v59 = vrot.slane %v5265_v22, 4  ;;  %v5095_v54 = vsel %vm232_vm0, %v5094_v32, %v10511_v38  ;;  %v5213_v56 = vsel %vm232_vm0, %v10464_v39, %v5212_v7 }
 0xa77   : > { %v10596_v18 = vperm.slane %v10507_v45, %v7657_v25  ;;  %v5459_v29 = vsel %vm232_vm0, %v5458_v26, %v10565_v21  ;;  %v5306_v48 = vrot.slane %v5289_v40, 4  ;;  %v10601_v52 = vperm.slane %v5237_v15, %v7624_v5 }
 0xa78   : > { %v5311_v50 = vsel %vm232_vm0, %v5310_v47, %v5269_v30  ;;  %v5309_v49 = vsel %vm232_vm0, %v5289_v40, %v5308_v59  ;;  %v10604_v35 = vperm.slane %v5225_v23, %v7624_v5  ;;  %v5489_v32 = vperm.slane %v5483_v58, %v7657_v25 }
 0xa79   : > { %5519 = vrot.lane.b32.xlu0 %v5501_v61, %s7565_s20  ;;  %5327 = vrot.lane.b32.xlu2 %v5311_v50, %s7552_s28  ;;  %v5096_v39 = vrot.slane %v10511_v38, 4  ;;  %v10609_v34 = vperm.slane %v5095_v54, %v7657_v25  ;;  %v5312_v0 = vrot.slane %v5269_v30, 4  ;;  %v10612_v45 = vsel %vm232_vm0, %v5306_v48, %v5265_v22 }
 0xa7a   : > { %5323 = vrot.lane.b32.xlu1 %v5309_v49, %s7568_s23  ;;  %v10615_v51 = vperm.slane %v5213_v56, %v7624_v5  ;;  %v5465_v44 = vperm.slane %v5459_v29, %v7657_v25  ;;  %v5295_v17 = vsel %vm232_vm0, %v5294_v36, %v10601_v52  ;;  %v5120_v38 = vrot.slane %v10596_v18, 4 }
 0xa7b   : > { %v5097_v24 = vsel %vm232_vm0, %v10514_v13, %v5096_v39  ;;  %v5270_v63 = vrot.slane %v10604_v35, 4  ;;  %v5060_v14 = vrot.slane %v10410_v16, 4  ;;  %v5502_v7 = vrot.slane %v5489_v32, 4 }
 0xa7c   : > { %v5121_v22 = vsel %vm232_vm0, %v10609_v34, %v5120_v38  ;;  %v5313_v10 = vsel %vm232_vm0, %v5293_v46, %v5312_v0  ;;  %v5105_v30 = vperm.slane %v5097_v24, %v7657_v25  ;;  %v5301_v47 = vperm.slane %v5295_v17, %v7657_v25 }
 0xa7d   : > { %v5503_v13 = vsel %vm232_vm0, %v5502_v7, %v5465_v44  ;;  %v5072_v40 = vrot.slane %v10495_v11, 4  ;;  %v5271_v16 = vsel %vm232_vm0, %v5270_v63, %v10615_v51  ;;  %v5061_v46 = vsel %vm232_vm0, %v10400_v42, %v5060_v14 }
 0xa7e   : > { %v5122_v26 = vrot.slane %v5105_v30, 4  ;;  %v5277_v15 = vperm.slane %v5271_v16, %v7657_v25  ;;  %v5314_v23 = vrot.slane %v5301_v47, 4  ;;  %v5504_v61 = vrot.slane %v5465_v44, 4 }
 0xa7f   : > { %v5073_v59 = vsel %vm232_vm0, %v10474_v27, %v5072_v40  ;;  %v5036_v50 = vrot.slane %v10396_v62, 4  ;;  %v5069_v11 = vperm.slane %v5061_v46, %v7624_v5  ;;  %v5484_v49 = vrot.slane %v10545_v20, 4 }
 0xa80   : > { %v5460_v58 = vrot.slane %v10565_v21, 4  ;;  %v5048_v36 = vrot.slane %v10404_v28, 4  ;;  %v5081_v42 = vperm.slane %v5073_v59, %v7657_v25  ;;  %v5315_v56 = vsel %vm232_vm0, %v5314_v23, %v5277_v15 }
 0xa81   : > { %5135 = vrot.lane.b32.xlu0 %v5121_v22, %s7568_s23  ;;  %5331 = vrot.lane.b32.xlu2 %v5313_v10, %s7565_s20  ;;  %v5037_v27 = vsel %vm232_vm0, %v10386_v55, %v5036_v50  ;;  %v5485_v62 = vsel %vm232_vm0, %v10539_v60, %v5484_v49  ;;  %v5505_v28 = vsel %vm232_vm0, %v5489_v32, %v5504_v61  ;;  %v5106_v20 = vrot.slane %v5069_v11, 4 }
 0xa82   : > { %5523 = vrot.lane.b32.xlu1 %v5503_v13, %s7549_s25  ;;  %v5123_v54 = vsel %vm232_vm0, %v5122_v26, %v5081_v42  ;;  %v5049_v29 = vsel %vm232_vm0, %v10382_v37, %v5048_v36  ;;  %v5461_v55 = vsel %vm232_vm0, %v10552_v8, %v5460_v58  ;;  %v5493_v21 = vperm.slane %v5485_v62, %v7657_v25 }
 0xa83   : > { %v5045_v48 = vperm.slane %v5037_v27, %v7624_v5  ;;  %v5057_v60 = vperm.slane %v5049_v29, %v7624_v5  ;;  %v5316_v39 = vrot.slane %v5277_v15, 4  ;;  %v5024_v37 = vrot.slane %v10422_v19, 4 }
 0xa84   : > { %v5296_v0 = vrot.slane %v10601_v52, 4  ;;  %v5272_v44 = vrot.slane %v10615_v51, 4  ;;  %v5469_v32 = vperm.slane %v5461_v55, %v7657_v25  ;;  %v5124_v17 = vrot.slane %v5081_v42, 4 }
 0xa85   : > { %v5107_v24 = vsel %vm232_vm0, %v5106_v20, %v5057_v60  ;;  %v5025_v8 = vsel %vm232_vm0, %v10392_v53, %v5024_v37  ;;  %v5506_v38 = vrot.slane %v5493_v21, 4  ;;  %v5082_v63 = vrot.slane %v5045_v48, 4  ;;  %v4996_v20 = vpop.permute.xlu2 %4995 }
 0xa86   : > { %v5297_v14 = vsel %vm232_vm0, %v10568_v3, %v5296_v0  ;;  %v5125_v7 = vsel %vm232_vm0, %v5105_v30, %v5124_v17  ;;  %v5317_v19 = vsel %vm232_vm0, %v5301_v47, %v5316_v39  ;;  %v5113_v52 = vperm.slane %v5107_v24, %v7657_v25 }
 0xa87   : > { %v5507_v51 = vsel %vm232_vm0, %v5506_v38, %v5469_v32  ;;  %v5033_v22 = vperm.slane %v5025_v8, %v7624_v5  ;;  %v5273_v53 = vsel %vm232_vm0, %v10604_v35, %v5272_v44  ;;  %v5305_v3 = vperm.slane %v5297_v14, %v7657_v25 }
 0xa88   : > { %v5108_v30 = vrot.slane %v5057_v60, 4  ;;  %v5126_v47 = vrot.slane %v5113_v52, 4  ;;  %v5281_v13 = vperm.slane %v5273_v53, %v7657_v25  ;;  %v5508_v40 = vrot.slane %v5469_v32, 4 }
 0xa89   : > { %5139 = vrot.lane.b32.xlu0 %v5123_v54, %s7552_s28  ;;  %5335 = vrot.lane.b32.xlu2 %v5315_v56, %s7549_s25  ;;  %v5083_v10 = vsel %vm232_vm0, %v5082_v63, %v5033_v22  ;;  %v5318_v59 = vrot.slane %v5305_v3, 4  ;;  %v5084_v61 = vrot.slane %v5033_v22, 4  ;;  %v4976_v56 = vrot.slane %v10440_v9, 4 }
 0xa8a   : > { %5527 = vrot.lane.b32.xlu1 %v5505_v28, %s7567_s22  ;;  %v5109_v16 = vsel %vm232_vm0, %v5069_v11, %v5108_v30  ;;  %v5089_v46 = vperm.slane %v5083_v10, %v7657_v25  ;;  %v5509_v23 = vsel %vm232_vm0, %v5493_v21, %v5508_v40  ;;  %v5320_v11 = vrot.slane %v5281_v13, 4 }
 0xa8b   : > { %v5319_v35 = vsel %vm232_vm0, %v5318_v59, %v5281_v13  ;;  %v5117_v15 = vperm.slane %v5109_v16, %v7657_v25  ;;  %v5085_v50 = vsel %vm232_vm0, %v5045_v48, %v5084_v61  ;;  %v4977_v29 = vsel %vm232_vm0, %v10429_v6, %v4976_v56  ;;  %v5000_v48 = vpop.permute.xlu1 %4999 }
 0xa8c   : > { %v5127_v26 = vsel %vm232_vm0, %v5126_v47, %v5089_v46  ;;  %v5093_v58 = vperm.slane %v5085_v50, %v7657_v25  ;;  %v5128_v36 = vrot.slane %v5089_v46, 4  ;;  %v5321_v42 = vsel %vm232_vm0, %v5305_v3, %v5320_v11 }
 0xa8d   : > { %v5130_v49 = vrot.slane %v5117_v15, 4  ;;  %v5118_v13 = vrot.slane %v10609_v34, 4 }
 0xa8e   : > { %v5129_v54 = vsel %vm232_vm0, %v5113_v52, %v5128_v36  ;;  %v5132_v62 = vrot.slane %v5093_v58, 4 }
 0xa8f   : > { %v5131_v27 = vsel %vm232_vm0, %v5130_v49, %v5093_v58 }
 0xa90   : > { %v5133_v28 = vsel %vm232_vm0, %v5117_v15, %v5132_v62  ;;  %v5119_v15 = vsel %vm232_vm0, %v5118_v13, %v10596_v18 }
 0xa91   : > { %5143 = vrot.lane.b32.xlu0 %v5125_v7, %s7565_s20  ;;  %5339 = vrot.lane.b32.xlu2 %v5317_v19, %s7567_s22 }
 0xa92   : > { %5531 = vrot.lane.b32.xlu1 %v5507_v51, %s7551_s27 }
 0xa99   : > { %5147 = vrot.lane.b32.xlu0 %v5127_v26, %s7549_s25  ;;  %5343 = vrot.lane.b32.xlu2 %v5319_v35, %s7551_s27  ;;  %v5558_v35 = vld [vmem:[%s11581_s4 + $0x8] sm:$0xff] }
 0xa9a   : > { %5535 = vrot.lane.b32.xlu1 %v5509_v23, %s7566_s21 }
 0xaa1   : > { %5347 = vrot.lane.b32.xlu0 %v5321_v42, %s7566_s21  ;;  %5155 = vrot.lane.b32.xlu2 %v5131_v27, %s7551_s27 }
 0xaa2   : > { %5151 = vrot.lane.b32.xlu1 %v5129_v54, %s7567_s22 }
 0xaa9   : > { %5003 = vrot.lane.b32.xlu0 %v4977_v29, %s7566_s21 }
 0xaaa   : > { %5159 = vrot.lane.b32.xlu1 %v5133_v28, %s7566_s21 }
 0xab2   : > { %5566 = vperm.xlu1 %7537, %v5558_v35  }
 0xacb   : > { %v5516_v55 = vpop.permute.xlu2 %5515 }
 0xad3   : > { %v5328_v60 = vpop.permute.xlu2 %5327 }
 0xadb   : > { %v5332_v0 = vpop.permute.xlu2 %5331 }
 0xae3   : > { %v5512_v21 = vpop.permute.xlu0 %5511  ;;  %v5336_v24 = vpop.permute.xlu2 %5335 }
 0xae4   : > { %v5538_v38 = vsel %vm4094_vm10, %v10579_v2, %v5512_v21  ;;  %v5552_v21 = vld [vmem:[#allocation4 + $0x20] sm:$0xff] }
 0xae5   : > { %v5539_v7 = vsel %vm400_vm1, %v5538_v38, %v5516_v55 }
 0xaeb   : > { %v5520_v39 = vpop.permute.xlu0 %5519  ;;  %v5340_v63 = vpop.permute.xlu2 %5339 }
 0xaec   : > { %v5324_v37 = vpop.permute.xlu1 %5323  ;;  %v5540_v19 = vsel %vm4097_vm14, %v5539_v7, %v5520_v39  ;;  %v5549_v39 = vld [vmem:[#allocation4 + $0x8] sm:$0xff] }
 0xaed   : > { %v5350_v14 = vsel %vm4094_vm10, %v10612_v45, %v5324_v37  ;;  %v4962_v45 = vrot.slane %v10364_v12, 4  ;;  %v5557_v12 = vld [vmem:[%s11581_s4] sm:$0xff] }
 0xaee   : > { %v5351_v52 = vsel %vm400_vm1, %v5350_v14, %v5328_v60  ;;  %5561 = vperm.xlu2 %7536, %v5557_v12   ;;  %v5550_v60 = vld [vmem:[#allocation4 + $0x10] sm:$0xff]  ;;  %v5546_v37 = vld [vmem:[%s11580_s3] sm:$0xff] }
 0xaef   : > { %v5352_v3 = vsel %vm4097_vm14, %v5351_v52, %v5332_v0  ;;  %v4963_v46 = vsel %vm232_vm0, %v4962_v45, %v10353_v43  ;;  %v5547_v0 = vld [vmem:[%s11580_s3 + $0x8] sm:$0xff] }
 0xaf0   : > { %v5353_v47 = vsel %vm402_vm2, %v5352_v3, %v5336_v24  ;;  %v5006_v34 = vsel %vm4094_vm10, %v4963_v46, %v10447_v41 }
 0xaf1   : > { %v5354_v16 = vsel %vm4100_vm15, %v5353_v47, %v5340_v63  ;;  %v5007_v61 = vsel %vm400_vm1, %v5006_v34, %v10449_v57 }
 0xaf2   : > { %v5008_v18 = vsel %vm4097_vm14, %v5007_v61, %v10445_v33 }
 0xaf3   : > { %v5136_v44 = vpop.permute.xlu0 %5135  ;;  %v5344_v40 = vpop.permute.xlu2 %5343  ;;  %v5009_v36 = vsel %vm402_vm2, %v5008_v18, %v10451_v1 }
 0xaf4   : > { %v5524_v9 = vpop.permute.xlu1 %5523  ;;  %v5355_v59 = vsel %vm404_vm3, %v5354_v16, %v5344_v40  ;;  %v5162_v50 = vsel %vm4094_vm10, %v5119_v15, %v5136_v44  ;;  %v5010_v42 = vsel %vm4100_vm15, %v5009_v36, %v4996_v20  ;;  %v5548_v44 = vld [vmem:[#allocation4] sm:$0xff]  ;;  %vm7368_vm10 = vcmask 786112  }
 0xaf5   : > { %v5541_v51 = vsel %vm402_vm2, %v5540_v19, %v5524_v9  ;;  %v5011_v27 = vsel %vm404_vm3, %v5010_v42, %v5000_v48  ;;  %v5551_v48 = vld [vmem:[#allocation4 + $0x18] sm:$0xff] }
 0xafb   : > { %v5140_v32 = vpop.permute.xlu0 %5139  ;;  %v5156_v54 = vpop.permute.xlu2 %5155 }
 0xafc   : > { %v5528_v17 = vpop.permute.xlu1 %5527  ;;  %v5163_v49 = vsel %vm400_vm1, %v5162_v50, %v5140_v32  ;;  %vm5569_vm1 = vcmask 588800  }
 0xafd   : > { %v5542_v22 = vsel %vm4100_vm15, %v5541_v51, %v5528_v17 }
 0xb03   : > { %v5144_v6 = vpop.permute.xlu0 %5143 }
 0xb04   : > { %v5532_v8 = vpop.permute.xlu1 %5531  ;;  %v5164_v41 = vsel %vm4097_vm14, %v5163_v49, %v5144_v6  ;;  %vm7372_vm14 = vcmask 851712  }
 0xb05   : > { %v5543_v10 = vsel %vm404_vm3, %v5542_v22, %v5532_v8 }
 0xb0b   : > { %v5148_v53 = vpop.permute.xlu0 %5147 }
 0xb0c   : > { %v5536_v2 = vpop.permute.xlu1 %5535  ;;  %v5165_v58 = vsel %vm402_vm2, %v5164_v41, %v5148_v53  ;;  %vm6421_vm2 = vcmask 11264  }
 0xb0d   : > { %v5544_v30 = vsel %vm4103_vm5, %v5543_v10, %v5536_v2 }
 0xb0e   : > { %5545 = vst.msk [vmem:[#allocation4 + $0x40] sm:$0xff] %vm406_vm4, %v5544_v30 }
 0xb13   : > { %v5348_v26 = vpop.permute.xlu0 %5347 }
 0xb14   : > { %v5356_v23 = vsel %vm4103_vm5, %v5355_v59, %v5348_v26  ;;  %v5152_v43 = vpop.permute.xlu1 %5151 }
 0xb15   : > { %5357 = vst.msk [vmem:[#allocation4 + $0x38] sm:$0xff] %vm406_vm4, %v5356_v23  ;;  %v5556_v11 = vld [vmem:[#allocation4 + $0x40] sm:$0xff]  ;;  %v5166_v57 = vsel %vm4100_vm15, %v5165_v58, %v5152_v43  ;;  %vm7376_vm15 = vcmask 917312  }
 0xb16   : > { %5583 = vmatpush.msra.mxu2 %v5556_v11  ;;  %7494 = vmatpush.msra.mxu3 %v5556_v11  ;;  %v5167_v29 = vsel %vm404_vm3, %v5166_v57, %v5156_v54  ;;  %vm7332_vm3 = vcmask 195712  }
 0xb1b   : > { %v5004_v56 = vpop.permute.xlu0 %5003 }
 0xb1c   : > { %v5012_v62 = vsel %vm4103_vm5, %v5011_v27, %v5004_v56  ;;  %v5160_v28 = vpop.permute.xlu1 %5159  ;;  %v5555_v55 = vld [vmem:[#allocation4 + $0x38] sm:$0xff] }
 0xb1d   : > { %5013 = vst.msk [vmem:[#allocation4 + $0x28] sm:$0xff] %vm406_vm4, %v5012_v62  ;;  %v5168_v33 = vsel %vm4103_vm5, %v5167_v29, %v5160_v28  ;;  %5584 = vmatpush.msra.mxu2 %v5555_v55  ;;  %7495 = vmatpush.msra.mxu3 %v5555_v55  ;;  %vm7380_vm5 = vcmask 982912  }
 0xb1e   : > { %5169 = vst.msk [vmem:[#allocation4 + $0x30] sm:$0xff] %vm406_vm4, %v5168_v33  ;;  %vm7336_vm4 = vcmask 261312  }
 0xb24   : > { %v5553_v20 = vld [vmem:[#allocation4 + $0x28] sm:$0xff]  ;;  %v5567_v32 = vpop.permute.xlu1 %5566 }
 0xb25   : > { %v5554_v1 = vld [vmem:[#allocation4 + $0x30] sm:$0xff] }
 0xb26   : > { %5585 = vmatpush.msra.mxu2 %v5554_v1  ;;  %7496 = vmatpush.msra.mxu3 %v5554_v1 }
 0xb28   : > { %5586 = vmatpush.msra.mxu2 %v5553_v20  ;;  %7497 = vmatpush.msra.mxu3 %v5553_v20 }
 0xb2a   : > { %5587 = vmatpush.msra.mxu2 %v5552_v21  ;;  %7498 = vmatpush.msra.mxu3 %v5552_v21 }
 0xb2c   : > { %5588 = vmatpush.msra.mxu2 %v5551_v48  ;;  %7499 = vmatpush.msra.mxu3 %v5551_v48 }
 0xb2e   : > { %5589 = vmatpush.msra.mxu2 %v5550_v60  ;;  %7500 = vmatpush.msra.mxu3 %v5550_v60 }
 0xb30   : > { %5590 = vmatpush.msra.mxu2 %v5549_v39  ;;  %7501 = vmatpush.msra.mxu3 %v5549_v39 }
 0xb32   : > { %5591 = vmatpush.msra.mxu2 %v5548_v44  ;;  %7502 = vmatpush.msra.mxu3 %v5548_v44 }
 0xb33   : > { %7490 = vmatmul.msk.f32.vlgmr.msra.gmra.mxu2 %vm5569_vm1, %v5546_v37  ;;  %7491 = vmatmul.msk.f32.vlgmr.msra.gmra.mxu3 %vm5569_vm1, %v5547_v0  ;;  %vm7384_vm1 = vcmask 1048512  }
 0xb48   : > { %v5562_v9 = vpop.permute.xlu2 %5561 }
 0xbb6   : > { %v5593_v24 = vpop.f32.mrf.mxu2  ;;  %v5596_v17 = vpop.f32.mrf.mxu3 }
 0xbb7   : > { %v5594_v6 = vadd.f32 %v5593_v24, %v5562_v9  ;;  %v5597_v8 = vadd.f32 %v5596_v17, %v5567_v32 }
 0xbb9   : > { %v5599_v38 = vmax.f32 %v5594_v6, 0.0  ;;  %v5600_v63 = vmax.f32 %v5597_v8, 0.0 }
 0xbbb   : > { %5605 = vrot.lane.b32.xlu2 %v5600_v63, %s7553_s29  ;;  %5609 = vrot.lane.b32.xlu1 %v5599_v38, %s7550_s26  ;;  %v5623_v19 = vrot.slane %v5599_v38, 4  ;;  %v5679_v12 = vrot.slane %v5600_v63, 4 }
 0xbbc   : > { %5603 = vrot.lane.b32.xlu0 %v5599_v38, %s7553_s29 }
 0xbc3   : > { %5615 = vrot.lane.b32.xlu2 %v5599_v38, %s7554_s30  ;;  %5617 = vrot.lane.b32.xlu1 %v5600_v63, %s7554_s30 }
 0xbc4   : > { %5611 = vrot.lane.b32.xlu0 %v5600_v63, %s7550_s26  ;;  %s7485_s26 = sshll.u32 %s11675_s19, 1 }
 0xc15   : > { %v5606_v14 = vpop.permute.xlu2 %5605 }
 0xc16   : > { %v5691_v26 = vrot.slane %v5606_v14, 4 }
 0xc1d   : > { %v5616_v7 = vpop.permute.xlu2 %5615 }
 0xc1e   : > { %v5633_v52 = vrot.slane %v5616_v7, 4 }
 0xc2d   : > { %v5610_v51 = vpop.permute.xlu1 %5609 }
 0xc2e   : > { %v5624_v22 = vsel %vm232_vm0, %v5610_v51, %v5623_v19  ;;  %v5604_v53 = vpop.permute.xlu0 %5603  ;;  %v5621_v3 = vrot.slane %v5610_v51, 4 }
 0xc2f   : > { %v5632_v10 = vperm.slane %v5624_v22, %v7624_v5  ;;  %v5634_v2 = vsel %vm232_vm0, %v5633_v52, %v5604_v53  ;;  %v5635_v30 = vrot.slane %v5604_v53, 4 }
 0xc30   : > { %v5640_v13 = vperm.slane %v5634_v2, %v7624_v5  ;;  %v5622_v16 = vsel %vm232_vm0, %v5621_v3, %v5599_v38 }
 0xc31   : > { %v5659_v45 = vrot.slane %v5632_v10, 4  ;;  %v5636_v47 = vsel %vm232_vm0, %v5616_v7, %v5635_v30  ;;  %v5628_v15 = vperm.slane %v5622_v16, %v7624_v5 }
 0xc32   : > { %v5644_v40 = vperm.slane %v5636_v47, %v7624_v5  ;;  %v5645_v23 = vrot.slane %v5640_v13, 4 }
 0xc33   : > { %v5647_v1 = vrot.slane %v5628_v15, 4 }
 0xc34   : > { %v5657_v46 = vrot.slane %v5644_v40, 4  ;;  %v5660_v59 = vsel %vm232_vm0, %v5644_v40, %v5659_v45  ;;  %v5646_v56 = vsel %vm232_vm0, %v5645_v23, %v5628_v15 }
 0xc35   : > { %v5618_v35 = vpop.permute.xlu1 %5617  ;;  %v10781_v34 = vperm.slane %v5660_v59, %v7657_v25  ;;  %v5652_v33 = vperm.slane %v5646_v56, %v7657_v25  ;;  %v5648_v60 = vsel %vm232_vm0, %v5640_v13, %v5647_v1 }
 0xc36   : > { %v5689_v43 = vrot.slane %v5618_v35, 4  ;;  %v5612_v61 = vpop.permute.xlu0 %5611  ;;  %v5658_v50 = vsel %vm232_vm0, %v5657_v46, %v5632_v10  ;;  %v5692_v11 = vsel %vm232_vm0, %v5618_v35, %v5691_v26  ;;  %v5656_v0 = vperm.slane %v5648_v60, %v7657_v25 }
 0xc37   : > { %v5677_v49 = vrot.slane %v5612_v61, 4  ;;  %v5680_v41 = vsel %vm232_vm0, %v5612_v61, %v5679_v12  ;;  %5761 = vrot.lane.b32.xlu0 %v10781_v34, %s7560_s14  ;;  %v5664_v18 = vperm.slane %v5658_v50, %v7657_v25  ;;  %v5700_v42 = vperm.slane %v5692_v11, %v7624_v5 }
 0xc38   : > { %v5688_v58 = vperm.slane %v5680_v41, %v7624_v5  ;;  %v5690_v36 = vsel %vm232_vm0, %v5689_v43, %v5606_v14  ;;  %v5675_v37 = vrot.slane %v10781_v34, 4  ;;  %v5669_v6 = vrot.slane %v5652_v33, 4 }
 0xc39   : > { %v5678_v57 = vsel %vm232_vm0, %v5677_v49, %v5600_v63  ;;  %5757 = vrot.lane.b32.xlu2 %v5664_v18, %s7560_s14  ;;  %v5696_v62 = vperm.slane %v5690_v36, %v7624_v5  ;;  %v5713_v20 = vrot.slane %v5700_v42, 4  ;;  %v5671_v14 = vrot.slane %v5656_v0, 4 }
 0xc3a   : > { %v5684_v27 = vperm.slane %v5678_v57, %v7624_v5  ;;  %v5715_v54 = vrot.slane %v5688_v58, 4  ;;  %v10814_v32 = vsel %vm232_vm0, 0.0, %v5675_v37  ;;  %v10824_v63 = vsel %vm232_vm0, 0.0, %v5669_v6 }
 0xc3b   : > { %v5714_v39 = vsel %vm232_vm0, %v5713_v20, %v5688_v58  ;;  %v5701_v9 = vrot.slane %v5696_v62, 4  ;;  %v5673_v7 = vrot.slane %v5664_v18, 4  ;;  %v5672_v52 = vsel %vm232_vm0, 0.0, %v5671_v14 }
 0xc3c   : > { %v5703_v29 = vrot.slane %v5684_v27, 4  ;;  %v5716_v28 = vsel %vm232_vm0, %v5700_v42, %v5715_v54  ;;  %v5720_v44 = vperm.slane %v5714_v39, %v7657_v25 }
 0xc3d   : > { %v5724_v55 = vperm.slane %v5716_v28, %v7657_v25  ;;  %v5702_v24 = vsel %vm232_vm0, %v5701_v9, %v5684_v27  ;;  %v5674_v51 = vsel %vm232_vm0, 0.0, %v5673_v7 }
 0xc3e   : > { %v5704_v21 = vsel %vm232_vm0, %v5696_v62, %v5703_v29  ;;  %v5708_v8 = vperm.slane %v5702_v24, %v7657_v25  ;;  %v5729_v19 = vrot.slane %v5720_v44, 4 }
 0xc3f   : > { %5777 = vrot.lane.b32.xlu1 %v5724_v55, %s7560_s14  ;;  %5749 = vrot.lane.b32.xlu0 %v5652_v33, %s7560_s14  ;;  %v5712_v48 = vperm.slane %v5704_v21, %v7657_v25  ;;  %v5731_v17 = vrot.slane %v5724_v55, 4 }
 0xc40   : > { %v10833_v22 = vsel %vm232_vm0, 0.0, %v5729_v19  ;;  %v5725_v53 = vrot.slane %v5708_v8, 4 }
 0xc41   : > { %5769 = vrot.lane.b32.xlu2 %v5712_v48, %s7560_s14  ;;  %v5732_v38 = vsel %vm232_vm0, 0.0, %v5731_v17  ;;  %v5727_v3 = vrot.slane %v5712_v48, 4 }
 0xc42   : > { %v5726_v10 = vsel %vm232_vm0, 0.0, %v5725_v53 }
 0xc43   : > { %v5728_v2 = vsel %vm232_vm0, 0.0, %v5727_v3 }
 0xc47   : > { %5753 = vrot.lane.b32.xlu1 %v5656_v0, %s7560_s14  ;;  %5773 = vrot.lane.b32.xlu0 %v5720_v44, %s7560_s14 }
 0xc49   : > { %5763 = vrot.lane.b32.xlu2 %v10814_v32, %s7560_s14 }
 0xc4f   : > { %5765 = vrot.lane.b32.xlu1 %v5708_v8, %s7560_s14  ;;  %5779 = vrot.lane.b32.xlu0 %v5732_v38, %s7560_s14 }
 0xc51   : > { %5751 = vrot.lane.b32.xlu2 %v10824_v63, %s7560_s14 }
 0xc57   : > { %5755 = vrot.lane.b32.xlu0 %v5672_v52, %s7560_s14  ;;  %5759 = vrot.lane.b32.xlu1 %v5674_v51, %s7560_s14 }
 0xc59   : > { %5775 = vrot.lane.b32.xlu2 %v10833_v22, %s7560_s14 }
 0xc5f   : > { %5767 = vrot.lane.b32.xlu0 %v5726_v10, %s7560_s14  ;;  %5771 = vrot.lane.b32.xlu1 %v5728_v2, %s7560_s14 }
 0xc93   : > { %v5758_v47 = vpop.permute.xlu2 %5757 }
 0xc94   : > { %v10850_v16 = vmax.f32 %v5664_v18, %v5758_v47 }
 0xc9b   : > { %v5770_v59 = vpop.permute.xlu2 %5769 }
 0xc9c   : > { %v10860_v35 = vmax.f32 %v5712_v48, %v5770_v59 }
 0xca3   : > { %v5764_v11 = vpop.permute.xlu2 %5763 }
 0xca4   : > { %v10901_v41 = vmax.f32 %v10814_v32, %v5764_v11 }
 0xca9   : > { %v5762_v30 = vpop.permute.xlu0 %5761 }
 0xcaa   : > { %v10842_v45 = vmax.f32 %v10781_v34, %v5762_v30 }
 0xcab   : > { %v5752_v36 = vpop.permute.xlu2 %5751 }
 0xcac   : > { %5841 = vrot.lane.b32.xlu2 %v10842_v45, %s7556_s7  ;;  %5889 = vrot.lane.b32.xlu1 %v10842_v45, %s7558_s12  ;;  %v10920_v27 = vmax.f32 %v10824_v63, %v5752_v36 }
 0xcb1   : > { %v5778_v13 = vpop.permute.xlu1 %5777  ;;  %v5750_v46 = vpop.permute.xlu0 %5749 }
 0xcb2   : > { %v10848_v40 = vmax.f32 %v5724_v55, %v5778_v13  ;;  %v10858_v26 = vmax.f32 %v5652_v33, %v5750_v46 }
 0xcb3   : > { %v5776_v62 = vpop.permute.xlu2 %5775 }
 0xcb4   : > { %5857 = vrot.lane.b32.xlu0 %v10848_v40, %s7556_s7  ;;  %5905 = vrot.lane.b32.xlu2 %v10848_v40, %s7558_s12  ;;  %v10933_v55 = vmax.f32 %v10833_v22, %v5776_v62 }
 0xcb5   : > { %5837 = vrot.lane.b32.xlu1 %v10850_v16, %s7556_s7 }
 0xcb9   : > { %v5754_v12 = vpop.permute.xlu1 %5753  ;;  %v5774_v34 = vpop.permute.xlu0 %5773 }
 0xcba   : > { %v10868_v15 = vmax.f32 %v5656_v0, %v5754_v12  ;;  %v10870_v23 = vmax.f32 %v5720_v44, %v5774_v34 }
 0xcbc   : > { %5937 = vrot.lane.b32.xlu0 %v10842_v45, %s7559_s13  ;;  %5829 = vrot.lane.b32.xlu2 %v10858_v26, %s7556_s7 }
 0xcbd   : > { %5849 = vrot.lane.b32.xlu1 %v10860_v35, %s7556_s7 }
 0xcc1   : > { %v5766_v43 = vpop.permute.xlu1 %5765  ;;  %v5780_v50 = vpop.permute.xlu0 %5779 }
 0xcc2   : > { %v10878_v61 = vmax.f32 %v5708_v8, %v5766_v43  ;;  %v10898_v49 = vmax.f32 %v5732_v38, %v5780_v50 }
 0xcc4   : > { %5833 = vrot.lane.b32.xlu0 %v10868_v15, %s7556_s7  ;;  %5853 = vrot.lane.b32.xlu2 %v10870_v23, %s7556_s7 }
 0xcc5   : > { %5877 = vrot.lane.b32.xlu1 %v10858_v26, %s7558_s12 }
 0xcc9   : > { %v5756_v18 = vpop.permute.xlu0 %5755  ;;  %v5760_v58 = vpop.permute.xlu1 %5759 }
 0xcca   : > { %v10915_v57 = vmax.f32 %v5672_v52, %v5756_v18  ;;  %v10917_v42 = vmax.f32 %v5674_v51, %v5760_v58 }
 0xccc   : > { %5845 = vrot.lane.b32.xlu0 %v10878_v61, %s7556_s7  ;;  %5881 = vrot.lane.b32.xlu2 %v10868_v15, %s7558_s12 }
 0xccd   : > { %5901 = vrot.lane.b32.xlu1 %v10870_v23, %s7558_s12 }
 0xcd1   : > { %v5768_v54 = vpop.permute.xlu0 %5767  ;;  %v5772_v56 = vpop.permute.xlu1 %5771 }
 0xcd2   : > { %v10928_v29 = vmax.f32 %v5726_v10, %v5768_v54  ;;  %v10930_v28 = vmax.f32 %v5728_v2, %v5772_v56 }
 0xcd4   : > { %5893 = vrot.lane.b32.xlu2 %v10878_v61, %s7558_s12  ;;  %5885 = vrot.lane.b32.xlu0 %v10850_v16, %s7558_s12 }
 0xcd5   : > { %5929 = vrot.lane.b32.xlu1 %v10868_v15, %s7559_s13 }
 0xcdc   : > { %5933 = vrot.lane.b32.xlu2 %v10850_v16, %s7559_s13  ;;  %5897 = vrot.lane.b32.xlu0 %v10860_v35, %s7558_s12 }
 0xcdd   : > { %5941 = vrot.lane.b32.xlu1 %v10878_v61, %s7559_s13 }
 0xce4   : > { %5859 = vrot.lane.b32.xlu2 %v10898_v49, %s7556_s7  ;;  %5925 = vrot.lane.b32.xlu0 %v10858_v26, %s7559_s13 }
 0xce5   : > { %5843 = vrot.lane.b32.xlu1 %v10901_v41, %s7556_s7 }
 0xcec   : > { %5939 = vrot.lane.b32.xlu2 %v10901_v41, %s7559_s13  ;;  %5891 = vrot.lane.b32.xlu0 %v10901_v41, %s7558_s12 }
 0xced   : > { %5907 = vrot.lane.b32.xlu1 %v10898_v49, %s7558_s12 }
 0xcf4   : > { %5835 = vrot.lane.b32.xlu2 %v10915_v57, %s7556_s7  ;;  %5839 = vrot.lane.b32.xlu0 %v10917_v42, %s7556_s7 }
 0xcf5   : > { %5831 = vrot.lane.b32.xlu1 %v10920_v27, %s7556_s7 }
 0xcfc   : > { %5847 = vrot.lane.b32.xlu2 %v10928_v29, %s7556_s7  ;;  %5851 = vrot.lane.b32.xlu0 %v10930_v28, %s7556_s7 }
 0xcfd   : > { %5855 = vrot.lane.b32.xlu1 %v10933_v55, %s7556_s7  ;;  %s222_s7 = scalar_lea.vmem %s11582_s5, %s7485_s26 }
 0xd04   : > { %5887 = vrot.lane.b32.xlu2 %v10917_v42, %s7558_s12  ;;  %5879 = vrot.lane.b32.xlu0 %v10920_v27, %s7558_s12 }
 0xd05   : > { %5883 = vrot.lane.b32.xlu1 %v10915_v57, %s7558_s12 }
 0xd06   : > { %v5842_v33 = vpop.permute.xlu2 %5841 }
 0xd0c   : > { %5899 = vrot.lane.b32.xlu2 %v10930_v28, %s7558_s12  ;;  %5903 = vrot.lane.b32.xlu0 %v10933_v55, %s7558_s12 }
 0xd0d   : > { %5895 = vrot.lane.b32.xlu1 %v10928_v29, %s7558_s12 }
 0xd0e   : > { %v10953_v1 = vpop.permute.xlu2 %5905 }
 0xd14   : > { %5927 = vrot.lane.b32.xlu2 %v10920_v27, %s7559_s13  ;;  %5949 = vrot.lane.b32.xlu0 %v10870_v23, %s7559_s13 }
 0xd15   : > { %5953 = vrot.lane.b32.xlu1 %v10848_v40, %s7559_s13 }
 0xd16   : > { %v10961_v20 = vpop.permute.xlu2 %5829 }
 0xd1c   : > { %5945 = vrot.lane.b32.xlu2 %v10860_v35, %s7559_s13  ;;  %5955 = vrot.lane.b32.xlu0 %v10898_v49, %s7559_s13 }
 0xd1d   : > { %5935 = vrot.lane.b32.xlu1 %v10917_v42, %s7559_s13 }
 0xd1e   : > { %v10969_v21 = vpop.permute.xlu2 %5853  ;;  %v5890_v48 = vpop.permute.xlu1 %5889 }
 0xd1f   : > { %v6141_v0 = vrot.slane %v5890_v48, 4 }
 0xd21   : > { %v6142_v44 = vsel %vm232_vm0, %v6141_v0, %v10842_v45 }
 0xd22   : > { %v6146_v24 = vperm.slane %v6142_v44, %v7624_v5 }
 0xd24   : > { %5951 = vrot.lane.b32.xlu2 %v10933_v55, %s7559_s13  ;;  %5931 = vrot.lane.b32.xlu0 %v10915_v57, %s7559_s13  ;;  %v6155_v63 = vrot.slane %v6146_v24, 4 }
 0xd25   : > { %5947 = vrot.lane.b32.xlu1 %v10930_v28, %s7559_s13 }
 0xd26   : > { %v10977_v60 = vpop.permute.xlu0 %5857  ;;  %v5882_v39 = vpop.permute.xlu2 %5881 }
 0xd27   : > { %v5838_v37 = vpop.permute.xlu1 %5837  ;;  %v6029_v45 = vrot.slane %v5882_v39, 4 }
 0xd29   : > { %v6030_v47 = vsel %vm232_vm0, %v6029_v45, %v10868_v15 }
 0xd2a   : > { %v6034_v59 = vperm.slane %v6030_v47, %v7624_v5 }
 0xd2c   : > { %5943 = vrot.lane.b32.xlu0 %v10928_v29, %s7559_s13  ;;  %v6043_v54 = vrot.slane %v6034_v59, 4 }
 0xd2e   : > { %v5938_v9 = vpop.permute.xlu0 %5937  ;;  %v5894_v32 = vpop.permute.xlu2 %5893 }
 0xd2f   : > { %v6147_v17 = vrot.slane %v5938_v9, 4  ;;  %v10984_v6 = vpop.permute.xlu1 %5849  ;;  %v6197_v50 = vrot.slane %v5894_v32, 4 }
 0xd31   : > { %v6148_v8 = vsel %vm232_vm0, %v6147_v17, %v5842_v33  ;;  %v6198_v62 = vsel %vm232_vm0, %v6197_v50, %v10878_v61 }
 0xd32   : > { %v6152_v38 = vperm.slane %v6148_v8, %v7624_v5  ;;  %v6202_v44 = vperm.slane %v6198_v62, %v7624_v5 }
 0xd34   : > { %v6153_v14 = vrot.slane %v6152_v38, 4  ;;  %v10989_v7 = vsel %vm232_vm0, %v6152_v38, %v6155_v63  ;;  %v6211_v38 = vrot.slane %v6202_v44, 4 }
 0xd36   : > { %v5834_v19 = vpop.permute.xlu0 %5833  ;;  %v5934_v52 = vpop.permute.xlu2 %5933  ;;  %v10992_v53 = vsel %vm232_vm0, %v6153_v14, %v6146_v24 }
 0xd37   : > { %v6091_v51 = vrot.slane %v5934_v52, 4  ;;  %v5878_v22 = vpop.permute.xlu1 %5877 }
 0xd38   : > { %v5973_v9 = vrot.slane %v5878_v22, 4 }
 0xd39   : > { %v6092_v3 = vsel %vm232_vm0, %v6091_v51, %v5838_v37 }
 0xd3a   : > { %v6096_v12 = vperm.slane %v6092_v3, %v7624_v5  ;;  %v5974_v63 = vsel %vm232_vm0, %v5973_v9, %v10858_v26 }
 0xd3b   : > { %v5978_v51 = vperm.slane %v5974_v63, %v7624_v5 }
 0xd3c   : > { %v6097_v56 = vrot.slane %v6096_v12, 4 }
 0xd3e   : > { %v5846_v10 = vpop.permute.xlu0 %5845  ;;  %v10995_v2 = vpop.permute.xlu2 %5859 }
 0xd3f   : > { %v10997_v30 = vpop.permute.xlu1 %5901 }
 0xd46   : > { %v5886_v13 = vpop.permute.xlu0 %5885  ;;  %v5940_v46 = vpop.permute.xlu2 %5939 }
 0xd47   : > { %v6085_v34 = vrot.slane %v5886_v13, 4  ;;  %v5930_v43 = vpop.permute.xlu1 %5929  ;;  %v6175_v22 = vrot.slane %v5940_v46, 4 }
 0xd48   : > { %v6035_v11 = vrot.slane %v5930_v43, 4 }
 0xd49   : > { %v6086_v18 = vsel %vm232_vm0, %v6085_v34, %v10850_v16 }
 0xd4a   : > { %v6090_v58 = vperm.slane %v6086_v18, %v7624_v5  ;;  %v6036_v36 = vsel %vm232_vm0, %v6035_v11, %v5834_v19 }
 0xd4b   : > { %v6040_v15 = vperm.slane %v6036_v36, %v7624_v5 }
 0xd4c   : > { %v6099_v33 = vrot.slane %v6090_v58, 4  ;;  %v11014_v37 = vsel %vm232_vm0, %v6097_v56, %v6090_v58 }
 0xd4d   : > { %v6041_v48 = vrot.slane %v6040_v15, 4  ;;  %v11011_v39 = vsel %vm232_vm0, %v6040_v15, %v6043_v54 }
 0xd4e   : > { %v11016_v16 = vpop.permute.xlu0 %5897  ;;  %v11018_v0 = vpop.permute.xlu2 %5835  ;;  %v11025_v61 = vsel %vm232_vm0, %v6096_v12, %v6099_v33  ;;  %v5987_v12 = vrot.slane %v5978_v51, 4 }
 0xd4f   : > { %v5942_v32 = vpop.permute.xlu1 %5941  ;;  %v11022_v24 = vsel %vm232_vm0, %v6041_v48, %v6034_v59 }
 0xd50   : > { %v6203_v17 = vrot.slane %v5942_v32, 4 }
 0xd52   : > { %v6204_v8 = vsel %vm232_vm0, %v6203_v17, %v5846_v10 }
 0xd53   : > { %v6208_v14 = vperm.slane %v6204_v8, %v7624_v5 }
 0xd55   : > { %v6209_v19 = vrot.slane %v6208_v14, 4  ;;  %v11032_v52 = vsel %vm232_vm0, %v6208_v14, %v6211_v38 }
 0xd56   : > { %v5926_v3 = vpop.permute.xlu0 %5925  ;;  %v11035_v45 = vpop.permute.xlu2 %5847 }
 0xd57   : > { %v5979_v47 = vrot.slane %v5926_v3, 4  ;;  %v5844_v13 = vpop.permute.xlu1 %5843  ;;  %v11038_v10 = vsel %vm232_vm0, %v6209_v19, %v6202_v44 }
 0xd58   : > { %v6176_v59 = vsel %vm232_vm0, %v6175_v22, %v5844_v13 }
 0xd59   : > { %v5980_v26 = vsel %vm232_vm0, %v5979_v47, %v10961_v20  ;;  %v6180_v36 = vperm.slane %v6176_v59, %v7624_v5 }
 0xd5a   : > { %v5984_v34 = vperm.slane %v5980_v26, %v7624_v5 }
 0xd5b   : > { %v6181_v32 = vrot.slane %v6180_v36, 4 }
 0xd5c   : > { %v5985_v43 = vrot.slane %v5984_v34, 4  ;;  %v5988_v50 = vsel %vm232_vm0, %v5984_v34, %v5987_v12 }
 0xd5d   : > { %v5996_v46 = vperm.slane %v5988_v50, %v7657_v25 }
 0xd5e   : > { %v5892_v11 = vpop.permute.xlu0 %5891  ;;  %v11046_v18 = vpop.permute.xlu2 %5887  ;;  %v5986_v58 = vsel %vm232_vm0, %v5985_v43, %v5978_v51 }
 0xd5f   : > { %v6169_v54 = vrot.slane %v5892_v11, 4  ;;  %v11050_v56 = vpop.permute.xlu1 %5907  ;;  %v6428_v20 = vsel %vm6421_vm2, %v5996_v46, -inf  ;;  %v5992_v15 = vperm.slane %v5986_v58, %v7657_v25  ;;  %v5999_v9 = vrot.slane %v5996_v46, 4 }
 0xd60   : > { %6429 = vmax.xlane.f32.xlu0 %v6428_v20 }
 0xd61   : > { %v6170_v62 = vsel %vm232_vm0, %v6169_v54, %v10901_v41  ;;  %v6422_v33 = vsel %vm6421_vm2, %v5992_v15, -inf  ;;  %v5997_v48 = vrot.slane %v5992_v15, 4  ;;  %v6000_v19 = vsel %vm232_vm0, 0.0, %v5999_v9 }
 0xd62   : > { %v6174_v44 = vperm.slane %v6170_v62, %v7624_v5  ;;  %6423 = vmax.xlane.f32.xlu2 %v6422_v33  ;;  %v6431_v3 = vsel %vm6421_vm2, %v6000_v19, -inf  ;;  %v6365_v33 = vrot.slane %v10953_v1, 4 }
 0xd63   : > { %v5998_v17 = vsel %vm232_vm0, 0.0, %v5997_v48  ;;  %v6309_v48 = vrot.slane %v10997_v30, 4 }
 0xd64   : > { %v6183_v8 = vrot.slane %v6174_v44, 4  ;;  %v6425_v38 = vsel %vm6421_vm2, %v5998_v17, -inf  ;;  %v11061_v63 = vsel %vm232_vm0, %v6181_v32, %v6174_v44  ;;  %v6048_v17 = vperm.slane %v11022_v24, %v7657_v25 }
 0xd65   : > { %6426 = vmax.xlane.f32.xlu1 %v6425_v38 }
 0xd66   : > { %v11063_v14 = vpop.permute.xlu0 %5839  ;;  %v11065_v41 = vpop.permute.xlu2 %5899  ;;  %v11069_v22 = vsel %vm232_vm0, %v6180_v36, %v6183_v8 }
 0xd67   : > { %v5832_v51 = vpop.permute.xlu1 %5831 }
 0xd6a   : > { %6432 = vmax.xlane.f32.xlu2 %v6431_v3 }
 0xd6e   : > { %v5928_v47 = vpop.permute.xlu2 %5927  ;;  %v11072_v13 = vpop.permute.xlu0 %5851 }
 0xd6f   : > { %v6007_v59 = vrot.slane %v5928_v47, 4  ;;  %v5856_v26 = vpop.permute.xlu1 %5855 }
 0xd71   : > { %v6008_v12 = vsel %vm232_vm0, %v6007_v59, %v5832_v51 }
 0xd72   : > { %v6012_v34 = vperm.slane %v6008_v12, %v7624_v5 }
 0xd74   : > { %v6013_v36 = vrot.slane %v6012_v34, 4 }
 0xd76   : > { %v11076_v43 = vpop.permute.xlu2 %5945  ;;  %v5880_v50 = vpop.permute.xlu0 %5879 }
 0xd77   : > { %v6001_v46 = vrot.slane %v5880_v50, 4  ;;  %v11078_v11 = vpop.permute.xlu1 %5883  ;;  %v6053_v50 = vrot.slane %v6048_v17, 4 }
 0xd79   : > { %v6002_v58 = vsel %vm232_vm0, %v6001_v46, %v10920_v27  ;;  %v6366_v46 = vsel %vm232_vm0, %v6365_v33, %v10848_v40 }
 0xd7a   : > { %v6006_v54 = vperm.slane %v6002_v58, %v7624_v5 }
 0xd7c   : > { %v6015_v20 = vrot.slane %v6006_v54, 4  ;;  %v6014_v15 = vsel %vm232_vm0, %v6013_v36, %v6006_v54 }
 0xd7d   : > { %v6020_v62 = vperm.slane %v6014_v15, %v7657_v25 }
 0xd7e   : > { %v5952_v44 = vpop.permute.xlu2 %5951  ;;  %v5904_v9 = vpop.permute.xlu0 %5903  ;;  %v6016_v32 = vsel %vm232_vm0, %v6012_v34, %v6015_v20  ;;  %v6370_v20 = vperm.slane %v6366_v46, %v7624_v5 }
 0xd7f   : > { %v6343_v27 = vrot.slane %v5952_v44, 4  ;;  %v6337_v8 = vrot.slane %v5904_v9, 4  ;;  %v11090_v38 = vpop.permute.xlu1 %5895  ;;  %v6434_v19 = vsel %vm6421_vm2, %v6020_v62, -inf  ;;  %v6024_v51 = vperm.slane %v6016_v32, %v7657_v25 }
 0xd80   : > { %6435 = vmax.xlane.f32.xlu1 %v6434_v19  ;;  %v6025_v3 = vrot.slane %v6020_v62, 4  ;;  %v6054_v44 = vsel %vm232_vm0, 0.0, %v6053_v50  ;;  %v6113_v9 = vrot.slane %v11046_v18, 4  ;;  %v6393_v19 = vrot.slane %v11050_v56, 4 }
 0xd81   : > { %v6344_v1 = vsel %vm232_vm0, %v6343_v27, %v5856_v26  ;;  %v6338_v30 = vsel %vm232_vm0, %v6337_v8, %v10933_v55  ;;  %v6440_v47 = vsel %vm6421_vm2, %v6024_v51, -inf  ;;  %v6027_v59 = vrot.slane %v6024_v51, 4 }
 0xd82   : > { %v6348_v24 = vperm.slane %v6344_v1, %v7624_v5  ;;  %v6342_v12 = vperm.slane %v6338_v30, %v7624_v5  ;;  %6441 = vmax.xlane.f32.xlu2 %v6440_v47  ;;  %v6026_v34 = vsel %vm232_vm0, 0.0, %v6025_v3  ;;  %v6310_v26 = vsel %vm232_vm0, %v6309_v48, %v10870_v23 }
 0xd83   : > { %v6437_v58 = vsel %vm6421_vm2, %v6026_v34, -inf  ;;  %v6028_v54 = vsel %vm232_vm0, 0.0, %v6027_v59  ;;  %v6314_v15 = vperm.slane %v6310_v26, %v7624_v5  ;;  %v6052_v27 = vperm.slane %v11011_v39, %v7657_v25 }
 0xd84   : > { %v6349_v55 = vrot.slane %v6348_v24, 4  ;;  %v6351_v36 = vrot.slane %v6342_v12, 4  ;;  %6438 = vmax.xlane.f32.xlu0 %v6437_v58  ;;  %v6443_v23 = vsel %vm6421_vm2, %v6028_v54, -inf  ;;  %v6449_v51 = vsel %vm6421_vm2, %v6054_v44, -inf }
 0xd85   : > { %v6379_v3 = vrot.slane %v6370_v20, 4  ;;  %v6323_v47 = vrot.slane %v6314_v15, 4  ;;  %v6114_v39 = vsel %vm232_vm0, %v6113_v9, %v10917_v42  ;;  %v6446_v56 = vsel %vm6421_vm2, %v6048_v17, -inf }
 0xd86   : > { %v5950_v62 = vpop.permute.xlu0 %5949  ;;  %v11113_v48 = vsel %vm232_vm0, %v6348_v24, %v6351_v36  ;;  %v11118_v8 = vsel %vm232_vm0, %v6349_v55, %v6342_v12  ;;  %v6394_v12 = vsel %vm232_vm0, %v6393_v19, %v10898_v49  ;;  %v6118_v46 = vperm.slane %v6114_v39, %v7624_v5 }
 0xd87   : > { %v6315_v40 = vrot.slane %v5950_v62, 4  ;;  %v5954_v33 = vpop.permute.xlu1 %5953  ;;  %v6452_v26 = vsel %vm6421_vm2, %v6052_v27, -inf  ;;  %v6057_v17 = vrot.slane %v11078_v11, 4  ;;  %v6398_v54 = vperm.slane %v6394_v12, %v7624_v5 }
 0xd88   : > { %v6371_v32 = vrot.slane %v5954_v33, 4  ;;  %6444 = vmax.xlane.f32.xlu1 %v6443_v23  ;;  %v6281_v62 = vrot.slane %v11065_v41, 4  ;;  %v6127_v33 = vrot.slane %v6118_v46, 4 }
 0xd89   : > { %v6316_v18 = vsel %vm232_vm0, %v6315_v40, %v10969_v21  ;;  %v6055_v21 = vrot.slane %v6052_v27, 4 }
 0xd8a   : > { %v6320_v1 = vperm.slane %v6316_v18, %v7624_v5  ;;  %v6372_v30 = vsel %vm232_vm0, %v6371_v32, %v10977_v60  ;;  %6450 = vmax.xlane.f32.xlu2 %v6449_v51  ;;  %v6407_v32 = vrot.slane %v6398_v54, 4  ;;  %v6282_v27 = vsel %vm232_vm0, %v6281_v62, %v10930_v28 }
 0xd8b   : > { %v6376_v59 = vperm.slane %v6372_v30, %v7624_v5  ;;  %v6056_v9 = vsel %vm232_vm0, 0.0, %v6055_v21 }
 0xd8c   : > { %v6321_v24 = vrot.slane %v6320_v1, 4  ;;  %6447 = vmax.xlane.f32.xlu0 %v6446_v56  ;;  %v11134_v50 = vsel %vm232_vm0, %v6320_v1, %v6323_v47  ;;  %v6455_v41 = vsel %vm6421_vm2, %v6056_v9, -inf }
 0xd8d   : > { %v6377_v34 = vrot.slane %v6376_v59, 4  ;;  %v11137_v60 = vsel %vm232_vm0, %v6376_v59, %v6379_v3 }
 0xd8e   : > { %v5956_v42 = vpop.permute.xlu0 %5955  ;;  %v11143_v36 = vsel %vm232_vm0, %v6321_v24, %v6314_v15 }
 0xd8f   : > { %v6399_v58 = vrot.slane %v5956_v42, 4  ;;  %v5936_v55 = vpop.permute.xlu1 %5935  ;;  %v11146_v49 = vsel %vm232_vm0, %v6377_v34, %v6370_v20  ;;  %v6058_v20 = vsel %vm232_vm0, %v6057_v17, %v10915_v57  ;;  %v6286_v57 = vperm.slane %v6282_v27, %v7624_v5 }
 0xd90   : > { %v6119_v44 = vrot.slane %v5936_v55, 4  ;;  %6453 = vmax.xlane.f32.xlu1 %v6452_v26  ;;  %v6062_v51 = vperm.slane %v6058_v20, %v7624_v5 }
 0xd91   : > { %v6400_v40 = vsel %vm232_vm0, %v6399_v58, %v10995_v2  ;;  %v6295_v12 = vrot.slane %v6286_v57, 4 }
 0xd92   : > { %v6404_v11 = vperm.slane %v6400_v40, %v7624_v5  ;;  %v6120_v15 = vsel %vm232_vm0, %v6119_v44, %v11063_v14  ;;  %v6071_v56 = vrot.slane %v6062_v51, 4 }
 0xd93   : > { %v6124_v23 = vperm.slane %v6120_v15, %v7624_v5 }
 0xd94   : > { %6456 = vmax.xlane.f32.xlu0 %v6455_v41  ;;  %v6405_v19 = vrot.slane %v6404_v11, 4  ;;  %v11165_v3 = vsel %vm232_vm0, %v6404_v11, %v6407_v32  ;;  %v6108_v32 = vperm.slane %v11025_v61, %v7657_v25 }
 0xd95   : > { %v6125_v2 = vrot.slane %v6124_v23, 4  ;;  %v6128_v18 = vsel %vm232_vm0, %v6124_v23, %v6127_v33 }
 0xd96   : > { %v5932_v14 = vpop.permute.xlu0 %5931  ;;  %v11172_v59 = vsel %vm232_vm0, %v6405_v19, %v6398_v54 }
 0xd97   : > { %v6063_v1 = vrot.slane %v5932_v14, 4  ;;  %v5948_v30 = vpop.permute.xlu1 %5947  ;;  %v6126_v47 = vsel %vm232_vm0, %v6125_v2, %v6118_v46  ;;  %v6104_v46 = vperm.slane %v11014_v37, %v7657_v25  ;;  %v6111_v2 = vrot.slane %v6108_v32, 4 }
 0xd98   : > { %v6287_v39 = vrot.slane %v5948_v30, 4  ;;  %v6132_v27 = vperm.slane %v6126_v47, %v7657_v25  ;;  %v6476_v14 = vsel %vm6421_vm2, %v6108_v32, -inf  ;;  %v6188_v30 = vperm.slane %v11061_v63, %v7657_v25 }
 0xd99   : > { %v6064_v28 = vsel %vm232_vm0, %v6063_v1, %v11018_v0  ;;  %v6109_v62 = vrot.slane %v6104_v46, 4  ;;  %v6470_v19 = vsel %vm6421_vm2, %v6104_v46, -inf  ;;  %v6164_v1 = vperm.slane %v10989_v7, %v7657_v25 }
 0xd9a   : > { %v6068_v24 = vperm.slane %v6064_v28, %v7624_v5  ;;  %v6288_v21 = vsel %vm232_vm0, %v6287_v39, %v11072_v13  ;;  %v6160_v47 = vperm.slane %v10992_v53, %v7657_v25  ;;  %v6136_v28 = vperm.slane %v6128_v18, %v7657_v25 }
 0xd9b   : > { %v6292_v34 = vperm.slane %v6288_v21, %v7624_v5  ;;  %v6110_v33 = vsel %vm232_vm0, 0.0, %v6109_v62  ;;  %v6500_v39 = vsel %vm6421_vm2, %v6164_v1, -inf  ;;  %v6137_v21 = vrot.slane %v6132_v27, 4 }
 0xd9c   : > { %v6069_v42 = vrot.slane %v6068_v24, 4  ;;  %v6072_v26 = vsel %vm232_vm0, %v6068_v24, %v6071_v56  ;;  %v6473_v23 = vsel %vm6421_vm2, %v6110_v33, -inf  ;;  %v6193_v56 = vrot.slane %v6188_v30, 4 }
 0xd9d   : > { %v6293_v17 = vrot.slane %v6292_v34, 4  ;;  %v6080_v0 = vperm.slane %v6072_v26, %v7657_v25  ;;  %v11183_v58 = vsel %vm232_vm0, %v6292_v34, %v6295_v12  ;;  %v6494_v24 = vsel %vm6421_vm2, %v6160_v47, -inf }
 0xd9e   : > { %v6070_v55 = vsel %vm232_vm0, %v6069_v42, %v6062_v51  ;;  %v6482_v51 = vsel %vm6421_vm2, %v6132_v27, -inf  ;;  %v6488_v7 = vsel %vm6421_vm2, %v6136_v28, -inf  ;;  %v6194_v12 = vsel %vm232_vm0, 0.0, %v6193_v56 }
 0xd9f   : > { %v6464_v54 = vsel %vm6421_vm2, %v6080_v0, -inf  ;;  %v6076_v13 = vperm.slane %v6070_v55, %v7657_v25  ;;  %v11189_v44 = vsel %vm232_vm0, %v6293_v17, %v6286_v57  ;;  %v6083_v40 = vrot.slane %v6080_v0, 4 }
 0xda0   : > { %6465 = vmax.xlane.f32.xlu0 %v6464_v54  ;;  %v6112_v57 = vsel %vm232_vm0, 0.0, %v6111_v2  ;;  %v6165_v63 = vrot.slane %v6160_v47, 4  ;;  %v6138_v34 = vsel %vm232_vm0, 0.0, %v6137_v21  ;;  %v6509_v53 = vsel %vm6421_vm2, %v6194_v12, -inf }
 0xda1   : > { %v6458_v9 = vsel %vm6421_vm2, %v6076_v13, -inf  ;;  %v6081_v37 = vrot.slane %v6076_v13, 4  ;;  %v6084_v20 = vsel %vm232_vm0, 0.0, %v6083_v40  ;;  %v6479_v61 = vsel %vm6421_vm2, %v6112_v57, -inf  ;;  %v5944_v13 = vpop.permute.xlu0 %5943 }
 0xda2   : > { %6459 = vmax.xlane.f32.xlu2 %v6458_v9  ;;  %v6467_v41 = vsel %vm6421_vm2, %v6084_v20, -inf  ;;  %v6139_v42 = vrot.slane %v6136_v28, 4  ;;  %v6485_v26 = vsel %vm6421_vm2, %v6138_v34, -inf  ;;  %v6166_v18 = vsel %vm232_vm0, 0.0, %v6165_v63 }
 0xda3   : > { %v6082_v11 = vsel %vm232_vm0, 0.0, %v6081_v37  ;;  %v6167_v46 = vrot.slane %v6164_v1, 4  ;;  %v6497_v17 = vsel %vm6421_vm2, %v6166_v18, -inf  ;;  %v6192_v9 = vperm.slane %v11069_v22, %v7657_v25 }
 0xda4   : > { %v6461_v15 = vsel %vm6421_vm2, %v6082_v11, -inf  ;;  %v6140_v0 = vsel %vm232_vm0, 0.0, %v6139_v42  ;;  %v6259_v37 = vrot.slane %v11076_v43, 4  ;;  %v6225_v40 = vrot.slane %v11090_v38, 4 }
 0xda5   : > { %6462 = vmax.xlane.f32.xlu1 %v6461_v15  ;;  %v6168_v55 = vsel %vm232_vm0, 0.0, %v6167_v46  ;;  %v6491_v54 = vsel %vm6421_vm2, %v6140_v0, -inf  ;;  %v6231_v11 = vrot.slane %v5944_v13, 4  ;;  %v6216_v15 = vperm.slane %v11038_v10, %v7657_v25 }
 0xda6   : > { %v6503_v62 = vsel %vm6421_vm2, %v6168_v55, -inf  ;;  %v6506_v33 = vsel %vm6421_vm2, %v6188_v30, -inf  ;;  %v6220_v20 = vperm.slane %v11032_v52, %v7657_v25  ;;  %v6226_v22 = vsel %vm232_vm0, %v6225_v40, %v10928_v29 }
 0xda7   : > { %v6232_v43 = vsel %vm232_vm0, %v6231_v11, %v11035_v45  ;;  %v6518_v38 = vsel %vm6421_vm2, %v6216_v15, -inf  ;;  %v6253_v10 = vrot.slane %v11016_v16, 4  ;;  %v6221_v27 = vrot.slane %v6216_v15, 4 }
 0xda8   : > { %6474 = vmax.xlane.f32.xlu0 %v6473_v23  ;;  %v6195_v23 = vrot.slane %v6192_v9, 4  ;;  %v6223_v32 = vrot.slane %v6220_v20, 4  ;;  %v6512_v2 = vsel %vm6421_vm2, %v6192_v9, -inf  ;;  %v6236_v29 = vperm.slane %v6232_v43, %v7624_v5 }
 0xda9   : > { %v6254_v45 = vsel %vm232_vm0, %v6253_v10, %v10860_v35 }
 0xdaa   : > { %6468 = vmax.xlane.f32.xlu2 %v6467_v41  ;;  %v6260_v41 = vsel %vm232_vm0, %v6259_v37, %v10984_v6  ;;  %v6196_v6 = vsel %vm232_vm0, 0.0, %v6195_v23  ;;  %v6224_v16 = vsel %vm232_vm0, 0.0, %v6223_v32  ;;  %v6237_v30 = vrot.slane %v6236_v29, 4 }
 0xdab   : > { %v6264_v52 = vperm.slane %v6260_v41, %v7624_v5  ;;  %v6258_v56 = vperm.slane %v6254_v45, %v7624_v5  ;;  %v6527_v21 = vsel %vm6421_vm2, %v6224_v16, -inf  ;;  %v6332_v16 = vperm.slane %v11134_v50, %v7657_v25 }
 0xdad   : > { %6471 = vmax.xlane.f32.xlu1 %v6470_v19  ;;  %v6230_v19 = vperm.slane %v6226_v22, %v7624_v5  ;;  %v6267_v46 = vrot.slane %v6258_v56, 4 }
 0xdaf   : > { %v6239_v57 = vrot.slane %v6230_v19, 4  ;;  %v6238_v5 = vsel %vm232_vm0, %v6237_v30, %v6230_v19 }
 0xdb0   : > { %6483 = vmax.xlane.f32.xlu0 %v6482_v51  ;;  %v6515_v51 = vsel %vm6421_vm2, %v6196_v6, -inf  ;;  %v11265_v55 = vperm.slane %v6238_v5, %v7657_v25  ;;  %v11282_v6 = vperm.slane %v11189_v44, %v7657_v25  ;;  %v11293_v44 = vperm.slane %v11183_v58, %v7657_v25 }
 0xdb2   : > { %6477 = vmax.xlane.f32.xlu2 %v6476_v14  ;;  %v6265_v14 = vrot.slane %v6264_v52, 4  ;;  %v6530_v9 = vsel %vm6421_vm2, %v11265_v55, -inf }
 0xdb5   : > { %6480 = vmax.xlane.f32.xlu1 %v6479_v61  ;;  %v6222_v61 = vsel %vm232_vm0, 0.0, %v6221_v27 }
 0xdb6   : > { %v6521_v34 = vsel %vm6421_vm2, %v6222_v61, -inf }
 0xdb8   : > { %6501 = vmax.xlane.f32.xlu0 %v6500_v39 }
 0xdba   : > { %6495 = vmax.xlane.f32.xlu2 %v6494_v24 }
 0xdbd   : > { %6489 = vmax.xlane.f32.xlu1 %v6488_v7  ;;  %v6240_v7 = vsel %vm232_vm0, %v6236_v29, %v6239_v57 }
 0xdbe   : > { %v11260_v18 = vperm.slane %v6240_v7, %v7657_v25 }
 0xdc0   : > { %6510 = vmax.xlane.f32.xlu0 %v6509_v53  ;;  %v6266_v53 = vsel %vm232_vm0, %v6265_v14, %v6258_v56  ;;  %v6536_v13 = vsel %vm6421_vm2, %v11260_v18, -inf  ;;  %v6554_v14 = vsel %vm6421_vm2, %v11282_v6, -inf }
 0xdc1   : > { %v6272_v0 = vperm.slane %v6266_v53, %v7657_v25 }
 0xdc2   : > { %6486 = vmax.xlane.f32.xlu2 %v6485_v26 }
 0xdc3   : > { %v6542_v11 = vsel %vm6421_vm2, %v6272_v0, -inf }
 0xdc5   : > { %6498 = vmax.xlane.f32.xlu1 %v6497_v17  ;;  %v6524_v17 = vsel %vm6421_vm2, %v6220_v20, -inf }
 0xdc8   : > { %6492 = vmax.xlane.f32.xlu0 %v6491_v54  ;;  %v6268_v54 = vsel %vm232_vm0, %v6264_v52, %v6267_v46  ;;  %v11311_v46 = vperm.slane %v11113_v48, %v7657_v25 }
 0xdc9   : > { %v6276_v37 = vperm.slane %v6268_v54, %v7657_v25 }
 0xdca   : > { %6504 = vmax.xlane.f32.xlu2 %v6503_v62  ;;  %v6277_v62 = vrot.slane %v6272_v0, 4 }
 0xdcb   : > { %v6279_v20 = vrot.slane %v6276_v37, 4  ;;  %v6548_v27 = vsel %vm6421_vm2, %v6276_v37, -inf }
 0xdcc   : > { %v6278_v15 = vsel %vm232_vm0, 0.0, %v6277_v62 }
 0xdcd   : > { %6507 = vmax.xlane.f32.xlu1 %v6506_v33  ;;  %v6280_v52 = vsel %vm232_vm0, 0.0, %v6279_v20 }
 0xdce   : > { %v6551_v45 = vsel %vm6421_vm2, %v6280_v52, -inf  ;;  %v11330_v52 = vperm.slane %v11165_v3, %v7657_v25 }
 0xdd0   : > { %6519 = vmax.xlane.f32.xlu0 %v6518_v38  ;;  %v6545_v38 = vsel %vm6421_vm2, %v6278_v15, -inf }
 0xdd2   : > { %6513 = vmax.xlane.f32.xlu2 %v6512_v2 }
 0xdd3   : > { %v6430_v40 = vpop.xlane.xlu0 %6429 }
 0xdd4   : > { %v6686_v33 = vperm.slane %v6430_v40, 0  ;;  %v6687_v23 = vperm.slane %v6430_v40, 1  ;;  %v6688_v43 = vperm.slane %v6430_v40, 2  ;;  %v6689_v10 = vperm.slane %v6430_v40, 3 }
 0xdd5   : > { %v6424_v1 = vpop.xlane.xlu2 %6423  ;;  %6516 = vmax.xlane.f32.xlu1 %v6515_v51  ;;  %v6328_v51 = vperm.slane %v11143_v36, %v7657_v25 }
 0xdd6   : > { %v6678_v47 = vperm.slane %v6424_v1, 0  ;;  %v6679_v39 = vperm.slane %v6424_v1, 1  ;;  %v6680_v28 = vperm.slane %v6424_v1, 2  ;;  %v6681_v24 = vperm.slane %v6424_v1, 3 }
 0xdd7   : > { %v6566_v57 = vsel %vm6421_vm2, %v6328_v51, -inf  ;;  %v6335_v1 = vrot.slane %v6332_v16, 4  ;;  %v6333_v56 = vrot.slane %v6328_v51, 4 }
 0xdd8   : > { %6934 = vst [vmem:[#allocation1] ss:$9 sm:$0xff] %v6678_v47  ;;  %6528 = vmax.xlane.f32.xlu0 %v6527_v21  ;;  %v6427_v35 = vpop.xlane.xlu1 %6426  ;;  %v6572_v21 = vsel %vm6421_vm2, %v6332_v16, -inf  ;;  %v6412_v16 = vperm.slane %v11172_v59, %v7657_v25 }
 0xdd9   : > { %6936 = vst [vmem:[#allocation1 + $0x1] ss:$9 sm:$0xff] %v6679_v39  ;;  %v6682_v12 = vperm.slane %v6427_v35, 0  ;;  %v6683_v63 = vperm.slane %v6427_v35, 1  ;;  %v6684_v42 = vperm.slane %v6427_v35, 2  ;;  %v6685_v26 = vperm.slane %v6427_v35, 3 }
 0xdda   : > { %6938 = vst [vmem:[#allocation1 + $0x2] ss:$9 sm:$0xff] %v6680_v28  ;;  %6522 = vmax.xlane.f32.xlu2 %v6521_v34  ;;  %v6560_v39 = vsel %vm6421_vm2, %v11293_v44, -inf  ;;  %v6336_v58 = vsel %vm232_vm0, 0.0, %v6335_v1  ;;  %v6334_v53 = vsel %vm232_vm0, 0.0, %v6333_v56 }
 0xddb   : > { %6940 = vst [vmem:[#allocation1 + $0x3] ss:$9 sm:$0xff] %v6681_v24  ;;  %v6575_v34 = vsel %vm6421_vm2, %v6336_v58, -inf  ;;  %v6569_v5 = vsel %vm6421_vm2, %v6334_v53, -inf }
 0xddc   : > { %6942 = vst [vmem:[#allocation1 + $0x4] ss:$9 sm:$0xff] %v6682_v12 }
 0xddd   : > { %6944 = vst [vmem:[#allocation1 + $0x5] ss:$9 sm:$0xff] %v6683_v63  ;;  %6525 = vmax.xlane.f32.xlu1 %v6524_v17  ;;  %v6433_v22 = vpop.xlane.xlu2 %6432  ;;  %v6249_v17 = vrot.slane %v11265_v55, 4 }
 0xdde   : > { %6946 = vst [vmem:[#allocation1 + $0x6] ss:$9 sm:$0xff] %v6684_v42  ;;  %v6690_v32 = vperm.slane %v6433_v22, 0  ;;  %v6691_v19 = vperm.slane %v6433_v22, 1  ;;  %v6692_v2 = vperm.slane %v6433_v22, 2  ;;  %v6693_v29 = vperm.slane %v6433_v22, 3 }
 0xddf   : > { %6948 = vst [vmem:[#allocation1 + $0x7] ss:$9 sm:$0xff] %v6685_v26  ;;  %v6384_v42 = vperm.slane %v11146_v49, %v7657_v25  ;;  %v6388_v26 = vperm.slane %v11137_v60, %v7657_v25  ;;  %v6584_v49 = vsel %vm6421_vm2, %v11311_v46, -inf  ;;  %v6250_v62 = vsel %vm232_vm0, 0.0, %v6249_v17 }
 0xde0   : > { %6537 = vmax.xlane.f32.xlu0 %v6536_v13  ;;  %v6251_v60 = vrot.slane %v11260_v18, 4  ;;  %v6533_v55 = vsel %vm6421_vm2, %v6250_v62, -inf }
 0xde1   : > { %v6590_v0 = vsel %vm6421_vm2, %v6384_v42, -inf  ;;  %v6391_v13 = vrot.slane %v6388_v26, 4 }
 0xde2   : > { %6531 = vmax.xlane.f32.xlu2 %v6530_v9  ;;  %v6252_v20 = vsel %vm232_vm0, 0.0, %v6251_v60 }
 0xde5   : > { %6543 = vmax.xlane.f32.xlu1 %v6542_v11  ;;  %v6392_v11 = vsel %vm232_vm0, 0.0, %v6391_v13  ;;  %v6419_v13 = vrot.slane %v11330_v52, 4 }
 0xde6   : > { %v11275_v41 = vld [vmem:[#allocation1] sm:$0xff]  ;;  %v6599_v18 = vsel %vm6421_vm2, %v6392_v11, -inf }
 0xde7   : > { %6950 = vst [vmem:[#allocation1] ss:$9 sm:$0xff] %v6686_v33 }
 0xde8   : > { %6951 = vst [vmem:[#allocation1 + $0x1] ss:$9 sm:$0xff] %v6687_v23  ;;  %6546 = vmax.xlane.f32.xlu0 %v6545_v38 }
 0xde9   : > { %6952 = vst [vmem:[#allocation1 + $0x2] ss:$9 sm:$0xff] %v6688_v43  ;;  %v6356_v43 = vperm.slane %v11118_v8, %v7657_v25 }
 0xdea   : > { %6953 = vst [vmem:[#allocation1 + $0x3] ss:$9 sm:$0xff] %v6689_v10  ;;  %6549 = vmax.xlane.f32.xlu2 %v6548_v27  ;;  %v6539_v10 = vsel %vm6421_vm2, %v6252_v20, -inf  ;;  %v6389_v27 = vrot.slane %v6384_v42, 4 }
 0xdeb   : > { %6954 = vst [vmem:[#allocation1 + $0x4] ss:$9 sm:$0xff] %v6690_v32  ;;  %v6361_v56 = vrot.slane %v6356_v43, 4 }
 0xdec   : > { %6955 = vst [vmem:[#allocation1 + $0x5] ss:$9 sm:$0xff] %v6691_v19  ;;  %v6578_v19 = vsel %vm6421_vm2, %v6356_v43, -inf }
 0xded   : > { %6956 = vst [vmem:[#allocation1 + $0x6] ss:$9 sm:$0xff] %v6692_v2  ;;  %6552 = vmax.xlane.f32.xlu1 %v6551_v45  ;;  %v6390_v2 = vsel %vm232_vm0, 0.0, %v6389_v27  ;;  %v6307_v45 = vrot.slane %v11293_v44, 4  ;;  %v6417_v44 = vrot.slane %v6412_v16, 4 }
 0xdee   : > { %6957 = vst [vmem:[#allocation1 + $0x7] ss:$9 sm:$0xff] %v6693_v29  ;;  %v6608_v29 = vsel %vm6421_vm2, %v11330_v52, -inf  ;;  %v6593_v51 = vsel %vm6421_vm2, %v6390_v2, -inf }
 0xdf0   : > { %6555 = vmax.xlane.f32.xlu0 %v6554_v14 }
 0xdf2   : > { %6567 = vmax.xlane.f32.xlu2 %v6566_v57 }
 0xdf3   : > { %v6436_v61 = vpop.xlane.xlu1 %6435 }
 0xdf4   : > { %v6694_v30 = vperm.slane %v6436_v61, 0  ;;  %v6695_v47 = vperm.slane %v6436_v61, 1  ;;  %v6696_v36 = vperm.slane %v6436_v61, 2  ;;  %v6697_v28 = vperm.slane %v6436_v61, 3 }
 0xdf5   : > { %v11298_v50 = vld [vmem:[#allocation1] sm:$0xff]  ;;  %6561 = vmax.xlane.f32.xlu1 %v6560_v39  ;;  %v6442_v54 = vpop.xlane.xlu2 %6441 }
 0xdf6   : > { %6959 = vst [vmem:[#allocation1] ss:$9 sm:$0xff] %v6694_v30  ;;  %v6702_v9 = vperm.slane %v6442_v54, 0  ;;  %v6703_v37 = vperm.slane %v6442_v54, 1  ;;  %v6704_v15 = vperm.slane %v6442_v54, 2  ;;  %v6705_v33 = vperm.slane %v6442_v54, 3 }
 0xdf7   : > { %6960 = vst [vmem:[#allocation1 + $0x1] ss:$9 sm:$0xff] %v6695_v47  ;;  %v6439_v24 = vpop.xlane.xlu0 %6438  ;;  %v6596_v30 = vsel %vm6421_vm2, %v6388_v26, -inf  ;;  %v6308_v47 = vsel %vm232_vm0, 0.0, %v6307_v45 }
 0xdf8   : > { %6961 = vst [vmem:[#allocation1 + $0x2] ss:$9 sm:$0xff] %v6696_v36  ;;  %v6698_v35 = vperm.slane %v6439_v24, 0  ;;  %v6699_v7 = vperm.slane %v6439_v24, 1  ;;  %v6700_v12 = vperm.slane %v6439_v24, 2  ;;  %6573 = vmax.xlane.f32.xlu0 %v6572_v21  ;;  %v6701_v63 = vperm.slane %v6439_v24, 3 }
 0xdf9   : > { %6962 = vst [vmem:[#allocation1 + $0x3] ss:$9 sm:$0xff] %v6697_v28  ;;  %v6563_v59 = vsel %vm6421_vm2, %v6308_v47, -inf  ;;  %v6602_v24 = vsel %vm6421_vm2, %v6412_v16, -inf  ;;  %v6418_v21 = vsel %vm232_vm0, 0.0, %v6417_v44 }
 0xdfa   : > { %6963 = vst [vmem:[#allocation1 + $0x4] ss:$9 sm:$0xff] %v6698_v35  ;;  %6576 = vmax.xlane.f32.xlu2 %v6575_v34  ;;  %v6305_v35 = vrot.slane %v11282_v6, 4 }
 0xdfb   : > { %6964 = vst [vmem:[#allocation1 + $0x5] ss:$9 sm:$0xff] %v6699_v7  ;;  %v6445_v48 = vpop.xlane.xlu1 %6444  ;;  %v6605_v7 = vsel %vm6421_vm2, %v6418_v21, -inf }
 0xdfc   : > { %6965 = vst [vmem:[#allocation1 + $0x6] ss:$9 sm:$0xff] %v6700_v12  ;;  %v6706_v23 = vperm.slane %v6445_v48, 0  ;;  %v6707_v22 = vperm.slane %v6445_v48, 1  ;;  %v6708_v38 = vperm.slane %v6445_v48, 2  ;;  %v6709_v32 = vperm.slane %v6445_v48, 3 }
 0xdfd   : > { %6966 = vst [vmem:[#allocation1 + $0x7] ss:$9 sm:$0xff] %v6701_v63  ;;  %6570 = vmax.xlane.f32.xlu1 %v6569_v5  ;;  %v6451_v8 = vpop.xlane.xlu2 %6450  ;;  %v6362_v12 = vsel %vm232_vm0, 0.0, %v6361_v56  ;;  %v6363_v63 = vrot.slane %v11311_v46, 4  ;;  %v6306_v53 = vsel %vm232_vm0, 0.0, %v6305_v35 }
 0xdfe   : > { %v6714_v3 = vperm.slane %v6451_v8, 0  ;;  %v6715_v57 = vperm.slane %v6451_v8, 1  ;;  %v6716_v61 = vperm.slane %v6451_v8, 2  ;;  %v6717_v36 = vperm.slane %v6451_v8, 3 }
 0xdff   : > { %v6448_v1 = vpop.xlane.xlu0 %6447  ;;  %v6581_v42 = vsel %vm6421_vm2, %v6362_v12, -inf  ;;  %v6557_v26 = vsel %vm6421_vm2, %v6306_v53, -inf  ;;  %v6364_v17 = vsel %vm232_vm0, 0.0, %v6363_v63 }
 0xe00   : > { %6591 = vmax.xlane.f32.xlu0 %v6590_v0  ;;  %v6710_v39 = vperm.slane %v6448_v1, 0  ;;  %v6711_v25 = vperm.slane %v6448_v1, 1  ;;  %v6712_v28 = vperm.slane %v6448_v1, 2  ;;  %v6713_v58 = vperm.slane %v6448_v1, 3 }
 0xe01   : > { %v6587_v62 = vsel %vm6421_vm2, %v6364_v17, -inf }
 0xe02   : > { %6585 = vmax.xlane.f32.xlu2 %v6584_v49 }
 0xe03   : > { %v6454_v34 = vpop.xlane.xlu1 %6453 }
 0xe04   : > { %v11319_v40 = vld [vmem:[#allocation1] sm:$0xff]  ;;  %v6718_v5 = vperm.slane %v6454_v34, 0  ;;  %v6719_v0 = vperm.slane %v6454_v34, 1  ;;  %v6720_v49 = vperm.slane %v6454_v34, 2  ;;  %v6721_v46 = vperm.slane %v6454_v34, 3 }
 0xe05   : > { %6968 = vst [vmem:[#allocation1] ss:$9 sm:$0xff] %v6702_v9  ;;  %6534 = vmax.xlane.f32.xlu1 %v6533_v55 }
 0xe06   : > { %6969 = vst [vmem:[#allocation1 + $0x1] ss:$9 sm:$0xff] %v6703_v37  ;;  %v6420_v37 = vsel %vm232_vm0, 0.0, %v6419_v13  ;;  %vm7328_vm0 = vcmask 130112  }
 0xe07   : > { %6970 = vst [vmem:[#allocation1 + $0x2] ss:$9 sm:$0xff] %v6704_v15  ;;  %v6457_v54 = vpop.xlane.xlu0 %6456  ;;  %v6611_v11 = vsel %vm6421_vm2, %v6420_v37, -inf  ;;  %vm7418_vm2 = vcmask 1040384  }
 0xe08   : > { %6971 = vst [vmem:[#allocation1 + $0x3] ss:$9 sm:$0xff] %v6705_v33  ;;  %6600 = vmax.xlane.f32.xlu0 %v6599_v18  ;;  %v6722_v60 = vperm.slane %v6457_v54, 0  ;;  %v6723_v9 = vperm.slane %v6457_v54, 1  ;;  %v6724_v48 = vperm.slane %v6457_v54, 2  ;;  %v6725_v55 = vperm.slane %v6457_v54, 3 }
 0xe09   : > { %6972 = vst [vmem:[#allocation1 + $0x4] ss:$9 sm:$0xff] %v6706_v23 }
 0xe0a   : > { %6973 = vst [vmem:[#allocation1 + $0x5] ss:$9 sm:$0xff] %v6707_v22  ;;  %6540 = vmax.xlane.f32.xlu2 %v6539_v10 }
 0xe0b   : > { %6974 = vst [vmem:[#allocation1 + $0x6] ss:$9 sm:$0xff] %v6708_v38 }
 0xe0c   : > { %6975 = vst [vmem:[#allocation1 + $0x7] ss:$9 sm:$0xff] %v6709_v32 }
 0xe0d   : > { %6579 = vmax.xlane.f32.xlu1 %v6578_v19 }
 0xe10   : > { %6609 = vmax.xlane.f32.xlu0 %v6608_v29 }
 0xe12   : > { %6594 = vmax.xlane.f32.xlu2 %v6593_v51 }
 0xe13   : > { %v11340_v14 = vld [vmem:[#allocation1] sm:$0xff]  ;;  %v6466_v52 = vpop.xlane.xlu0 %6465 }
 0xe14   : > { %6981 = vst [vmem:[#allocation1 + $0x4] ss:$9 sm:$0xff] %v6714_v3  ;;  %v6734_v19 = vperm.slane %v6466_v52, 0  ;;  %v6735_v2 = vperm.slane %v6466_v52, 1  ;;  %v6736_v45 = vperm.slane %v6466_v52, 2  ;;  %v6737_v51 = vperm.slane %v6466_v52, 3 }
 0xe15   : > { %6982 = vst [vmem:[#allocation1 + $0x5] ss:$9 sm:$0xff] %v6715_v57  ;;  %6597 = vmax.xlane.f32.xlu1 %v6596_v30  ;;  %v6460_v15 = vpop.xlane.xlu2 %6459 }
 0xe16   : > { %6983 = vst [vmem:[#allocation1 + $0x6] ss:$9 sm:$0xff] %v6716_v61  ;;  %v6726_v33 = vperm.slane %v6460_v15, 0  ;;  %v6727_v20 = vperm.slane %v6460_v15, 1  ;;  %v6728_v18 = vperm.slane %v6460_v15, 2  ;;  %v6729_v43 = vperm.slane %v6460_v15, 3 }
 0xe17   : > { %6984 = vst [vmem:[#allocation1 + $0x7] ss:$9 sm:$0xff] %v6717_v36 }
 0xe18   : > { %6977 = vst [vmem:[#allocation1] ss:$9 sm:$0xff] %v6710_v39  ;;  %6564 = vmax.xlane.f32.xlu0 %v6563_v59  ;;  %v6463_v23 = vpop.xlane.xlu1 %6462 }
 0xe19   : > { %6978 = vst [vmem:[#allocation1 + $0x1] ss:$9 sm:$0xff] %v6711_v25  ;;  %v6730_v38 = vperm.slane %v6463_v23, 0  ;;  %v6731_v10 = vperm.slane %v6463_v23, 1  ;;  %v6732_v32 = vperm.slane %v6463_v23, 2  ;;  %v6733_v27 = vperm.slane %v6463_v23, 3 }
 0xe1a   : > { %6979 = vst [vmem:[#allocation1 + $0x2] ss:$9 sm:$0xff] %v6712_v28  ;;  %6603 = vmax.xlane.f32.xlu2 %v6602_v24 }
 0xe1b   : > { %6980 = vst [vmem:[#allocation1 + $0x3] ss:$9 sm:$0xff] %v6713_v58 }
 0xe1d   : > { %6606 = vmax.xlane.f32.xlu1 %v6605_v7  ;;  %v6469_v29 = vpop.xlane.xlu2 %6468 }
 0xe1e   : > { %v6739_v16 = vperm.slane %v6469_v29, 1  ;;  %v6740_v3 = vperm.slane %v6469_v29, 2 }
 0xe20   : > { %6582 = vmax.xlane.f32.xlu0 %v6581_v42  ;;  %v6472_v30 = vpop.xlane.xlu1 %6471 }
 0xe21   : > { %v6742_v36 = vperm.slane %v6472_v30, 0  ;;  %v6743_v44 = vperm.slane %v6472_v30, 1  ;;  %v6744_v39 = vperm.slane %v6472_v30, 2  ;;  %v6745_v25 = vperm.slane %v6472_v30, 3 }
 0xe22   : > { %v11355_v6 = vld [vmem:[#allocation1] sm:$0xff]  ;;  %6558 = vmax.xlane.f32.xlu2 %v6557_v26 }
 0xe23   : > { %6986 = vst [vmem:[#allocation1] ss:$9 sm:$0xff] %v6718_v5 }
 0xe24   : > { %6987 = vst [vmem:[#allocation1 + $0x1] ss:$9 sm:$0xff] %v6719_v0 }
 0xe25   : > { %6988 = vst [vmem:[#allocation1 + $0x2] ss:$9 sm:$0xff] %v6720_v49  ;;  %6588 = vmax.xlane.f32.xlu1 %v6587_v62  ;;  %v6478_v59 = vpop.xlane.xlu2 %6477 }
 0xe26   : > { %6989 = vst [vmem:[#allocation1 + $0x3] ss:$9 sm:$0xff] %v6721_v46  ;;  %v6750_v28 = vperm.slane %v6478_v59, 0  ;;  %v6751_v24 = vperm.slane %v6478_v59, 1  ;;  %v6752_v35 = vperm.slane %v6478_v59, 2  ;;  %v6753_v7 = vperm.slane %v6478_v59, 3 }
 0xe27   : > { %6990 = vst [vmem:[#allocation1 + $0x4] ss:$9 sm:$0xff] %v6722_v60 }
 0xe28   : > { %6991 = vst [vmem:[#allocation1 + $0x5] ss:$9 sm:$0xff] %v6723_v9  ;;  %v6481_v21 = vpop.xlane.xlu1 %6480 }
 0xe29   : > { %6992 = vst [vmem:[#allocation1 + $0x6] ss:$9 sm:$0xff] %v6724_v48  ;;  %v6754_v12 = vperm.slane %v6481_v21, 0  ;;  %v6755_v63 = vperm.slane %v6481_v21, 1  ;;  %v6756_v34 = vperm.slane %v6481_v21, 2  ;;  %v6757_v42 = vperm.slane %v6481_v21, 3 }
 0xe2a   : > { %6993 = vst [vmem:[#allocation1 + $0x7] ss:$9 sm:$0xff] %v6725_v55  ;;  %6612 = vmax.xlane.f32.xlu2 %v6611_v11 }
 0xe2d   : > { %v6496_v53 = vpop.xlane.xlu2 %6495 }
 0xe2e   : > { %v6776_v52 = vperm.slane %v6496_v53, 2 }
 0xe30   : > { %v6490_v37 = vpop.xlane.xlu1 %6489 }
 0xe31   : > { %v6994_v22 = vld [vmem:[#allocation1] sm:$0xff]  ;;  %v6766_v48 = vperm.slane %v6490_v37, 0  ;;  %v6767_v55 = vperm.slane %v6490_v37, 1 }
 0xe32   : > { %6995 = vst [vmem:[#allocation1] ss:$9 sm:$0xff] %v6726_v33  ;;  %v6768_v33 = vperm.slane %v6490_v37, 2 }
 0xe33   : > { %6996 = vst [vmem:[#allocation1 + $0x1] ss:$9 sm:$0xff] %v6727_v20  ;;  %v6769_v20 = vperm.slane %v6490_v37, 3 }
 0xe34   : > { %6997 = vst [vmem:[#allocation1 + $0x2] ss:$9 sm:$0xff] %v6728_v18  ;;  %7233 = vperm.xlu0 %7535, %v11298_v50   ;;  %v6738_v50 = vperm.slane %v6469_v29, 0 }
 0xe35   : > { %6998 = vst [vmem:[#allocation1 + $0x3] ss:$9 sm:$0xff] %v6729_v43  ;;  %v6487_v0 = vpop.xlane.xlu2 %6486 }
 0xe36   : > { %6999 = vst [vmem:[#allocation1 + $0x4] ss:$9 sm:$0xff] %v6730_v38  ;;  %v6762_v49 = vperm.slane %v6487_v0, 0  ;;  %v6763_v46 = vperm.slane %v6487_v0, 1  ;;  %v6764_v60 = vperm.slane %v6487_v0, 2  ;;  %v6765_v9 = vperm.slane %v6487_v0, 3 }
 0xe37   : > { %7000 = vst [vmem:[#allocation1 + $0x5] ss:$9 sm:$0xff] %v6731_v10  ;;  %v6774_v38 = vperm.slane %v6496_v53, 0  ;;  %v6775_v10 = vperm.slane %v6496_v53, 1 }
 0xe38   : > { %7001 = vst [vmem:[#allocation1 + $0x6] ss:$9 sm:$0xff] %v6732_v32  ;;  %v6499_v32 = vpop.xlane.xlu1 %6498 }
 0xe39   : > { %7002 = vst [vmem:[#allocation1 + $0x7] ss:$9 sm:$0xff] %v6733_v27 }
 0xe3c   : > { %7239 = vperm.xlu0 %7535, %v11340_v14   ;;  %v6741_v14 = vperm.slane %v6469_v29, 3  ;;  %v6780_v29 = vperm.slane %v6499_v32, 2 }
 0xe3e   : > { %7230 = vperm.xlu1 %7537, %v11275_v41   ;;  %v6475_v41 = vpop.xlane.xlu0 %6474 }
 0xe3f   : > { %v6746_v57 = vperm.slane %v6475_v41, 0  ;;  %v6747_v1 = vperm.slane %v6475_v41, 1  ;;  %v6749_v47 = vperm.slane %v6475_v41, 3 }
 0xe40   : > { %v7003_v8 = vld [vmem:[#allocation1] sm:$0xff] }
 0xe41   : > { %7004 = vst [vmem:[#allocation1] ss:$9 sm:$0xff] %v6734_v19  ;;  %v6777_v19 = vperm.slane %v6496_v53, 3 }
 0xe42   : > { %7005 = vst [vmem:[#allocation1 + $0x1] ss:$9 sm:$0xff] %v6735_v2  ;;  %7236 = vperm.xlu2 %7536, %v11319_v40   ;;  %v6748_v40 = vperm.slane %v6475_v41, 2  ;;  %v6778_v2 = vperm.slane %v6499_v32, 0 }
 0xe43   : > { %7006 = vst [vmem:[#allocation1 + $0x2] ss:$9 sm:$0xff] %v6736_v45  ;;  %v6781_v45 = vperm.slane %v6499_v32, 3 }
 0xe44   : > { %7007 = vst [vmem:[#allocation1 + $0x3] ss:$9 sm:$0xff] %v6737_v51  ;;  %7248 = vperm.xlu0 %7535, %v7003_v8   ;;  %v6779_v8 = vperm.slane %v6499_v32, 1 }
 0xe45   : > { %7008 = vst [vmem:[#allocation1 + $0x4] ss:$9 sm:$0xff] %v6738_v50 }
 0xe46   : > { %7009 = vst [vmem:[#allocation1 + $0x5] ss:$9 sm:$0xff] %v6739_v16  ;;  %7242 = vperm.xlu1 %7537, %v11355_v6   ;;  %v6484_v58 = vpop.xlane.xlu0 %6483 }
 0xe47   : > { %7010 = vst [vmem:[#allocation1 + $0x6] ss:$9 sm:$0xff] %v6740_v3  ;;  %v6758_v26 = vperm.slane %v6484_v58, 0  ;;  %v6759_v17 = vperm.slane %v6484_v58, 1  ;;  %v6760_v54 = vperm.slane %v6484_v58, 2  ;;  %v6761_v13 = vperm.slane %v6484_v58, 3  ;;  %v6505_v3 = vpop.xlane.xlu2 %6504 }
 0xe48   : > { %7011 = vst [vmem:[#allocation1 + $0x7] ss:$9 sm:$0xff] %v6741_v14  ;;  %v6788_v30 = vperm.slane %v6505_v3, 2 }
 0xe4a   : > { %7245 = vperm.xlu2 %7536, %v6994_v22  }
 0xe4e   : > { %v11366_v5 = vpop.xlane.xlu0 %6501 }
 0xe4f   : > { %v7012_v61 = vld [vmem:[#allocation1] sm:$0xff]  ;;  %v6782_v51 = vperm.slane %v11366_v5, 0  ;;  %v6783_v50 = vperm.slane %v11366_v5, 1  ;;  %v6784_v14 = vperm.slane %v11366_v5, 2  ;;  %v6785_v41 = vperm.slane %v11366_v5, 3 }
 0xe50   : > { %7017 = vst [vmem:[#allocation1 + $0x4] ss:$9 sm:$0xff] %v6746_v57  ;;  %7251 = vperm.xlu1 %7537, %v7012_v61   ;;  %v6786_v57 = vperm.slane %v6505_v3, 0  ;;  %v6787_v61 = vperm.slane %v6505_v3, 1 }
 0xe51   : > { %7018 = vst [vmem:[#allocation1 + $0x5] ss:$9 sm:$0xff] %v6747_v1  ;;  %v6508_v1 = vpop.xlane.xlu1 %6507 }
 0xe52   : > { %7019 = vst [vmem:[#allocation1 + $0x6] ss:$9 sm:$0xff] %v6748_v40  ;;  %v6789_v40 = vperm.slane %v6505_v3, 3  ;;  %v6792_v58 = vperm.slane %v6508_v1, 2  ;;  %v6793_v21 = vperm.slane %v6508_v1, 3 }
 0xe53   : > { %7020 = vst [vmem:[#allocation1 + $0x7] ss:$9 sm:$0xff] %v6749_v47 }
 0xe54   : > { %7013 = vst [vmem:[#allocation1] ss:$9 sm:$0xff] %v6742_v36 }
 0xe55   : > { %7014 = vst [vmem:[#allocation1 + $0x1] ss:$9 sm:$0xff] %v6743_v44 }
 0xe56   : > { %7015 = vst [vmem:[#allocation1 + $0x2] ss:$9 sm:$0xff] %v6744_v39  ;;  %v11368_v62 = vpop.xlane.xlu0 %6510 }
 0xe57   : > { %7016 = vst [vmem:[#allocation1 + $0x3] ss:$9 sm:$0xff] %v6745_v25  ;;  %v6794_v36 = vperm.slane %v11368_v62, 0  ;;  %v6795_v44 = vperm.slane %v11368_v62, 1  ;;  %v6796_v25 = vperm.slane %v11368_v62, 2  ;;  %v6797_v59 = vperm.slane %v11368_v62, 3 }
 0xe59   : > { %v6517_v47 = vpop.xlane.xlu1 %6516 }
 0xe5a   : > { %v6802_v5 = vperm.slane %v6517_v47, 0  ;;  %v6805_v0 = vperm.slane %v6517_v47, 3 }
 0xe5e   : > { %v7021_v56 = vld [vmem:[#allocation1] sm:$0xff]  ;;  %v6493_v15 = vpop.xlane.xlu0 %6492 }
 0xe5f   : > { %7022 = vst [vmem:[#allocation1] ss:$9 sm:$0xff] %v6750_v28  ;;  %7254 = vperm.xlu2 %7536, %v7021_v56   ;;  %v6770_v23 = vperm.slane %v6493_v15, 0  ;;  %v6771_v18 = vperm.slane %v6493_v15, 1  ;;  %v6772_v22 = vperm.slane %v6493_v15, 2  ;;  %v6773_v43 = vperm.slane %v6493_v15, 3 }
 0xe60   : > { %7023 = vst [vmem:[#allocation1 + $0x1] ss:$9 sm:$0xff] %v6751_v24  ;;  %v6790_v28 = vperm.slane %v6508_v1, 0  ;;  %v6791_v56 = vperm.slane %v6508_v1, 1  ;;  %v6514_v24 = vpop.xlane.xlu2 %6513 }
 0xe61   : > { %7024 = vst [vmem:[#allocation1 + $0x2] ss:$9 sm:$0xff] %v6752_v35  ;;  %v11378_v35 = vpop.xlane.xlu1 %6525  ;;  %v6800_v53 = vperm.slane %v6514_v24, 2 }
 0xe62   : > { %7025 = vst [vmem:[#allocation1 + $0x3] ss:$9 sm:$0xff] %v6753_v7  ;;  %v6798_v7 = vperm.slane %v6514_v24, 0 }
 0xe63   : > { %7026 = vst [vmem:[#allocation1 + $0x4] ss:$9 sm:$0xff] %v6754_v12 }
 0xe64   : > { %7027 = vst [vmem:[#allocation1 + $0x5] ss:$9 sm:$0xff] %v6755_v63  ;;  %v6799_v63 = vperm.slane %v6514_v24, 1 }
 0xe65   : > { %7028 = vst [vmem:[#allocation1 + $0x6] ss:$9 sm:$0xff] %v6756_v34 }
 0xe66   : > { %7029 = vst [vmem:[#allocation1 + $0x7] ss:$9 sm:$0xff] %v6757_v42  ;;  %v6801_v42 = vperm.slane %v6514_v24, 3 }
 0xe68   : > { %v6523_v34 = vpop.xlane.xlu2 %6522 }
 0xe6d   : > { %v7030_v6 = vld [vmem:[#allocation1] sm:$0xff] }
 0xe6e   : > { %7031 = vst [vmem:[#allocation1] ss:$9 sm:$0xff] %v6758_v26  ;;  %7257 = vperm.xlu0 %7535, %v7030_v6   ;;  %v11380_v26 = vpop.xlane.xlu1 %6543  ;;  %v6804_v6 = vperm.slane %v6517_v47, 2 }
 0xe6f   : > { %7032 = vst [vmem:[#allocation1 + $0x1] ss:$9 sm:$0xff] %v6759_v17  ;;  %v6803_v17 = vperm.slane %v6517_v47, 1 }
 0xe70   : > { %7033 = vst [vmem:[#allocation1 + $0x2] ss:$9 sm:$0xff] %v6760_v54  ;;  %v6532_v54 = vpop.xlane.xlu2 %6531 }
 0xe71   : > { %7034 = vst [vmem:[#allocation1 + $0x3] ss:$9 sm:$0xff] %v6761_v13  ;;  %v6520_v13 = vpop.xlane.xlu0 %6519  ;;  %v6823_v3 = vperm.slane %v6532_v54, 1 }
 0xe72   : > { %7035 = vst [vmem:[#allocation1 + $0x4] ss:$9 sm:$0xff] %v6762_v49  ;;  %v6807_v62 = vperm.slane %v6520_v13, 1  ;;  %v6809_v37 = vperm.slane %v6520_v13, 3 }
 0xe73   : > { %7036 = vst [vmem:[#allocation1 + $0x5] ss:$9 sm:$0xff] %v6763_v46  ;;  %v6806_v46 = vperm.slane %v6520_v13, 0 }
 0xe74   : > { %7037 = vst [vmem:[#allocation1 + $0x6] ss:$9 sm:$0xff] %v6764_v60 }
 0xe75   : > { %7038 = vst [vmem:[#allocation1 + $0x7] ss:$9 sm:$0xff] %v6765_v9  ;;  %v6808_v9 = vperm.slane %v6520_v13, 2 }
 0xe76   : > { %v11382_v49 = vpop.xlane.xlu1 %6552 }
 0xe78   : > { %v11384_v15 = vpop.xlane.xlu2 %6549 }
 0xe7c   : > { %v7039_v11 = vld [vmem:[#allocation1] sm:$0xff] }
 0xe7d   : > { %7040 = vst [vmem:[#allocation1] ss:$9 sm:$0xff] %v6766_v48  ;;  %7260 = vperm.xlu1 %7537, %v7039_v11   ;;  %v6810_v48 = vperm.slane %v6523_v34, 0  ;;  %v6812_v11 = vperm.slane %v6523_v34, 2 }
 0xe7e   : > { %7041 = vst [vmem:[#allocation1 + $0x1] ss:$9 sm:$0xff] %v6767_v55  ;;  %v6811_v55 = vperm.slane %v6523_v34, 1 }
 0xe7f   : > { %7042 = vst [vmem:[#allocation1 + $0x2] ss:$9 sm:$0xff] %v6768_v33  ;;  %v6813_v33 = vperm.slane %v6523_v34, 3 }
 0xe80   : > { %7043 = vst [vmem:[#allocation1 + $0x3] ss:$9 sm:$0xff] %v6769_v20  ;;  %v11386_v20 = vpop.xlane.xlu1 %6561 }
 0xe81   : > { %7044 = vst [vmem:[#allocation1 + $0x4] ss:$9 sm:$0xff] %v6770_v23  ;;  %v6529_v23 = vpop.xlane.xlu0 %6528 }
 0xe82   : > { %7045 = vst [vmem:[#allocation1 + $0x5] ss:$9 sm:$0xff] %v6771_v18  ;;  %v6818_v18 = vperm.slane %v6529_v23, 0  ;;  %v6821_v32 = vperm.slane %v6529_v23, 3 }
 0xe83   : > { %7046 = vst [vmem:[#allocation1 + $0x6] ss:$9 sm:$0xff] %v6772_v22  ;;  %v6819_v22 = vperm.slane %v6529_v23, 1 }
 0xe84   : > { %7047 = vst [vmem:[#allocation1 + $0x7] ss:$9 sm:$0xff] %v6773_v43 }
 0xe8b   : > { %v7048_v27 = vld [vmem:[#allocation1] sm:$0xff] }
 0xe8c   : > { %7049 = vst [vmem:[#allocation1] ss:$9 sm:$0xff] %v6774_v38  ;;  %7263 = vperm.xlu2 %7536, %v7048_v27   ;;  %v11388_v38 = vpop.xlane.xlu2 %6567  ;;  %v6814_v27 = vperm.slane %v11378_v35, 0 }
 0xe8d   : > { %7050 = vst [vmem:[#allocation1 + $0x1] ss:$9 sm:$0xff] %v6775_v10  ;;  %v6820_v10 = vperm.slane %v6529_v23, 2 }
 0xe8e   : > { %7051 = vst [vmem:[#allocation1 + $0x2] ss:$9 sm:$0xff] %v6776_v52  ;;  %v11391_v52 = vpop.xlane.xlu1 %6570 }
 0xe8f   : > { %7052 = vst [vmem:[#allocation1 + $0x3] ss:$9 sm:$0xff] %v6777_v19  ;;  %v6815_v19 = vperm.slane %v11378_v35, 1 }
 0xe90   : > { %7053 = vst [vmem:[#allocation1 + $0x4] ss:$9 sm:$0xff] %v6778_v2  ;;  %v6816_v2 = vperm.slane %v11378_v35, 2 }
 0xe91   : > { %7054 = vst [vmem:[#allocation1 + $0x5] ss:$9 sm:$0xff] %v6779_v8  ;;  %v6817_v8 = vperm.slane %v11378_v35, 3 }
 0xe92   : > { %7055 = vst [vmem:[#allocation1 + $0x6] ss:$9 sm:$0xff] %v6780_v29  ;;  %v6538_v29 = vpop.xlane.xlu0 %6537 }
 0xe93   : > { %7056 = vst [vmem:[#allocation1 + $0x7] ss:$9 sm:$0xff] %v6781_v45 }
 0xe94   : > { %v11396_v45 = vpop.xlane.xlu2 %6576 }
 0xe9a   : > { %v7057_v16 = vld [vmem:[#allocation1] sm:$0xff] }
 0xe9b   : > { %7058 = vst [vmem:[#allocation1] ss:$9 sm:$0xff] %v6782_v51  ;;  %7266 = vperm.xlu0 %7535, %v7057_v16   ;;  %v6535_v51 = vpop.xlane.xlu1 %6534 }
 0xe9c   : > { %7059 = vst [vmem:[#allocation1 + $0x1] ss:$9 sm:$0xff] %v6783_v50  ;;  %v6822_v50 = vperm.slane %v6532_v54, 0  ;;  %v6827_v1 = vperm.slane %v6535_v51, 1  ;;  %v11398_v47 = vpop.xlane.xlu2 %6585 }
 0xe9d   : > { %7060 = vst [vmem:[#allocation1 + $0x2] ss:$9 sm:$0xff] %v6784_v14  ;;  %v6824_v14 = vperm.slane %v6532_v54, 2 }
 0xe9e   : > { %7061 = vst [vmem:[#allocation1 + $0x3] ss:$9 sm:$0xff] %v6785_v41  ;;  %v6826_v41 = vperm.slane %v6535_v51, 0 }
 0xe9f   : > { %7062 = vst [vmem:[#allocation1 + $0x4] ss:$9 sm:$0xff] %v6786_v57  ;;  %v6825_v57 = vperm.slane %v6532_v54, 3 }
 0xea0   : > { %7063 = vst [vmem:[#allocation1 + $0x5] ss:$9 sm:$0xff] %v6787_v61  ;;  %v6828_v61 = vperm.slane %v6535_v51, 2 }
 0xea1   : > { %7064 = vst [vmem:[#allocation1 + $0x6] ss:$9 sm:$0xff] %v6788_v30  ;;  %v6829_v30 = vperm.slane %v6535_v51, 3 }
 0xea2   : > { %7065 = vst [vmem:[#allocation1 + $0x7] ss:$9 sm:$0xff] %v6789_v40  ;;  %v6547_v40 = vpop.xlane.xlu0 %6546 }
 0xea3   : > { %v6845_v54 = vperm.slane %v6547_v40, 3 }
 0xea9   : > { %v7066_v39 = vld [vmem:[#allocation1] sm:$0xff] }
 0xeaa   : > { %7071 = vst [vmem:[#allocation1 + $0x4] ss:$9 sm:$0xff] %v6794_v36  ;;  %7269 = vperm.xlu1 %7537, %v7066_v39   ;;  %v6830_v36 = vperm.slane %v6538_v29, 0  ;;  %v11400_v39 = vpop.xlane.xlu0 %6555 }
 0xeab   : > { %7072 = vst [vmem:[#allocation1 + $0x5] ss:$9 sm:$0xff] %v6795_v44  ;;  %v6831_v44 = vperm.slane %v6538_v29, 1 }
 0xeac   : > { %7073 = vst [vmem:[#allocation1 + $0x6] ss:$9 sm:$0xff] %v6796_v25 }
 0xead   : > { %7074 = vst [vmem:[#allocation1 + $0x7] ss:$9 sm:$0xff] %v6797_v59  ;;  %v6541_v59 = vpop.xlane.xlu2 %6540 }
 0xeae   : > { %7067 = vst [vmem:[#allocation1] ss:$9 sm:$0xff] %v6790_v28  ;;  %v6832_v28 = vperm.slane %v6538_v29, 2  ;;  %v6835_v24 = vperm.slane %v6541_v59, 1  ;;  %v6837_v35 = vperm.slane %v6541_v59, 3 }
 0xeaf   : > { %7068 = vst [vmem:[#allocation1 + $0x1] ss:$9 sm:$0xff] %v6791_v56  ;;  %v6833_v56 = vperm.slane %v6538_v29, 3 }
 0xeb0   : > { %7069 = vst [vmem:[#allocation1 + $0x2] ss:$9 sm:$0xff] %v6792_v58  ;;  %v6834_v58 = vperm.slane %v6541_v59, 0 }
 0xeb1   : > { %7070 = vst [vmem:[#allocation1 + $0x3] ss:$9 sm:$0xff] %v6793_v21  ;;  %v6836_v21 = vperm.slane %v6541_v59, 2 }
 0xeb5   : > { %v11410_v13 = vpop.xlane.xlu2 %6594 }
 0xeb8   : > { %v7075_v12 = vld [vmem:[#allocation1] sm:$0xff] }
 0xeb9   : > { %7076 = vst [vmem:[#allocation1] ss:$9 sm:$0xff] %v6798_v7  ;;  %7272 = vperm.xlu2 %7536, %v7075_v12   ;;  %v11402_v7 = vpop.xlane.xlu0 %6573  ;;  %v6838_v12 = vperm.slane %v11380_v26, 0 }
 0xeba   : > { %7077 = vst [vmem:[#allocation1 + $0x1] ss:$9 sm:$0xff] %v6799_v63  ;;  %v6839_v63 = vperm.slane %v11380_v26, 1 }
 0xebb   : > { %7078 = vst [vmem:[#allocation1 + $0x2] ss:$9 sm:$0xff] %v6800_v53  ;;  %v6840_v53 = vperm.slane %v11380_v26, 2 }
 0xebc   : > { %7079 = vst [vmem:[#allocation1 + $0x3] ss:$9 sm:$0xff] %v6801_v42  ;;  %v6841_v42 = vperm.slane %v11380_v26, 3 }
 0xebd   : > { %7080 = vst [vmem:[#allocation1 + $0x4] ss:$9 sm:$0xff] %v6802_v5  ;;  %v6842_v5 = vperm.slane %v6547_v40, 0  ;;  %v11423_v23 = vpop.xlane.xlu2 %6603 }
 0xebe   : > { %7081 = vst [vmem:[#allocation1 + $0x5] ss:$9 sm:$0xff] %v6803_v17  ;;  %v6843_v17 = vperm.slane %v6547_v40, 1 }
 0xebf   : > { %7082 = vst [vmem:[#allocation1 + $0x6] ss:$9 sm:$0xff] %v6804_v6  ;;  %v6844_v6 = vperm.slane %v6547_v40, 2 }
 0xec0   : > { %7083 = vst [vmem:[#allocation1 + $0x7] ss:$9 sm:$0xff] %v6805_v0 }
 0xec1   : > { %v11408_v0 = vpop.xlane.xlu0 %6591 }
 0xec7   : > { %v7084_v60 = vld [vmem:[#allocation1] sm:$0xff] }
 0xec8   : > { %7085 = vst [vmem:[#allocation1] ss:$9 sm:$0xff] %v6806_v46  ;;  %7275 = vperm.xlu0 %7535, %v7084_v60   ;;  %v6846_v46 = vperm.slane %v11384_v15, 0 }
 0xec9   : > { %7086 = vst [vmem:[#allocation1 + $0x1] ss:$9 sm:$0xff] %v6807_v62  ;;  %v6847_v62 = vperm.slane %v11384_v15, 1  ;;  %v11414_v26 = vpop.xlane.xlu0 %6600 }
 0xeca   : > { %7087 = vst [vmem:[#allocation1 + $0x2] ss:$9 sm:$0xff] %v6808_v9  ;;  %v6848_v9 = vperm.slane %v11384_v15, 2 }
 0xecb   : > { %7088 = vst [vmem:[#allocation1 + $0x3] ss:$9 sm:$0xff] %v6809_v37  ;;  %v6849_v37 = vperm.slane %v11384_v15, 3 }
 0xecc   : > { %7089 = vst [vmem:[#allocation1 + $0x4] ss:$9 sm:$0xff] %v6810_v48  ;;  %v11418_v48 = vpop.xlane.xlu1 %6579 }
 0xecd   : > { %7090 = vst [vmem:[#allocation1 + $0x5] ss:$9 sm:$0xff] %v6811_v55  ;;  %v6850_v55 = vperm.slane %v11382_v49, 0 }
 0xece   : > { %7091 = vst [vmem:[#allocation1 + $0x6] ss:$9 sm:$0xff] %v6812_v11  ;;  %v6851_v11 = vperm.slane %v11382_v49, 1 }
 0xecf   : > { %7092 = vst [vmem:[#allocation1 + $0x7] ss:$9 sm:$0xff] %v6813_v33  ;;  %v6852_v33 = vperm.slane %v11382_v49, 2 }
 0xed1   : > { %v11426_v15 = vpop.xlane.xlu0 %6609 }
 0xed6   : > { %v7093_v43 = vld [vmem:[#allocation1] sm:$0xff] }
 0xed7   : > { %7098 = vst [vmem:[#allocation1 + $0x4] ss:$9 sm:$0xff] %v6818_v18  ;;  %7278 = vperm.xlu1 %7537, %v7093_v43   ;;  %v6853_v18 = vperm.slane %v11382_v49, 3  ;;  %v6854_v43 = vperm.slane %v11400_v39, 0 }
 0xed8   : > { %7099 = vst [vmem:[#allocation1 + $0x5] ss:$9 sm:$0xff] %v6819_v22  ;;  %v11428_v22 = vpop.xlane.xlu1 %6597 }
 0xed9   : > { %7100 = vst [vmem:[#allocation1 + $0x6] ss:$9 sm:$0xff] %v6820_v10  ;;  %v6855_v10 = vperm.slane %v11400_v39, 1  ;;  %v6565_v29 = vpop.xlane.xlu0 %6564 }
 0xeda   : > { %7101 = vst [vmem:[#allocation1 + $0x7] ss:$9 sm:$0xff] %v6821_v32  ;;  %v6559_v32 = vpop.xlane.xlu2 %6558  ;;  %v6866_v40 = vperm.slane %v6565_v29, 0 }
 0xedb   : > { %7094 = vst [vmem:[#allocation1] ss:$9 sm:$0xff] %v6814_v27  ;;  %v6858_v49 = vperm.slane %v6559_v32, 0  ;;  %v6860_v51 = vperm.slane %v6559_v32, 2 }
 0xedc   : > { %7095 = vst [vmem:[#allocation1 + $0x1] ss:$9 sm:$0xff] %v6815_v19  ;;  %v6856_v19 = vperm.slane %v11400_v39, 2 }
 0xedd   : > { %7096 = vst [vmem:[#allocation1 + $0x2] ss:$9 sm:$0xff] %v6816_v2  ;;  %v6857_v2 = vperm.slane %v11400_v39, 3  ;;  %v6869_v39 = vperm.slane %v6565_v29, 3 }
 0xede   : > { %7097 = vst [vmem:[#allocation1 + $0x3] ss:$9 sm:$0xff] %v6817_v8  ;;  %v6859_v8 = vperm.slane %v6559_v32, 1 }
 0xee5   : > { %v7102_v16 = vld [vmem:[#allocation1] sm:$0xff] }
 0xee6   : > { %7103 = vst [vmem:[#allocation1] ss:$9 sm:$0xff] %v6822_v50  ;;  %7281 = vperm.xlu2 %7536, %v7102_v16   ;;  %v6861_v50 = vperm.slane %v6559_v32, 3  ;;  %v11434_v16 = vpop.xlane.xlu1 %6606  ;;  %v6894_v32 = vperm.slane %v11398_v47, 0 }
 0xee7   : > { %7104 = vst [vmem:[#allocation1 + $0x1] ss:$9 sm:$0xff] %v6823_v3  ;;  %v6862_v3 = vperm.slane %v11386_v20, 0 }
 0xee8   : > { %7105 = vst [vmem:[#allocation1 + $0x2] ss:$9 sm:$0xff] %v6824_v14  ;;  %v6863_v14 = vperm.slane %v11386_v20, 1 }
 0xee9   : > { %7106 = vst [vmem:[#allocation1 + $0x3] ss:$9 sm:$0xff] %v6825_v57 }
 0xeea   : > { %7107 = vst [vmem:[#allocation1 + $0x4] ss:$9 sm:$0xff] %v6826_v41  ;;  %v11438_v41 = vpop.xlane.xlu0 %6582 }
 0xeeb   : > { %7108 = vst [vmem:[#allocation1 + $0x5] ss:$9 sm:$0xff] %v6827_v1  ;;  %v6864_v1 = vperm.slane %v11386_v20, 2 }
 0xeec   : > { %7109 = vst [vmem:[#allocation1 + $0x6] ss:$9 sm:$0xff] %v6828_v61  ;;  %v6865_v61 = vperm.slane %v11386_v20, 3 }
 0xeed   : > { %7110 = vst [vmem:[#allocation1 + $0x7] ss:$9 sm:$0xff] %v6829_v30 }
 0xeee   : > { %v11442_v30 = vpop.xlane.xlu1 %6588 }
 0xef2   : > { %v7234_v59 = vpop.permute.xlu0 %7233 }
 0xef4   : > { %v7111_v25 = vld [vmem:[#allocation1] sm:$0xff] }
 0xef5   : > { %7112 = vst [vmem:[#allocation1] ss:$9 sm:$0xff] %v6830_v36  ;;  %7284 = vperm.xlu0 %7535, %v7111_v25   ;;  %v6867_v36 = vperm.slane %v6565_v29, 1  ;;  %v11445_v25 = vadd.s32 4294967288, %v9550_v31 }
 0xef6   : > { %7113 = vst [vmem:[#allocation1 + $0x1] ss:$9 sm:$0xff] %v6831_v44  ;;  %v6868_v44 = vperm.slane %v6565_v29, 2  ;;  %v6900_v29 = vperm.slane %v11442_v30, 2 }
 0xef7   : > { %7114 = vst [vmem:[#allocation1 + $0x2] ss:$9 sm:$0xff] %v6832_v28  ;;  %v7231_v28 = vpop.permute.xlu1 %7230  ;;  %v7327_v20 = vperm.slane %v7234_v59, %v11445_v25  ;;  %v6914_v59 = vperm.slane %v11414_v26, 0 }
 0xef8   : > { %7115 = vst [vmem:[#allocation1 + $0x3] ss:$9 sm:$0xff] %v6833_v56  ;;  %v7325_v56 = vperm.slane %v7231_v28, %v9550_v31  ;;  %v6916_v28 = vperm.slane %v11414_v26, 2 }
 0xef9   : > { %7116 = vst [vmem:[#allocation1 + $0x4] ss:$9 sm:$0xff] %v6834_v58 }
 0xefa   : > { %7117 = vst [vmem:[#allocation1 + $0x5] ss:$9 sm:$0xff] %v6835_v24  ;;  %v11450_v58 = vsel %vm7328_vm0, %v7327_v20, %v7325_v56  ;;  %v6870_v24 = vperm.slane %v11388_v38, 0  ;;  %v6917_v20 = vperm.slane %v11414_v26, 3  ;;  %v6918_v56 = vperm.slane %v11423_v23, 0 }
 0xefb   : > { %7118 = vst [vmem:[#allocation1 + $0x6] ss:$9 sm:$0xff] %v6836_v21  ;;  %v6871_v21 = vperm.slane %v11388_v38, 1 }
 0xefc   : > { %7119 = vst [vmem:[#allocation1 + $0x7] ss:$9 sm:$0xff] %v6837_v35 }
 0xf03   : > { %v7120_v34 = vld [vmem:[#allocation1] sm:$0xff] }
 0xf04   : > { %7121 = vst [vmem:[#allocation1] ss:$9 sm:$0xff] %v6838_v12  ;;  %7287 = vperm.xlu1 %7537, %v7120_v34   ;;  %v6872_v12 = vperm.slane %v11388_v38, 2  ;;  %v6874_v34 = vperm.slane %v11391_v52, 0 }
 0xf05   : > { %7122 = vst [vmem:[#allocation1 + $0x1] ss:$9 sm:$0xff] %v6839_v63  ;;  %v6873_v63 = vperm.slane %v11388_v38, 3 }
 0xf06   : > { %7123 = vst [vmem:[#allocation1 + $0x2] ss:$9 sm:$0xff] %v6840_v53  ;;  %v6875_v53 = vperm.slane %v11391_v52, 1 }
 0xf07   : > { %7124 = vst [vmem:[#allocation1 + $0x3] ss:$9 sm:$0xff] %v6841_v42  ;;  %v6876_v42 = vperm.slane %v11391_v52, 2 }
 0xf08   : > { %7125 = vst [vmem:[#allocation1 + $0x4] ss:$9 sm:$0xff] %v6842_v5  ;;  %v6877_v5 = vperm.slane %v11391_v52, 3  ;;  %v6883_v52 = vperm.slane %v11396_v45, 1 }
 0xf09   : > { %7126 = vst [vmem:[#allocation1 + $0x5] ss:$9 sm:$0xff] %v6843_v17  ;;  %v6878_v17 = vperm.slane %v11402_v7, 0 }
 0xf0a   : > { %7127 = vst [vmem:[#allocation1 + $0x6] ss:$9 sm:$0xff] %v6844_v6  ;;  %v6879_v6 = vperm.slane %v11402_v7, 1 }
 0xf0b   : > { %7128 = vst [vmem:[#allocation1 + $0x7] ss:$9 sm:$0xff] %v6845_v54  ;;  %v6880_v54 = vperm.slane %v11402_v7, 2 }
 0xf12   : > { %v7129_v60 = vld [vmem:[#allocation1] sm:$0xff] }
 0xf13   : > { %7130 = vst [vmem:[#allocation1] ss:$9 sm:$0xff] %v6846_v46  ;;  %7290 = vperm.xlu2 %7536, %v7129_v60   ;;  %v6881_v46 = vperm.slane %v11402_v7, 3  ;;  %v6884_v60 = vperm.slane %v11396_v45, 2 }
 0xf14   : > { %7131 = vst [vmem:[#allocation1 + $0x1] ss:$9 sm:$0xff] %v6847_v62  ;;  %v6882_v62 = vperm.slane %v11396_v45, 0 }
 0xf15   : > { %7132 = vst [vmem:[#allocation1 + $0x2] ss:$9 sm:$0xff] %v6848_v9  ;;  %v6885_v9 = vperm.slane %v11396_v45, 3  ;;  %v6891_v45 = vperm.slane %v11438_v41, 1 }
 0xf16   : > { %7133 = vst [vmem:[#allocation1 + $0x3] ss:$9 sm:$0xff] %v6849_v37  ;;  %v6886_v37 = vperm.slane %v11418_v48, 0 }
 0xf17   : > { %7134 = vst [vmem:[#allocation1 + $0x4] ss:$9 sm:$0xff] %v6850_v55  ;;  %v6887_v55 = vperm.slane %v11418_v48, 1 }
 0xf18   : > { %7135 = vst [vmem:[#allocation1 + $0x5] ss:$9 sm:$0xff] %v6851_v11  ;;  %v6888_v11 = vperm.slane %v11418_v48, 2 }
 0xf19   : > { %7136 = vst [vmem:[#allocation1 + $0x6] ss:$9 sm:$0xff] %v6852_v33  ;;  %v6889_v33 = vperm.slane %v11418_v48, 3 }
 0xf1a   : > { %7137 = vst [vmem:[#allocation1 + $0x7] ss:$9 sm:$0xff] %v6853_v18  ;;  %v6890_v18 = vperm.slane %v11438_v41, 0 }
 0xf21   : > { %v7138_v27 = vld [vmem:[#allocation1] sm:$0xff] }
 0xf22   : > { %7139 = vst [vmem:[#allocation1] ss:$9 sm:$0xff] %v6854_v43  ;;  %7293 = vperm.xlu0 %7535, %v7138_v27   ;;  %v6892_v43 = vperm.slane %v11438_v41, 2  ;;  %v6895_v27 = vperm.slane %v11398_v47, 1 }
 0xf23   : > { %7140 = vst [vmem:[#allocation1 + $0x1] ss:$9 sm:$0xff] %v6855_v10  ;;  %v6893_v10 = vperm.slane %v11438_v41, 3  ;;  %v6905_v41 = vperm.slane %v11408_v0, 3 }
 0xf24   : > { %7141 = vst [vmem:[#allocation1 + $0x2] ss:$9 sm:$0xff] %v6856_v19  ;;  %v6896_v19 = vperm.slane %v11398_v47, 2 }
 0xf25   : > { %7142 = vst [vmem:[#allocation1 + $0x3] ss:$9 sm:$0xff] %v6857_v2  ;;  %v6897_v2 = vperm.slane %v11398_v47, 3 }
 0xf26   : > { %7143 = vst [vmem:[#allocation1 + $0x4] ss:$9 sm:$0xff] %v6858_v49  ;;  %v6898_v49 = vperm.slane %v11442_v30, 0 }
 0xf27   : > { %7144 = vst [vmem:[#allocation1 + $0x5] ss:$9 sm:$0xff] %v6859_v8  ;;  %v6899_v8 = vperm.slane %v11442_v30, 1 }
 0xf28   : > { %7145 = vst [vmem:[#allocation1 + $0x6] ss:$9 sm:$0xff] %v6860_v51  ;;  %v6901_v51 = vperm.slane %v11442_v30, 3  ;;  %v6909_v30 = vperm.slane %v11410_v13, 3 }
 0xf29   : > { %7146 = vst [vmem:[#allocation1 + $0x7] ss:$9 sm:$0xff] %v6861_v50  ;;  %v6902_v50 = vperm.slane %v11408_v0, 0 }
 0xf30   : > { %v7147_v57 = vld [vmem:[#allocation1] sm:$0xff] }
 0xf31   : > { %7148 = vst [vmem:[#allocation1] ss:$9 sm:$0xff] %v6862_v3  ;;  %7296 = vperm.xlu1 %7537, %v7147_v57   ;;  %v6903_v3 = vperm.slane %v11408_v0, 1  ;;  %v6906_v57 = vperm.slane %v11410_v13, 0 }
 0xf32   : > { %7149 = vst [vmem:[#allocation1 + $0x1] ss:$9 sm:$0xff] %v6863_v14  ;;  %v6904_v14 = vperm.slane %v11408_v0, 2 }
 0xf33   : > { %7150 = vst [vmem:[#allocation1 + $0x2] ss:$9 sm:$0xff] %v6864_v1  ;;  %v6907_v1 = vperm.slane %v11410_v13, 1 }
 0xf34   : > { %7151 = vst [vmem:[#allocation1 + $0x3] ss:$9 sm:$0xff] %v6865_v61  ;;  %v6908_v61 = vperm.slane %v11410_v13, 2  ;;  %v6915_v13 = vperm.slane %v11414_v26, 1  ;;  %v6923_v26 = vperm.slane %v11434_v16, 1 }
 0xf35   : > { %7152 = vst [vmem:[#allocation1 + $0x4] ss:$9 sm:$0xff] %v6866_v40  ;;  %v6910_v40 = vperm.slane %v11428_v22, 0 }
 0xf36   : > { %7153 = vst [vmem:[#allocation1 + $0x5] ss:$9 sm:$0xff] %v6867_v36  ;;  %v6911_v36 = vperm.slane %v11428_v22, 1 }
 0xf37   : > { %7154 = vst [vmem:[#allocation1 + $0x6] ss:$9 sm:$0xff] %v6868_v44  ;;  %v6912_v44 = vperm.slane %v11428_v22, 2 }
 0xf38   : > { %7155 = vst [vmem:[#allocation1 + $0x7] ss:$9 sm:$0xff] %v6869_v39  ;;  %v6913_v39 = vperm.slane %v11428_v22, 3 }
 0xf3f   : > { %v7156_v35 = vld [vmem:[#allocation1] sm:$0xff] }
 0xf40   : > { %7157 = vst [vmem:[#allocation1] ss:$9 sm:$0xff] %v6870_v24  ;;  %7299 = vperm.xlu2 %7536, %v7156_v35   ;;  %v6919_v24 = vperm.slane %v11423_v23, 1  ;;  %v6921_v35 = vperm.slane %v11423_v23, 3 }
 0xf41   : > { %7158 = vst [vmem:[#allocation1 + $0x1] ss:$9 sm:$0xff] %v6871_v21  ;;  %v6920_v21 = vperm.slane %v11423_v23, 2  ;;  %v6613_v23 = vpop.xlane.xlu2 %6612 }
 0xf42   : > { %7159 = vst [vmem:[#allocation1 + $0x2] ss:$9 sm:$0xff] %v6872_v12  ;;  %v6922_v12 = vperm.slane %v11434_v16, 0 }
 0xf43   : > { %7160 = vst [vmem:[#allocation1 + $0x3] ss:$9 sm:$0xff] %v6873_v63  ;;  %v6924_v63 = vperm.slane %v11434_v16, 2 }
 0xf44   : > { %7161 = vst [vmem:[#allocation1 + $0x4] ss:$9 sm:$0xff] %v6874_v34  ;;  %v6925_v34 = vperm.slane %v11434_v16, 3  ;;  %v6932_v16 = vperm.slane %v6613_v23, 2 }
 0xf45   : > { %7162 = vst [vmem:[#allocation1 + $0x5] ss:$9 sm:$0xff] %v6875_v53  ;;  %v6926_v53 = vperm.slane %v11426_v15, 0 }
 0xf46   : > { %7163 = vst [vmem:[#allocation1 + $0x6] ss:$9 sm:$0xff] %v6876_v42  ;;  %v6927_v42 = vperm.slane %v11426_v15, 1 }
 0xf47   : > { %7164 = vst [vmem:[#allocation1 + $0x7] ss:$9 sm:$0xff] %v6877_v5 }
 0xf4e   : > { %v7165_v38 = vld [vmem:[#allocation1] sm:$0xff] }
 0xf4f   : > { %7166 = vst [vmem:[#allocation1] ss:$9 sm:$0xff] %v6878_v17  ;;  %7302 = vperm.xlu0 %7535, %v7165_v38   ;;  %v6928_v17 = vperm.slane %v11426_v15, 2  ;;  %v6930_v38 = vperm.slane %v6613_v23, 0 }
 0xf50   : > { %7167 = vst [vmem:[#allocation1 + $0x1] ss:$9 sm:$0xff] %v6879_v6  ;;  %v6929_v6 = vperm.slane %v11426_v15, 3 }
 0xf51   : > { %7168 = vst [vmem:[#allocation1 + $0x2] ss:$9 sm:$0xff] %v6880_v54  ;;  %v6931_v54 = vperm.slane %v6613_v23, 1 }
 0xf52   : > { %7169 = vst [vmem:[#allocation1 + $0x3] ss:$9 sm:$0xff] %v6881_v46  ;;  %v6933_v46 = vperm.slane %v6613_v23, 3  ;;  %v7362_v23 = vadd.s32 4294967216, %v9550_v31 }
 0xf53   : > { %7170 = vst [vmem:[#allocation1 + $0x4] ss:$9 sm:$0xff] %v6882_v62 }
 0xf54   : > { %7171 = vst [vmem:[#allocation1 + $0x5] ss:$9 sm:$0xff] %v6883_v52  ;;  %v7237_v52 = vpop.permute.xlu2 %7236 }
 0xf55   : > { %7172 = vst [vmem:[#allocation1 + $0x6] ss:$9 sm:$0xff] %v6884_v60  ;;  %v7240_v60 = vpop.permute.xlu0 %7239 }
 0xf56   : > { %7173 = vst [vmem:[#allocation1 + $0x7] ss:$9 sm:$0xff] %v6885_v9  ;;  %v7243_v9 = vpop.permute.xlu1 %7242 }
 0xf5d   : > { %v7174_v7 = vld [vmem:[#allocation1] sm:$0xff] }
 0xf5e   : > { %7175 = vst [vmem:[#allocation1] ss:$9 sm:$0xff] %v6886_v37  ;;  %7305 = vperm.xlu1 %7537, %v7174_v7   ;;  %v7246_v37 = vpop.permute.xlu2 %7245  ;;  %v7252_v7 = vpop.permute.xlu1 %7251 }
 0xf5f   : > { %7176 = vst [vmem:[#allocation1 + $0x1] ss:$9 sm:$0xff] %v6887_v55  ;;  %v7249_v55 = vpop.permute.xlu0 %7248 }
 0xf60   : > { %7177 = vst [vmem:[#allocation1 + $0x2] ss:$9 sm:$0xff] %v6888_v11 }
 0xf61   : > { %7178 = vst [vmem:[#allocation1 + $0x3] ss:$9 sm:$0xff] %v6889_v33 }
 0xf62   : > { %7179 = vst [vmem:[#allocation1 + $0x4] ss:$9 sm:$0xff] %v6890_v18 }
 0xf63   : > { %7180 = vst [vmem:[#allocation1 + $0x5] ss:$9 sm:$0xff] %v6891_v45 }
 0xf64   : > { %7181 = vst [vmem:[#allocation1 + $0x6] ss:$9 sm:$0xff] %v6892_v43 }
 0xf65   : > { %7182 = vst [vmem:[#allocation1 + $0x7] ss:$9 sm:$0xff] %v6893_v10 }
 0xf66   : > { %v7255_v15 = vpop.permute.xlu2 %7254  ;;  %v11514_v33 = vpop.permute.xlu1 %7260 }
 0xf67   : > { %v11512_v11 = vpop.permute.xlu0 %7257 }
 0xf6c   : > { %v7183_v48 = vld [vmem:[#allocation1] sm:$0xff] }
 0xf6d   : > { %7308 = vperm.xlu2 %7536, %v7183_v48   ;;  %7184 = vst [vmem:[#allocation1] ss:$9 sm:$0xff] %v6894_v32 }
 0xf6e   : > { %7185 = vst [vmem:[#allocation1 + $0x1] ss:$9 sm:$0xff] %v6895_v27  ;;  %v11516_v18 = vpop.permute.xlu2 %7263  ;;  %v11520_v43 = vpop.permute.xlu1 %7269 }
 0xf6f   : > { %7186 = vst [vmem:[#allocation1 + $0x2] ss:$9 sm:$0xff] %v6896_v19  ;;  %v11518_v45 = vpop.permute.xlu0 %7266 }
 0xf70   : > { %7187 = vst [vmem:[#allocation1 + $0x3] ss:$9 sm:$0xff] %v6897_v2 }
 0xf71   : > { %7188 = vst [vmem:[#allocation1 + $0x4] ss:$9 sm:$0xff] %v6898_v49  ;;  %v7330_v49 = vadd.s32 4294967280, %v9550_v31 }
 0xf72   : > { %7189 = vst [vmem:[#allocation1 + $0x5] ss:$9 sm:$0xff] %v6899_v8  ;;  %v7338_v8 = vadd.s32 4294967264, %v9550_v31 }
 0xf73   : > { %7190 = vst [vmem:[#allocation1 + $0x6] ss:$9 sm:$0xff] %v6900_v29  ;;  %v7334_v29 = vadd.s32 4294967272, %v9550_v31 }
 0xf74   : > { %7191 = vst [vmem:[#allocation1 + $0x7] ss:$9 sm:$0xff] %v6901_v51 }
 0xf76   : > { %v11524_v32 = vpop.permute.xlu2 %7272  ;;  %v7279_v27 = vpop.permute.xlu1 %7278 }
 0xf77   : > { %v11522_v10 = vpop.permute.xlu0 %7275 }
 0xf7b   : > { %v7192_v47 = vld [vmem:[#allocation1] sm:$0xff] }
 0xf7c   : > { %7311 = vperm.xlu0 %7535, %v7192_v47   ;;  %7193 = vst [vmem:[#allocation1] ss:$9 sm:$0xff] %v6902_v50  ;;  %v7331_v50 = vperm.slane %v7237_v52, %v7330_v49 }
 0xf7d   : > { %7194 = vst [vmem:[#allocation1 + $0x1] ss:$9 sm:$0xff] %v6903_v3 }
 0xf7e   : > { %7195 = vst [vmem:[#allocation1 + $0x2] ss:$9 sm:$0xff] %v6904_v14  ;;  %v7282_v19 = vpop.permute.xlu2 %7281  ;;  %v7288_v2 = vpop.permute.xlu1 %7287  ;;  %v7333_v47 = vsel %vm7332_vm3, %v7331_v50, %v11450_v58  ;;  %v7339_v14 = vperm.slane %v7243_v9, %v7338_v8 }
 0xf7f   : > { %7196 = vst [vmem:[#allocation1 + $0x3] ss:$9 sm:$0xff] %v6905_v41  ;;  %v7285_v48 = vpop.permute.xlu0 %7284  ;;  %v7342_v41 = vadd.s32 4294967256, %v9550_v31 }
 0xf80   : > { %7197 = vst [vmem:[#allocation1 + $0x4] ss:$9 sm:$0xff] %v6906_v57  ;;  %v7335_v57 = vperm.slane %v7240_v60, %v7334_v29  ;;  %v7363_v60 = vperm.slane %v11514_v33, %v7362_v23 }
 0xf81   : > { %7198 = vst [vmem:[#allocation1 + $0x5] ss:$9 sm:$0xff] %v6907_v1  ;;  %v7343_v58 = vperm.slane %v7246_v37, %v7342_v41 }
 0xf82   : > { %7199 = vst [vmem:[#allocation1 + $0x6] ss:$9 sm:$0xff] %v6908_v61  ;;  %v7337_v61 = vsel %vm7336_vm4, %v7335_v57, %v7333_v47 }
 0xf83   : > { %7200 = vst [vmem:[#allocation1 + $0x7] ss:$9 sm:$0xff] %v6909_v30  ;;  %v7350_v30 = vadd.s32 4294967240, %v9550_v31 }
 0xf86   : > { %v7291_v3 = vpop.permute.xlu2 %7290 }
 0xf8a   : > { %v7201_v0 = vld [vmem:[#allocation1] sm:$0xff] }
 0xf8b   : > { %7314 = vperm.xlu1 %7537, %v7201_v0   ;;  %7202 = vst [vmem:[#allocation1] ss:$9 sm:$0xff] %v6910_v40  ;;  %v7386_v40 = vperm.slane %v7279_v27, %v9550_v31  ;;  %v7341_v0 = vsel %vm7340_vm6, %v7339_v14, %v7337_v61 }
 0xf8c   : > { %7203 = vst [vmem:[#allocation1 + $0x1] ss:$9 sm:$0xff] %v6911_v36  ;;  %v7346_v36 = vadd.s32 4294967248, %v9550_v31 }
 0xf8d   : > { %7204 = vst [vmem:[#allocation1 + $0x2] ss:$9 sm:$0xff] %v6912_v44  ;;  %v7389_v44 = vperm.slane %v7285_v48, %v7330_v49  ;;  %v7370_v48 = vadd.s32 4294967200, %v9550_v31 }
 0xf8e   : > { %7205 = vst [vmem:[#allocation1 + $0x3] ss:$9 sm:$0xff] %v6913_v39  ;;  %v7387_v39 = vperm.slane %v7282_v19, %v11445_v25 }
 0xf8f   : > { %7206 = vst [vmem:[#allocation1 + $0x4] ss:$9 sm:$0xff] %v6914_v59  ;;  %v7391_v59 = vperm.slane %v7288_v2, %v7334_v29  ;;  %v7374_v2 = vadd.s32 4294967192, %v9550_v31  ;;  %v7371_v61 = vperm.slane %v11518_v45, %v7370_v48 }
 0xf90   : > { %7207 = vst [vmem:[#allocation1 + $0x5] ss:$9 sm:$0xff] %v6915_v13 }
 0xf91   : > { %7208 = vst [vmem:[#allocation1 + $0x6] ss:$9 sm:$0xff] %v6916_v28 }
 0xf92   : > { %7209 = vst [vmem:[#allocation1 + $0x7] ss:$9 sm:$0xff] %v6917_v20  ;;  %v7345_v20 = vsel %vm7344_vm7, %v7343_v58, %v7341_v0 }
 0xf94   : > { %v7294_v51 = vpop.permute.xlu0 %7293 }
 0xf99   : > { %v7210_v22 = vld [vmem:[#allocation1] sm:$0xff] }
 0xf9a   : > { %7317 = vperm.xlu2 %7536, %v7210_v22   ;;  %7211 = vst [vmem:[#allocation1] ss:$9 sm:$0xff] %v6918_v56  ;;  %v7300_v28 = vpop.permute.xlu2 %7299  ;;  %v7351_v56 = vperm.slane %v7252_v7, %v7350_v30  ;;  %v7354_v22 = vadd.s32 4294967232, %v9550_v31 }
 0xf9b   : > { %7212 = vst [vmem:[#allocation1 + $0x1] ss:$9 sm:$0xff] %v6919_v24  ;;  %v7388_v24 = vsel %vm7328_vm0, %v7387_v39, %v7386_v40  ;;  %v7399_v9 = vperm.slane %v7300_v28, %v7350_v30  ;;  %v7382_v30 = vadd.s32 4294967176, %v9550_v31  ;;  %vm7423_vm0 = vcmp.lt.s32.totalorder %v3799_v4, 256 }
 0xf9c   : > { %7213 = vst [vmem:[#allocation1 + $0x2] ss:$9 sm:$0xff] %v6920_v21  ;;  %v7347_v21 = vperm.slane %v7249_v55, %v7346_v36  ;;  %v7366_v55 = vadd.s32 4294967208, %v9550_v31 }
 0xf9d   : > { %7214 = vst [vmem:[#allocation1 + $0x3] ss:$9 sm:$0xff] %v6921_v35  ;;  %v7390_v35 = vsel %vm7332_vm3, %v7389_v44, %v7388_v24 }
 0xf9e   : > { %7215 = vst [vmem:[#allocation1 + $0x4] ss:$9 sm:$0xff] %v6922_v12  ;;  %v7392_v12 = vsel %vm7336_vm4, %v7391_v59, %v7390_v35  ;;  %v7349_v25 = vsel %vm7348_vm8, %v7347_v21, %v7345_v20 }
 0xf9f   : > { %7216 = vst [vmem:[#allocation1 + $0x5] ss:$9 sm:$0xff] %v6923_v26  ;;  %v7395_v26 = vperm.slane %v7294_v51, %v7342_v41  ;;  %v7367_v51 = vperm.slane %v11516_v18, %v7366_v55  ;;  %v7375_v41 = vperm.slane %v11520_v43, %v7374_v2  ;;  %v7383_v43 = vperm.slane %v11522_v10, %v7382_v30 }
 0xfa0   : > { %7217 = vst [vmem:[#allocation1 + $0x6] ss:$9 sm:$0xff] %v6924_v63 }
 0xfa1   : > { %7218 = vst [vmem:[#allocation1 + $0x7] ss:$9 sm:$0xff] %v6925_v34  ;;  %v7393_v34 = vperm.slane %v7291_v3, %v7338_v8  ;;  %v7378_v3 = vadd.s32 4294967184, %v9550_v31 }
 0xfa3   : > { %v7297_v1 = vpop.permute.xlu1 %7296  ;;  %v7379_v28 = vperm.slane %v11524_v32, %v7378_v3 }
 0xfa8   : > { %v7219_v5 = vld [vmem:[#allocation1] sm:$0xff] }
 0xfa9   : > { %7320 = vperm.xlu0 %7535, %v7219_v5   ;;  %7220 = vst [vmem:[#allocation1] ss:$9 sm:$0xff] %v6926_v53  ;;  %v7397_v53 = vperm.slane %v7297_v1, %v7346_v36  ;;  %v7355_v5 = vperm.slane %v7255_v15, %v7354_v22 }
 0xfaa   : > { %7221 = vst [vmem:[#allocation1 + $0x1] ss:$9 sm:$0xff] %v6927_v42  ;;  %v7353_v42 = vsel %vm7352_vm9, %v7351_v56, %v7349_v25 }
 0xfab   : > { %7222 = vst [vmem:[#allocation1 + $0x2] ss:$9 sm:$0xff] %v6928_v17  ;;  %v7358_v17 = vadd.s32 4294967224, %v9550_v31 }
 0xfac   : > { %7223 = vst [vmem:[#allocation1 + $0x3] ss:$9 sm:$0xff] %v6929_v6  ;;  %v7394_v6 = vsel %vm7340_vm6, %v7393_v34, %v7392_v12 }
 0xfad   : > { %7224 = vst [vmem:[#allocation1 + $0x4] ss:$9 sm:$0xff] %v6930_v38  ;;  %v7396_v38 = vsel %vm7344_vm7, %v7395_v26, %v7394_v6  ;;  %v7359_v7 = vperm.slane %v11512_v11, %v7358_v17 }
 0xfae   : > { %7225 = vst [vmem:[#allocation1 + $0x5] ss:$9 sm:$0xff] %v6931_v54 }
 0xfaf   : > { %7226 = vst [vmem:[#allocation1 + $0x6] ss:$9 sm:$0xff] %v6932_v16  ;;  %v7357_v16 = vsel %vm7356_vm11, %v7355_v5, %v7353_v42 }
 0xfb0   : > { %7227 = vst [vmem:[#allocation1 + $0x7] ss:$9 sm:$0xff] %v6933_v46  ;;  %v7398_v46 = vsel %vm7348_vm8, %v7397_v53, %v7396_v38  ;;  %v7361_v19 = vsel %vm7360_vm12, %v7359_v7, %v7357_v16 }
 0xfb1   : > { %v7400_v15 = vsel %vm7352_vm9, %v7399_v9, %v7398_v46  ;;  %v7365_v33 = vsel %vm7364_vm13, %v7363_v60, %v7361_v19 }
 0xfb2   : > { %v7369_v14 = vsel %vm7368_vm10, %v7367_v51, %v7365_v33 }
 0xfb3   : > { %v7373_v0 = vsel %vm7372_vm14, %v7371_v61, %v7369_v14 }
 0xfb4   : > { %v7377_v58 = vsel %vm7376_vm15, %v7375_v41, %v7373_v0 }
 0xfb5   : > { %v7381_v20 = vsel %vm7380_vm5, %v7379_v28, %v7377_v58 }
 0xfb6   : > { %v7385_v24 = vsel %vm7384_vm1, %v7383_v43, %v7381_v20 }
 0xfb7   : > { %v7228_v62 = vld [vmem:[#allocation1] sm:$0xff] }
 0xfb8   : > { %7323 = vperm.xlu1 %7537, %v7228_v62  }
 0xfc1   : > { %v7303_v13 = vpop.permute.xlu0 %7302 }
 0xfc2   : > { %v7401_v52 = vperm.slane %v7303_v13, %v7354_v22 }
 0xfc4   : > { %v7402_v49 = vsel %vm7356_vm11, %v7401_v52, %v7400_v15 }
 0xfc7   : > { %v7309_v62 = vpop.permute.xlu2 %7308 }
 0xfc8   : > { %v7405_v50 = vperm.slane %v7309_v62, %v7362_v23 }
 0xfd0   : > { %v7306_v63 = vpop.permute.xlu1 %7305 }
 0xfd1   : > { %v7403_v37 = vperm.slane %v7306_v63, %v7358_v17 }
 0xfd3   : > { %v7404_v8 = vsel %vm7360_vm12, %v7403_v37, %v7402_v49 }
 0xfd4   : > { %v7406_v1 = vsel %vm7364_vm13, %v7405_v50, %v7404_v8 }
 0xfee   : > { %v7312_v54 = vpop.permute.xlu0 %7311 }
 0xfef   : > { %v7407_v29 = vperm.slane %v7312_v54, %v7366_v55 }
 0xff1   : > { %v7408_v18 = vsel %vm7368_vm10, %v7407_v29, %v7406_v1 }
 0xff4   : > { %v7318_v57 = vpop.permute.xlu2 %7317 }
 0xff5   : > { %v7411_v44 = vperm.slane %v7318_v57, %v7374_v2 }
 0xffd   : > { %v7315_v27 = vpop.permute.xlu1 %7314 }
 0xffe   : > { %v7409_v11 = vperm.slane %v7315_v27, %v7370_v48 }
0x1000   : > { %v7410_v40 = vsel %vm7372_vm14, %v7409_v11, %v7408_v18 }
0x1001   : > { %v7412_v59 = vsel %vm7376_vm15, %v7411_v44, %v7410_v40 }
0x101b   : > { %v7321_v47 = vpop.permute.xlu0 %7320 }
0x101c   : > { %v7413_v36 = vperm.slane %v7321_v47, %v7378_v3 }
0x101e   : > { %v7414_v45 = vsel %vm7380_vm5, %v7413_v36, %v7412_v59 }
0x102a   : > { %v7324_v39 = vpop.permute.xlu1 %7323 }
0x102b   : > { %v7415_v13 = vperm.slane %v7324_v39, %v7382_v30 }
0x102d   : > { %v7416_v31 = vsel %vm7384_vm1, %v7415_v13, %v7414_v45 }
0x102e   : > { %v7417_v56 = vrot.slane %v7416_v31, 7 }
0x1030   : > { %v7419_v22 = vsel %vm7418_vm2, %v7385_v24, %v7417_v56 }
0x1031   : > { %7425 = vst.msk [vmem:[%s222_s7] sm:$0x3] %vm7423_vm0, %v7419_v22 }
0x1032 PF: > { %s15_s18 = sadd.s32 1, %s7544_s18  }
0x1033   : > { %p12_p4 = scmp.ge.s32.totalorder %s15_s18, 4  }
0x1035   :  { %14 = sbr.rel (!%p12_p4) target bundleno = 1 (0x1), region = 77 }

</bundles_post_ra>
